<compile_context>
chip_gen: v5e
topology: v5e:2x2
jax: 0.10.0
libtpu: 0.0.40
codegen_flags: <defaults>
</compile_context>

<pallas_src>
import functools

import jax
import jax.numpy as jnp
from jax import lax
from jax.experimental import pallas as pl
from jax.experimental.pallas import tpu as pltpu


def _round_up(x, m):
    return (x + m - 1) // m * m


# ---------------------------------------------------------------------------
# Fused conv kernel: per-tap slab matmuls on one contiguous flat slab, with
# bias / GDN / residual / LeakyReLU fused into the epilogue.
# ---------------------------------------------------------------------------
def _make_conv_kernel(*, tap_offsets, th, wp, n_halo, slope, has_gdn, has_res):
    m_rows = th * wp

    def kernel(*refs):
        it = iter(refs)
        x_main = next(it)                                  # (1, th*wp, K)
        halos = [next(it) for _ in range(n_halo)]          # each (1, wp, K)
        w_ref = next(it)                                   # (T, K, Cout)
        b_ref = next(it)                                   # (1, Cout) f32
        gamma_ref = next(it) if has_gdn else None          # (Cout, Cout)
        beta_ref = next(it) if has_gdn else None           # (1, Cout) f32
        res_ref = next(it) if has_res else None            # (1, th*wp, Cout)
        o_ref = next(it)                                   # (1, th*wp, Cout)
        slab = next(it)                                    # ((th+n_halo+1)*wp, K)

        k = slab.shape[-1]
        cout = o_ref.shape[-1]

        # Contiguous slab: main tile rows, halo rows, one zero guard row.
        # (All stores are sublane-aligned since wp % 8 == 0.)
        slab[pl.ds(0, m_rows), :] = x_main[0]
        for j in range(n_halo):
            slab[pl.ds((th + j) * wp, wp), :] = halos[j][0]
        slab[pl.ds((th + n_halo) * wp, wp), :] = jnp.zeros((wp, k), slab.dtype)

        # One (th*wp, K) @ (K, Cout) MXU matmul per tap, f32 accumulation.
        acc = jnp.zeros((m_rows, cout), jnp.float32)
        for t, off in enumerate(tap_offsets):
            xt = slab[pl.ds(off, m_rows), :]
            acc = acc + jnp.dot(xt, w_ref[t],
                                preferred_element_type=jnp.float32)

        y = acc + b_ref[...]                               # bias added once

        if has_gdn:                                        # fused GDN
            sq = (y * y).astype(gamma_ref.dtype)           # compute-dtype operands
            norm = jnp.dot(sq, gamma_ref[...],
                           preferred_element_type=jnp.float32)
            y = y * lax.rsqrt(norm + beta_ref[...])
        if has_res:                                        # ResBlock skip add
            y = y + res_ref[0].astype(jnp.float32)
        if slope is not None:                              # LeakyReLU
            y = jnp.where(y >= 0, y, y * slope)

        o_ref[0] = y.astype(o_ref.dtype)

    return kernel


# ---------------------------------------------------------------------------
# Wrapper-side layout preparation (XLA): padding / phase-merge / weight packing
# ---------------------------------------------------------------------------
def _prep_stride1(x, wp):
    """NHWC -> flat padded (N, (H+2)*wp, C): 1-px zero border + zero fill cols."""
    n, h, w, c = x.shape
    xp = jnp.pad(x, ((0, 0), (1, 1), (1, wp - w - 1), (0, 0)))
    return xp.reshape(n, (h + 2) * wp, c)


def _prep_stride2(x, wp):
    """NHWC -> phase-merged flat (N, (H//2+1)*wp, 4C).

    Space-to-depth by 2 turns the stride-2 3x3 conv into a 2x2 stride-1 conv
    with 4x contraction depth (K-folding): 4 taps, no strided kernel access."""
    n, h, w, c = x.shape
    hc = h // 2 + 1
    xp = jnp.pad(x, ((0, 0), (1, 1), (1, 2 * wp - w - 1), (0, 0)))
    xp = xp.reshape(n, hc, 2, wp, 2, c)
    xp = xp.transpose(0, 1, 3, 2, 4, 5).reshape(n, hc, wp, 4 * c)
    return xp.reshape(n, hc * wp, 4 * c)


def _pack_w_stride1(w, dtype):
    """PyTorch OIHW (Cout, Cin, 3, 3) -> (9, Cin, Cout), tap = ky*3 + kx."""
    cout, cin = w.shape[0], w.shape[1]
    return jnp.transpose(w, (2, 3, 1, 0)).reshape(9, cin, cout).astype(dtype)


def _pack_w_stride2(w, dtype):
    """OIHW -> (4, 4*Cin, Cout): tap = bdy*2+bdx over the phase-merged input."""
    cout, cin = w.shape[0], w.shape[1]
    w_hwio = jnp.transpose(w, (2, 3, 1, 0))                  # (3, 3, Cin, Cout)
    comp = ((0, 0), (0, 1), (1, 0))                          # k -> (block_off, phase)
    w2 = jnp.zeros((2, 2, 2, 2, cin, cout), w.dtype)         # (bdy,bdx,pr,pc,ci,co)
    for ky in range(3):
        bdy, pr = comp[ky]
        for kx in range(3):
            bdx, pc = comp[kx]
            w2 = w2.at[bdy, bdx, pr, pc].set(w_hwio[ky, kx])
    return w2.reshape(4, 4 * cin, cout).astype(dtype)


def _pick_th(h_out, wp, k_dim, cout, itemsize, target):
    """Largest row tile dividing h_out, <= target, with a modest block budget."""
    budget = 8 * 1024 * 1024
    best = 1
    for d in range(1, h_out + 1):
        if h_out % d or d > target:
            continue
        if d * wp * (k_dim + 2 * cout) * itemsize <= budget:
            best = d
    return best


def _flat_to_nhwc(flat):
    data, h, w, wp = flat
    n, _, c = data.shape
    return data.reshape(n, h, wp, c)[:, :, :w, :]


# ---------------------------------------------------------------------------
# Fused 3x3 conv (+GDN / +residual / +LeakyReLU)
# ---------------------------------------------------------------------------
def fused_conv3x3(x_nhwc, w, b, *, stride, slope=None, gdn_params=None,
                  residual=None, compute_dtype=jnp.bfloat16, tile_rows=8):
    n, h, width, cin = x_nhwc.shape
    cout = w.shape[0]
    x_nhwc = x_nhwc.astype(compute_dtype)

    if stride == 1:
        h_out, w_out = h, width
        wp = _round_up(w_out + 2, 8)
        xflat = _prep_stride1(x_nhwc, wp)
        w_taps = _pack_w_stride1(w, compute_dtype)
        n_halo = 2
        taps = tuple(dy * wp + dx for dy in range(3) for dx in range(3))
    else:
        assert stride == 2 and h % 2 == 0 and width % 2 == 0
        h_out, w_out = h // 2, width // 2
        wp = _round_up(w_out + 2, 8)
        xflat = _prep_stride2(x_nhwc, wp)
        w_taps = _pack_w_stride2(w, compute_dtype)
        n_halo = 1
        taps = tuple(dy * wp + dx for dy in range(2) for dx in range(2))

    k_dim = xflat.shape[-1]
    itemsize = jnp.dtype(compute_dtype).itemsize
    th = _pick_th(h_out, wp, k_dim, cout, itemsize, tile_rows)
    n_tiles = h_out // th
    m_rows = th * wp

    b2 = b.reshape(1, cout).astype(jnp.float32)

    args = [xflat] + [xflat] * n_halo + [w_taps, b2]
    in_specs = [pl.BlockSpec((1, m_rows, k_dim), lambda nn, t: (nn, t, 0))]

    def _halo_map(j):
        return lambda nn, t, _j=j, _th=th: (nn, (t + 1) * _th + _j, 0)

    for j in range(n_halo):
        in_specs.append(pl.BlockSpec((1, wp, k_dim), _halo_map(j)))
    in_specs += [
        pl.BlockSpec(tuple(w_taps.shape), lambda nn, t: (0, 0, 0)),
        pl.BlockSpec((1, cout), lambda nn, t: (0, 0)),
    ]

    has_gdn = gdn_params is not None
    if has_gdn:
        gamma, beta = gdn_params
        args += [jnp.transpose(gamma).astype(compute_dtype),
                 beta.reshape(1, cout).astype(jnp.float32)]
        in_specs += [pl.BlockSpec((cout, cout), lambda nn, t: (0, 0)),
                     pl.BlockSpec((1, cout), lambda nn, t: (0, 0))]

    has_res = residual is not None
    if has_res:
        r_data, r_h, r_w, r_wp = residual
        assert r_h == h_out and r_wp == wp and r_data.shape[-1] == cout
        args.append(r_data)
        in_specs.append(pl.BlockSpec((1, m_rows, cout), lambda nn, t: (nn, t, 0)))

    kernel = _make_conv_kernel(tap_offsets=taps, th=th, wp=wp, n_halo=n_halo,
                               slope=slope, has_gdn=has_gdn, has_res=has_res)

    # VMEM budget derived from the actual block sizes (pipeline double-buffers).
    blk_bytes = (m_rows * k_dim + n_halo * wp * k_dim
                 + m_rows * cout * (2 if has_res else 1)) * itemsize
    fixed_bytes = (int(w_taps.size) + (cout * cout if has_gdn else 0)) * itemsize \
        + (th + n_halo + 1) * wp * k_dim * itemsize
    vmem_limit = int(min(100 * 2**20,
                         max(32 * 2**20, 3 * blk_bytes + fixed_bytes + 4 * 2**20)))

    out = pl.pallas_call(
        kernel,
        out_shape=jax.ShapeDtypeStruct((n, h_out * wp, cout), compute_dtype),
        grid=(n, n_tiles),
        in_specs=in_specs,
        out_specs=pl.BlockSpec((1, m_rows, cout), lambda nn, t: (nn, t, 0)),
        scratch_shapes=[pltpu.VMEM(((th + n_halo + 1) * wp, k_dim), compute_dtype)],
        compiler_params=pltpu.CompilerParams(
            dimension_semantics=("parallel", "parallel"),
            vmem_limit_bytes=vmem_limit),
    )(*args)
    return (out, h_out, w_out, wp)


# ---------------------------------------------------------------------------
# MVResEncoder forward: Conv(s2)+GDN -> ResBlock(start_from_relu=False) -> LReLU(0.1)
# ---------------------------------------------------------------------------
def _stage(x_nhwc, conv_p, gdn_p, res1_p, res2_p, dtype, tile_rows):
    y = fused_conv3x3(x_nhwc, conv_p["w"], conv_p["b"], stride=2,
                      gdn_params=(gdn_p["gamma"], gdn_p["beta"]),
                      compute_dtype=dtype, tile_rows=tile_rows)
    h = fused_conv3x3(_flat_to_nhwc(y), res1_p["w"], res1_p["b"], stride=1,
                      slope=0.01, compute_dtype=dtype, tile_rows=tile_rows)
    return fused_conv3x3(_flat_to_nhwc(h), res2_p["w"], res2_p["b"], stride=1,
                         residual=y, slope=0.1, compute_dtype=dtype,
                         tile_rows=tile_rows)


def mv_res_encoder_forward(params, mv, mv_ctx, *, compute_dtype=jnp.bfloat16,
                           tile_rows=8):
    _, _, h, w = mv.shape
    assert h % 16 == 0 and w % 16 == 0, "spatial dims must be divisible by 16"
    x = jnp.transpose(mv, (0, 2, 3, 1))                       # NCHW -> NHWC
    ctx = jnp.transpose(mv_ctx, (0, 2, 3, 1)).astype(compute_dtype)

    # encoder1
    f = _stage(x, params["e1_conv"], params["e1_gdn"],
               params["e1_res1"], params["e1_res2"], compute_dtype, tile_rows)

    # torch.cat([feature, mv_ctx], dim=1) == channel concat in NHWC
    z = jnp.concatenate([_flat_to_nhwc(f), ctx], axis=-1)

    # encoder2
    z = _stage(z, params["e2a_conv"], params["e2a_gdn"],
               params["e2a_res1"], params["e2a_res2"], compute_dtype, tile_rows)
    z = _stage(_flat_to_nhwc(z), params["e2b_conv"], params["e2b_gdn"],
               params["e2b_res1"], params["e2b_res2"], compute_dtype, tile_rows)
    z = fused_conv3x3(_flat_to_nhwc(z), params["e2c_conv"]["w"],
                      params["e2c_conv"]["b"], stride=2,
                      compute_dtype=compute_dtype, tile_rows=tile_rows)

    y = _flat_to_nhwc(z)
    return jnp.transpose(y, (0, 3, 1, 2)).astype(jnp.float32)  # NHWC -> NCHW


# ---------------------------------------------------------------------------
# Deterministic synthetic parameters (shapes from the module __init__).
# GDN's reparametrization (lower-bounded beta/gamma) is folded into effective
# post-reparam parameters.
# ---------------------------------------------------------------------------
def init_params(key, channel_mv):
    c = channel_mv
    keys = jax.random.split(key, 16)

    def conv_p(k, cin, cout):
        kw, kb = jax.random.split(k)
        wgt = jax.random.normal(kw, (cout, cin, 3, 3), jnp.float32) / jnp.sqrt(9.0 * cin)
        bias = 0.01 * jax.random.normal(kb, (cout,), jnp.float32)
        return {"w": wgt, "b": bias}

    def gdn_p(k, ch):
        gamma = 0.1 * jnp.eye(ch, dtype=jnp.float32) + \
            0.005 * jax.random.uniform(k, (ch, ch), jnp.float32)
        beta = jnp.ones((ch,), jnp.float32)
        return {"gamma": gamma, "beta": beta}

    return {
        "e1_conv": conv_p(keys[0], 2, c),
        "e1_gdn": gdn_p(keys[1], c),
        "e1_res1": conv_p(keys[2], c, c),
        "e1_res2": conv_p(keys[3], c, c),
        "e2a_conv": conv_p(keys[4], 2 * c, c),
        "e2a_gdn": gdn_p(keys[5], c),
        "e2a_res1": conv_p(keys[6], c, c),
        "e2a_res2": conv_p(keys[7], c, c),
        "e2b_conv": conv_p(keys[8], c, c),
        "e2b_gdn": gdn_p(keys[9], c),
        "e2b_res1": conv_p(keys[10], c, c),
        "e2b_res2": conv_p(keys[11], c, c),
        "e2c_conv": conv_p(keys[12], c, c),
    }


# ---------------------------------------------------------------------------
# Pure-JAX reference (lax.conv, HIGHEST precision) to validate the Pallas path
# ---------------------------------------------------------------------------
def _ref_conv3x3(x, w, b, stride):
    w_hwio = jnp.transpose(w, (2, 3, 1, 0))
    y = lax.conv_general_dilated(
        x, w_hwio, (stride, stride), ((1, 1), (1, 1)),
        dimension_numbers=("NHWC", "HWIO", "NHWC"),
        precision=lax.Precision.HIGHEST)
    return y + b.reshape(1, 1, 1, -1)


def _ref_gdn(x, gamma, beta):
    norm = jnp.einsum("nhwc,oc->nhwo", x * x, gamma,
                      precision=lax.Precision.HIGHEST) + beta.reshape(1, 1, 1, -1)
    return x * lax.rsqrt(norm)


def _ref_lrelu(x, slope):
    return jnp.where(x >= 0, x, slope * x)


def _ref_stage(x, cp, gp, r1, r2):
    y = _ref_gdn(_ref_conv3x3(x, cp["w"], cp["b"], 2), gp["gamma"], gp["beta"])
    h = _ref_lrelu(_ref_conv3x3(y, r1["w"], r1["b"], 1), 0.01)
    y = y + _ref_conv3x3(h, r2["w"], r2["b"], 1)
    return _ref_lrelu(y, 0.1)


def ref_forward(params, mv_nchw, mv_ctx_nchw):
    x = jnp.transpose(mv_nchw, (0, 2, 3, 1))
    ctx = jnp.transpose(mv_ctx_nchw, (0, 2, 3, 1))
    f = _ref_stage(x, params["e1_conv"], params["e1_gdn"],
                   params["e1_res1"], params["e1_res2"])
    z = jnp.concatenate([f, ctx], axis=-1)
    z = _ref_stage(z, params["e2a_conv"], params["e2a_gdn"],
                   params["e2a_res1"], params["e2a_res2"])
    z = _ref_stage(z, params["e2b_conv"], params["e2b_gdn"],
                   params["e2b_res1"], params["e2b_res2"])
    z = _ref_conv3x3(z, params["e2c_conv"]["w"], params["e2c_conv"]["b"], 2)
    return jnp.transpose(z, (0, 3, 1, 2))


# ---------------------------------------------------------------------------
if __name__ == "__main__":
    key = jax.random.PRNGKey(0)
    k_p, k_mv, k_ctx = jax.random.split(key, 3)

    channel_mv = 16   # small synthetic width (module default is 64)
    B, H, W = 2, 16, 16

    params = init_params(k_p, channel_mv)
    mv = jax.random.normal(k_mv, (B, 2, H, W), jnp.float32)                       # NCHW
    mv_ctx = jax.random.normal(k_ctx, (B, channel_mv, H // 2, W // 2), jnp.float32)

    ref = ref_forward(params, mv, mv_ctx)
    ref_scale = float(jnp.max(jnp.abs(ref)))

    # 1) structural / numerical gate: f32 MXU operands
    fwd_f32 = jax.jit(functools.partial(mv_res_encoder_forward,
                                        compute_dtype=jnp.float32))
    out_f32 = jax.block_until_ready(fwd_f32(params, mv, mv_ctx))
    assert out_f32.shape == (B, channel_mv, H // 16, W // 16), out_f32.shape
    err_f32 = float(jnp.max(jnp.abs(out_f32 - ref)))
    assert err_f32 < 0.01 * ref_scale + 0.01, f"f32 path mismatch: {err_f32}"

    # 2) performance mode: bf16 MXU operands, f32 accumulation & epilogue
    fwd_bf16 = jax.jit(functools.partial(mv_res_encoder_forward,
                                         compute_dtype=jnp.bfloat16))
    out_bf16 = jax.block_until_ready(fwd_bf16(params, mv, mv_ctx))
    err_bf16 = float(jnp.max(jnp.abs(out_bf16 - ref)))
    assert bool(jnp.all(jnp.isfinite(out_bf16))), "bf16 path produced non-finite values"
    assert err_bf16 < 0.1 * ref_scale + 0.1, f"bf16 path mismatch: {err_bf16}"

    print("KERNEL_OK")
</pallas_src>

<mosaic_0001>
module attributes {stable_mosaic.version = 11 : i64} {
  func.func @kernel(%arg0: i32, %arg1: i32, %arg2: memref<1x128x8xf32, #tpu.memory_space<vmem>>, %arg3: memref<1x16x8xf32, #tpu.memory_space<vmem>>, %arg4: memref<4x8x16xf32, #tpu.memory_space<vmem>>, %arg5: memref<1x16xf32, #tpu.memory_space<vmem>>, %arg6: memref<16x16xf32, #tpu.memory_space<vmem>>, %arg7: memref<1x16xf32, #tpu.memory_space<vmem>>, %arg8: memref<1x128x16xf32, #tpu.memory_space<vmem>>, %arg9: memref<160x8xf32, #tpu.memory_space<vmem>>) attributes {dimension_semantics = [#tpu.dimension_semantics<parallel>, #tpu.dimension_semantics<parallel>], iteration_bounds = array<i64: 2, 1>, scalar_prefetch = 0 : i64, scratch_operands = 1 : i64, tpu.core_type = #tpu.core_type<tc>, window_params = [{transform_indices = @transform_0, window_bounds = array<i64: 1, 128, 8>}, {transform_indices = @transform_1, window_bounds = array<i64: 1, 16, 8>}, {pipeline_mode = #tpu.pipeline_mode<synchronous>, transform_indices = @transform_2, window_bounds = array<i64: 4, 8, 16>}, {pipeline_mode = #tpu.pipeline_mode<synchronous>, transform_indices = @transform_3, window_bounds = array<i64: 1, 16>}, {pipeline_mode = #tpu.pipeline_mode<synchronous>, transform_indices = @transform_4, window_bounds = array<i64: 16, 16>}, {pipeline_mode = #tpu.pipeline_mode<synchronous>, transform_indices = @transform_5, window_bounds = array<i64: 1, 16>}, {transform_indices = @transform_6, window_bounds = array<i64: 1, 128, 16>}]} {
    %c0 = arith.constant 0 : index
    %c0_0 = arith.constant 0 : index
    %c0_1 = arith.constant 0 : index
    %0 = vector.load %arg2[%c0, %c0_0, %c0_1] : memref<1x128x8xf32, #tpu.memory_space<vmem>>, vector<1x128x8xf32>
    %1 = vector.shape_cast %0 : vector<1x128x8xf32> to vector<128x8xf32>
    %c0_2 = arith.constant 0 : index
    %c0_3 = arith.constant 0 : index
    %2 = vector.load %arg9[%c0_2, %c0_3] : memref<160x8xf32, #tpu.memory_space<vmem>>, vector<128x8xf32>
    tpu.vector_store %arg9[%c0_2, %c0_3], %1 {strides = array<i32>} : memref<160x8xf32, #tpu.memory_space<vmem>>, vector<128x8xf32>,
    %c0_4 = arith.constant 0 : index
    %c0_5 = arith.constant 0 : index
    %c0_6 = arith.constant 0 : index
    %3 = vector.load %arg3[%c0_4, %c0_5, %c0_6] : memref<1x16x8xf32, #tpu.memory_space<vmem>>, vector<1x16x8xf32>
    %4 = vector.shape_cast %3 : vector<1x16x8xf32> to vector<16x8xf32>
    %c128 = arith.constant 128 : index
    %c0_7 = arith.constant 0 : index
    %5 = vector.load %arg9[%c128, %c0_7] : memref<160x8xf32, #tpu.memory_space<vmem>>, vector<16x8xf32>
    tpu.vector_store %arg9[%c128, %c0_7], %4 {strides = array<i32>} : memref<160x8xf32, #tpu.memory_space<vmem>>, vector<16x8xf32>,
    %cst = arith.constant 0.000000e+00 : f32
    %6 = vector.broadcast %cst : f32 to vector<16x8xf32>
    %c144 = arith.constant 144 : index
    %c0_8 = arith.constant 0 : index
    %7 = vector.load %arg9[%c144, %c0_8] : memref<160x8xf32, #tpu.memory_space<vmem>>, vector<16x8xf32>
    tpu.vector_store %arg9[%c144, %c0_8], %6 {strides = array<i32>} : memref<160x8xf32, #tpu.memory_space<vmem>>, vector<16x8xf32>,
    %cst_9 = arith.constant 0.000000e+00 : f32
    %8 = vector.broadcast %cst_9 : f32 to vector<128x16xf32>
    %c0_10 = arith.constant 0 : index
    %c0_11 = arith.constant 0 : index
    %9 = vector.load %arg9[%c0_10, %c0_11] : memref<160x8xf32, #tpu.memory_space<vmem>>, vector<128x8xf32>
    %c0_12 = arith.constant 0 : index
    %c0_13 = arith.constant 0 : index
    %c0_14 = arith.constant 0 : index
    %10 = vector.load %arg4[%c0_12, %c0_13, %c0_14] : memref<4x8x16xf32, #tpu.memory_space<vmem>>, vector<1x8x16xf32>
    %11 = vector.shape_cast %10 : vector<1x8x16xf32> to vector<8x16xf32>
    %cst_15 = arith.constant dense<0.000000e+00> : vector<128x16xf32>
    %12 = tpu.matmul %9, %11, %cst_15 {dimension_numbers = #tpu.dot_dimension_numbers<[1], [0], [0], [1], [0, 0, 1, 1], [], []>} : vector<128x8xf32>, vector<8x16xf32>, vector<128x16xf32> -> vector<128x16xf32>
    %13 = arith.addf %8, %12 : vector<128x16xf32>
    %c1 = arith.constant 1 : index
    %c0_16 = arith.constant 0 : index
    %14 = vector.load %arg9[%c1, %c0_16] : memref<160x8xf32, #tpu.memory_space<vmem>>, vector<128x8xf32>
    %c1_17 = arith.constant 1 : index
    %c0_18 = arith.constant 0 : index
    %c0_19 = arith.constant 0 : index
    %15 = vector.load %arg4[%c1_17, %c0_18, %c0_19] : memref<4x8x16xf32, #tpu.memory_space<vmem>>, vector<1x8x16xf32>
    %16 = vector.shape_cast %15 : vector<1x8x16xf32> to vector<8x16xf32>
    %cst_20 = arith.constant dense<0.000000e+00> : vector<128x16xf32>
    %17 = tpu.matmul %14, %16, %cst_20 {dimension_numbers = #tpu.dot_dimension_numbers<[1], [0], [0], [1], [0, 0, 1, 1], [], []>} : vector<128x8xf32>, vector<8x16xf32>, vector<128x16xf32> -> vector<128x16xf32>
    %18 = arith.addf %13, %17 : vector<128x16xf32>
    %c16 = arith.constant 16 : index
    %c0_21 = arith.constant 0 : index
    %19 = vector.load %arg9[%c16, %c0_21] : memref<160x8xf32, #tpu.memory_space<vmem>>, vector<128x8xf32>
    %c2 = arith.constant 2 : index
    %c0_22 = arith.constant 0 : index
    %c0_23 = arith.constant 0 : index
    %20 = vector.load %arg4[%c2, %c0_22, %c0_23] : memref<4x8x16xf32, #tpu.memory_space<vmem>>, vector<1x8x16xf32>
    %21 = vector.shape_cast %20 : vector<1x8x16xf32> to vector<8x16xf32>
    %cst_24 = arith.constant dense<0.000000e+00> : vector<128x16xf32>
    %22 = tpu.matmul %19, %21, %cst_24 {dimension_numbers = #tpu.dot_dimension_numbers<[1], [0], [0], [1], [0, 0, 1, 1], [], []>} : vector<128x8xf32>, vector<8x16xf32>, vector<128x16xf32> -> vector<128x16xf32>
    %23 = arith.addf %18, %22 : vector<128x16xf32>
    %c17 = arith.constant 17 : index
    %c0_25 = arith.constant 0 : index
    %24 = vector.load %arg9[%c17, %c0_25] : memref<160x8xf32, #tpu.memory_space<vmem>>, vector<128x8xf32>
    %c3 = arith.constant 3 : index
    %c0_26 = arith.constant 0 : index
    %c0_27 = arith.constant 0 : index
    %25 = vector.load %arg4[%c3, %c0_26, %c0_27] : memref<4x8x16xf32, #tpu.memory_space<vmem>>, vector<1x8x16xf32>
    %26 = vector.shape_cast %25 : vector<1x8x16xf32> to vector<8x16xf32>
    %cst_28 = arith.constant dense<0.000000e+00> : vector<128x16xf32>
    %27 = tpu.matmul %24, %26, %cst_28 {dimension_numbers = #tpu.dot_dimension_numbers<[1], [0], [0], [1], [0, 0, 1, 1], [], []>} : vector<128x8xf32>, vector<8x16xf32>, vector<128x16xf32> -> vector<128x16xf32>
    %28 = arith.addf %23, %27 : vector<128x16xf32>
    %c0_29 = arith.constant 0 : index
    %c0_30 = arith.constant 0 : index
    %29 = vector.load %arg5[%c0_29, %c0_30] : memref<1x16xf32, #tpu.memory_space<vmem>>, vector<1x16xf32>
    %30 = vector.broadcast %29 : vector<1x16xf32> to vector<128x16xf32>
    %31 = arith.addf %28, %30 : vector<128x16xf32>
    %32 = arith.mulf %31, %31 : vector<128x16xf32>
    %c0_31 = arith.constant 0 : index
    %c0_32 = arith.constant 0 : index
    %33 = vector.load %arg6[%c0_31, %c0_32] : memref<16x16xf32, #tpu.memory_space<vmem>>, vector<16x16xf32>
    %cst_33 = arith.constant dense<0.000000e+00> : vector<128x16xf32>
    %34 = tpu.matmul %32, %33, %cst_33 {dimension_numbers = #tpu.dot_dimension_numbers<[1], [0], [0], [1], [0, 0, 1, 1], [], []>} : vector<128x16xf32>, vector<16x16xf32>, vector<128x16xf32> -> vector<128x16xf32>
    %c0_34 = arith.constant 0 : index
    %c0_35 = arith.constant 0 : index
    %35 = vector.load %arg7[%c0_34, %c0_35] : memref<1x16xf32, #tpu.memory_space<vmem>>, vector<1x16xf32>
    %36 = vector.broadcast %35 : vector<1x16xf32> to vector<128x16xf32>
    %37 = arith.addf %34, %36 : vector<128x16xf32>
    %38 = math.rsqrt %37 : vector<128x16xf32>
    %39 = arith.mulf %31, %38 : vector<128x16xf32>
    %c0_36 = arith.constant 0 : index
    %c0_37 = arith.constant 0 : index
    %c0_38 = arith.constant 0 : index
    %40 = vector.load %arg8[%c0_36, %c0_37, %c0_38] : memref<1x128x16xf32, #tpu.memory_space<vmem>>, vector<1x128x16xf32>
    %41 = vector.shape_cast %40 : vector<1x128x16xf32> to vector<128x16xf32>
    %42 = vector.shape_cast %39 : vector<128x16xf32> to vector<1x128x16xf32>
    tpu.vector_store %arg8[%c0_36, %c0_37, %c0_38], %42 {strides = array<i32>} : memref<1x128x16xf32, #tpu.memory_space<vmem>>, vector<1x128x16xf32>,
    return
  }
  func.func @transform_0(%arg0: i32, %arg1: i32) -> (i32, i32, i32) {
    %c0_i32 = arith.constant 0 : i32
    %c0_i32_0 = arith.constant 0 : i32
    return %arg0, %arg1, %c0_i32 : i32, i32, i32
  }
  func.func @transform_1(%arg0: i32, %arg1: i32) -> (i32, i32, i32) {
    %c1_i32 = arith.constant 1 : i32
    %0 = arith.addi %arg1, %c1_i32 : i32
    %c8_i32 = arith.constant 8 : i32
    %1 = arith.muli %0, %c8_i32 : i32
    %c0_i32 = arith.constant 0 : i32
    %2 = arith.addi %1, %c0_i32 : i32
    %c0_i32_0 = arith.constant 0 : i32
    %c0_i32_1 = arith.constant 0 : i32
    return %arg0, %2, %c0_i32_0 : i32, i32, i32
  }
  func.func @transform_2(%arg0: i32, %arg1: i32) -> (i32, i32, i32) {
    %c0_i32 = arith.constant 0 : i32
    %c0_i32_0 = arith.constant 0 : i32
    %c0_i32_1 = arith.constant 0 : i32
    %c0_i32_2 = arith.constant 0 : i32
    return %c0_i32, %c0_i32_0, %c0_i32_1 : i32, i32, i32
  }
  func.func @transform_3(%arg0: i32, %arg1: i32) -> (i32, i32) {
    %c0_i32 = arith.constant 0 : i32
    %c0_i32_0 = arith.constant 0 : i32
    %c0_i32_1 = arith.constant 0 : i32
    return %c0_i32, %c0_i32_0 : i32, i32
  }
  func.func @transform_4(%arg0: i32, %arg1: i32) -> (i32, i32) {
    %c0_i32 = arith.constant 0 : i32
    %c0_i32_0 = arith.constant 0 : i32
    %c0_i32_1 = arith.constant 0 : i32
    return %c0_i32, %c0_i32_0 : i32, i32
  }
  func.func @transform_5(%arg0: i32, %arg1: i32) -> (i32, i32) {
    %c0_i32 = arith.constant 0 : i32
    %c0_i32_0 = arith.constant 0 : i32
    %c0_i32_1 = arith.constant 0 : i32
    return %c0_i32, %c0_i32_0 : i32, i32
  }
  func.func @transform_6(%arg0: i32, %arg1: i32) -> (i32, i32, i32) {
    %c0_i32 = arith.constant 0 : i32
    %c0_i32_0 = arith.constant 0 : i32
    return %arg0, %arg1, %c0_i32 : i32, i32, i32
  }
}

module attributes {stable_mosaic.version = 11 : i64} {
  func.func @kernel(%arg0: i32, %arg1: i32, %arg2: memref<1x128x16xf32, #tpu.memory_space<vmem>>, %arg3: memref<1x16x16xf32, #tpu.memory_space<vmem>>, %arg4: memref<1x16x16xf32, #tpu.memory_space<vmem>>, %arg5: memref<9x16x16xf32, #tpu.memory_space<vmem>>, %arg6: memref<1x16xf32, #tpu.memory_space<vmem>>, %arg7: memref<1x128x16xf32, #tpu.memory_space<vmem>>, %arg8: memref<176x16xf32, #tpu.memory_space<vmem>>) attributes {dimension_semantics = [#tpu.dimension_semantics<parallel>, #tpu.dimension_semantics<parallel>], iteration_bounds = array<i64: 2, 1>, scalar_prefetch = 0 : i64, scratch_operands = 1 : i64, tpu.core_type = #tpu.core_type<tc>, window_params = [{transform_indices = @transform_0, window_bounds = array<i64: 1, 128, 16>}, {transform_indices = @transform_1, window_bounds = array<i64: 1, 16, 16>}, {transform_indices = @transform_2, window_bounds = array<i64: 1, 16, 16>}, {pipeline_mode = #tpu.pipeline_mode<synchronous>, transform_indices = @transform_3, window_bounds = array<i64: 9, 16, 16>}, {pipeline_mode = #tpu.pipeline_mode<synchronous>, transform_indices = @transform_4, window_bounds = array<i64: 1, 16>}, {transform_indices = @transform_5, window_bounds = array<i64: 1, 128, 16>}]} {
    %c0 = arith.constant 0 : index
    %c0_0 = arith.constant 0 : index
    %c0_1 = arith.constant 0 : index
    %0 = vector.load %arg2[%c0, %c0_0, %c0_1] : memref<1x128x16xf32, #tpu.memory_space<vmem>>, vector<1x128x16xf32>
    %1 = vector.shape_cast %0 : vector<1x128x16xf32> to vector<128x16xf32>
    %c0_2 = arith.constant 0 : index
    %c0_3 = arith.constant 0 : index
    %2 = vector.load %arg8[%c0_2, %c0_3] : memref<176x16xf32, #tpu.memory_space<vmem>>, vector<128x16xf32>
    tpu.vector_store %arg8[%c0_2, %c0_3], %1 {strides = array<i32>} : memref<176x16xf32, #tpu.memory_space<vmem>>, vector<128x16xf32>,
    %c0_4 = arith.constant 0 : index
    %c0_5 = arith.constant 0 : index
    %c0_6 = arith.constant 0 : index
    %3 = vector.load %arg3[%c0_4, %c0_5, %c0_6] : memref<1x16x16xf32, #tpu.memory_space<vmem>>, vector<1x16x16xf32>
    %4 = vector.shape_cast %3 : vector<1x16x16xf32> to vector<16x16xf32>
    %c128 = arith.constant 128 : index
    %c0_7 = arith.constant 0 : index
    %5 = vector.load %arg8[%c128, %c0_7] : memref<176x16xf32, #tpu.memory_space<vmem>>, vector<16x16xf32>
    tpu.vector_store %arg8[%c128, %c0_7], %4 {strides = array<i32>} : memref<176x16xf32, #tpu.memory_space<vmem>>, vector<16x16xf32>,
    %c0_8 = arith.constant 0 : index
    %c0_9 = arith.constant 0 : index
    %c0_10 = arith.constant 0 : index
    %6 = vector.load %arg4[%c0_8, %c0_9, %c0_10] : memref<1x16x16xf32, #tpu.memory_space<vmem>>, vector<1x16x16xf32>
    %7 = vector.shape_cast %6 : vector<1x16x16xf32> to vector<16x16xf32>
    %c144 = arith.constant 144 : index
    %c0_11 = arith.constant 0 : index
    %8 = vector.load %arg8[%c144, %c0_11] : memref<176x16xf32, #tpu.memory_space<vmem>>, vector<16x16xf32>
    tpu.vector_store %arg8[%c144, %c0_11], %7 {strides = array<i32>} : memref<176x16xf32, #tpu.memory_space<vmem>>, vector<16x16xf32>,
    %cst = arith.constant 0.000000e+00 : f32
    %9 = vector.broadcast %cst : f32 to vector<16x16xf32>
    %c160 = arith.constant 160 : index
    %c0_12 = arith.constant 0 : index
    %10 = vector.load %arg8[%c160, %c0_12] : memref<176x16xf32, #tpu.memory_space<vmem>>, vector<16x16xf32>
    tpu.vector_store %arg8[%c160, %c0_12], %9 {strides = array<i32>} : memref<176x16xf32, #tpu.memory_space<vmem>>, vector<16x16xf32>,
    %cst_13 = arith.constant 0.000000e+00 : f32
    %11 = vector.broadcast %cst_13 : f32 to vector<128x16xf32>
    %c0_14 = arith.constant 0 : index
    %c0_15 = arith.constant 0 : index
    %12 = vector.load %arg8[%c0_14, %c0_15] : memref<176x16xf32, #tpu.memory_space<vmem>>, vector<128x16xf32>
    %c0_16 = arith.constant 0 : index
    %c0_17 = arith.constant 0 : index
    %c0_18 = arith.constant 0 : index
    %13 = vector.load %arg5[%c0_16, %c0_17, %c0_18] : memref<9x16x16xf32, #tpu.memory_space<vmem>>, vector<1x16x16xf32>
    %14 = vector.shape_cast %13 : vector<1x16x16xf32> to vector<16x16xf32>
    %cst_19 = arith.constant dense<0.000000e+00> : vector<128x16xf32>
    %15 = tpu.matmul %12, %14, %cst_19 {dimension_numbers = #tpu.dot_dimension_numbers<[1], [0], [0], [1], [0, 0, 1, 1], [], []>} : vector<128x16xf32>, vector<16x16xf32>, vector<128x16xf32> -> vector<128x16xf32>
    %16 = arith.addf %11, %15 : vector<128x16xf32>
    %c1 = arith.constant 1 : index
    %c0_20 = arith.constant 0 : index
    %17 = vector.load %arg8[%c1, %c0_20] : memref<176x16xf32, #tpu.memory_space<vmem>>, vector<128x16xf32>
    %c1_21 = arith.constant 1 : index
    %c0_22 = arith.constant 0 : index
    %c0_23 = arith.constant 0 : index
    %18 = vector.load %arg5[%c1_21, %c0_22, %c0_23] : memref<9x16x16xf32, #tpu.memory_space<vmem>>, vector<1x16x16xf32>
    %19 = vector.shape_cast %18 : vector<1x16x16xf32> to vector<16x16xf32>
    %cst_24 = arith.constant dense<0.000000e+00> : vector<128x16xf32>
    %20 = tpu.matmul %17, %19, %cst_24 {dimension_numbers = #tpu.dot_dimension_numbers<[1], [0], [0], [1], [0, 0, 1, 1], [], []>} : vector<128x16xf32>, vector<16x16xf32>, vector<128x16xf32> -> vector<128x16xf32>
    %21 = arith.addf %16, %20 : vector<128x16xf32>
    %c2 = arith.constant 2 : index
    %c0_25 = arith.constant 0 : index
    %22 = vector.load %arg8[%c2, %c0_25] : memref<176x16xf32, #tpu.memory_space<vmem>>, vector<128x16xf32>
    %c2_26 = arith.constant 2 : index
    %c0_27 = arith.constant 0 : index
    %c0_28 = arith.constant 0 : index
    %23 = vector.load %arg5[%c2_26, %c0_27, %c0_28] : memref<9x16x16xf32, #tpu.memory_space<vmem>>, vector<1x16x16xf32>
    %24 = vector.shape_cast %23 : vector<1x16x16xf32> to vector<16x16xf32>
    %cst_29 = arith.constant dense<0.000000e+00> : vector<128x16xf32>
    %25 = tpu.matmul %22, %24, %cst_29 {dimension_numbers = #tpu.dot_dimension_numbers<[1], [0], [0], [1], [0, 0, 1, 1], [], []>} : vector<128x16xf32>, vector<16x16xf32>, vector<128x16xf32> -> vector<128x16xf32>
    %26 = arith.addf %21, %25 : vector<128x16xf32>
    %c16 = arith.constant 16 : index
    %c0_30 = arith.constant 0 : index
    %27 = vector.load %arg8[%c16, %c0_30] : memref<176x16xf32, #tpu.memory_space<vmem>>, vector<128x16xf32>
    %c3 = arith.constant 3 : index
    %c0_31 = arith.constant 0 : index
    %c0_32 = arith.constant 0 : index
    %28 = vector.load %arg5[%c3, %c0_31, %c0_32] : memref<9x16x16xf32, #tpu.memory_space<vmem>>, vector<1x16x16xf32>
    %29 = vector.shape_cast %28 : vector<1x16x16xf32> to vector<16x16xf32>
    %cst_33 = arith.constant dense<0.000000e+00> : vector<128x16xf32>
    %30 = tpu.matmul %27, %29, %cst_33 {dimension_numbers = #tpu.dot_dimension_numbers<[1], [0], [0], [1], [0, 0, 1, 1], [], []>} : vector<128x16xf32>, vector<16x16xf32>, vector<128x16xf32> -> vector<128x16xf32>
    %31 = arith.addf %26, %30 : vector<128x16xf32>
    %c17 = arith.constant 17 : index
    %c0_34 = arith.constant 0 : index
    %32 = vector.load %arg8[%c17, %c0_34] : memref<176x16xf32, #tpu.memory_space<vmem>>, vector<128x16xf32>
    %c4 = arith.constant 4 : index
    %c0_35 = arith.constant 0 : index
    %c0_36 = arith.constant 0 : index
    %33 = vector.load %arg5[%c4, %c0_35, %c0_36] : memref<9x16x16xf32, #tpu.memory_space<vmem>>, vector<1x16x16xf32>
    %34 = vector.shape_cast %33 : vector<1x16x16xf32> to vector<16x16xf32>
    %cst_37 = arith.constant dense<0.000000e+00> : vector<128x16xf32>
    %35 = tpu.matmul %32, %34, %cst_37 {dimension_numbers = #tpu.dot_dimension_numbers<[1], [0], [0], [1], [0, 0, 1, 1], [], []>} : vector<128x16xf32>, vector<16x16xf32>, vector<128x16xf32> -> vector<128x16xf32>
    %36 = arith.addf %31, %35 : vector<128x16xf32>
    %c18 = arith.constant 18 : index
    %c0_38 = arith.constant 0 : index
    %37 = vector.load %arg8[%c18, %c0_38] : memref<176x16xf32, #tpu.memory_space<vmem>>, vector<128x16xf32>
    %c5 = arith.constant 5 : index
    %c0_39 = arith.constant 0 : index
    %c0_40 = arith.constant 0 : index
    %38 = vector.load %arg5[%c5, %c0_39, %c0_40] : memref<9x16x16xf32, #tpu.memory_space<vmem>>, vector<1x16x16xf32>
    %39 = vector.shape_cast %38 : vector<1x16x16xf32> to vector<16x16xf32>
    %cst_41 = arith.constant dense<0.000000e+00> : vector<128x16xf32>
    %40 = tpu.matmul %37, %39, %cst_41 {dimension_numbers = #tpu.dot_dimension_numbers<[1], [0], [0], [1], [0, 0, 1, 1], [], []>} : vector<128x16xf32>, vector<16x16xf32>, vector<128x16xf32> -> vector<128x16xf32>
    %41 = arith.addf %36, %40 : vector<128x16xf32>
    %c32 = arith.constant 32 : index
    %c0_42 = arith.constant 0 : index
    %42 = vector.load %arg8[%c32, %c0_42] : memref<176x16xf32, #tpu.memory_space<vmem>>, vector<128x16xf32>
    %c6 = arith.constant 6 : index
    %c0_43 = arith.constant 0 : index
    %c0_44 = arith.constant 0 : index
    %43 = vector.load %arg5[%c6, %c0_43, %c0_44] : memref<9x16x16xf32, #tpu.memory_space<vmem>>, vector<1x16x16xf32>
    %44 = vector.shape_cast %43 : vector<1x16x16xf32> to vector<16x16xf32>
    %cst_45 = arith.constant dense<0.000000e+00> : vector<128x16xf32>
    %45 = tpu.matmul %42, %44, %cst_45 {dimension_numbers = #tpu.dot_dimension_numbers<[1], [0], [0], [1], [0, 0, 1, 1], [], []>} : vector<128x16xf32>, vector<16x16xf32>, vector<128x16xf32> -> vector<128x16xf32>
    %46 = arith.addf %41, %45 : vector<128x16xf32>
    %c33 = arith.constant 33 : index
    %c0_46 = arith.constant 0 : index
    %47 = vector.load %arg8[%c33, %c0_46] : memref<176x16xf32, #tpu.memory_space<vmem>>, vector<128x16xf32>
    %c7 = arith.constant 7 : index
    %c0_47 = arith.constant 0 : index
    %c0_48 = arith.constant 0 : index
    %48 = vector.load %arg5[%c7, %c0_47, %c0_48] : memref<9x16x16xf32, #tpu.memory_space<vmem>>, vector<1x16x16xf32>
    %49 = vector.shape_cast %48 : vector<1x16x16xf32> to vector<16x16xf32>
    %cst_49 = arith.constant dense<0.000000e+00> : vector<128x16xf32>
    %50 = tpu.matmul %47, %49, %cst_49 {dimension_numbers = #tpu.dot_dimension_numbers<[1], [0], [0], [1], [0, 0, 1, 1], [], []>} : vector<128x16xf32>, vector<16x16xf32>, vector<128x16xf32> -> vector<128x16xf32>
    %51 = arith.addf %46, %50 : vector<128x16xf32>
    %c34 = arith.constant 34 : index
    %c0_50 = arith.constant 0 : index
    %52 = vector.load %arg8[%c34, %c0_50] : memref<176x16xf32, #tpu.memory_space<vmem>>, vector<128x16xf32>
    %c8 = arith.constant 8 : index
    %c0_51 = arith.constant 0 : index
    %c0_52 = arith.constant 0 : index
    %53 = vector.load %arg5[%c8, %c0_51, %c0_52] : memref<9x16x16xf32, #tpu.memory_space<vmem>>, vector<1x16x16xf32>
    %54 = vector.shape_cast %53 : vector<1x16x16xf32> to vector<16x16xf32>
    %cst_53 = arith.constant dense<0.000000e+00> : vector<128x16xf32>
    %55 = tpu.matmul %52, %54, %cst_53 {dimension_numbers = #tpu.dot_dimension_numbers<[1], [0], [0], [1], [0, 0, 1, 1], [], []>} : vector<128x16xf32>, vector<16x16xf32>, vector<128x16xf32> -> vector<128x16xf32>
    %56 = arith.addf %51, %55 : vector<128x16xf32>
    %c0_54 = arith.constant 0 : index
    %c0_55 = arith.constant 0 : index
    %57 = vector.load %arg6[%c0_54, %c0_55] : memref<1x16xf32, #tpu.memory_space<vmem>>, vector<1x16xf32>
    %58 = vector.broadcast %57 : vector<1x16xf32> to vector<128x16xf32>
    %59 = arith.addf %56, %58 : vector<128x16xf32>
    %cst_56 = arith.constant 0.000000e+00 : f32
    %60 = vector.broadcast %cst_56 : f32 to vector<128x16xf32>
    %61 = arith.cmpf oge, %59, %60 : vector<128x16xf32>
    %cst_57 = arith.constant 0.00999999977 : f32
    %62 = vector.broadcast %cst_57 : f32 to vector<128x16xf32>
    %63 = arith.mulf %59, %62 : vector<128x16xf32>
    %64 = arith.select %61, %59, %63 : vector<128x16xi1>, vector<128x16xf32>
    %c0_58 = arith.constant 0 : index
    %c0_59 = arith.constant 0 : index
    %c0_60 = arith.constant 0 : index
    %65 = vector.load %arg7[%c0_58, %c0_59, %c0_60] : memref<1x128x16xf32, #tpu.memory_space<vmem>>, vector<1x128x16xf32>
    %66 = vector.shape_cast %65 : vector<1x128x16xf32> to vector<128x16xf32>
    %67 = vector.shape_cast %64 : vector<128x16xf32> to vector<1x128x16xf32>
    tpu.vector_store %arg7[%c0_58, %c0_59, %c0_60], %67 {strides = array<i32>} : memref<1x128x16xf32, #tpu.memory_space<vmem>>, vector<1x128x16xf32>,
    return
  }
  func.func @transform_0(%arg0: i32, %arg1: i32) -> (i32, i32, i32) {
    %c0_i32 = arith.constant 0 : i32
    %c0_i32_0 = arith.constant 0 : i32
    return %arg0, %arg1, %c0_i32 : i32, i32, i32
  }
  func.func @transform_1(%arg0: i32, %arg1: i32) -> (i32, i32, i32) {
    %c1_i32 = arith.constant 1 : i32
    %0 = arith.addi %arg1, %c1_i32 : i32
    %c8_i32 = arith.constant 8 : i32
    %1 = arith.muli %0, %c8_i32 : i32
    %c0_i32 = arith.constant 0 : i32
    %2 = arith.addi %1, %c0_i32 : i32
    %c0_i32_0 = arith.constant 0 : i32
    %c0_i32_1 = arith.constant 0 : i32
    return %arg0, %2, %c0_i32_0 : i32, i32, i32
  }
  func.func @transform_2(%arg0: i32, %arg1: i32) -> (i32, i32, i32) {
    %c1_i32 = arith.constant 1 : i32
    %0 = arith.addi %arg1, %c1_i32 : i32
    %c8_i32 = arith.constant 8 : i32
    %1 = arith.muli %0, %c8_i32 : i32
    %c1_i32_0 = arith.constant 1 : i32
    %2 = arith.addi %1, %c1_i32_0 : i32
    %c0_i32 = arith.constant 0 : i32
    %c0_i32_1 = arith.constant 0 : i32
    return %arg0, %2, %c0_i32 : i32, i32, i32
  }
  func.func @transform_3(%arg0: i32, %arg1: i32) -> (i32, i32, i32) {
    %c0_i32 = arith.constant 0 : i32
    %c0_i32_0 = arith.constant 0 : i32
    %c0_i32_1 = arith.constant 0 : i32
    %c0_i32_2 = arith.constant 0 : i32
    return %c0_i32, %c0_i32_0, %c0_i32_1 : i32, i32, i32
  }
  func.func @transform_4(%arg0: i32, %arg1: i32) -> (i32, i32) {
    %c0_i32 = arith.constant 0 : i32
    %c0_i32_0 = arith.constant 0 : i32
    %c0_i32_1 = arith.constant 0 : i32
    return %c0_i32, %c0_i32_0 : i32, i32
  }
  func.func @transform_5(%arg0: i32, %arg1: i32) -> (i32, i32, i32) {
    %c0_i32 = arith.constant 0 : i32
    %c0_i32_0 = arith.constant 0 : i32
    return %arg0, %arg1, %c0_i32 : i32, i32, i32
  }
}

module attributes {stable_mosaic.version = 11 : i64} {
  func.func @kernel(%arg0: i32, %arg1: i32, %arg2: memref<1x128x16xf32, #tpu.memory_space<vmem>>, %arg3: memref<1x16x16xf32, #tpu.memory_space<vmem>>, %arg4: memref<1x16x16xf32, #tpu.memory_space<vmem>>, %arg5: memref<9x16x16xf32, #tpu.memory_space<vmem>>, %arg6: memref<1x16xf32, #tpu.memory_space<vmem>>, %arg7: memref<1x128x16xf32, #tpu.memory_space<vmem>>, %arg8: memref<1x128x16xf32, #tpu.memory_space<vmem>>, %arg9: memref<176x16xf32, #tpu.memory_space<vmem>>) attributes {dimension_semantics = [#tpu.dimension_semantics<parallel>, #tpu.dimension_semantics<parallel>], iteration_bounds = array<i64: 2, 1>, scalar_prefetch = 0 : i64, scratch_operands = 1 : i64, tpu.core_type = #tpu.core_type<tc>, window_params = [{transform_indices = @transform_0, window_bounds = array<i64: 1, 128, 16>}, {transform_indices = @transform_1, window_bounds = array<i64: 1, 16, 16>}, {transform_indices = @transform_2, window_bounds = array<i64: 1, 16, 16>}, {pipeline_mode = #tpu.pipeline_mode<synchronous>, transform_indices = @transform_3, window_bounds = array<i64: 9, 16, 16>}, {pipeline_mode = #tpu.pipeline_mode<synchronous>, transform_indices = @transform_4, window_bounds = array<i64: 1, 16>}, {transform_indices = @transform_5, window_bounds = array<i64: 1, 128, 16>}, {transform_indices = @transform_6, window_bounds = array<i64: 1, 128, 16>}]} {
    %c0 = arith.constant 0 : index
    %c0_0 = arith.constant 0 : index
    %c0_1 = arith.constant 0 : index
    %0 = vector.load %arg2[%c0, %c0_0, %c0_1] : memref<1x128x16xf32, #tpu.memory_space<vmem>>, vector<1x128x16xf32>
    %1 = vector.shape_cast %0 : vector<1x128x16xf32> to vector<128x16xf32>
    %c0_2 = arith.constant 0 : index
    %c0_3 = arith.constant 0 : index
    %2 = vector.load %arg9[%c0_2, %c0_3] : memref<176x16xf32, #tpu.memory_space<vmem>>, vector<128x16xf32>
    tpu.vector_store %arg9[%c0_2, %c0_3], %1 {strides = array<i32>} : memref<176x16xf32, #tpu.memory_space<vmem>>, vector<128x16xf32>,
    %c0_4 = arith.constant 0 : index
    %c0_5 = arith.constant 0 : index
    %c0_6 = arith.constant 0 : index
    %3 = vector.load %arg3[%c0_4, %c0_5, %c0_6] : memref<1x16x16xf32, #tpu.memory_space<vmem>>, vector<1x16x16xf32>
    %4 = vector.shape_cast %3 : vector<1x16x16xf32> to vector<16x16xf32>
    %c128 = arith.constant 128 : index
    %c0_7 = arith.constant 0 : index
    %5 = vector.load %arg9[%c128, %c0_7] : memref<176x16xf32, #tpu.memory_space<vmem>>, vector<16x16xf32>
    tpu.vector_store %arg9[%c128, %c0_7], %4 {strides = array<i32>} : memref<176x16xf32, #tpu.memory_space<vmem>>, vector<16x16xf32>,
    %c0_8 = arith.constant 0 : index
    %c0_9 = arith.constant 0 : index
    %c0_10 = arith.constant 0 : index
    %6 = vector.load %arg4[%c0_8, %c0_9, %c0_10] : memref<1x16x16xf32, #tpu.memory_space<vmem>>, vector<1x16x16xf32>
    %7 = vector.shape_cast %6 : vector<1x16x16xf32> to vector<16x16xf32>
    %c144 = arith.constant 144 : index
    %c0_11 = arith.constant 0 : index
    %8 = vector.load %arg9[%c144, %c0_11] : memref<176x16xf32, #tpu.memory_space<vmem>>, vector<16x16xf32>
    tpu.vector_store %arg9[%c144, %c0_11], %7 {strides = array<i32>} : memref<176x16xf32, #tpu.memory_space<vmem>>, vector<16x16xf32>,
    %cst = arith.constant 0.000000e+00 : f32
    %9 = vector.broadcast %cst : f32 to vector<16x16xf32>
    %c160 = arith.constant 160 : index
    %c0_12 = arith.constant 0 : index
    %10 = vector.load %arg9[%c160, %c0_12] : memref<176x16xf32, #tpu.memory_space<vmem>>, vector<16x16xf32>
    tpu.vector_store %arg9[%c160, %c0_12], %9 {strides = array<i32>} : memref<176x16xf32, #tpu.memory_space<vmem>>, vector<16x16xf32>,
    %cst_13 = arith.constant 0.000000e+00 : f32
    %11 = vector.broadcast %cst_13 : f32 to vector<128x16xf32>
    %c0_14 = arith.constant 0 : index
    %c0_15 = arith.constant 0 : index
    %12 = vector.load %arg9[%c0_14, %c0_15] : memref<176x16xf32, #tpu.memory_space<vmem>>, vector<128x16xf32>
    %c0_16 = arith.constant 0 : index
    %c0_17 = arith.constant 0 : index
    %c0_18 = arith.constant 0 : index
    %13 = vector.load %arg5[%c0_16, %c0_17, %c0_18] : memref<9x16x16xf32, #tpu.memory_space<vmem>>, vector<1x16x16xf32>
    %14 = vector.shape_cast %13 : vector<1x16x16xf32> to vector<16x16xf32>
    %cst_19 = arith.constant dense<0.000000e+00> : vector<128x16xf32>
    %15 = tpu.matmul %12, %14, %cst_19 {dimension_numbers = #tpu.dot_dimension_numbers<[1], [0], [0], [1], [0, 0, 1, 1], [], []>} : vector<128x16xf32>, vector<16x16xf32>, vector<128x16xf32> -> vector<128x16xf32>
    %16 = arith.addf %11, %15 : vector<128x16xf32>
    %c1 = arith.constant 1 : index
    %c0_20 = arith.constant 0 : index
    %17 = vector.load %arg9[%c1, %c0_20] : memref<176x16xf32, #tpu.memory_space<vmem>>, vector<128x16xf32>
    %c1_21 = arith.constant 1 : index
    %c0_22 = arith.constant 0 : index
    %c0_23 = arith.constant 0 : index
    %18 = vector.load %arg5[%c1_21, %c0_22, %c0_23] : memref<9x16x16xf32, #tpu.memory_space<vmem>>, vector<1x16x16xf32>
    %19 = vector.shape_cast %18 : vector<1x16x16xf32> to vector<16x16xf32>
    %cst_24 = arith.constant dense<0.000000e+00> : vector<128x16xf32>
    %20 = tpu.matmul %17, %19, %cst_24 {dimension_numbers = #tpu.dot_dimension_numbers<[1], [0], [0], [1], [0, 0, 1, 1], [], []>} : vector<128x16xf32>, vector<16x16xf32>, vector<128x16xf32> -> vector<128x16xf32>
    %21 = arith.addf %16, %20 : vector<128x16xf32>
    %c2 = arith.constant 2 : index
    %c0_25 = arith.constant 0 : index
    %22 = vector.load %arg9[%c2, %c0_25] : memref<176x16xf32, #tpu.memory_space<vmem>>, vector<128x16xf32>
    %c2_26 = arith.constant 2 : index
    %c0_27 = arith.constant 0 : index
    %c0_28 = arith.constant 0 : index
    %23 = vector.load %arg5[%c2_26, %c0_27, %c0_28] : memref<9x16x16xf32, #tpu.memory_space<vmem>>, vector<1x16x16xf32>
    %24 = vector.shape_cast %23 : vector<1x16x16xf32> to vector<16x16xf32>
    %cst_29 = arith.constant dense<0.000000e+00> : vector<128x16xf32>
    %25 = tpu.matmul %22, %24, %cst_29 {dimension_numbers = #tpu.dot_dimension_numbers<[1], [0], [0], [1], [0, 0, 1, 1], [], []>} : vector<128x16xf32>, vector<16x16xf32>, vector<128x16xf32> -> vector<128x16xf32>
    %26 = arith.addf %21, %25 : vector<128x16xf32>
    %c16 = arith.constant 16 : index
    %c0_30 = arith.constant 0 : index
    %27 = vector.load %arg9[%c16, %c0_30] : memref<176x16xf32, #tpu.memory_space<vmem>>, vector<128x16xf32>
    %c3 = arith.constant 3 : index
    %c0_31 = arith.constant 0 : index
    %c0_32 = arith.constant 0 : index
    %28 = vector.load %arg5[%c3, %c0_31, %c0_32] : memref<9x16x16xf32, #tpu.memory_space<vmem>>, vector<1x16x16xf32>
    %29 = vector.shape_cast %28 : vector<1x16x16xf32> to vector<16x16xf32>
    %cst_33 = arith.constant dense<0.000000e+00> : vector<128x16xf32>
    %30 = tpu.matmul %27, %29, %cst_33 {dimension_numbers = #tpu.dot_dimension_numbers<[1], [0], [0], [1], [0, 0, 1, 1], [], []>} : vector<128x16xf32>, vector<16x16xf32>, vector<128x16xf32> -> vector<128x16xf32>
    %31 = arith.addf %26, %30 : vector<128x16xf32>
    %c17 = arith.constant 17 : index
    %c0_34 = arith.constant 0 : index
    %32 = vector.load %arg9[%c17, %c0_34] : memref<176x16xf32, #tpu.memory_space<vmem>>, vector<128x16xf32>
    %c4 = arith.constant 4 : index
    %c0_35 = arith.constant 0 : index
    %c0_36 = arith.constant 0 : index
    %33 = vector.load %arg5[%c4, %c0_35, %c0_36] : memref<9x16x16xf32, #tpu.memory_space<vmem>>, vector<1x16x16xf32>
    %34 = vector.shape_cast %33 : vector<1x16x16xf32> to vector<16x16xf32>
    %cst_37 = arith.constant dense<0.000000e+00> : vector<128x16xf32>
    %35 = tpu.matmul %32, %34, %cst_37 {dimension_numbers = #tpu.dot_dimension_numbers<[1], [0], [0], [1], [0, 0, 1, 1], [], []>} : vector<128x16xf32>, vector<16x16xf32>, vector<128x16xf32> -> vector<128x16xf32>
    %36 = arith.addf %31, %35 : vector<128x16xf32>
    %c18 = arith.constant 18 : index
    %c0_38 = arith.constant 0 : index
    %37 = vector.load %arg9[%c18, %c0_38] : memref<176x16xf32, #tpu.memory_space<vmem>>, vector<128x16xf32>
    %c5 = arith.constant 5 : index
    %c0_39 = arith.constant 0 : index
    %c0_40 = arith.constant 0 : index
    %38 = vector.load %arg5[%c5, %c0_39, %c0_40] : memref<9x16x16xf32, #tpu.memory_space<vmem>>, vector<1x16x16xf32>
    %39 = vector.shape_cast %38 : vector<1x16x16xf32> to vector<16x16xf32>
    %cst_41 = arith.constant dense<0.000000e+00> : vector<128x16xf32>
    %40 = tpu.matmul %37, %39, %cst_41 {dimension_numbers = #tpu.dot_dimension_numbers<[1], [0], [0], [1], [0, 0, 1, 1], [], []>} : vector<128x16xf32>, vector<16x16xf32>, vector<128x16xf32> -> vector<128x16xf32>
    %41 = arith.addf %36, %40 : vector<128x16xf32>
    %c32 = arith.constant 32 : index
    %c0_42 = arith.constant 0 : index
    %42 = vector.load %arg9[%c32, %c0_42] : memref<176x16xf32, #tpu.memory_space<vmem>>, vector<128x16xf32>
    %c6 = arith.constant 6 : index
    %c0_43 = arith.constant 0 : index
    %c0_44 = arith.constant 0 : index
    %43 = vector.load %arg5[%c6, %c0_43, %c0_44] : memref<9x16x16xf32, #tpu.memory_space<vmem>>, vector<1x16x16xf32>
    %44 = vector.shape_cast %43 : vector<1x16x16xf32> to vector<16x16xf32>
    %cst_45 = arith.constant dense<0.000000e+00> : vector<128x16xf32>
    %45 = tpu.matmul %42, %44, %cst_45 {dimension_numbers = #tpu.dot_dimension_numbers<[1], [0], [0], [1], [0, 0, 1, 1], [], []>} : vector<128x16xf32>, vector<16x16xf32>, vector<128x16xf32> -> vector<128x16xf32>
    %46 = arith.addf %41, %45 : vector<128x16xf32>
    %c33 = arith.constant 33 : index
    %c0_46 = arith.constant 0 : index
    %47 = vector.load %arg9[%c33, %c0_46] : memref<176x16xf32, #tpu.memory_space<vmem>>, vector<128x16xf32>
    %c7 = arith.constant 7 : index
    %c0_47 = arith.constant 0 : index
    %c0_48 = arith.constant 0 : index
    %48 = vector.load %arg5[%c7, %c0_47, %c0_48] : memref<9x16x16xf32, #tpu.memory_space<vmem>>, vector<1x16x16xf32>
    %49 = vector.shape_cast %48 : vector<1x16x16xf32> to vector<16x16xf32>
    %cst_49 = arith.constant dense<0.000000e+00> : vector<128x16xf32>
    %50 = tpu.matmul %47, %49, %cst_49 {dimension_numbers = #tpu.dot_dimension_numbers<[1], [0], [0], [1], [0, 0, 1, 1], [], []>} : vector<128x16xf32>, vector<16x16xf32>, vector<128x16xf32> -> vector<128x16xf32>
    %51 = arith.addf %46, %50 : vector<128x16xf32>
    %c34 = arith.constant 34 : index
    %c0_50 = arith.constant 0 : index
    %52 = vector.load %arg9[%c34, %c0_50] : memref<176x16xf32, #tpu.memory_space<vmem>>, vector<128x16xf32>
    %c8 = arith.constant 8 : index
    %c0_51 = arith.constant 0 : index
    %c0_52 = arith.constant 0 : index
    %53 = vector.load %arg5[%c8, %c0_51, %c0_52] : memref<9x16x16xf32, #tpu.memory_space<vmem>>, vector<1x16x16xf32>
    %54 = vector.shape_cast %53 : vector<1x16x16xf32> to vector<16x16xf32>
    %cst_53 = arith.constant dense<0.000000e+00> : vector<128x16xf32>
    %55 = tpu.matmul %52, %54, %cst_53 {dimension_numbers = #tpu.dot_dimension_numbers<[1], [0], [0], [1], [0, 0, 1, 1], [], []>} : vector<128x16xf32>, vector<16x16xf32>, vector<128x16xf32> -> vector<128x16xf32>
    %56 = arith.addf %51, %55 : vector<128x16xf32>
    %c0_54 = arith.constant 0 : index
    %c0_55 = arith.constant 0 : index
    %57 = vector.load %arg6[%c0_54, %c0_55] : memref<1x16xf32, #tpu.memory_space<vmem>>, vector<1x16xf32>
    %58 = vector.broadcast %57 : vector<1x16xf32> to vector<128x16xf32>
    %59 = arith.addf %56, %58 : vector<128x16xf32>
    %c0_56 = arith.constant 0 : index
    %c0_57 = arith.constant 0 : index
    %c0_58 = arith.constant 0 : index
    %60 = vector.load %arg7[%c0_56, %c0_57, %c0_58] : memref<1x128x16xf32, #tpu.memory_space<vmem>>, vector<1x128x16xf32>
    %61 = vector.shape_cast %60 : vector<1x128x16xf32> to vector<128x16xf32>
    %62 = arith.addf %59, %61 : vector<128x16xf32>
    %cst_59 = arith.constant 0.000000e+00 : f32
    %63 = vector.broadcast %cst_59 : f32 to vector<128x16xf32>
    %64 = arith.cmpf oge, %62, %63 : vector<128x16xf32>
    %cst_60 = arith.constant 1.000000e-01 : f32
    %65 = vector.broadcast %cst_60 : f32 to vector<128x16xf32>
    %66 = arith.mulf %62, %65 : vector<128x16xf32>
    %67 = arith.select %64, %62, %66 : vector<128x16xi1>, vector<128x16xf32>
    %c0_61 = arith.constant 0 : index
    %c0_62 = arith.constant 0 : index
    %c0_63 = arith.constant 0 : index
    %68 = vector.load %arg8[%c0_61, %c0_62, %c0_63] : memref<1x128x16xf32, #tpu.memory_space<vmem>>, vector<1x128x16xf32>
    %69 = vector.shape_cast %68 : vector<1x128x16xf32> to vector<128x16xf32>
    %70 = vector.shape_cast %67 : vector<128x16xf32> to vector<1x128x16xf32>
    tpu.vector_store %arg8[%c0_61, %c0_62, %c0_63], %70 {strides = array<i32>} : memref<1x128x16xf32, #tpu.memory_space<vmem>>, vector<1x128x16xf32>,
    return
  }
  func.func @transform_0(%arg0: i32, %arg1: i32) -> (i32, i32, i32) {
    %c0_i32 = arith.constant 0 : i32
    %c0_i32_0 = arith.constant 0 : i32
    return %arg0, %arg1, %c0_i32 : i32, i32, i32
  }
  func.func @transform_1(%arg0: i32, %arg1: i32) -> (i32, i32, i32) {
    %c1_i32 = arith.constant 1 : i32
    %0 = arith.addi %arg1, %c1_i32 : i32
    %c8_i32 = arith.constant 8 : i32
    %1 = arith.muli %0, %c8_i32 : i32
    %c0_i32 = arith.constant 0 : i32
    %2 = arith.addi %1, %c0_i32 : i32
    %c0_i32_0 = arith.constant 0 : i32
    %c0_i32_1 = arith.constant 0 : i32
    return %arg0, %2, %c0_i32_0 : i32, i32, i32
  }
  func.func @transform_2(%arg0: i32, %arg1: i32) -> (i32, i32, i32) {
    %c1_i32 = arith.constant 1 : i32
    %0 = arith.addi %arg1, %c1_i32 : i32
    %c8_i32 = arith.constant 8 : i32
    %1 = arith.muli %0, %c8_i32 : i32
    %c1_i32_0 = arith.constant 1 : i32
    %2 = arith.addi %1, %c1_i32_0 : i32
    %c0_i32 = arith.constant 0 : i32
    %c0_i32_1 = arith.constant 0 : i32
    return %arg0, %2, %c0_i32 : i32, i32, i32
  }
  func.func @transform_3(%arg0: i32, %arg1: i32) -> (i32, i32, i32) {
    %c0_i32 = arith.constant 0 : i32
    %c0_i32_0 = arith.constant 0 : i32
    %c0_i32_1 = arith.constant 0 : i32
    %c0_i32_2 = arith.constant 0 : i32
    return %c0_i32, %c0_i32_0, %c0_i32_1 : i32, i32, i32
  }
  func.func @transform_4(%arg0: i32, %arg1: i32) -> (i32, i32) {
    %c0_i32 = arith.constant 0 : i32
    %c0_i32_0 = arith.constant 0 : i32
    %c0_i32_1 = arith.constant 0 : i32
    return %c0_i32, %c0_i32_0 : i32, i32
  }
  func.func @transform_5(%arg0: i32, %arg1: i32) -> (i32, i32, i32) {
    %c0_i32 = arith.constant 0 : i32
    %c0_i32_0 = arith.constant 0 : i32
    return %arg0, %arg1, %c0_i32 : i32, i32, i32
  }
  func.func @transform_6(%arg0: i32, %arg1: i32) -> (i32, i32, i32) {
    %c0_i32 = arith.constant 0 : i32
    %c0_i32_0 = arith.constant 0 : i32
    return %arg0, %arg1, %c0_i32 : i32, i32, i32
  }
}

module attributes {stable_mosaic.version = 11 : i64} {
  func.func @kernel(%arg0: i32, %arg1: i32, %arg2: memref<1x32x128xf32, #tpu.memory_space<vmem>>, %arg3: memref<1x8x128xf32, #tpu.memory_space<vmem>>, %arg4: memref<4x128x16xf32, #tpu.memory_space<vmem>>, %arg5: memref<1x16xf32, #tpu.memory_space<vmem>>, %arg6: memref<16x16xf32, #tpu.memory_space<vmem>>, %arg7: memref<1x16xf32, #tpu.memory_space<vmem>>, %arg8: memref<1x32x16xf32, #tpu.memory_space<vmem>>, %arg9: memref<48x128xf32, #tpu.memory_space<vmem>>) attributes {dimension_semantics = [#tpu.dimension_semantics<parallel>, #tpu.dimension_semantics<parallel>], iteration_bounds = array<i64: 2, 1>, scalar_prefetch = 0 : i64, scratch_operands = 1 : i64, tpu.core_type = #tpu.core_type<tc>, window_params = [{transform_indices = @transform_0, window_bounds = array<i64: 1, 32, 128>}, {transform_indices = @transform_1, window_bounds = array<i64: 1, 8, 128>}, {pipeline_mode = #tpu.pipeline_mode<synchronous>, transform_indices = @transform_2, window_bounds = array<i64: 4, 128, 16>}, {pipeline_mode = #tpu.pipeline_mode<synchronous>, transform_indices = @transform_3, window_bounds = array<i64: 1, 16>}, {pipeline_mode = #tpu.pipeline_mode<synchronous>, transform_indices = @transform_4, window_bounds = array<i64: 16, 16>}, {pipeline_mode = #tpu.pipeline_mode<synchronous>, transform_indices = @transform_5, window_bounds = array<i64: 1, 16>}, {transform_indices = @transform_6, window_bounds = array<i64: 1, 32, 16>}]} {
    %c0 = arith.constant 0 : index
    %c0_0 = arith.constant 0 : index
    %c0_1 = arith.constant 0 : index
    %0 = vector.load %arg2[%c0, %c0_0, %c0_1] : memref<1x32x128xf32, #tpu.memory_space<vmem>>, vector<1x32x128xf32>
    %1 = vector.shape_cast %0 : vector<1x32x128xf32> to vector<32x128xf32>
    %c0_2 = arith.constant 0 : index
    %c0_3 = arith.constant 0 : index
    %2 = vector.load %arg9[%c0_2, %c0_3] : memref<48x128xf32, #tpu.memory_space<vmem>>, vector<32x128xf32>
    tpu.vector_store %arg9[%c0_2, %c0_3], %1 {strides = array<i32>} : memref<48x128xf32, #tpu.memory_space<vmem>>, vector<32x128xf32>,
    %c0_4 = arith.constant 0 : index
    %c0_5 = arith.constant 0 : index
    %c0_6 = arith.constant 0 : index
    %3 = vector.load %arg3[%c0_4, %c0_5, %c0_6] : memref<1x8x128xf32, #tpu.memory_space<vmem>>, vector<1x8x128xf32>
    %4 = vector.shape_cast %3 : vector<1x8x128xf32> to vector<8x128xf32>
    %c32 = arith.constant 32 : index
    %c0_7 = arith.constant 0 : index
    %5 = vector.load %arg9[%c32, %c0_7] : memref<48x128xf32, #tpu.memory_space<vmem>>, vector<8x128xf32>
    tpu.vector_store %arg9[%c32, %c0_7], %4 {strides = array<i32>} : memref<48x128xf32, #tpu.memory_space<vmem>>, vector<8x128xf32>,
    %cst = arith.constant 0.000000e+00 : f32
    %6 = vector.broadcast %cst : f32 to vector<8x128xf32>
    %c40 = arith.constant 40 : index
    %c0_8 = arith.constant 0 : index
    %7 = vector.load %arg9[%c40, %c0_8] : memref<48x128xf32, #tpu.memory_space<vmem>>, vector<8x128xf32>
    tpu.vector_store %arg9[%c40, %c0_8], %6 {strides = array<i32>} : memref<48x128xf32, #tpu.memory_space<vmem>>, vector<8x128xf32>,
    %cst_9 = arith.constant 0.000000e+00 : f32
    %8 = vector.broadcast %cst_9 : f32 to vector<32x16xf32>
    %c0_10 = arith.constant 0 : index
    %c0_11 = arith.constant 0 : index
    %9 = vector.load %arg9[%c0_10, %c0_11] : memref<48x128xf32, #tpu.memory_space<vmem>>, vector<32x128xf32>
    %c0_12 = arith.constant 0 : index
    %c0_13 = arith.constant 0 : index
    %c0_14 = arith.constant 0 : index
    %10 = vector.load %arg4[%c0_12, %c0_13, %c0_14] : memref<4x128x16xf32, #tpu.memory_space<vmem>>, vector<1x128x16xf32>
    %11 = vector.shape_cast %10 : vector<1x128x16xf32> to vector<128x16xf32>
    %cst_15 = arith.constant dense<0.000000e+00> : vector<32x16xf32>
    %12 = tpu.matmul %9, %11, %cst_15 {dimension_numbers = #tpu.dot_dimension_numbers<[1], [0], [0], [1], [0, 0, 1, 1], [], []>} : vector<32x128xf32>, vector<128x16xf32>, vector<32x16xf32> -> vector<32x16xf32>
    %13 = arith.addf %8, %12 : vector<32x16xf32>
    %c1 = arith.constant 1 : index
    %c0_16 = arith.constant 0 : index
    %14 = vector.load %arg9[%c1, %c0_16] : memref<48x128xf32, #tpu.memory_space<vmem>>, vector<32x128xf32>
    %c1_17 = arith.constant 1 : index
    %c0_18 = arith.constant 0 : index
    %c0_19 = arith.constant 0 : index
    %15 = vector.load %arg4[%c1_17, %c0_18, %c0_19] : memref<4x128x16xf32, #tpu.memory_space<vmem>>, vector<1x128x16xf32>
    %16 = vector.shape_cast %15 : vector<1x128x16xf32> to vector<128x16xf32>
    %cst_20 = arith.constant dense<0.000000e+00> : vector<32x16xf32>
    %17 = tpu.matmul %14, %16, %cst_20 {dimension_numbers = #tpu.dot_dimension_numbers<[1], [0], [0], [1], [0, 0, 1, 1], [], []>} : vector<32x128xf32>, vector<128x16xf32>, vector<32x16xf32> -> vector<32x16xf32>
    %18 = arith.addf %13, %17 : vector<32x16xf32>
    %c8 = arith.constant 8 : index
    %c0_21 = arith.constant 0 : index
    %19 = vector.load %arg9[%c8, %c0_21] : memref<48x128xf32, #tpu.memory_space<vmem>>, vector<32x128xf32>
    %c2 = arith.constant 2 : index
    %c0_22 = arith.constant 0 : index
    %c0_23 = arith.constant 0 : index
    %20 = vector.load %arg4[%c2, %c0_22, %c0_23] : memref<4x128x16xf32, #tpu.memory_space<vmem>>, vector<1x128x16xf32>
    %21 = vector.shape_cast %20 : vector<1x128x16xf32> to vector<128x16xf32>
    %cst_24 = arith.constant dense<0.000000e+00> : vector<32x16xf32>
    %22 = tpu.matmul %19, %21, %cst_24 {dimension_numbers = #tpu.dot_dimension_numbers<[1], [0], [0], [1], [0, 0, 1, 1], [], []>} : vector<32x128xf32>, vector<128x16xf32>, vector<32x16xf32> -> vector<32x16xf32>
    %23 = arith.addf %18, %22 : vector<32x16xf32>
    %c9 = arith.constant 9 : index
    %c0_25 = arith.constant 0 : index
    %24 = vector.load %arg9[%c9, %c0_25] : memref<48x128xf32, #tpu.memory_space<vmem>>, vector<32x128xf32>
    %c3 = arith.constant 3 : index
    %c0_26 = arith.constant 0 : index
    %c0_27 = arith.constant 0 : index
    %25 = vector.load %arg4[%c3, %c0_26, %c0_27] : memref<4x128x16xf32, #tpu.memory_space<vmem>>, vector<1x128x16xf32>
    %26 = vector.shape_cast %25 : vector<1x128x16xf32> to vector<128x16xf32>
    %cst_28 = arith.constant dense<0.000000e+00> : vector<32x16xf32>
    %27 = tpu.matmul %24, %26, %cst_28 {dimension_numbers = #tpu.dot_dimension_numbers<[1], [0], [0], [1], [0, 0, 1, 1], [], []>} : vector<32x128xf32>, vector<128x16xf32>, vector<32x16xf32> -> vector<32x16xf32>
    %28 = arith.addf %23, %27 : vector<32x16xf32>
    %c0_29 = arith.constant 0 : index
    %c0_30 = arith.constant 0 : index
    %29 = vector.load %arg5[%c0_29, %c0_30] : memref<1x16xf32, #tpu.memory_space<vmem>>, vector<1x16xf32>
    %30 = vector.broadcast %29 : vector<1x16xf32> to vector<32x16xf32>
    %31 = arith.addf %28, %30 : vector<32x16xf32>
    %32 = arith.mulf %31, %31 : vector<32x16xf32>
    %c0_31 = arith.constant 0 : index
    %c0_32 = arith.constant 0 : index
    %33 = vector.load %arg6[%c0_31, %c0_32] : memref<16x16xf32, #tpu.memory_space<vmem>>, vector<16x16xf32>
    %cst_33 = arith.constant dense<0.000000e+00> : vector<32x16xf32>
    %34 = tpu.matmul %32, %33, %cst_33 {dimension_numbers = #tpu.dot_dimension_numbers<[1], [0], [0], [1], [0, 0, 1, 1], [], []>} : vector<32x16xf32>, vector<16x16xf32>, vector<32x16xf32> -> vector<32x16xf32>
    %c0_34 = arith.constant 0 : index
    %c0_35 = arith.constant 0 : index
    %35 = vector.load %arg7[%c0_34, %c0_35] : memref<1x16xf32, #tpu.memory_space<vmem>>, vector<1x16xf32>
    %36 = vector.broadcast %35 : vector<1x16xf32> to vector<32x16xf32>
    %37 = arith.addf %34, %36 : vector<32x16xf32>
    %38 = math.rsqrt %37 : vector<32x16xf32>
    %39 = arith.mulf %31, %38 : vector<32x16xf32>
    %c0_36 = arith.constant 0 : index
    %c0_37 = arith.constant 0 : index
    %c0_38 = arith.constant 0 : index
    %40 = vector.load %arg8[%c0_36, %c0_37, %c0_38] : memref<1x32x16xf32, #tpu.memory_space<vmem>>, vector<1x32x16xf32>
    %41 = vector.shape_cast %40 : vector<1x32x16xf32> to vector<32x16xf32>
    %42 = vector.shape_cast %39 : vector<32x16xf32> to vector<1x32x16xf32>
    tpu.vector_store %arg8[%c0_36, %c0_37, %c0_38], %42 {strides = array<i32>} : memref<1x32x16xf32, #tpu.memory_space<vmem>>, vector<1x32x16xf32>,
    return
  }
  func.func @transform_0(%arg0: i32, %arg1: i32) -> (i32, i32, i32) {
    %c0_i32 = arith.constant 0 : i32
    %c0_i32_0 = arith.constant 0 : i32
    return %arg0, %arg1, %c0_i32 : i32, i32, i32
  }
  func.func @transform_1(%arg0: i32, %arg1: i32) -> (i32, i32, i32) {
    %c1_i32 = arith.constant 1 : i32
    %0 = arith.addi %arg1, %c1_i32 : i32
    %c4_i32 = arith.constant 4 : i32
    %1 = arith.muli %0, %c4_i32 : i32
    %c0_i32 = arith.constant 0 : i32
    %2 = arith.addi %1, %c0_i32 : i32
    %c0_i32_0 = arith.constant 0 : i32
    %c0_i32_1 = arith.constant 0 : i32
    return %arg0, %2, %c0_i32_0 : i32, i32, i32
  }
  func.func @transform_2(%arg0: i32, %arg1: i32) -> (i32, i32, i32) {
    %c0_i32 = arith.constant 0 : i32
    %c0_i32_0 = arith.constant 0 : i32
    %c0_i32_1 = arith.constant 0 : i32
    %c0_i32_2 = arith.constant 0 : i32
    return %c0_i32, %c0_i32_0, %c0_i32_1 : i32, i32, i32
  }
  func.func @transform_3(%arg0: i32, %arg1: i32) -> (i32, i32) {
    %c0_i32 = arith.constant 0 : i32
    %c0_i32_0 = arith.constant 0 : i32
    %c0_i32_1 = arith.constant 0 : i32
    return %c0_i32, %c0_i32_0 : i32, i32
  }
  func.func @transform_4(%arg0: i32, %arg1: i32) -> (i32, i32) {
    %c0_i32 = arith.constant 0 : i32
    %c0_i32_0 = arith.constant 0 : i32
    %c0_i32_1 = arith.constant 0 : i32
    return %c0_i32, %c0_i32_0 : i32, i32
  }
  func.func @transform_5(%arg0: i32, %arg1: i32) -> (i32, i32) {
    %c0_i32 = arith.constant 0 : i32
    %c0_i32_0 = arith.constant 0 : i32
    %c0_i32_1 = arith.constant 0 : i32
    return %c0_i32, %c0_i32_0 : i32, i32
  }
  func.func @transform_6(%arg0: i32, %arg1: i32) -> (i32, i32, i32) {
    %c0_i32 = arith.constant 0 : i32
    %c0_i32_0 = arith.constant 0 : i32
    return %arg0, %arg1, %c0_i32 : i32, i32, i32
  }
}

module attributes {stable_mosaic.version = 11 : i64} {
  func.func @kernel(%arg0: i32, %arg1: i32, %arg2: memref<1x32x16xf32, #tpu.memory_space<vmem>>, %arg3: memref<1x8x16xf32, #tpu.memory_space<vmem>>, %arg4: memref<1x8x16xf32, #tpu.memory_space<vmem>>, %arg5: memref<9x16x16xf32, #tpu.memory_space<vmem>>, %arg6: memref<1x16xf32, #tpu.memory_space<vmem>>, %arg7: memref<1x32x16xf32, #tpu.memory_space<vmem>>, %arg8: memref<1x32x16xf32, #tpu.memory_space<vmem>>, %arg9: memref<56x16xf32, #tpu.memory_space<vmem>>) attributes {dimension_semantics = [#tpu.dimension_semantics<parallel>, #tpu.dimension_semantics<parallel>], iteration_bounds = array<i64: 2, 1>, scalar_prefetch = 0 : i64, scratch_operands = 1 : i64, tpu.core_type = #tpu.core_type<tc>, window_params = [{transform_indices = @transform_0, window_bounds = array<i64: 1, 32, 16>}, {transform_indices = @transform_1, window_bounds = array<i64: 1, 8, 16>}, {transform_indices = @transform_2, window_bounds = array<i64: 1, 8, 16>}, {pipeline_mode = #tpu.pipeline_mode<synchronous>, transform_indices = @transform_3, window_bounds = array<i64: 9, 16, 16>}, {pipeline_mode = #tpu.pipeline_mode<synchronous>, transform_indices = @transform_4, window_bounds = array<i64: 1, 16>}, {transform_indices = @transform_5, window_bounds = array<i64: 1, 32, 16>}, {transform_indices = @transform_6, window_bounds = array<i64: 1, 32, 16>}]} {
    %c0 = arith.constant 0 : index
    %c0_0 = arith.constant 0 : index
    %c0_1 = arith.constant 0 : index
    %0 = vector.load %arg2[%c0, %c0_0, %c0_1] : memref<1x32x16xf32, #tpu.memory_space<vmem>>, vector<1x32x16xf32>
    %1 = vector.shape_cast %0 : vector<1x32x16xf32> to vector<32x16xf32>
    %c0_2 = arith.constant 0 : index
    %c0_3 = arith.constant 0 : index
    %2 = vector.load %arg9[%c0_2, %c0_3] : memref<56x16xf32, #tpu.memory_space<vmem>>, vector<32x16xf32>
    tpu.vector_store %arg9[%c0_2, %c0_3], %1 {strides = array<i32>} : memref<56x16xf32, #tpu.memory_space<vmem>>, vector<32x16xf32>,
    %c0_4 = arith.constant 0 : index
    %c0_5 = arith.constant 0 : index
    %c0_6 = arith.constant 0 : index
    %3 = vector.load %arg3[%c0_4, %c0_5, %c0_6] : memref<1x8x16xf32, #tpu.memory_space<vmem>>, vector<1x8x16xf32>
    %4 = vector.shape_cast %3 : vector<1x8x16xf32> to vector<8x16xf32>
    %c32 = arith.constant 32 : index
    %c0_7 = arith.constant 0 : index
    %5 = vector.load %arg9[%c32, %c0_7] : memref<56x16xf32, #tpu.memory_space<vmem>>, vector<8x16xf32>
    tpu.vector_store %arg9[%c32, %c0_7], %4 {strides = array<i32>} : memref<56x16xf32, #tpu.memory_space<vmem>>, vector<8x16xf32>,
    %c0_8 = arith.constant 0 : index
    %c0_9 = arith.constant 0 : index
    %c0_10 = arith.constant 0 : index
    %6 = vector.load %arg4[%c0_8, %c0_9, %c0_10] : memref<1x8x16xf32, #tpu.memory_space<vmem>>, vector<1x8x16xf32>
    %7 = vector.shape_cast %6 : vector<1x8x16xf32> to vector<8x16xf32>
    %c40 = arith.constant 40 : index
    %c0_11 = arith.constant 0 : index
    %8 = vector.load %arg9[%c40, %c0_11] : memref<56x16xf32, #tpu.memory_space<vmem>>, vector<8x16xf32>
    tpu.vector_store %arg9[%c40, %c0_11], %7 {strides = array<i32>} : memref<56x16xf32, #tpu.memory_space<vmem>>, vector<8x16xf32>,
    %cst = arith.constant 0.000000e+00 : f32
    %9 = vector.broadcast %cst : f32 to vector<8x16xf32>
    %c48 = arith.constant 48 : index
    %c0_12 = arith.constant 0 : index
    %10 = vector.load %arg9[%c48, %c0_12] : memref<56x16xf32, #tpu.memory_space<vmem>>, vector<8x16xf32>
    tpu.vector_store %arg9[%c48, %c0_12], %9 {strides = array<i32>} : memref<56x16xf32, #tpu.memory_space<vmem>>, vector<8x16xf32>,
    %cst_13 = arith.constant 0.000000e+00 : f32
    %11 = vector.broadcast %cst_13 : f32 to vector<32x16xf32>
    %c0_14 = arith.constant 0 : index
    %c0_15 = arith.constant 0 : index
    %12 = vector.load %arg9[%c0_14, %c0_15] : memref<56x16xf32, #tpu.memory_space<vmem>>, vector<32x16xf32>
    %c0_16 = arith.constant 0 : index
    %c0_17 = arith.constant 0 : index
    %c0_18 = arith.constant 0 : index
    %13 = vector.load %arg5[%c0_16, %c0_17, %c0_18] : memref<9x16x16xf32, #tpu.memory_space<vmem>>, vector<1x16x16xf32>
    %14 = vector.shape_cast %13 : vector<1x16x16xf32> to vector<16x16xf32>
    %cst_19 = arith.constant dense<0.000000e+00> : vector<32x16xf32>
    %15 = tpu.matmul %12, %14, %cst_19 {dimension_numbers = #tpu.dot_dimension_numbers<[1], [0], [0], [1], [0, 0, 1, 1], [], []>} : vector<32x16xf32>, vector<16x16xf32>, vector<32x16xf32> -> vector<32x16xf32>
    %16 = arith.addf %11, %15 : vector<32x16xf32>
    %c1 = arith.constant 1 : index
    %c0_20 = arith.constant 0 : index
    %17 = vector.load %arg9[%c1, %c0_20] : memref<56x16xf32, #tpu.memory_space<vmem>>, vector<32x16xf32>
    %c1_21 = arith.constant 1 : index
    %c0_22 = arith.constant 0 : index
    %c0_23 = arith.constant 0 : index
    %18 = vector.load %arg5[%c1_21, %c0_22, %c0_23] : memref<9x16x16xf32, #tpu.memory_space<vmem>>, vector<1x16x16xf32>
    %19 = vector.shape_cast %18 : vector<1x16x16xf32> to vector<16x16xf32>
    %cst_24 = arith.constant dense<0.000000e+00> : vector<32x16xf32>
    %20 = tpu.matmul %17, %19, %cst_24 {dimension_numbers = #tpu.dot_dimension_numbers<[1], [0], [0], [1], [0, 0, 1, 1], [], []>} : vector<32x16xf32>, vector<16x16xf32>, vector<32x16xf32> -> vector<32x16xf32>
    %21 = arith.addf %16, %20 : vector<32x16xf32>
    %c2 = arith.constant 2 : index
    %c0_25 = arith.constant 0 : index
    %22 = vector.load %arg9[%c2, %c0_25] : memref<56x16xf32, #tpu.memory_space<vmem>>, vector<32x16xf32>
    %c2_26 = arith.constant 2 : index
    %c0_27 = arith.constant 0 : index
    %c0_28 = arith.constant 0 : index
    %23 = vector.load %arg5[%c2_26, %c0_27, %c0_28] : memref<9x16x16xf32, #tpu.memory_space<vmem>>, vector<1x16x16xf32>
    %24 = vector.shape_cast %23 : vector<1x16x16xf32> to vector<16x16xf32>
    %cst_29 = arith.constant dense<0.000000e+00> : vector<32x16xf32>
    %25 = tpu.matmul %22, %24, %cst_29 {dimension_numbers = #tpu.dot_dimension_numbers<[1], [0], [0], [1], [0, 0, 1, 1], [], []>} : vector<32x16xf32>, vector<16x16xf32>, vector<32x16xf32> -> vector<32x16xf32>
    %26 = arith.addf %21, %25 : vector<32x16xf32>
    %c8 = arith.constant 8 : index
    %c0_30 = arith.constant 0 : index
    %27 = vector.load %arg9[%c8, %c0_30] : memref<56x16xf32, #tpu.memory_space<vmem>>, vector<32x16xf32>
    %c3 = arith.constant 3 : index
    %c0_31 = arith.constant 0 : index
    %c0_32 = arith.constant 0 : index
    %28 = vector.load %arg5[%c3, %c0_31, %c0_32] : memref<9x16x16xf32, #tpu.memory_space<vmem>>, vector<1x16x16xf32>
    %29 = vector.shape_cast %28 : vector<1x16x16xf32> to vector<16x16xf32>
    %cst_33 = arith.constant dense<0.000000e+00> : vector<32x16xf32>
    %30 = tpu.matmul %27, %29, %cst_33 {dimension_numbers = #tpu.dot_dimension_numbers<[1], [0], [0], [1], [0, 0, 1, 1], [], []>} : vector<32x16xf32>, vector<16x16xf32>, vector<32x16xf32> -> vector<32x16xf32>
    %31 = arith.addf %26, %30 : vector<32x16xf32>
    %c9 = arith.constant 9 : index
    %c0_34 = arith.constant 0 : index
    %32 = vector.load %arg9[%c9, %c0_34] : memref<56x16xf32, #tpu.memory_space<vmem>>, vector<32x16xf32>
    %c4 = arith.constant 4 : index
    %c0_35 = arith.constant 0 : index
    %c0_36 = arith.constant 0 : index
    %33 = vector.load %arg5[%c4, %c0_35, %c0_36] : memref<9x16x16xf32, #tpu.memory_space<vmem>>, vector<1x16x16xf32>
    %34 = vector.shape_cast %33 : vector<1x16x16xf32> to vector<16x16xf32>
    %cst_37 = arith.constant dense<0.000000e+00> : vector<32x16xf32>
    %35 = tpu.matmul %32, %34, %cst_37 {dimension_numbers = #tpu.dot_dimension_numbers<[1], [0], [0], [1], [0, 0, 1, 1], [], []>} : vector<32x16xf32>, vector<16x16xf32>, vector<32x16xf32> -> vector<32x16xf32>
    %36 = arith.addf %31, %35 : vector<32x16xf32>
    %c10 = arith.constant 10 : index
    %c0_38 = arith.constant 0 : index
    %37 = vector.load %arg9[%c10, %c0_38] : memref<56x16xf32, #tpu.memory_space<vmem>>, vector<32x16xf32>
    %c5 = arith.constant 5 : index
    %c0_39 = arith.constant 0 : index
    %c0_40 = arith.constant 0 : index
    %38 = vector.load %arg5[%c5, %c0_39, %c0_40] : memref<9x16x16xf32, #tpu.memory_space<vmem>>, vector<1x16x16xf32>
    %39 = vector.shape_cast %38 : vector<1x16x16xf32> to vector<16x16xf32>
    %cst_41 = arith.constant dense<0.000000e+00> : vector<32x16xf32>
    %40 = tpu.matmul %37, %39, %cst_41 {dimension_numbers = #tpu.dot_dimension_numbers<[1], [0], [0], [1], [0, 0, 1, 1], [], []>} : vector<32x16xf32>, vector<16x16xf32>, vector<32x16xf32> -> vector<32x16xf32>
    %41 = arith.addf %36, %40 : vector<32x16xf32>
    %c16 = arith.constant 16 : index
    %c0_42 = arith.constant 0 : index
    %42 = vector.load %arg9[%c16, %c0_42] : memref<56x16xf32, #tpu.memory_space<vmem>>, vector<32x16xf32>
    %c6 = arith.constant 6 : index
    %c0_43 = arith.constant 0 : index
    %c0_44 = arith.constant 0 : index
    %43 = vector.load %arg5[%c6, %c0_43, %c0_44] : memref<9x16x16xf32, #tpu.memory_space<vmem>>, vector<1x16x16xf32>
    %44 = vector.shape_cast %43 : vector<1x16x16xf32> to vector<16x16xf32>
    %cst_45 = arith.constant dense<0.000000e+00> : vector<32x16xf32>
    %45 = tpu.matmul %42, %44, %cst_45 {dimension_numbers = #tpu.dot_dimension_numbers<[1], [0], [0], [1], [0, 0, 1, 1], [], []>} : vector<32x16xf32>, vector<16x16xf32>, vector<32x16xf32> -> vector<32x16xf32>
    %46 = arith.addf %41, %45 : vector<32x16xf32>
    %c17 = arith.constant 17 : index
    %c0_46 = arith.constant 0 : index
    %47 = vector.load %arg9[%c17, %c0_46] : memref<56x16xf32, #tpu.memory_space<vmem>>, vector<32x16xf32>
    %c7 = arith.constant 7 : index
    %c0_47 = arith.constant 0 : index
    %c0_48 = arith.constant 0 : index
    %48 = vector.load %arg5[%c7, %c0_47, %c0_48] : memref<9x16x16xf32, #tpu.memory_space<vmem>>, vector<1x16x16xf32>
    %49 = vector.shape_cast %48 : vector<1x16x16xf32> to vector<16x16xf32>
    %cst_49 = arith.constant dense<0.000000e+00> : vector<32x16xf32>
    %50 = tpu.matmul %47, %49, %cst_49 {dimension_numbers = #tpu.dot_dimension_numbers<[1], [0], [0], [1], [0, 0, 1, 1], [], []>} : vector<32x16xf32>, vector<16x16xf32>, vector<32x16xf32> -> vector<32x16xf32>
    %51 = arith.addf %46, %50 : vector<32x16xf32>
    %c18 = arith.constant 18 : index
    %c0_50 = arith.constant 0 : index
    %52 = vector.load %arg9[%c18, %c0_50] : memref<56x16xf32, #tpu.memory_space<vmem>>, vector<32x16xf32>
    %c8_51 = arith.constant 8 : index
    %c0_52 = arith.constant 0 : index
    %c0_53 = arith.constant 0 : index
    %53 = vector.load %arg5[%c8_51, %c0_52, %c0_53] : memref<9x16x16xf32, #tpu.memory_space<vmem>>, vector<1x16x16xf32>
    %54 = vector.shape_cast %53 : vector<1x16x16xf32> to vector<16x16xf32>
    %cst_54 = arith.constant dense<0.000000e+00> : vector<32x16xf32>
    %55 = tpu.matmul %52, %54, %cst_54 {dimension_numbers = #tpu.dot_dimension_numbers<[1], [0], [0], [1], [0, 0, 1, 1], [], []>} : vector<32x16xf32>, vector<16x16xf32>, vector<32x16xf32> -> vector<32x16xf32>
    %56 = arith.addf %51, %55 : vector<32x16xf32>
    %c0_55 = arith.constant 0 : index
    %c0_56 = arith.constant 0 : index
    %57 = vector.load %arg6[%c0_55, %c0_56] : memref<1x16xf32, #tpu.memory_space<vmem>>, vector<1x16xf32>
    %58 = vector.broadcast %57 : vector<1x16xf32> to vector<32x16xf32>
    %59 = arith.addf %56, %58 : vector<32x16xf32>
    %c0_57 = arith.constant 0 : index
    %c0_58 = arith.constant 0 : index
    %c0_59 = arith.constant 0 : index
    %60 = vector.load %arg7[%c0_57, %c0_58, %c0_59] : memref<1x32x16xf32, #tpu.memory_space<vmem>>, vector<1x32x16xf32>
    %61 = vector.shape_cast %60 : vector<1x32x16xf32> to vector<32x16xf32>
    %62 = arith.addf %59, %61 : vector<32x16xf32>
    %cst_60 = arith.constant 0.000000e+00 : f32
    %63 = vector.broadcast %cst_60 : f32 to vector<32x16xf32>
    %64 = arith.cmpf oge, %62, %63 : vector<32x16xf32>
    %cst_61 = arith.constant 1.000000e-01 : f32
    %65 = vector.broadcast %cst_61 : f32 to vector<32x16xf32>
    %66 = arith.mulf %62, %65 : vector<32x16xf32>
    %67 = arith.select %64, %62, %66 : vector<32x16xi1>, vector<32x16xf32>
    %c0_62 = arith.constant 0 : index
    %c0_63 = arith.constant 0 : index
    %c0_64 = arith.constant 0 : index
    %68 = vector.load %arg8[%c0_62, %c0_63, %c0_64] : memref<1x32x16xf32, #tpu.memory_space<vmem>>, vector<1x32x16xf32>
    %69 = vector.shape_cast %68 : vector<1x32x16xf32> to vector<32x16xf32>
    %70 = vector.shape_cast %67 : vector<32x16xf32> to vector<1x32x16xf32>
    tpu.vector_store %arg8[%c0_62, %c0_63, %c0_64], %70 {strides = array<i32>} : memref<1x32x16xf32, #tpu.memory_space<vmem>>, vector<1x32x16xf32>,
    return
  }
  func.func @transform_0(%arg0: i32, %arg1: i32) -> (i32, i32, i32) {
    %c0_i32 = arith.constant 0 : i32
    %c0_i32_0 = arith.constant 0 : i32
    return %arg0, %arg1, %c0_i32 : i32, i32, i32
  }
  func.func @transform_1(%arg0: i32, %arg1: i32) -> (i32, i32, i32) {
    %c1_i32 = arith.constant 1 : i32
    %0 = arith.addi %arg1, %c1_i32 : i32
    %c4_i32 = arith.constant 4 : i32
    %1 = arith.muli %0, %c4_i32 : i32
    %c0_i32 = arith.constant 0 : i32
    %2 = arith.addi %1, %c0_i32 : i32
    %c0_i32_0 = arith.constant 0 : i32
    %c0_i32_1 = arith.constant 0 : i32
    return %arg0, %2, %c0_i32_0 : i32, i32, i32
  }
  func.func @transform_2(%arg0: i32, %arg1: i32) -> (i32, i32, i32) {
    %c1_i32 = arith.constant 1 : i32
    %0 = arith.addi %arg1, %c1_i32 : i32
    %c4_i32 = arith.constant 4 : i32
    %1 = arith.muli %0, %c4_i32 : i32
    %c1_i32_0 = arith.constant 1 : i32
    %2 = arith.addi %1, %c1_i32_0 : i32
    %c0_i32 = arith.constant 0 : i32
    %c0_i32_1 = arith.constant 0 : i32
    return %arg0, %2, %c0_i32 : i32, i32, i32
  }
  func.func @transform_3(%arg0: i32, %arg1: i32) -> (i32, i32, i32) {
    %c0_i32 = arith.constant 0 : i32
    %c0_i32_0 = arith.constant 0 : i32
    %c0_i32_1 = arith.constant 0 : i32
    %c0_i32_2 = arith.constant 0 : i32
    return %c0_i32, %c0_i32_0, %c0_i32_1 : i32, i32, i32
  }
  func.func @transform_4(%arg0: i32, %arg1: i32) -> (i32, i32) {
    %c0_i32 = arith.constant 0 : i32
    %c0_i32_0 = arith.constant 0 : i32
    %c0_i32_1 = arith.constant 0 : i32
    return %c0_i32, %c0_i32_0 : i32, i32
  }
  func.func @transform_5(%arg0: i32, %arg1: i32) -> (i32, i32, i32) {
    %c0_i32 = arith.constant 0 : i32
    %c0_i32_0 = arith.constant 0 : i32
    return %arg0, %arg1, %c0_i32 : i32, i32, i32
  }
  func.func @transform_6(%arg0: i32, %arg1: i32) -> (i32, i32, i32) {
    %c0_i32 = arith.constant 0 : i32
    %c0_i32_0 = arith.constant 0 : i32
    return %arg0, %arg1, %c0_i32 : i32, i32, i32
  }
}

module attributes {stable_mosaic.version = 11 : i64} {
  func.func @kernel(%arg0: i32, %arg1: i32, %arg2: memref<1x32x16xf32, #tpu.memory_space<vmem>>, %arg3: memref<1x8x16xf32, #tpu.memory_space<vmem>>, %arg4: memref<1x8x16xf32, #tpu.memory_space<vmem>>, %arg5: memref<9x16x16xf32, #tpu.memory_space<vmem>>, %arg6: memref<1x16xf32, #tpu.memory_space<vmem>>, %arg7: memref<1x32x16xf32, #tpu.memory_space<vmem>>, %arg8: memref<56x16xf32, #tpu.memory_space<vmem>>) attributes {dimension_semantics = [#tpu.dimension_semantics<parallel>, #tpu.dimension_semantics<parallel>], iteration_bounds = array<i64: 2, 1>, scalar_prefetch = 0 : i64, scratch_operands = 1 : i64, tpu.core_type = #tpu.core_type<tc>, window_params = [{transform_indices = @transform_0, window_bounds = array<i64: 1, 32, 16>}, {transform_indices = @transform_1, window_bounds = array<i64: 1, 8, 16>}, {transform_indices = @transform_2, window_bounds = array<i64: 1, 8, 16>}, {pipeline_mode = #tpu.pipeline_mode<synchronous>, transform_indices = @transform_3, window_bounds = array<i64: 9, 16, 16>}, {pipeline_mode = #tpu.pipeline_mode<synchronous>, transform_indices = @transform_4, window_bounds = array<i64: 1, 16>}, {transform_indices = @transform_5, window_bounds = array<i64: 1, 32, 16>}]} {
    %c0 = arith.constant 0 : index
    %c0_0 = arith.constant 0 : index
    %c0_1 = arith.constant 0 : index
    %0 = vector.load %arg2[%c0, %c0_0, %c0_1] : memref<1x32x16xf32, #tpu.memory_space<vmem>>, vector<1x32x16xf32>
    %1 = vector.shape_cast %0 : vector<1x32x16xf32> to vector<32x16xf32>
    %c0_2 = arith.constant 0 : index
    %c0_3 = arith.constant 0 : index
    %2 = vector.load %arg8[%c0_2, %c0_3] : memref<56x16xf32, #tpu.memory_space<vmem>>, vector<32x16xf32>
    tpu.vector_store %arg8[%c0_2, %c0_3], %1 {strides = array<i32>} : memref<56x16xf32, #tpu.memory_space<vmem>>, vector<32x16xf32>,
    %c0_4 = arith.constant 0 : index
    %c0_5 = arith.constant 0 : index
    %c0_6 = arith.constant 0 : index
    %3 = vector.load %arg3[%c0_4, %c0_5, %c0_6] : memref<1x8x16xf32, #tpu.memory_space<vmem>>, vector<1x8x16xf32>
    %4 = vector.shape_cast %3 : vector<1x8x16xf32> to vector<8x16xf32>
    %c32 = arith.constant 32 : index
    %c0_7 = arith.constant 0 : index
    %5 = vector.load %arg8[%c32, %c0_7] : memref<56x16xf32, #tpu.memory_space<vmem>>, vector<8x16xf32>
    tpu.vector_store %arg8[%c32, %c0_7], %4 {strides = array<i32>} : memref<56x16xf32, #tpu.memory_space<vmem>>, vector<8x16xf32>,
    %c0_8 = arith.constant 0 : index
    %c0_9 = arith.constant 0 : index
    %c0_10 = arith.constant 0 : index
    %6 = vector.load %arg4[%c0_8, %c0_9, %c0_10] : memref<1x8x16xf32, #tpu.memory_space<vmem>>, vector<1x8x16xf32>
    %7 = vector.shape_cast %6 : vector<1x8x16xf32> to vector<8x16xf32>
    %c40 = arith.constant 40 : index
    %c0_11 = arith.constant 0 : index
    %8 = vector.load %arg8[%c40, %c0_11] : memref<56x16xf32, #tpu.memory_space<vmem>>, vector<8x16xf32>
    tpu.vector_store %arg8[%c40, %c0_11], %7 {strides = array<i32>} : memref<56x16xf32, #tpu.memory_space<vmem>>, vector<8x16xf32>,
    %cst = arith.constant 0.000000e+00 : f32
    %9 = vector.broadcast %cst : f32 to vector<8x16xf32>
    %c48 = arith.constant 48 : index
    %c0_12 = arith.constant 0 : index
    %10 = vector.load %arg8[%c48, %c0_12] : memref<56x16xf32, #tpu.memory_space<vmem>>, vector<8x16xf32>
    tpu.vector_store %arg8[%c48, %c0_12], %9 {strides = array<i32>} : memref<56x16xf32, #tpu.memory_space<vmem>>, vector<8x16xf32>,
    %cst_13 = arith.constant 0.000000e+00 : f32
    %11 = vector.broadcast %cst_13 : f32 to vector<32x16xf32>
    %c0_14 = arith.constant 0 : index
    %c0_15 = arith.constant 0 : index
    %12 = vector.load %arg8[%c0_14, %c0_15] : memref<56x16xf32, #tpu.memory_space<vmem>>, vector<32x16xf32>
    %c0_16 = arith.constant 0 : index
    %c0_17 = arith.constant 0 : index
    %c0_18 = arith.constant 0 : index
    %13 = vector.load %arg5[%c0_16, %c0_17, %c0_18] : memref<9x16x16xf32, #tpu.memory_space<vmem>>, vector<1x16x16xf32>
    %14 = vector.shape_cast %13 : vector<1x16x16xf32> to vector<16x16xf32>
    %cst_19 = arith.constant dense<0.000000e+00> : vector<32x16xf32>
    %15 = tpu.matmul %12, %14, %cst_19 {dimension_numbers = #tpu.dot_dimension_numbers<[1], [0], [0], [1], [0, 0, 1, 1], [], []>} : vector<32x16xf32>, vector<16x16xf32>, vector<32x16xf32> -> vector<32x16xf32>
    %16 = arith.addf %11, %15 : vector<32x16xf32>
    %c1 = arith.constant 1 : index
    %c0_20 = arith.constant 0 : index
    %17 = vector.load %arg8[%c1, %c0_20] : memref<56x16xf32, #tpu.memory_space<vmem>>, vector<32x16xf32>
    %c1_21 = arith.constant 1 : index
    %c0_22 = arith.constant 0 : index
    %c0_23 = arith.constant 0 : index
    %18 = vector.load %arg5[%c1_21, %c0_22, %c0_23] : memref<9x16x16xf32, #tpu.memory_space<vmem>>, vector<1x16x16xf32>
    %19 = vector.shape_cast %18 : vector<1x16x16xf32> to vector<16x16xf32>
    %cst_24 = arith.constant dense<0.000000e+00> : vector<32x16xf32>
    %20 = tpu.matmul %17, %19, %cst_24 {dimension_numbers = #tpu.dot_dimension_numbers<[1], [0], [0], [1], [0, 0, 1, 1], [], []>} : vector<32x16xf32>, vector<16x16xf32>, vector<32x16xf32> -> vector<32x16xf32>
    %21 = arith.addf %16, %20 : vector<32x16xf32>
    %c2 = arith.constant 2 : index
    %c0_25 = arith.constant 0 : index
    %22 = vector.load %arg8[%c2, %c0_25] : memref<56x16xf32, #tpu.memory_space<vmem>>, vector<32x16xf32>
    %c2_26 = arith.constant 2 : index
    %c0_27 = arith.constant 0 : index
    %c0_28 = arith.constant 0 : index
    %23 = vector.load %arg5[%c2_26, %c0_27, %c0_28] : memref<9x16x16xf32, #tpu.memory_space<vmem>>, vector<1x16x16xf32>
    %24 = vector.shape_cast %23 : vector<1x16x16xf32> to vector<16x16xf32>
    %cst_29 = arith.constant dense<0.000000e+00> : vector<32x16xf32>
    %25 = tpu.matmul %22, %24, %cst_29 {dimension_numbers = #tpu.dot_dimension_numbers<[1], [0], [0], [1], [0, 0, 1, 1], [], []>} : vector<32x16xf32>, vector<16x16xf32>, vector<32x16xf32> -> vector<32x16xf32>
    %26 = arith.addf %21, %25 : vector<32x16xf32>
    %c8 = arith.constant 8 : index
    %c0_30 = arith.constant 0 : index
    %27 = vector.load %arg8[%c8, %c0_30] : memref<56x16xf32, #tpu.memory_space<vmem>>, vector<32x16xf32>
    %c3 = arith.constant 3 : index
    %c0_31 = arith.constant 0 : index
    %c0_32 = arith.constant 0 : index
    %28 = vector.load %arg5[%c3, %c0_31, %c0_32] : memref<9x16x16xf32, #tpu.memory_space<vmem>>, vector<1x16x16xf32>
    %29 = vector.shape_cast %28 : vector<1x16x16xf32> to vector<16x16xf32>
    %cst_33 = arith.constant dense<0.000000e+00> : vector<32x16xf32>
    %30 = tpu.matmul %27, %29, %cst_33 {dimension_numbers = #tpu.dot_dimension_numbers<[1], [0], [0], [1], [0, 0, 1, 1], [], []>} : vector<32x16xf32>, vector<16x16xf32>, vector<32x16xf32> -> vector<32x16xf32>
    %31 = arith.addf %26, %30 : vector<32x16xf32>
    %c9 = arith.constant 9 : index
    %c0_34 = arith.constant 0 : index
    %32 = vector.load %arg8[%c9, %c0_34] : memref<56x16xf32, #tpu.memory_space<vmem>>, vector<32x16xf32>
    %c4 = arith.constant 4 : index
    %c0_35 = arith.constant 0 : index
    %c0_36 = arith.constant 0 : index
    %33 = vector.load %arg5[%c4, %c0_35, %c0_36] : memref<9x16x16xf32, #tpu.memory_space<vmem>>, vector<1x16x16xf32>
    %34 = vector.shape_cast %33 : vector<1x16x16xf32> to vector<16x16xf32>
    %cst_37 = arith.constant dense<0.000000e+00> : vector<32x16xf32>
    %35 = tpu.matmul %32, %34, %cst_37 {dimension_numbers = #tpu.dot_dimension_numbers<[1], [0], [0], [1], [0, 0, 1, 1], [], []>} : vector<32x16xf32>, vector<16x16xf32>, vector<32x16xf32> -> vector<32x16xf32>
    %36 = arith.addf %31, %35 : vector<32x16xf32>
    %c10 = arith.constant 10 : index
    %c0_38 = arith.constant 0 : index
    %37 = vector.load %arg8[%c10, %c0_38] : memref<56x16xf32, #tpu.memory_space<vmem>>, vector<32x16xf32>
    %c5 = arith.constant 5 : index
    %c0_39 = arith.constant 0 : index
    %c0_40 = arith.constant 0 : index
    %38 = vector.load %arg5[%c5, %c0_39, %c0_40] : memref<9x16x16xf32, #tpu.memory_space<vmem>>, vector<1x16x16xf32>
    %39 = vector.shape_cast %38 : vector<1x16x16xf32> to vector<16x16xf32>
    %cst_41 = arith.constant dense<0.000000e+00> : vector<32x16xf32>
    %40 = tpu.matmul %37, %39, %cst_41 {dimension_numbers = #tpu.dot_dimension_numbers<[1], [0], [0], [1], [0, 0, 1, 1], [], []>} : vector<32x16xf32>, vector<16x16xf32>, vector<32x16xf32> -> vector<32x16xf32>
    %41 = arith.addf %36, %40 : vector<32x16xf32>
    %c16 = arith.constant 16 : index
    %c0_42 = arith.constant 0 : index
    %42 = vector.load %arg8[%c16, %c0_42] : memref<56x16xf32, #tpu.memory_space<vmem>>, vector<32x16xf32>
    %c6 = arith.constant 6 : index
    %c0_43 = arith.constant 0 : index
    %c0_44 = arith.constant 0 : index
    %43 = vector.load %arg5[%c6, %c0_43, %c0_44] : memref<9x16x16xf32, #tpu.memory_space<vmem>>, vector<1x16x16xf32>
    %44 = vector.shape_cast %43 : vector<1x16x16xf32> to vector<16x16xf32>
    %cst_45 = arith.constant dense<0.000000e+00> : vector<32x16xf32>
    %45 = tpu.matmul %42, %44, %cst_45 {dimension_numbers = #tpu.dot_dimension_numbers<[1], [0], [0], [1], [0, 0, 1, 1], [], []>} : vector<32x16xf32>, vector<16x16xf32>, vector<32x16xf32> -> vector<32x16xf32>
    %46 = arith.addf %41, %45 : vector<32x16xf32>
    %c17 = arith.constant 17 : index
    %c0_46 = arith.constant 0 : index
    %47 = vector.load %arg8[%c17, %c0_46] : memref<56x16xf32, #tpu.memory_space<vmem>>, vector<32x16xf32>
    %c7 = arith.constant 7 : index
    %c0_47 = arith.constant 0 : index
    %c0_48 = arith.constant 0 : index
    %48 = vector.load %arg5[%c7, %c0_47, %c0_48] : memref<9x16x16xf32, #tpu.memory_space<vmem>>, vector<1x16x16xf32>
    %49 = vector.shape_cast %48 : vector<1x16x16xf32> to vector<16x16xf32>
    %cst_49 = arith.constant dense<0.000000e+00> : vector<32x16xf32>
    %50 = tpu.matmul %47, %49, %cst_49 {dimension_numbers = #tpu.dot_dimension_numbers<[1], [0], [0], [1], [0, 0, 1, 1], [], []>} : vector<32x16xf32>, vector<16x16xf32>, vector<32x16xf32> -> vector<32x16xf32>
    %51 = arith.addf %46, %50 : vector<32x16xf32>
    %c18 = arith.constant 18 : index
    %c0_50 = arith.constant 0 : index
    %52 = vector.load %arg8[%c18, %c0_50] : memref<56x16xf32, #tpu.memory_space<vmem>>, vector<32x16xf32>
    %c8_51 = arith.constant 8 : index
    %c0_52 = arith.constant 0 : index
    %c0_53 = arith.constant 0 : index
    %53 = vector.load %arg5[%c8_51, %c0_52, %c0_53] : memref<9x16x16xf32, #tpu.memory_space<vmem>>, vector<1x16x16xf32>
    %54 = vector.shape_cast %53 : vector<1x16x16xf32> to vector<16x16xf32>
    %cst_54 = arith.constant dense<0.000000e+00> : vector<32x16xf32>
    %55 = tpu.matmul %52, %54, %cst_54 {dimension_numbers = #tpu.dot_dimension_numbers<[1], [0], [0], [1], [0, 0, 1, 1], [], []>} : vector<32x16xf32>, vector<16x16xf32>, vector<32x16xf32> -> vector<32x16xf32>
    %56 = arith.addf %51, %55 : vector<32x16xf32>
    %c0_55 = arith.constant 0 : index
    %c0_56 = arith.constant 0 : index
    %57 = vector.load %arg6[%c0_55, %c0_56] : memref<1x16xf32, #tpu.memory_space<vmem>>, vector<1x16xf32>
    %58 = vector.broadcast %57 : vector<1x16xf32> to vector<32x16xf32>
    %59 = arith.addf %56, %58 : vector<32x16xf32>
    %cst_57 = arith.constant 0.000000e+00 : f32
    %60 = vector.broadcast %cst_57 : f32 to vector<32x16xf32>
    %61 = arith.cmpf oge, %59, %60 : vector<32x16xf32>
    %cst_58 = arith.constant 0.00999999977 : f32
    %62 = vector.broadcast %cst_58 : f32 to vector<32x16xf32>
    %63 = arith.mulf %59, %62 : vector<32x16xf32>
    %64 = arith.select %61, %59, %63 : vector<32x16xi1>, vector<32x16xf32>
    %c0_59 = arith.constant 0 : index
    %c0_60 = arith.constant 0 : index
    %c0_61 = arith.constant 0 : index
    %65 = vector.load %arg7[%c0_59, %c0_60, %c0_61] : memref<1x32x16xf32, #tpu.memory_space<vmem>>, vector<1x32x16xf32>
    %66 = vector.shape_cast %65 : vector<1x32x16xf32> to vector<32x16xf32>
    %67 = vector.shape_cast %64 : vector<32x16xf32> to vector<1x32x16xf32>
    tpu.vector_store %arg7[%c0_59, %c0_60, %c0_61], %67 {strides = array<i32>} : memref<1x32x16xf32, #tpu.memory_space<vmem>>, vector<1x32x16xf32>,
    return
  }
  func.func @transform_0(%arg0: i32, %arg1: i32) -> (i32, i32, i32) {
    %c0_i32 = arith.constant 0 : i32
    %c0_i32_0 = arith.constant 0 : i32
    return %arg0, %arg1, %c0_i32 : i32, i32, i32
  }
  func.func @transform_1(%arg0: i32, %arg1: i32) -> (i32, i32, i32) {
    %c1_i32 = arith.constant 1 : i32
    %0 = arith.addi %arg1, %c1_i32 : i32
    %c4_i32 = arith.constant 4 : i32
    %1 = arith.muli %0, %c4_i32 : i32
    %c0_i32 = arith.constant 0 : i32
    %2 = arith.addi %1, %c0_i32 : i32
    %c0_i32_0 = arith.constant 0 : i32
    %c0_i32_1 = arith.constant 0 : i32
    return %arg0, %2, %c0_i32_0 : i32, i32, i32
  }
  func.func @transform_2(%arg0: i32, %arg1: i32) -> (i32, i32, i32) {
    %c1_i32 = arith.constant 1 : i32
    %0 = arith.addi %arg1, %c1_i32 : i32
    %c4_i32 = arith.constant 4 : i32
    %1 = arith.muli %0, %c4_i32 : i32
    %c1_i32_0 = arith.constant 1 : i32
    %2 = arith.addi %1, %c1_i32_0 : i32
    %c0_i32 = arith.constant 0 : i32
    %c0_i32_1 = arith.constant 0 : i32
    return %arg0, %2, %c0_i32 : i32, i32, i32
  }
  func.func @transform_3(%arg0: i32, %arg1: i32) -> (i32, i32, i32) {
    %c0_i32 = arith.constant 0 : i32
    %c0_i32_0 = arith.constant 0 : i32
    %c0_i32_1 = arith.constant 0 : i32
    %c0_i32_2 = arith.constant 0 : i32
    return %c0_i32, %c0_i32_0, %c0_i32_1 : i32, i32, i32
  }
  func.func @transform_4(%arg0: i32, %arg1: i32) -> (i32, i32) {
    %c0_i32 = arith.constant 0 : i32
    %c0_i32_0 = arith.constant 0 : i32
    %c0_i32_1 = arith.constant 0 : i32
    return %c0_i32, %c0_i32_0 : i32, i32
  }
  func.func @transform_5(%arg0: i32, %arg1: i32) -> (i32, i32, i32) {
    %c0_i32 = arith.constant 0 : i32
    %c0_i32_0 = arith.constant 0 : i32
    return %arg0, %arg1, %c0_i32 : i32, i32, i32
  }
}

module attributes {stable_mosaic.version = 11 : i64} {
  func.func @kernel(%arg0: i32, %arg1: i32, %arg2: memref<1x16x64xf32, #tpu.memory_space<vmem>>, %arg3: memref<1x8x64xf32, #tpu.memory_space<vmem>>, %arg4: memref<4x64x16xf32, #tpu.memory_space<vmem>>, %arg5: memref<1x16xf32, #tpu.memory_space<vmem>>, %arg6: memref<16x16xf32, #tpu.memory_space<vmem>>, %arg7: memref<1x16xf32, #tpu.memory_space<vmem>>, %arg8: memref<1x16x16xf32, #tpu.memory_space<vmem>>, %arg9: memref<32x64xf32, #tpu.memory_space<vmem>>) attributes {dimension_semantics = [#tpu.dimension_semantics<parallel>, #tpu.dimension_semantics<parallel>], iteration_bounds = array<i64: 2, 1>, scalar_prefetch = 0 : i64, scratch_operands = 1 : i64, tpu.core_type = #tpu.core_type<tc>, window_params = [{transform_indices = @transform_0, window_bounds = array<i64: 1, 16, 64>}, {transform_indices = @transform_1, window_bounds = array<i64: 1, 8, 64>}, {pipeline_mode = #tpu.pipeline_mode<synchronous>, transform_indices = @transform_2, window_bounds = array<i64: 4, 64, 16>}, {pipeline_mode = #tpu.pipeline_mode<synchronous>, transform_indices = @transform_3, window_bounds = array<i64: 1, 16>}, {pipeline_mode = #tpu.pipeline_mode<synchronous>, transform_indices = @transform_4, window_bounds = array<i64: 16, 16>}, {pipeline_mode = #tpu.pipeline_mode<synchronous>, transform_indices = @transform_5, window_bounds = array<i64: 1, 16>}, {transform_indices = @transform_6, window_bounds = array<i64: 1, 16, 16>}]} {
    %c0 = arith.constant 0 : index
    %c0_0 = arith.constant 0 : index
    %c0_1 = arith.constant 0 : index
    %0 = vector.load %arg2[%c0, %c0_0, %c0_1] : memref<1x16x64xf32, #tpu.memory_space<vmem>>, vector<1x16x64xf32>
    %1 = vector.shape_cast %0 : vector<1x16x64xf32> to vector<16x64xf32>
    %c0_2 = arith.constant 0 : index
    %c0_3 = arith.constant 0 : index
    %2 = vector.load %arg9[%c0_2, %c0_3] : memref<32x64xf32, #tpu.memory_space<vmem>>, vector<16x64xf32>
    tpu.vector_store %arg9[%c0_2, %c0_3], %1 {strides = array<i32>} : memref<32x64xf32, #tpu.memory_space<vmem>>, vector<16x64xf32>,
    %c0_4 = arith.constant 0 : index
    %c0_5 = arith.constant 0 : index
    %c0_6 = arith.constant 0 : index
    %3 = vector.load %arg3[%c0_4, %c0_5, %c0_6] : memref<1x8x64xf32, #tpu.memory_space<vmem>>, vector<1x8x64xf32>
    %4 = vector.shape_cast %3 : vector<1x8x64xf32> to vector<8x64xf32>
    %c16 = arith.constant 16 : index
    %c0_7 = arith.constant 0 : index
    %5 = vector.load %arg9[%c16, %c0_7] : memref<32x64xf32, #tpu.memory_space<vmem>>, vector<8x64xf32>
    tpu.vector_store %arg9[%c16, %c0_7], %4 {strides = array<i32>} : memref<32x64xf32, #tpu.memory_space<vmem>>, vector<8x64xf32>,
    %cst = arith.constant 0.000000e+00 : f32
    %6 = vector.broadcast %cst : f32 to vector<8x64xf32>
    %c24 = arith.constant 24 : index
    %c0_8 = arith.constant 0 : index
    %7 = vector.load %arg9[%c24, %c0_8] : memref<32x64xf32, #tpu.memory_space<vmem>>, vector<8x64xf32>
    tpu.vector_store %arg9[%c24, %c0_8], %6 {strides = array<i32>} : memref<32x64xf32, #tpu.memory_space<vmem>>, vector<8x64xf32>,
    %cst_9 = arith.constant 0.000000e+00 : f32
    %8 = vector.broadcast %cst_9 : f32 to vector<16x16xf32>
    %c0_10 = arith.constant 0 : index
    %c0_11 = arith.constant 0 : index
    %9 = vector.load %arg9[%c0_10, %c0_11] : memref<32x64xf32, #tpu.memory_space<vmem>>, vector<16x64xf32>
    %c0_12 = arith.constant 0 : index
    %c0_13 = arith.constant 0 : index
    %c0_14 = arith.constant 0 : index
    %10 = vector.load %arg4[%c0_12, %c0_13, %c0_14] : memref<4x64x16xf32, #tpu.memory_space<vmem>>, vector<1x64x16xf32>
    %11 = vector.shape_cast %10 : vector<1x64x16xf32> to vector<64x16xf32>
    %cst_15 = arith.constant dense<0.000000e+00> : vector<16x16xf32>
    %12 = tpu.matmul %9, %11, %cst_15 {dimension_numbers = #tpu.dot_dimension_numbers<[1], [0], [0], [1], [0, 0, 1, 1], [], []>} : vector<16x64xf32>, vector<64x16xf32>, vector<16x16xf32> -> vector<16x16xf32>
    %13 = arith.addf %8, %12 : vector<16x16xf32>
    %c1 = arith.constant 1 : index
    %c0_16 = arith.constant 0 : index
    %14 = vector.load %arg9[%c1, %c0_16] : memref<32x64xf32, #tpu.memory_space<vmem>>, vector<16x64xf32>
    %c1_17 = arith.constant 1 : index
    %c0_18 = arith.constant 0 : index
    %c0_19 = arith.constant 0 : index
    %15 = vector.load %arg4[%c1_17, %c0_18, %c0_19] : memref<4x64x16xf32, #tpu.memory_space<vmem>>, vector<1x64x16xf32>
    %16 = vector.shape_cast %15 : vector<1x64x16xf32> to vector<64x16xf32>
    %cst_20 = arith.constant dense<0.000000e+00> : vector<16x16xf32>
    %17 = tpu.matmul %14, %16, %cst_20 {dimension_numbers = #tpu.dot_dimension_numbers<[1], [0], [0], [1], [0, 0, 1, 1], [], []>} : vector<16x64xf32>, vector<64x16xf32>, vector<16x16xf32> -> vector<16x16xf32>
    %18 = arith.addf %13, %17 : vector<16x16xf32>
    %c8 = arith.constant 8 : index
    %c0_21 = arith.constant 0 : index
    %19 = vector.load %arg9[%c8, %c0_21] : memref<32x64xf32, #tpu.memory_space<vmem>>, vector<16x64xf32>
    %c2 = arith.constant 2 : index
    %c0_22 = arith.constant 0 : index
    %c0_23 = arith.constant 0 : index
    %20 = vector.load %arg4[%c2, %c0_22, %c0_23] : memref<4x64x16xf32, #tpu.memory_space<vmem>>, vector<1x64x16xf32>
    %21 = vector.shape_cast %20 : vector<1x64x16xf32> to vector<64x16xf32>
    %cst_24 = arith.constant dense<0.000000e+00> : vector<16x16xf32>
    %22 = tpu.matmul %19, %21, %cst_24 {dimension_numbers = #tpu.dot_dimension_numbers<[1], [0], [0], [1], [0, 0, 1, 1], [], []>} : vector<16x64xf32>, vector<64x16xf32>, vector<16x16xf32> -> vector<16x16xf32>
    %23 = arith.addf %18, %22 : vector<16x16xf32>
    %c9 = arith.constant 9 : index
    %c0_25 = arith.constant 0 : index
    %24 = vector.load %arg9[%c9, %c0_25] : memref<32x64xf32, #tpu.memory_space<vmem>>, vector<16x64xf32>
    %c3 = arith.constant 3 : index
    %c0_26 = arith.constant 0 : index
    %c0_27 = arith.constant 0 : index
    %25 = vector.load %arg4[%c3, %c0_26, %c0_27] : memref<4x64x16xf32, #tpu.memory_space<vmem>>, vector<1x64x16xf32>
    %26 = vector.shape_cast %25 : vector<1x64x16xf32> to vector<64x16xf32>
    %cst_28 = arith.constant dense<0.000000e+00> : vector<16x16xf32>
    %27 = tpu.matmul %24, %26, %cst_28 {dimension_numbers = #tpu.dot_dimension_numbers<[1], [0], [0], [1], [0, 0, 1, 1], [], []>} : vector<16x64xf32>, vector<64x16xf32>, vector<16x16xf32> -> vector<16x16xf32>
    %28 = arith.addf %23, %27 : vector<16x16xf32>
    %c0_29 = arith.constant 0 : index
    %c0_30 = arith.constant 0 : index
    %29 = vector.load %arg5[%c0_29, %c0_30] : memref<1x16xf32, #tpu.memory_space<vmem>>, vector<1x16xf32>
    %30 = vector.broadcast %29 : vector<1x16xf32> to vector<16x16xf32>
    %31 = arith.addf %28, %30 : vector<16x16xf32>
    %32 = arith.mulf %31, %31 : vector<16x16xf32>
    %c0_31 = arith.constant 0 : index
    %c0_32 = arith.constant 0 : index
    %33 = vector.load %arg6[%c0_31, %c0_32] : memref<16x16xf32, #tpu.memory_space<vmem>>, vector<16x16xf32>
    %cst_33 = arith.constant dense<0.000000e+00> : vector<16x16xf32>
    %34 = tpu.matmul %32, %33, %cst_33 {dimension_numbers = #tpu.dot_dimension_numbers<[1], [0], [0], [1], [0, 0, 1, 1], [], []>} : vector<16x16xf32>, vector<16x16xf32>, vector<16x16xf32> -> vector<16x16xf32>
    %c0_34 = arith.constant 0 : index
    %c0_35 = arith.constant 0 : index
    %35 = vector.load %arg7[%c0_34, %c0_35] : memref<1x16xf32, #tpu.memory_space<vmem>>, vector<1x16xf32>
    %36 = vector.broadcast %35 : vector<1x16xf32> to vector<16x16xf32>
    %37 = arith.addf %34, %36 : vector<16x16xf32>
    %38 = math.rsqrt %37 : vector<16x16xf32>
    %39 = arith.mulf %31, %38 : vector<16x16xf32>
    %c0_36 = arith.constant 0 : index
    %c0_37 = arith.constant 0 : index
    %c0_38 = arith.constant 0 : index
    %40 = vector.load %arg8[%c0_36, %c0_37, %c0_38] : memref<1x16x16xf32, #tpu.memory_space<vmem>>, vector<1x16x16xf32>
    %41 = vector.shape_cast %40 : vector<1x16x16xf32> to vector<16x16xf32>
    %42 = vector.shape_cast %39 : vector<16x16xf32> to vector<1x16x16xf32>
    tpu.vector_store %arg8[%c0_36, %c0_37, %c0_38], %42 {strides = array<i32>} : memref<1x16x16xf32, #tpu.memory_space<vmem>>, vector<1x16x16xf32>,
    return
  }
  func.func @transform_0(%arg0: i32, %arg1: i32) -> (i32, i32, i32) {
    %c0_i32 = arith.constant 0 : i32
    %c0_i32_0 = arith.constant 0 : i32
    return %arg0, %arg1, %c0_i32 : i32, i32, i32
  }
  func.func @transform_1(%arg0: i32, %arg1: i32) -> (i32, i32, i32) {
    %c1_i32 = arith.constant 1 : i32
    %0 = arith.addi %arg1, %c1_i32 : i32
    %c2_i32 = arith.constant 2 : i32
    %1 = arith.muli %0, %c2_i32 : i32
    %c0_i32 = arith.constant 0 : i32
    %2 = arith.addi %1, %c0_i32 : i32
    %c0_i32_0 = arith.constant 0 : i32
    %c0_i32_1 = arith.constant 0 : i32
    return %arg0, %2, %c0_i32_0 : i32, i32, i32
  }
  func.func @transform_2(%arg0: i32, %arg1: i32) -> (i32, i32, i32) {
    %c0_i32 = arith.constant 0 : i32
    %c0_i32_0 = arith.constant 0 : i32
    %c0_i32_1 = arith.constant 0 : i32
    %c0_i32_2 = arith.constant 0 : i32
    return %c0_i32, %c0_i32_0, %c0_i32_1 : i32, i32, i32
  }
  func.func @transform_3(%arg0: i32, %arg1: i32) -> (i32, i32) {
    %c0_i32 = arith.constant 0 : i32
    %c0_i32_0 = arith.constant 0 : i32
    %c0_i32_1 = arith.constant 0 : i32
    return %c0_i32, %c0_i32_0 : i32, i32
  }
  func.func @transform_4(%arg0: i32, %arg1: i32) -> (i32, i32) {
    %c0_i32 = arith.constant 0 : i32
    %c0_i32_0 = arith.constant 0 : i32
    %c0_i32_1 = arith.constant 0 : i32
    return %c0_i32, %c0_i32_0 : i32, i32
  }
  func.func @transform_5(%arg0: i32, %arg1: i32) -> (i32, i32) {
    %c0_i32 = arith.constant 0 : i32
    %c0_i32_0 = arith.constant 0 : i32
    %c0_i32_1 = arith.constant 0 : i32
    return %c0_i32, %c0_i32_0 : i32, i32
  }
  func.func @transform_6(%arg0: i32, %arg1: i32) -> (i32, i32, i32) {
    %c0_i32 = arith.constant 0 : i32
    %c0_i32_0 = arith.constant 0 : i32
    return %arg0, %arg1, %c0_i32 : i32, i32, i32
  }
}

module attributes {stable_mosaic.version = 11 : i64} {
  func.func @kernel(%arg0: i32, %arg1: i32, %arg2: memref<1x16x16xf32, #tpu.memory_space<vmem>>, %arg3: memref<1x8x16xf32, #tpu.memory_space<vmem>>, %arg4: memref<1x8x16xf32, #tpu.memory_space<vmem>>, %arg5: memref<9x16x16xf32, #tpu.memory_space<vmem>>, %arg6: memref<1x16xf32, #tpu.memory_space<vmem>>, %arg7: memref<1x16x16xf32, #tpu.memory_space<vmem>>, %arg8: memref<1x16x16xf32, #tpu.memory_space<vmem>>, %arg9: memref<40x16xf32, #tpu.memory_space<vmem>>) attributes {dimension_semantics = [#tpu.dimension_semantics<parallel>, #tpu.dimension_semantics<parallel>], iteration_bounds = array<i64: 2, 1>, scalar_prefetch = 0 : i64, scratch_operands = 1 : i64, tpu.core_type = #tpu.core_type<tc>, window_params = [{transform_indices = @transform_0, window_bounds = array<i64: 1, 16, 16>}, {transform_indices = @transform_1, window_bounds = array<i64: 1, 8, 16>}, {transform_indices = @transform_2, window_bounds = array<i64: 1, 8, 16>}, {pipeline_mode = #tpu.pipeline_mode<synchronous>, transform_indices = @transform_3, window_bounds = array<i64: 9, 16, 16>}, {pipeline_mode = #tpu.pipeline_mode<synchronous>, transform_indices = @transform_4, window_bounds = array<i64: 1, 16>}, {transform_indices = @transform_5, window_bounds = array<i64: 1, 16, 16>}, {transform_indices = @transform_6, window_bounds = array<i64: 1, 16, 16>}]} {
    %c0 = arith.constant 0 : index
    %c0_0 = arith.constant 0 : index
    %c0_1 = arith.constant 0 : index
    %0 = vector.load %arg2[%c0, %c0_0, %c0_1] : memref<1x16x16xf32, #tpu.memory_space<vmem>>, vector<1x16x16xf32>
    %1 = vector.shape_cast %0 : vector<1x16x16xf32> to vector<16x16xf32>
    %c0_2 = arith.constant 0 : index
    %c0_3 = arith.constant 0 : index
    %2 = vector.load %arg9[%c0_2, %c0_3] : memref<40x16xf32, #tpu.memory_space<vmem>>, vector<16x16xf32>
    tpu.vector_store %arg9[%c0_2, %c0_3], %1 {strides = array<i32>} : memref<40x16xf32, #tpu.memory_space<vmem>>, vector<16x16xf32>,
    %c0_4 = arith.constant 0 : index
    %c0_5 = arith.constant 0 : index
    %c0_6 = arith.constant 0 : index
    %3 = vector.load %arg3[%c0_4, %c0_5, %c0_6] : memref<1x8x16xf32, #tpu.memory_space<vmem>>, vector<1x8x16xf32>
    %4 = vector.shape_cast %3 : vector<1x8x16xf32> to vector<8x16xf32>
    %c16 = arith.constant 16 : index
    %c0_7 = arith.constant 0 : index
    %5 = vector.load %arg9[%c16, %c0_7] : memref<40x16xf32, #tpu.memory_space<vmem>>, vector<8x16xf32>
    tpu.vector_store %arg9[%c16, %c0_7], %4 {strides = array<i32>} : memref<40x16xf32, #tpu.memory_space<vmem>>, vector<8x16xf32>,
    %c0_8 = arith.constant 0 : index
    %c0_9 = arith.constant 0 : index
    %c0_10 = arith.constant 0 : index
    %6 = vector.load %arg4[%c0_8, %c0_9, %c0_10] : memref<1x8x16xf32, #tpu.memory_space<vmem>>, vector<1x8x16xf32>
    %7 = vector.shape_cast %6 : vector<1x8x16xf32> to vector<8x16xf32>
    %c24 = arith.constant 24 : index
    %c0_11 = arith.constant 0 : index
    %8 = vector.load %arg9[%c24, %c0_11] : memref<40x16xf32, #tpu.memory_space<vmem>>, vector<8x16xf32>
    tpu.vector_store %arg9[%c24, %c0_11], %7 {strides = array<i32>} : memref<40x16xf32, #tpu.memory_space<vmem>>, vector<8x16xf32>,
    %cst = arith.constant 0.000000e+00 : f32
    %9 = vector.broadcast %cst : f32 to vector<8x16xf32>
    %c32 = arith.constant 32 : index
    %c0_12 = arith.constant 0 : index
    %10 = vector.load %arg9[%c32, %c0_12] : memref<40x16xf32, #tpu.memory_space<vmem>>, vector<8x16xf32>
    tpu.vector_store %arg9[%c32, %c0_12], %9 {strides = array<i32>} : memref<40x16xf32, #tpu.memory_space<vmem>>, vector<8x16xf32>,
    %cst_13 = arith.constant 0.000000e+00 : f32
    %11 = vector.broadcast %cst_13 : f32 to vector<16x16xf32>
    %c0_14 = arith.constant 0 : index
    %c0_15 = arith.constant 0 : index
    %12 = vector.load %arg9[%c0_14, %c0_15] : memref<40x16xf32, #tpu.memory_space<vmem>>, vector<16x16xf32>
    %c0_16 = arith.constant 0 : index
    %c0_17 = arith.constant 0 : index
    %c0_18 = arith.constant 0 : index
    %13 = vector.load %arg5[%c0_16, %c0_17, %c0_18] : memref<9x16x16xf32, #tpu.memory_space<vmem>>, vector<1x16x16xf32>
    %14 = vector.shape_cast %13 : vector<1x16x16xf32> to vector<16x16xf32>
    %cst_19 = arith.constant dense<0.000000e+00> : vector<16x16xf32>
    %15 = tpu.matmul %12, %14, %cst_19 {dimension_numbers = #tpu.dot_dimension_numbers<[1], [0], [0], [1], [0, 0, 1, 1], [], []>} : vector<16x16xf32>, vector<16x16xf32>, vector<16x16xf32> -> vector<16x16xf32>
    %16 = arith.addf %11, %15 : vector<16x16xf32>
    %c1 = arith.constant 1 : index
    %c0_20 = arith.constant 0 : index
    %17 = vector.load %arg9[%c1, %c0_20] : memref<40x16xf32, #tpu.memory_space<vmem>>, vector<16x16xf32>
    %c1_21 = arith.constant 1 : index
    %c0_22 = arith.constant 0 : index
    %c0_23 = arith.constant 0 : index
    %18 = vector.load %arg5[%c1_21, %c0_22, %c0_23] : memref<9x16x16xf32, #tpu.memory_space<vmem>>, vector<1x16x16xf32>
    %19 = vector.shape_cast %18 : vector<1x16x16xf32> to vector<16x16xf32>
    %cst_24 = arith.constant dense<0.000000e+00> : vector<16x16xf32>
    %20 = tpu.matmul %17, %19, %cst_24 {dimension_numbers = #tpu.dot_dimension_numbers<[1], [0], [0], [1], [0, 0, 1, 1], [], []>} : vector<16x16xf32>, vector<16x16xf32>, vector<16x16xf32> -> vector<16x16xf32>
    %21 = arith.addf %16, %20 : vector<16x16xf32>
    %c2 = arith.constant 2 : index
    %c0_25 = arith.constant 0 : index
    %22 = vector.load %arg9[%c2, %c0_25] : memref<40x16xf32, #tpu.memory_space<vmem>>, vector<16x16xf32>
    %c2_26 = arith.constant 2 : index
    %c0_27 = arith.constant 0 : index
    %c0_28 = arith.constant 0 : index
    %23 = vector.load %arg5[%c2_26, %c0_27, %c0_28] : memref<9x16x16xf32, #tpu.memory_space<vmem>>, vector<1x16x16xf32>
    %24 = vector.shape_cast %23 : vector<1x16x16xf32> to vector<16x16xf32>
    %cst_29 = arith.constant dense<0.000000e+00> : vector<16x16xf32>
    %25 = tpu.matmul %22, %24, %cst_29 {dimension_numbers = #tpu.dot_dimension_numbers<[1], [0], [0], [1], [0, 0, 1, 1], [], []>} : vector<16x16xf32>, vector<16x16xf32>, vector<16x16xf32> -> vector<16x16xf32>
    %26 = arith.addf %21, %25 : vector<16x16xf32>
    %c8 = arith.constant 8 : index
    %c0_30 = arith.constant 0 : index
    %27 = vector.load %arg9[%c8, %c0_30] : memref<40x16xf32, #tpu.memory_space<vmem>>, vector<16x16xf32>
    %c3 = arith.constant 3 : index
    %c0_31 = arith.constant 0 : index
    %c0_32 = arith.constant 0 : index
    %28 = vector.load %arg5[%c3, %c0_31, %c0_32] : memref<9x16x16xf32, #tpu.memory_space<vmem>>, vector<1x16x16xf32>
    %29 = vector.shape_cast %28 : vector<1x16x16xf32> to vector<16x16xf32>
    %cst_33 = arith.constant dense<0.000000e+00> : vector<16x16xf32>
    %30 = tpu.matmul %27, %29, %cst_33 {dimension_numbers = #tpu.dot_dimension_numbers<[1], [0], [0], [1], [0, 0, 1, 1], [], []>} : vector<16x16xf32>, vector<16x16xf32>, vector<16x16xf32> -> vector<16x16xf32>
    %31 = arith.addf %26, %30 : vector<16x16xf32>
    %c9 = arith.constant 9 : index
    %c0_34 = arith.constant 0 : index
    %32 = vector.load %arg9[%c9, %c0_34] : memref<40x16xf32, #tpu.memory_space<vmem>>, vector<16x16xf32>
    %c4 = arith.constant 4 : index
    %c0_35 = arith.constant 0 : index
    %c0_36 = arith.constant 0 : index
    %33 = vector.load %arg5[%c4, %c0_35, %c0_36] : memref<9x16x16xf32, #tpu.memory_space<vmem>>, vector<1x16x16xf32>
    %34 = vector.shape_cast %33 : vector<1x16x16xf32> to vector<16x16xf32>
    %cst_37 = arith.constant dense<0.000000e+00> : vector<16x16xf32>
    %35 = tpu.matmul %32, %34, %cst_37 {dimension_numbers = #tpu.dot_dimension_numbers<[1], [0], [0], [1], [0, 0, 1, 1], [], []>} : vector<16x16xf32>, vector<16x16xf32>, vector<16x16xf32> -> vector<16x16xf32>
    %36 = arith.addf %31, %35 : vector<16x16xf32>
    %c10 = arith.constant 10 : index
    %c0_38 = arith.constant 0 : index
    %37 = vector.load %arg9[%c10, %c0_38] : memref<40x16xf32, #tpu.memory_space<vmem>>, vector<16x16xf32>
    %c5 = arith.constant 5 : index
    %c0_39 = arith.constant 0 : index
    %c0_40 = arith.constant 0 : index
    %38 = vector.load %arg5[%c5, %c0_39, %c0_40] : memref<9x16x16xf32, #tpu.memory_space<vmem>>, vector<1x16x16xf32>
    %39 = vector.shape_cast %38 : vector<1x16x16xf32> to vector<16x16xf32>
    %cst_41 = arith.constant dense<0.000000e+00> : vector<16x16xf32>
    %40 = tpu.matmul %37, %39, %cst_41 {dimension_numbers = #tpu.dot_dimension_numbers<[1], [0], [0], [1], [0, 0, 1, 1], [], []>} : vector<16x16xf32>, vector<16x16xf32>, vector<16x16xf32> -> vector<16x16xf32>
    %41 = arith.addf %36, %40 : vector<16x16xf32>
    %c16_42 = arith.constant 16 : index
    %c0_43 = arith.constant 0 : index
    %42 = vector.load %arg9[%c16_42, %c0_43] : memref<40x16xf32, #tpu.memory_space<vmem>>, vector<16x16xf32>
    %c6 = arith.constant 6 : index
    %c0_44 = arith.constant 0 : index
    %c0_45 = arith.constant 0 : index
    %43 = vector.load %arg5[%c6, %c0_44, %c0_45] : memref<9x16x16xf32, #tpu.memory_space<vmem>>, vector<1x16x16xf32>
    %44 = vector.shape_cast %43 : vector<1x16x16xf32> to vector<16x16xf32>
    %cst_46 = arith.constant dense<0.000000e+00> : vector<16x16xf32>
    %45 = tpu.matmul %42, %44, %cst_46 {dimension_numbers = #tpu.dot_dimension_numbers<[1], [0], [0], [1], [0, 0, 1, 1], [], []>} : vector<16x16xf32>, vector<16x16xf32>, vector<16x16xf32> -> vector<16x16xf32>
    %46 = arith.addf %41, %45 : vector<16x16xf32>
    %c17 = arith.constant 17 : index
    %c0_47 = arith.constant 0 : index
    %47 = vector.load %arg9[%c17, %c0_47] : memref<40x16xf32, #tpu.memory_space<vmem>>, vector<16x16xf32>
    %c7 = arith.constant 7 : index
    %c0_48 = arith.constant 0 : index
    %c0_49 = arith.constant 0 : index
    %48 = vector.load %arg5[%c7, %c0_48, %c0_49] : memref<9x16x16xf32, #tpu.memory_space<vmem>>, vector<1x16x16xf32>
    %49 = vector.shape_cast %48 : vector<1x16x16xf32> to vector<16x16xf32>
    %cst_50 = arith.constant dense<0.000000e+00> : vector<16x16xf32>
    %50 = tpu.matmul %47, %49, %cst_50 {dimension_numbers = #tpu.dot_dimension_numbers<[1], [0], [0], [1], [0, 0, 1, 1], [], []>} : vector<16x16xf32>, vector<16x16xf32>, vector<16x16xf32> -> vector<16x16xf32>
    %51 = arith.addf %46, %50 : vector<16x16xf32>
    %c18 = arith.constant 18 : index
    %c0_51 = arith.constant 0 : index
    %52 = vector.load %arg9[%c18, %c0_51] : memref<40x16xf32, #tpu.memory_space<vmem>>, vector<16x16xf32>
    %c8_52 = arith.constant 8 : index
    %c0_53 = arith.constant 0 : index
    %c0_54 = arith.constant 0 : index
    %53 = vector.load %arg5[%c8_52, %c0_53, %c0_54] : memref<9x16x16xf32, #tpu.memory_space<vmem>>, vector<1x16x16xf32>
    %54 = vector.shape_cast %53 : vector<1x16x16xf32> to vector<16x16xf32>
    %cst_55 = arith.constant dense<0.000000e+00> : vector<16x16xf32>
    %55 = tpu.matmul %52, %54, %cst_55 {dimension_numbers = #tpu.dot_dimension_numbers<[1], [0], [0], [1], [0, 0, 1, 1], [], []>} : vector<16x16xf32>, vector<16x16xf32>, vector<16x16xf32> -> vector<16x16xf32>
    %56 = arith.addf %51, %55 : vector<16x16xf32>
    %c0_56 = arith.constant 0 : index
    %c0_57 = arith.constant 0 : index
    %57 = vector.load %arg6[%c0_56, %c0_57] : memref<1x16xf32, #tpu.memory_space<vmem>>, vector<1x16xf32>
    %58 = vector.broadcast %57 : vector<1x16xf32> to vector<16x16xf32>
    %59 = arith.addf %56, %58 : vector<16x16xf32>
    %c0_58 = arith.constant 0 : index
    %c0_59 = arith.constant 0 : index
    %c0_60 = arith.constant 0 : index
    %60 = vector.load %arg7[%c0_58, %c0_59, %c0_60] : memref<1x16x16xf32, #tpu.memory_space<vmem>>, vector<1x16x16xf32>
    %61 = vector.shape_cast %60 : vector<1x16x16xf32> to vector<16x16xf32>
    %62 = arith.addf %59, %61 : vector<16x16xf32>
    %cst_61 = arith.constant 0.000000e+00 : f32
    %63 = vector.broadcast %cst_61 : f32 to vector<16x16xf32>
    %64 = arith.cmpf oge, %62, %63 : vector<16x16xf32>
    %cst_62 = arith.constant 1.000000e-01 : f32
    %65 = vector.broadcast %cst_62 : f32 to vector<16x16xf32>
    %66 = arith.mulf %62, %65 : vector<16x16xf32>
    %67 = arith.select %64, %62, %66 : vector<16x16xi1>, vector<16x16xf32>
    %c0_63 = arith.constant 0 : index
    %c0_64 = arith.constant 0 : index
    %c0_65 = arith.constant 0 : index
    %68 = vector.load %arg8[%c0_63, %c0_64, %c0_65] : memref<1x16x16xf32, #tpu.memory_space<vmem>>, vector<1x16x16xf32>
    %69 = vector.shape_cast %68 : vector<1x16x16xf32> to vector<16x16xf32>
    %70 = vector.shape_cast %67 : vector<16x16xf32> to vector<1x16x16xf32>
    tpu.vector_store %arg8[%c0_63, %c0_64, %c0_65], %70 {strides = array<i32>} : memref<1x16x16xf32, #tpu.memory_space<vmem>>, vector<1x16x16xf32>,
    return
  }
  func.func @transform_0(%arg0: i32, %arg1: i32) -> (i32, i32, i32) {
    %c0_i32 = arith.constant 0 : i32
    %c0_i32_0 = arith.constant 0 : i32
    return %arg0, %arg1, %c0_i32 : i32, i32, i32
  }
  func.func @transform_1(%arg0: i32, %arg1: i32) -> (i32, i32, i32) {
    %c1_i32 = arith.constant 1 : i32
    %0 = arith.addi %arg1, %c1_i32 : i32
    %c2_i32 = arith.constant 2 : i32
    %1 = arith.muli %0, %c2_i32 : i32
    %c0_i32 = arith.constant 0 : i32
    %2 = arith.addi %1, %c0_i32 : i32
    %c0_i32_0 = arith.constant 0 : i32
    %c0_i32_1 = arith.constant 0 : i32
    return %arg0, %2, %c0_i32_0 : i32, i32, i32
  }
  func.func @transform_2(%arg0: i32, %arg1: i32) -> (i32, i32, i32) {
    %c1_i32 = arith.constant 1 : i32
    %0 = arith.addi %arg1, %c1_i32 : i32
    %c2_i32 = arith.constant 2 : i32
    %1 = arith.muli %0, %c2_i32 : i32
    %c1_i32_0 = arith.constant 1 : i32
    %2 = arith.addi %1, %c1_i32_0 : i32
    %c0_i32 = arith.constant 0 : i32
    %c0_i32_1 = arith.constant 0 : i32
    return %arg0, %2, %c0_i32 : i32, i32, i32
  }
  func.func @transform_3(%arg0: i32, %arg1: i32) -> (i32, i32, i32) {
    %c0_i32 = arith.constant 0 : i32
    %c0_i32_0 = arith.constant 0 : i32
    %c0_i32_1 = arith.constant 0 : i32
    %c0_i32_2 = arith.constant 0 : i32
    return %c0_i32, %c0_i32_0, %c0_i32_1 : i32, i32, i32
  }
  func.func @transform_4(%arg0: i32, %arg1: i32) -> (i32, i32) {
    %c0_i32 = arith.constant 0 : i32
    %c0_i32_0 = arith.constant 0 : i32
    %c0_i32_1 = arith.constant 0 : i32
    return %c0_i32, %c0_i32_0 : i32, i32
  }
  func.func @transform_5(%arg0: i32, %arg1: i32) -> (i32, i32, i32) {
    %c0_i32 = arith.constant 0 : i32
    %c0_i32_0 = arith.constant 0 : i32
    return %arg0, %arg1, %c0_i32 : i32, i32, i32
  }
  func.func @transform_6(%arg0: i32, %arg1: i32) -> (i32, i32, i32) {
    %c0_i32 = arith.constant 0 : i32
    %c0_i32_0 = arith.constant 0 : i32
    return %arg0, %arg1, %c0_i32 : i32, i32, i32
  }
}

module attributes {stable_mosaic.version = 11 : i64} {
  func.func @kernel(%arg0: i32, %arg1: i32, %arg2: memref<1x16x16xf32, #tpu.memory_space<vmem>>, %arg3: memref<1x8x16xf32, #tpu.memory_space<vmem>>, %arg4: memref<1x8x16xf32, #tpu.memory_space<vmem>>, %arg5: memref<9x16x16xf32, #tpu.memory_space<vmem>>, %arg6: memref<1x16xf32, #tpu.memory_space<vmem>>, %arg7: memref<1x16x16xf32, #tpu.memory_space<vmem>>, %arg8: memref<40x16xf32, #tpu.memory_space<vmem>>) attributes {dimension_semantics = [#tpu.dimension_semantics<parallel>, #tpu.dimension_semantics<parallel>], iteration_bounds = array<i64: 2, 1>, scalar_prefetch = 0 : i64, scratch_operands = 1 : i64, tpu.core_type = #tpu.core_type<tc>, window_params = [{transform_indices = @transform_0, window_bounds = array<i64: 1, 16, 16>}, {transform_indices = @transform_1, window_bounds = array<i64: 1, 8, 16>}, {transform_indices = @transform_2, window_bounds = array<i64: 1, 8, 16>}, {pipeline_mode = #tpu.pipeline_mode<synchronous>, transform_indices = @transform_3, window_bounds = array<i64: 9, 16, 16>}, {pipeline_mode = #tpu.pipeline_mode<synchronous>, transform_indices = @transform_4, window_bounds = array<i64: 1, 16>}, {transform_indices = @transform_5, window_bounds = array<i64: 1, 16, 16>}]} {
    %c0 = arith.constant 0 : index
    %c0_0 = arith.constant 0 : index
    %c0_1 = arith.constant 0 : index
    %0 = vector.load %arg2[%c0, %c0_0, %c0_1] : memref<1x16x16xf32, #tpu.memory_space<vmem>>, vector<1x16x16xf32>
    %1 = vector.shape_cast %0 : vector<1x16x16xf32> to vector<16x16xf32>
    %c0_2 = arith.constant 0 : index
    %c0_3 = arith.constant 0 : index
    %2 = vector.load %arg8[%c0_2, %c0_3] : memref<40x16xf32, #tpu.memory_space<vmem>>, vector<16x16xf32>
    tpu.vector_store %arg8[%c0_2, %c0_3], %1 {strides = array<i32>} : memref<40x16xf32, #tpu.memory_space<vmem>>, vector<16x16xf32>,
    %c0_4 = arith.constant 0 : index
    %c0_5 = arith.constant 0 : index
    %c0_6 = arith.constant 0 : index
    %3 = vector.load %arg3[%c0_4, %c0_5, %c0_6] : memref<1x8x16xf32, #tpu.memory_space<vmem>>, vector<1x8x16xf32>
    %4 = vector.shape_cast %3 : vector<1x8x16xf32> to vector<8x16xf32>
    %c16 = arith.constant 16 : index
    %c0_7 = arith.constant 0 : index
    %5 = vector.load %arg8[%c16, %c0_7] : memref<40x16xf32, #tpu.memory_space<vmem>>, vector<8x16xf32>
    tpu.vector_store %arg8[%c16, %c0_7], %4 {strides = array<i32>} : memref<40x16xf32, #tpu.memory_space<vmem>>, vector<8x16xf32>,
    %c0_8 = arith.constant 0 : index
    %c0_9 = arith.constant 0 : index
    %c0_10 = arith.constant 0 : index
    %6 = vector.load %arg4[%c0_8, %c0_9, %c0_10] : memref<1x8x16xf32, #tpu.memory_space<vmem>>, vector<1x8x16xf32>
    %7 = vector.shape_cast %6 : vector<1x8x16xf32> to vector<8x16xf32>
    %c24 = arith.constant 24 : index
    %c0_11 = arith.constant 0 : index
    %8 = vector.load %arg8[%c24, %c0_11] : memref<40x16xf32, #tpu.memory_space<vmem>>, vector<8x16xf32>
    tpu.vector_store %arg8[%c24, %c0_11], %7 {strides = array<i32>} : memref<40x16xf32, #tpu.memory_space<vmem>>, vector<8x16xf32>,
    %cst = arith.constant 0.000000e+00 : f32
    %9 = vector.broadcast %cst : f32 to vector<8x16xf32>
    %c32 = arith.constant 32 : index
    %c0_12 = arith.constant 0 : index
    %10 = vector.load %arg8[%c32, %c0_12] : memref<40x16xf32, #tpu.memory_space<vmem>>, vector<8x16xf32>
    tpu.vector_store %arg8[%c32, %c0_12], %9 {strides = array<i32>} : memref<40x16xf32, #tpu.memory_space<vmem>>, vector<8x16xf32>,
    %cst_13 = arith.constant 0.000000e+00 : f32
    %11 = vector.broadcast %cst_13 : f32 to vector<16x16xf32>
    %c0_14 = arith.constant 0 : index
    %c0_15 = arith.constant 0 : index
    %12 = vector.load %arg8[%c0_14, %c0_15] : memref<40x16xf32, #tpu.memory_space<vmem>>, vector<16x16xf32>
    %c0_16 = arith.constant 0 : index
    %c0_17 = arith.constant 0 : index
    %c0_18 = arith.constant 0 : index
    %13 = vector.load %arg5[%c0_16, %c0_17, %c0_18] : memref<9x16x16xf32, #tpu.memory_space<vmem>>, vector<1x16x16xf32>
    %14 = vector.shape_cast %13 : vector<1x16x16xf32> to vector<16x16xf32>
    %cst_19 = arith.constant dense<0.000000e+00> : vector<16x16xf32>
    %15 = tpu.matmul %12, %14, %cst_19 {dimension_numbers = #tpu.dot_dimension_numbers<[1], [0], [0], [1], [0, 0, 1, 1], [], []>} : vector<16x16xf32>, vector<16x16xf32>, vector<16x16xf32> -> vector<16x16xf32>
    %16 = arith.addf %11, %15 : vector<16x16xf32>
    %c1 = arith.constant 1 : index
    %c0_20 = arith.constant 0 : index
    %17 = vector.load %arg8[%c1, %c0_20] : memref<40x16xf32, #tpu.memory_space<vmem>>, vector<16x16xf32>
    %c1_21 = arith.constant 1 : index
    %c0_22 = arith.constant 0 : index
    %c0_23 = arith.constant 0 : index
    %18 = vector.load %arg5[%c1_21, %c0_22, %c0_23] : memref<9x16x16xf32, #tpu.memory_space<vmem>>, vector<1x16x16xf32>
    %19 = vector.shape_cast %18 : vector<1x16x16xf32> to vector<16x16xf32>
    %cst_24 = arith.constant dense<0.000000e+00> : vector<16x16xf32>
    %20 = tpu.matmul %17, %19, %cst_24 {dimension_numbers = #tpu.dot_dimension_numbers<[1], [0], [0], [1], [0, 0, 1, 1], [], []>} : vector<16x16xf32>, vector<16x16xf32>, vector<16x16xf32> -> vector<16x16xf32>
    %21 = arith.addf %16, %20 : vector<16x16xf32>
    %c2 = arith.constant 2 : index
    %c0_25 = arith.constant 0 : index
    %22 = vector.load %arg8[%c2, %c0_25] : memref<40x16xf32, #tpu.memory_space<vmem>>, vector<16x16xf32>
    %c2_26 = arith.constant 2 : index
    %c0_27 = arith.constant 0 : index
    %c0_28 = arith.constant 0 : index
    %23 = vector.load %arg5[%c2_26, %c0_27, %c0_28] : memref<9x16x16xf32, #tpu.memory_space<vmem>>, vector<1x16x16xf32>
    %24 = vector.shape_cast %23 : vector<1x16x16xf32> to vector<16x16xf32>
    %cst_29 = arith.constant dense<0.000000e+00> : vector<16x16xf32>
    %25 = tpu.matmul %22, %24, %cst_29 {dimension_numbers = #tpu.dot_dimension_numbers<[1], [0], [0], [1], [0, 0, 1, 1], [], []>} : vector<16x16xf32>, vector<16x16xf32>, vector<16x16xf32> -> vector<16x16xf32>
    %26 = arith.addf %21, %25 : vector<16x16xf32>
    %c8 = arith.constant 8 : index
    %c0_30 = arith.constant 0 : index
    %27 = vector.load %arg8[%c8, %c0_30] : memref<40x16xf32, #tpu.memory_space<vmem>>, vector<16x16xf32>
    %c3 = arith.constant 3 : index
    %c0_31 = arith.constant 0 : index
    %c0_32 = arith.constant 0 : index
    %28 = vector.load %arg5[%c3, %c0_31, %c0_32] : memref<9x16x16xf32, #tpu.memory_space<vmem>>, vector<1x16x16xf32>
    %29 = vector.shape_cast %28 : vector<1x16x16xf32> to vector<16x16xf32>
    %cst_33 = arith.constant dense<0.000000e+00> : vector<16x16xf32>
    %30 = tpu.matmul %27, %29, %cst_33 {dimension_numbers = #tpu.dot_dimension_numbers<[1], [0], [0], [1], [0, 0, 1, 1], [], []>} : vector<16x16xf32>, vector<16x16xf32>, vector<16x16xf32> -> vector<16x16xf32>
    %31 = arith.addf %26, %30 : vector<16x16xf32>
    %c9 = arith.constant 9 : index
    %c0_34 = arith.constant 0 : index
    %32 = vector.load %arg8[%c9, %c0_34] : memref<40x16xf32, #tpu.memory_space<vmem>>, vector<16x16xf32>
    %c4 = arith.constant 4 : index
    %c0_35 = arith.constant 0 : index
    %c0_36 = arith.constant 0 : index
    %33 = vector.load %arg5[%c4, %c0_35, %c0_36] : memref<9x16x16xf32, #tpu.memory_space<vmem>>, vector<1x16x16xf32>
    %34 = vector.shape_cast %33 : vector<1x16x16xf32> to vector<16x16xf32>
    %cst_37 = arith.constant dense<0.000000e+00> : vector<16x16xf32>
    %35 = tpu.matmul %32, %34, %cst_37 {dimension_numbers = #tpu.dot_dimension_numbers<[1], [0], [0], [1], [0, 0, 1, 1], [], []>} : vector<16x16xf32>, vector<16x16xf32>, vector<16x16xf32> -> vector<16x16xf32>
    %36 = arith.addf %31, %35 : vector<16x16xf32>
    %c10 = arith.constant 10 : index
    %c0_38 = arith.constant 0 : index
    %37 = vector.load %arg8[%c10, %c0_38] : memref<40x16xf32, #tpu.memory_space<vmem>>, vector<16x16xf32>
    %c5 = arith.constant 5 : index
    %c0_39 = arith.constant 0 : index
    %c0_40 = arith.constant 0 : index
    %38 = vector.load %arg5[%c5, %c0_39, %c0_40] : memref<9x16x16xf32, #tpu.memory_space<vmem>>, vector<1x16x16xf32>
    %39 = vector.shape_cast %38 : vector<1x16x16xf32> to vector<16x16xf32>
    %cst_41 = arith.constant dense<0.000000e+00> : vector<16x16xf32>
    %40 = tpu.matmul %37, %39, %cst_41 {dimension_numbers = #tpu.dot_dimension_numbers<[1], [0], [0], [1], [0, 0, 1, 1], [], []>} : vector<16x16xf32>, vector<16x16xf32>, vector<16x16xf32> -> vector<16x16xf32>
    %41 = arith.addf %36, %40 : vector<16x16xf32>
    %c16_42 = arith.constant 16 : index
    %c0_43 = arith.constant 0 : index
    %42 = vector.load %arg8[%c16_42, %c0_43] : memref<40x16xf32, #tpu.memory_space<vmem>>, vector<16x16xf32>
    %c6 = arith.constant 6 : index
    %c0_44 = arith.constant 0 : index
    %c0_45 = arith.constant 0 : index
    %43 = vector.load %arg5[%c6, %c0_44, %c0_45] : memref<9x16x16xf32, #tpu.memory_space<vmem>>, vector<1x16x16xf32>
    %44 = vector.shape_cast %43 : vector<1x16x16xf32> to vector<16x16xf32>
    %cst_46 = arith.constant dense<0.000000e+00> : vector<16x16xf32>
    %45 = tpu.matmul %42, %44, %cst_46 {dimension_numbers = #tpu.dot_dimension_numbers<[1], [0], [0], [1], [0, 0, 1, 1], [], []>} : vector<16x16xf32>, vector<16x16xf32>, vector<16x16xf32> -> vector<16x16xf32>
    %46 = arith.addf %41, %45 : vector<16x16xf32>
    %c17 = arith.constant 17 : index
    %c0_47 = arith.constant 0 : index
    %47 = vector.load %arg8[%c17, %c0_47] : memref<40x16xf32, #tpu.memory_space<vmem>>, vector<16x16xf32>
    %c7 = arith.constant 7 : index
    %c0_48 = arith.constant 0 : index
    %c0_49 = arith.constant 0 : index
    %48 = vector.load %arg5[%c7, %c0_48, %c0_49] : memref<9x16x16xf32, #tpu.memory_space<vmem>>, vector<1x16x16xf32>
    %49 = vector.shape_cast %48 : vector<1x16x16xf32> to vector<16x16xf32>
    %cst_50 = arith.constant dense<0.000000e+00> : vector<16x16xf32>
    %50 = tpu.matmul %47, %49, %cst_50 {dimension_numbers = #tpu.dot_dimension_numbers<[1], [0], [0], [1], [0, 0, 1, 1], [], []>} : vector<16x16xf32>, vector<16x16xf32>, vector<16x16xf32> -> vector<16x16xf32>
    %51 = arith.addf %46, %50 : vector<16x16xf32>
    %c18 = arith.constant 18 : index
    %c0_51 = arith.constant 0 : index
    %52 = vector.load %arg8[%c18, %c0_51] : memref<40x16xf32, #tpu.memory_space<vmem>>, vector<16x16xf32>
    %c8_52 = arith.constant 8 : index
    %c0_53 = arith.constant 0 : index
    %c0_54 = arith.constant 0 : index
    %53 = vector.load %arg5[%c8_52, %c0_53, %c0_54] : memref<9x16x16xf32, #tpu.memory_space<vmem>>, vector<1x16x16xf32>
    %54 = vector.shape_cast %53 : vector<1x16x16xf32> to vector<16x16xf32>
    %cst_55 = arith.constant dense<0.000000e+00> : vector<16x16xf32>
    %55 = tpu.matmul %52, %54, %cst_55 {dimension_numbers = #tpu.dot_dimension_numbers<[1], [0], [0], [1], [0, 0, 1, 1], [], []>} : vector<16x16xf32>, vector<16x16xf32>, vector<16x16xf32> -> vector<16x16xf32>
    %56 = arith.addf %51, %55 : vector<16x16xf32>
    %c0_56 = arith.constant 0 : index
    %c0_57 = arith.constant 0 : index
    %57 = vector.load %arg6[%c0_56, %c0_57] : memref<1x16xf32, #tpu.memory_space<vmem>>, vector<1x16xf32>
    %58 = vector.broadcast %57 : vector<1x16xf32> to vector<16x16xf32>
    %59 = arith.addf %56, %58 : vector<16x16xf32>
    %cst_58 = arith.constant 0.000000e+00 : f32
    %60 = vector.broadcast %cst_58 : f32 to vector<16x16xf32>
    %61 = arith.cmpf oge, %59, %60 : vector<16x16xf32>
    %cst_59 = arith.constant 0.00999999977 : f32
    %62 = vector.broadcast %cst_59 : f32 to vector<16x16xf32>
    %63 = arith.mulf %59, %62 : vector<16x16xf32>
    %64 = arith.select %61, %59, %63 : vector<16x16xi1>, vector<16x16xf32>
    %c0_60 = arith.constant 0 : index
    %c0_61 = arith.constant 0 : index
    %c0_62 = arith.constant 0 : index
    %65 = vector.load %arg7[%c0_60, %c0_61, %c0_62] : memref<1x16x16xf32, #tpu.memory_space<vmem>>, vector<1x16x16xf32>
    %66 = vector.shape_cast %65 : vector<1x16x16xf32> to vector<16x16xf32>
    %67 = vector.shape_cast %64 : vector<16x16xf32> to vector<1x16x16xf32>
    tpu.vector_store %arg7[%c0_60, %c0_61, %c0_62], %67 {strides = array<i32>} : memref<1x16x16xf32, #tpu.memory_space<vmem>>, vector<1x16x16xf32>,
    return
  }
  func.func @transform_0(%arg0: i32, %arg1: i32) -> (i32, i32, i32) {
    %c0_i32 = arith.constant 0 : i32
    %c0_i32_0 = arith.constant 0 : i32
    return %arg0, %arg1, %c0_i32 : i32, i32, i32
  }
  func.func @transform_1(%arg0: i32, %arg1: i32) -> (i32, i32, i32) {
    %c1_i32 = arith.constant 1 : i32
    %0 = arith.addi %arg1, %c1_i32 : i32
    %c2_i32 = arith.constant 2 : i32
    %1 = arith.muli %0, %c2_i32 : i32
    %c0_i32 = arith.constant 0 : i32
    %2 = arith.addi %1, %c0_i32 : i32
    %c0_i32_0 = arith.constant 0 : i32
    %c0_i32_1 = arith.constant 0 : i32
    return %arg0, %2, %c0_i32_0 : i32, i32, i32
  }
  func.func @transform_2(%arg0: i32, %arg1: i32) -> (i32, i32, i32) {
    %c1_i32 = arith.constant 1 : i32
    %0 = arith.addi %arg1, %c1_i32 : i32
    %c2_i32 = arith.constant 2 : i32
    %1 = arith.muli %0, %c2_i32 : i32
    %c1_i32_0 = arith.constant 1 : i32
    %2 = arith.addi %1, %c1_i32_0 : i32
    %c0_i32 = arith.constant 0 : i32
    %c0_i32_1 = arith.constant 0 : i32
    return %arg0, %2, %c0_i32 : i32, i32, i32
  }
  func.func @transform_3(%arg0: i32, %arg1: i32) -> (i32, i32, i32) {
    %c0_i32 = arith.constant 0 : i32
    %c0_i32_0 = arith.constant 0 : i32
    %c0_i32_1 = arith.constant 0 : i32
    %c0_i32_2 = arith.constant 0 : i32
    return %c0_i32, %c0_i32_0, %c0_i32_1 : i32, i32, i32
  }
  func.func @transform_4(%arg0: i32, %arg1: i32) -> (i32, i32) {
    %c0_i32 = arith.constant 0 : i32
    %c0_i32_0 = arith.constant 0 : i32
    %c0_i32_1 = arith.constant 0 : i32
    return %c0_i32, %c0_i32_0 : i32, i32
  }
  func.func @transform_5(%arg0: i32, %arg1: i32) -> (i32, i32, i32) {
    %c0_i32 = arith.constant 0 : i32
    %c0_i32_0 = arith.constant 0 : i32
    return %arg0, %arg1, %c0_i32 : i32, i32, i32
  }
}

module attributes {stable_mosaic.version = 11 : i64} {
  func.func @kernel(%arg0: i32, %arg1: i32, %arg2: memref<1x8x64xf32, #tpu.memory_space<vmem>>, %arg3: memref<1x8x64xf32, #tpu.memory_space<vmem>>, %arg4: memref<4x64x16xf32, #tpu.memory_space<vmem>>, %arg5: memref<1x16xf32, #tpu.memory_space<vmem>>, %arg6: memref<1x8x16xf32, #tpu.memory_space<vmem>>, %arg7: memref<24x64xf32, #tpu.memory_space<vmem>>) attributes {dimension_semantics = [#tpu.dimension_semantics<parallel>, #tpu.dimension_semantics<parallel>], iteration_bounds = array<i64: 2, 1>, scalar_prefetch = 0 : i64, scratch_operands = 1 : i64, tpu.core_type = #tpu.core_type<tc>, window_params = [{transform_indices = @transform_0, window_bounds = array<i64: 1, 8, 64>}, {transform_indices = @transform_1, window_bounds = array<i64: 1, 8, 64>}, {pipeline_mode = #tpu.pipeline_mode<synchronous>, transform_indices = @transform_2, window_bounds = array<i64: 4, 64, 16>}, {pipeline_mode = #tpu.pipeline_mode<synchronous>, transform_indices = @transform_3, window_bounds = array<i64: 1, 16>}, {transform_indices = @transform_4, window_bounds = array<i64: 1, 8, 16>}]} {
    %c0 = arith.constant 0 : index
    %c0_0 = arith.constant 0 : index
    %c0_1 = arith.constant 0 : index
    %0 = vector.load %arg2[%c0, %c0_0, %c0_1] : memref<1x8x64xf32, #tpu.memory_space<vmem>>, vector<1x8x64xf32>
    %1 = vector.shape_cast %0 : vector<1x8x64xf32> to vector<8x64xf32>
    %c0_2 = arith.constant 0 : index
    %c0_3 = arith.constant 0 : index
    %2 = vector.load %arg7[%c0_2, %c0_3] : memref<24x64xf32, #tpu.memory_space<vmem>>, vector<8x64xf32>
    tpu.vector_store %arg7[%c0_2, %c0_3], %1 {strides = array<i32>} : memref<24x64xf32, #tpu.memory_space<vmem>>, vector<8x64xf32>,
    %c0_4 = arith.constant 0 : index
    %c0_5 = arith.constant 0 : index
    %c0_6 = arith.constant 0 : index
    %3 = vector.load %arg3[%c0_4, %c0_5, %c0_6] : memref<1x8x64xf32, #tpu.memory_space<vmem>>, vector<1x8x64xf32>
    %4 = vector.shape_cast %3 : vector<1x8x64xf32> to vector<8x64xf32>
    %c8 = arith.constant 8 : index
    %c0_7 = arith.constant 0 : index
    %5 = vector.load %arg7[%c8, %c0_7] : memref<24x64xf32, #tpu.memory_space<vmem>>, vector<8x64xf32>
    tpu.vector_store %arg7[%c8, %c0_7], %4 {strides = array<i32>} : memref<24x64xf32, #tpu.memory_space<vmem>>, vector<8x64xf32>,
    %cst = arith.constant 0.000000e+00 : f32
    %6 = vector.broadcast %cst : f32 to vector<8x64xf32>
    %c16 = arith.constant 16 : index
    %c0_8 = arith.constant 0 : index
    %7 = vector.load %arg7[%c16, %c0_8] : memref<24x64xf32, #tpu.memory_space<vmem>>, vector<8x64xf32>
    tpu.vector_store %arg7[%c16, %c0_8], %6 {strides = array<i32>} : memref<24x64xf32, #tpu.memory_space<vmem>>, vector<8x64xf32>,
    %cst_9 = arith.constant 0.000000e+00 : f32
    %8 = vector.broadcast %cst_9 : f32 to vector<8x16xf32>
    %c0_10 = arith.constant 0 : index
    %c0_11 = arith.constant 0 : index
    %9 = vector.load %arg7[%c0_10, %c0_11] : memref<24x64xf32, #tpu.memory_space<vmem>>, vector<8x64xf32>
    %c0_12 = arith.constant 0 : index
    %c0_13 = arith.constant 0 : index
    %c0_14 = arith.constant 0 : index
    %10 = vector.load %arg4[%c0_12, %c0_13, %c0_14] : memref<4x64x16xf32, #tpu.memory_space<vmem>>, vector<1x64x16xf32>
    %11 = vector.shape_cast %10 : vector<1x64x16xf32> to vector<64x16xf32>
    %cst_15 = arith.constant dense<0.000000e+00> : vector<8x16xf32>
    %12 = tpu.matmul %9, %11, %cst_15 {dimension_numbers = #tpu.dot_dimension_numbers<[1], [0], [0], [1], [0, 0, 1, 1], [], []>} : vector<8x64xf32>, vector<64x16xf32>, vector<8x16xf32> -> vector<8x16xf32>
    %13 = arith.addf %8, %12 : vector<8x16xf32>
    %c1 = arith.constant 1 : index
    %c0_16 = arith.constant 0 : index
    %14 = vector.load %arg7[%c1, %c0_16] : memref<24x64xf32, #tpu.memory_space<vmem>>, vector<8x64xf32>
    %c1_17 = arith.constant 1 : index
    %c0_18 = arith.constant 0 : index
    %c0_19 = arith.constant 0 : index
    %15 = vector.load %arg4[%c1_17, %c0_18, %c0_19] : memref<4x64x16xf32, #tpu.memory_space<vmem>>, vector<1x64x16xf32>
    %16 = vector.shape_cast %15 : vector<1x64x16xf32> to vector<64x16xf32>
    %cst_20 = arith.constant dense<0.000000e+00> : vector<8x16xf32>
    %17 = tpu.matmul %14, %16, %cst_20 {dimension_numbers = #tpu.dot_dimension_numbers<[1], [0], [0], [1], [0, 0, 1, 1], [], []>} : vector<8x64xf32>, vector<64x16xf32>, vector<8x16xf32> -> vector<8x16xf32>
    %18 = arith.addf %13, %17 : vector<8x16xf32>
    %c8_21 = arith.constant 8 : index
    %c0_22 = arith.constant 0 : index
    %19 = vector.load %arg7[%c8_21, %c0_22] : memref<24x64xf32, #tpu.memory_space<vmem>>, vector<8x64xf32>
    %c2 = arith.constant 2 : index
    %c0_23 = arith.constant 0 : index
    %c0_24 = arith.constant 0 : index
    %20 = vector.load %arg4[%c2, %c0_23, %c0_24] : memref<4x64x16xf32, #tpu.memory_space<vmem>>, vector<1x64x16xf32>
    %21 = vector.shape_cast %20 : vector<1x64x16xf32> to vector<64x16xf32>
    %cst_25 = arith.constant dense<0.000000e+00> : vector<8x16xf32>
    %22 = tpu.matmul %19, %21, %cst_25 {dimension_numbers = #tpu.dot_dimension_numbers<[1], [0], [0], [1], [0, 0, 1, 1], [], []>} : vector<8x64xf32>, vector<64x16xf32>, vector<8x16xf32> -> vector<8x16xf32>
    %23 = arith.addf %18, %22 : vector<8x16xf32>
    %c9 = arith.constant 9 : index
    %c0_26 = arith.constant 0 : index
    %24 = vector.load %arg7[%c9, %c0_26] : memref<24x64xf32, #tpu.memory_space<vmem>>, vector<8x64xf32>
    %c3 = arith.constant 3 : index
    %c0_27 = arith.constant 0 : index
    %c0_28 = arith.constant 0 : index
    %25 = vector.load %arg4[%c3, %c0_27, %c0_28] : memref<4x64x16xf32, #tpu.memory_space<vmem>>, vector<1x64x16xf32>
    %26 = vector.shape_cast %25 : vector<1x64x16xf32> to vector<64x16xf32>
    %cst_29 = arith.constant dense<0.000000e+00> : vector<8x16xf32>
    %27 = tpu.matmul %24, %26, %cst_29 {dimension_numbers = #tpu.dot_dimension_numbers<[1], [0], [0], [1], [0, 0, 1, 1], [], []>} : vector<8x64xf32>, vector<64x16xf32>, vector<8x16xf32> -> vector<8x16xf32>
    %28 = arith.addf %23, %27 : vector<8x16xf32>
    %c0_30 = arith.constant 0 : index
    %c0_31 = arith.constant 0 : index
    %29 = vector.load %arg5[%c0_30, %c0_31] : memref<1x16xf32, #tpu.memory_space<vmem>>, vector<1x16xf32>
    %30 = vector.broadcast %29 : vector<1x16xf32> to vector<8x16xf32>
    %31 = arith.addf %28, %30 : vector<8x16xf32>
    %c0_32 = arith.constant 0 : index
    %c0_33 = arith.constant 0 : index
    %c0_34 = arith.constant 0 : index
    %32 = vector.load %arg6[%c0_32, %c0_33, %c0_34] : memref<1x8x16xf32, #tpu.memory_space<vmem>>, vector<1x8x16xf32>
    %33 = vector.shape_cast %32 : vector<1x8x16xf32> to vector<8x16xf32>
    %34 = vector.shape_cast %31 : vector<8x16xf32> to vector<1x8x16xf32>
    tpu.vector_store %arg6[%c0_32, %c0_33, %c0_34], %34 {strides = array<i32>} : memref<1x8x16xf32, #tpu.memory_space<vmem>>, vector<1x8x16xf32>,
    return
  }
  func.func @transform_0(%arg0: i32, %arg1: i32) -> (i32, i32, i32) {
    %c0_i32 = arith.constant 0 : i32
    %c0_i32_0 = arith.constant 0 : i32
    return %arg0, %arg1, %c0_i32 : i32, i32, i32
  }
  func.func @transform_1(%arg0: i32, %arg1: i32) -> (i32, i32, i32) {
    %c1_i32 = arith.constant 1 : i32
    %0 = arith.addi %arg1, %c1_i32 : i32
    %c1_i32_0 = arith.constant 1 : i32
    %1 = arith.muli %0, %c1_i32_0 : i32
    %c0_i32 = arith.constant 0 : i32
    %2 = arith.addi %1, %c0_i32 : i32
    %c0_i32_1 = arith.constant 0 : i32
    %c0_i32_2 = arith.constant 0 : i32
    return %arg0, %2, %c0_i32_1 : i32, i32, i32
  }
  func.func @transform_2(%arg0: i32, %arg1: i32) -> (i32, i32, i32) {
    %c0_i32 = arith.constant 0 : i32
    %c0_i32_0 = arith.constant 0 : i32
    %c0_i32_1 = arith.constant 0 : i32
    %c0_i32_2 = arith.constant 0 : i32
    return %c0_i32, %c0_i32_0, %c0_i32_1 : i32, i32, i32
  }
  func.func @transform_3(%arg0: i32, %arg1: i32) -> (i32, i32) {
    %c0_i32 = arith.constant 0 : i32
    %c0_i32_0 = arith.constant 0 : i32
    %c0_i32_1 = arith.constant 0 : i32
    return %c0_i32, %c0_i32_0 : i32, i32
  }
  func.func @transform_4(%arg0: i32, %arg1: i32) -> (i32, i32, i32) {
    %c0_i32 = arith.constant 0 : i32
    %c0_i32_0 = arith.constant 0 : i32
    return %arg0, %arg1, %c0_i32 : i32, i32, i32
  }
}

</mosaic_0001>

<bundles_post_ra>
// kernel: mv_res_encoder_forward.10
= control target key start
LH: loop header
LB: loop body
LE: loop exit
PB: predicated region body
PF: predicated region fallthrough
CT: control target
= control target key end

     0   :  { %s1630_s21 = smov 0   ;;  %s1632_s22 = smov 0   ;;  %s2021_s0 = inlined_call_operand.vmem [shape: f32[2,144,8], index: 0, kind: input, shape index: {}, may-alias: {0,1}]   ;;  %s2022_s1 = inlined_call_operand.vmem [shape: f32[2,144,8], index: 1, kind: input, shape index: {}, may-alias: {0,1}]   ;;  %s2023_s2 = inlined_call_operand.vmem [shape: f32[4,8,16], index: 2, kind: input, shape index: {}]   ;;  %s2024_s3 = inlined_call_operand.vmem [shape: f32[1,16], index: 3, kind: input, shape index: {}]   ;;  %s2025_s4 = inlined_call_operand.vmem [shape: f32[16,16], index: 4, kind: input, shape index: {}]   ;;  %s2026_s5 = inlined_call_operand.vmem [shape: f32[1,16], index: 5, kind: input, shape index: {}]   ;;  %s2027_s6 = inlined_call_operand.vmem [shape: f32[2,128,16], index: 6, kind: output, shape index: {}]  }
   0x1   :  { %s1634_s23 = smov 0  }
   0x2 LB: > { %s28_s24 = sadd.s32 1, %s1588_s22  ;;  %p1412_p0 = scmp.ge.s32.totalorder %s1592_s23, 1  ;;  %s1592_s23 = sphi %s1634_s23, %s16_s23   ;;  %s1588_s22 = sphi %s1632_s22, %s2029_s22   ;;  %s1584_s21 = sphi %s1630_s21, %s2028_s21  }
   0x3   : > { %p30_p1 = scmp.ge.s32.totalorder %s28_s24, 2  ;;  %p266_p2 = scmp.lt.s32.totalorder %s1592_s23, 3 }
   0x5   : > { %s2031_s24 = smov (%p30_p1, %s28_s24), 0  ;;  %p267_p3 = pnand %p1412_p0, %p266_p2 }
   0x6   : > { %p324_p4 = scmp.lt.s32.totalorder (!%p267_p3), %s1584_s21, 1 }
   0x7   : > { %270 = sbr.rel (%p267_p3) target bundleno = 469 (0x1d5), region = 44 }
   0xc   : > { %v1417_v0 = vld [vmem:[%s2023_s2 + $0x8] sm:$0xff]  ;;  %v1450_v1 = vld [vmem:[%s2023_s2 + $0x10] sm:$0xff]  ;;  %v1467_v2 = vld [vmem:[%s2023_s2 + $0x18] sm:$0xff]  ;;  %s2033_s21 = smov (!%p324_p4, %s1584_s21), 1  ;;  %vm377_vm0 = vcmask 64512   ;;  %v1594_v52 = vmov 0.0  }
   0xd   : > { %1505 = vmatpush.msra.mxu1 %v1417_v0  ;;  %1506 = vmatpush.msra.mxu2 %v1417_v0  ;;  %v416_v3 = vld [vmem:[%s2023_s2] sm:$0xff]  ;;  %s1508_s9 = smul.u32 144, %s2033_s21  ;;  %v992_v50 = vld [vmem:[%s2025_s4 + $0x8] sm:$0xff]  ;;  %398 = vst.msk [vmem:[#allocation2 + $0x90] sm:$0xff] %vm377_vm0, %v1594_v52  ;;  %vm997_vm1 = vcmask 130048   ;;  %s1504_s29 = sshll.u32 %s2033_s21, 7 }
   0xe   : > { %1507 = vmatpush.msra.mxu3 %v1417_v0  ;;  %498 = vmatpush.msra.mxu0 %v1417_v0  ;;  %v991_v55 = vld [vmem:[%s2025_s4] sm:$0xff]  ;;  %s1949_s8 = scalar_lea.vmem %s2027_s6, %s1504_s29 }
   0xf   : > { %742 = vmatpush.msrb.mxu2 %v1450_v1  ;;  %611 = vmatpush.msrb.mxu1 %v416_v3  ;;  %s1666_s12 = scalar_lea.vmem %s2021_s0, %s1508_s9  ;;  %s1503_s13 = sadd.s32 128, %s1508_s9 }
  0x10   : > { %889 = vmatpush.msrb.mxu3 %v1467_v2  ;;  %v365_v4 = vld [vmem:[%s1666_s12 + $0x20] sm:$0xff]  ;;  %v366_v5 = vld [vmem:[%s1666_s12 + $0x28] sm:$0xff]  ;;  %v367_v10 = vld [vmem:[%s1666_s12 + $0x30] sm:$0xff]  ;;  %s1688_s16 = scalar_lea.vmem %s2022_s1, %s1503_s13  ;;  %1060 = vmatpush.msrb.mxu0 %v992_v50 }
  0x11   : > { %v369_v6 = vld [vmem:[%s1666_s12 + $0x40] sm:$0xff]  ;;  %382 = vst.msk [vmem:[#allocation2 + $0x20] sm:$0xff] %vm377_vm0, %v365_v4  ;;  %v370_v7 = vld [vmem:[%s1666_s12 + $0x48] sm:$0xff]  ;;  %v371_v11 = vld [vmem:[%s1666_s12 + $0x50] sm:$0xff] }
  0x12   : > { %383 = vst.msk [vmem:[#allocation2 + $0x28] sm:$0xff] %vm377_vm0, %v366_v5  ;;  %v373_v8 = vld [vmem:[%s1666_s12 + $0x60] sm:$0xff]  ;;  %v374_v9 = vld [vmem:[%s1666_s12 + $0x68] sm:$0xff]  ;;  %v375_v12 = vld [vmem:[%s1666_s12 + $0x70] sm:$0xff]  ;;  %1061 = vmatpush.msrb.mxu0 %v991_v55 }
  0x13   : > { %386 = vst.msk [vmem:[#allocation2 + $0x40] sm:$0xff] %vm377_vm0, %v369_v6  ;;  %v368_v13 = vld [vmem:[%s1666_s12 + $0x38] sm:$0xff]  ;;  %v394_v17 = vld [vmem:[%s1688_s16] sm:$0xff]  ;;  %v363_v20 = vld [vmem:[%s1666_s12 + $0x10] sm:$0xff] }
  0x14   : > { %387 = vst.msk [vmem:[#allocation2 + $0x48] sm:$0xff] %vm377_vm0, %v370_v7  ;;  %v372_v14 = vld [vmem:[%s1666_s12 + $0x58] sm:$0xff]  ;;  %v361_v19 = vld [vmem:[%s1666_s12] sm:$0xff]  ;;  %v362_v23 = vld [vmem:[%s1666_s12 + $0x8] sm:$0xff] }
  0x15   : > { %390 = vst.msk [vmem:[#allocation2 + $0x60] sm:$0xff] %vm377_vm0, %v373_v8  ;;  %v376_v16 = vld [vmem:[%s1666_s12 + $0x78] sm:$0xff]  ;;  %v395_v49 = vld [vmem:[%s1688_s16 + $0x8] sm:$0xff] }
  0x16   : > { %391 = vst.msk [vmem:[#allocation2 + $0x68] sm:$0xff] %vm377_vm0, %v374_v9  ;;  %v364_v22 = vld [vmem:[%s1666_s12 + $0x18] sm:$0xff] }
  0x17   : > { %384 = vst.msk [vmem:[#allocation2 + $0x30] sm:$0xff] %vm377_vm0, %v367_v10 }
  0x18   : > { %388 = vst.msk [vmem:[#allocation2 + $0x50] sm:$0xff] %vm377_vm0, %v371_v11  ;;  %v663_v41 = vld [vmem:[#allocation2 + $0x20] sm:$0xff] }
  0x19   : > { %v421_v15 = vld [vmem:[#allocation2 + $0x21] sm:$0xff]  ;;  %392 = vst.msk [vmem:[#allocation2 + $0x70] sm:$0xff] %vm377_vm0, %v375_v12 }
  0x1a   : > { %1422 = vmatmul.msk.f32.vlgmr.msra.gmra.mxu1 %vm377_vm0, %v421_v15  ;;  %385 = vst.msk [vmem:[#allocation2 + $0x38] sm:$0xff] %vm377_vm0, %v368_v13  ;;  %v664_v42 = vld [vmem:[#allocation2 + $0x28] sm:$0xff]  ;;  %v667_v45 = vld [vmem:[#allocation2 + $0x40] sm:$0xff] }
  0x1b   : > { %v1697_v18 = vld [vmem:[#allocation2 + $0x41] sm:$0xff]  ;;  %389 = vst.msk [vmem:[#allocation2 + $0x58] sm:$0xff] %vm377_vm0, %v372_v14 }
  0x1c   : > { %1426 = vmatmul.msk.f32.vlgmr.msra.gmra.mxu2 %vm377_vm0, %v1697_v18  ;;  %393 = vst.msk [vmem:[#allocation2 + $0x78] sm:$0xff] %vm377_vm0, %v376_v16  ;;  %v668_v46 = vld [vmem:[#allocation2 + $0x48] sm:$0xff]  ;;  %v671_v51 = vld [vmem:[#allocation2 + $0x60] sm:$0xff] }
  0x1d   : > { %v1705_v21 = vld [vmem:[#allocation2 + $0x61] sm:$0xff]  ;;  %396 = vst.msk [vmem:[#allocation2 + $0x80] sm:$0xff] %vm377_vm0, %v394_v17  ;;  %v1827_v16 = vld [vmem:[%s2024_s3] ss:$0 sm:$0xff] }
  0x1e   : > { %1430 = vmatmul.msk.f32.vlgmr.msra.gmra.mxu3 %vm377_vm0, %v1705_v21  ;;  %378 = vst.msk [vmem:[#allocation2] sm:$0xff] %vm377_vm0, %v361_v19  ;;  %v422_v24 = vld [vmem:[#allocation2 + $0x29] sm:$0xff] }
  0x1f   : > { %380 = vst.msk [vmem:[#allocation2 + $0x10] sm:$0xff] %vm377_vm0, %v363_v20  ;;  %v426_v25 = vld [vmem:[#allocation2 + $0x49] sm:$0xff] }
  0x20   : > { %381 = vst.msk [vmem:[#allocation2 + $0x18] sm:$0xff] %vm377_vm0, %v364_v22  ;;  %v1717_v26 = vld [vmem:[#allocation2 + $0x69] sm:$0xff] }
  0x21   : > { %379 = vst.msk [vmem:[#allocation2 + $0x8] sm:$0xff] %vm377_vm0, %v362_v23  ;;  %v423_v27 = vld [vmem:[#allocation2 + $0x31] sm:$0xff]  ;;  %v424_v32 = vld [vmem:[#allocation2 + $0x39] sm:$0xff]  ;;  %v672_v53 = vld [vmem:[#allocation2 + $0x68] sm:$0xff] }
  0x22   : > { %1423 = vmatmul.msk.f32.gmra.mxu1 %vm377_vm0, %v422_v24  ;;  %v427_v29 = vld [vmem:[#allocation2 + $0x51] sm:$0xff]  ;;  %v428_v33 = vld [vmem:[#allocation2 + $0x59] sm:$0xff]  ;;  %397 = vst.msk [vmem:[#allocation2 + $0x88] sm:$0xff] %vm377_vm0, %v395_v49 }
  0x23   : > { %v1724_v30 = vld [vmem:[#allocation2 + $0x71] sm:$0xff] }
  0x24   : > { %1427 = vmatmul.msk.f32.gmra.mxu2 %vm377_vm0, %v426_v25  ;;  %v1731_v34 = vld [vmem:[#allocation2 + $0x79] sm:$0xff]  ;;  %v665_v43 = vld [vmem:[#allocation2 + $0x30] sm:$0xff] }
  0x25   : > { %v400_v35 = vld [vmem:[#allocation2] sm:$0xff]  ;;  %v666_v44 = vld [vmem:[#allocation2 + $0x38] sm:$0xff]  ;;  %v669_v47 = vld [vmem:[#allocation2 + $0x50] sm:$0xff] }
  0x26   : > { %1431 = vmatmul.msk.f32.gmra.mxu3 %vm377_vm0, %v1717_v26  ;;  %v661_v37 = vld [vmem:[#allocation2 + $0x10] sm:$0xff]  ;;  %v670_v48 = vld [vmem:[#allocation2 + $0x58] sm:$0xff]  ;;  %v675_v0 = vld [vmem:[#allocation2 + $0x80] sm:$0xff] }
  0x27   : > { %v808_v36 = vld [vmem:[#allocation2 + $0x11] sm:$0xff]  ;;  %v809_v39 = vld [vmem:[#allocation2 + $0x19] sm:$0xff] }
  0x28   : > { %v417_v28 = vld [vmem:[#allocation2 + $0x1] sm:$0xff]  ;;  %v418_v31 = vld [vmem:[#allocation2 + $0x9] sm:$0xff]  ;;  %v662_v40 = vld [vmem:[#allocation2 + $0x18] sm:$0xff] }
  0x29   : > { %1418 = vmatmul.msk.f32.vlgmr.msra.gmra.mxu0 %vm377_vm0, %v417_v28  ;;  %v401_v38 = vld [vmem:[#allocation2 + $0x8] sm:$0xff]  ;;  %v673_v56 = vld [vmem:[#allocation2 + $0x70] sm:$0xff]  ;;  %v674_v60 = vld [vmem:[#allocation2 + $0x78] sm:$0xff] }
  0x2a   : > { %1424 = vmatmul.msk.f32.gmra.mxu1 %vm377_vm0, %v423_v27  ;;  %v822_v1 = vld [vmem:[#allocation2 + $0x81] sm:$0xff]  ;;  %v823_v7 = vld [vmem:[#allocation2 + $0x89] sm:$0xff] }
  0x2b   : > { %v676_v5 = vld [vmem:[#allocation2 + $0x88] sm:$0xff] }
  0x2c   : > { %1428 = vmatmul.msk.f32.gmra.mxu2 %vm377_vm0, %v427_v29 }
  0x2e   : > { %1432 = vmatmul.msk.f32.gmra.mxu3 %vm377_vm0, %v1724_v30 }
  0x31   : > { %1419 = vmatmul.msk.f32.gmra.mxu0 %vm377_vm0, %v418_v31 }
  0x32   : > { %1425 = vmatmul.msk.f32.gmra.mxu1 %vm377_vm0, %v424_v32 }
  0x34   : > { %1429 = vmatmul.msk.f32.gmra.mxu2 %vm377_vm0, %v428_v33 }
  0x36   : > { %1433 = vmatmul.msk.f32.gmra.mxu3 %vm377_vm0, %v1731_v34 }
  0x39   : > { %1420 = vmatmul.msk.f32.gmra.mxu0 %vm377_vm0, %v808_v36 }
  0x3a   : > { %1434 = vmatmul.msk.f32.vlgmr.msrb.gmra.mxu1 %vm377_vm0, %v400_v35 }
  0x3c   : > { %1451 = vmatmul.msk.f32.vlgmr.msrb.gmra.mxu2 %vm377_vm0, %v661_v37 }
  0x3e   : > { %1468 = vmatmul.msk.f32.vlgmr.msrb.gmra.mxu3 %vm377_vm0, %v808_v36 }
  0x41   : > { %1421 = vmatmul.msk.f32.gmra.mxu0 %vm377_vm0, %v809_v39 }
  0x42   : > { %1435 = vmatmul.msk.f32.gmra.mxu1 %vm377_vm0, %v401_v38 }
  0x44   : > { %1452 = vmatmul.msk.f32.gmra.mxu2 %vm377_vm0, %v662_v40 }
  0x46   : > { %1469 = vmatmul.msk.f32.gmra.mxu3 %vm377_vm0, %v809_v39 }
  0x4a   : > { %1436 = vmatmul.msk.f32.gmra.mxu1 %vm377_vm0, %v661_v37 }
  0x4c   : > { %1453 = vmatmul.msk.f32.gmra.mxu2 %vm377_vm0, %v663_v41 }
  0x4e   : > { %1470 = vmatmul.msk.f32.gmra.mxu3 %vm377_vm0, %v421_v15 }
  0x52   : > { %1437 = vmatmul.msk.f32.gmra.mxu1 %vm377_vm0, %v662_v40 }
  0x54   : > { %1454 = vmatmul.msk.f32.gmra.mxu2 %vm377_vm0, %v664_v42 }
  0x56   : > { %1471 = vmatmul.msk.f32.gmra.mxu3 %vm377_vm0, %v422_v24 }
  0x5a   : > { %1438 = vmatmul.msk.f32.gmra.mxu1 %vm377_vm0, %v663_v41 }
  0x5c   : > { %1455 = vmatmul.msk.f32.gmra.mxu2 %vm377_vm0, %v665_v43 }
  0x5e   : > { %1472 = vmatmul.msk.f32.gmra.mxu3 %vm377_vm0, %v423_v27 }
  0x62   : > { %1439 = vmatmul.msk.f32.gmra.mxu1 %vm377_vm0, %v664_v42 }
  0x64   : > { %1456 = vmatmul.msk.f32.gmra.mxu2 %vm377_vm0, %v666_v44 }
  0x66   : > { %1473 = vmatmul.msk.f32.gmra.mxu3 %vm377_vm0, %v424_v32 }
  0x6a   : > { %1440 = vmatmul.msk.f32.gmra.mxu1 %vm377_vm0, %v665_v43 }
  0x6c   : > { %1457 = vmatmul.msk.f32.gmra.mxu2 %vm377_vm0, %v667_v45 }
  0x6e   : > { %1474 = vmatmul.msk.f32.gmra.mxu3 %vm377_vm0, %v1697_v18 }
  0x72   : > { %1441 = vmatmul.msk.f32.gmra.mxu1 %vm377_vm0, %v666_v44 }
  0x74   : > { %1458 = vmatmul.msk.f32.gmra.mxu2 %vm377_vm0, %v668_v46 }
  0x76   : > { %1475 = vmatmul.msk.f32.gmra.mxu3 %vm377_vm0, %v426_v25 }
  0x7a   : > { %1442 = vmatmul.msk.f32.gmra.mxu1 %vm377_vm0, %v667_v45 }
  0x7c   : > { %1459 = vmatmul.msk.f32.gmra.mxu2 %vm377_vm0, %v669_v47 }
  0x7e   : > { %1476 = vmatmul.msk.f32.gmra.mxu3 %vm377_vm0, %v427_v29 }
  0x82   : > { %1443 = vmatmul.msk.f32.gmra.mxu1 %vm377_vm0, %v668_v46 }
  0x84   : > { %1460 = vmatmul.msk.f32.gmra.mxu2 %vm377_vm0, %v670_v48 }
  0x86   : > { %1477 = vmatmul.msk.f32.gmra.mxu3 %vm377_vm0, %v428_v33 }
  0x8a   : > { %1444 = vmatmul.msk.f32.gmra.mxu1 %vm377_vm0, %v669_v47 }
  0x8c   : > { %1461 = vmatmul.msk.f32.gmra.mxu2 %vm377_vm0, %v671_v51 }
  0x8e   : > { %1478 = vmatmul.msk.f32.gmra.mxu3 %vm377_vm0, %v1705_v21 }
  0x92   : > { %1445 = vmatmul.msk.f32.gmra.mxu1 %vm377_vm0, %v670_v48 }
  0x94   : > { %1462 = vmatmul.msk.f32.gmra.mxu2 %vm377_vm0, %v672_v53 }
  0x96   : > { %1479 = vmatmul.msk.f32.gmra.mxu3 %vm377_vm0, %v1717_v26 }
  0x97   : > { %v1783_v54 = vpop.f32.mrf.mxu1 }
  0x9a   : > { %1446 = vmatmul.msk.f32.gmra.mxu1 %vm377_vm0, %v671_v51 }
  0x9c   : > { %1463 = vmatmul.msk.f32.gmra.mxu2 %vm377_vm0, %v673_v56 }
  0x9e   : > { %1480 = vmatmul.msk.f32.gmra.mxu3 %vm377_vm0, %v1724_v30 }
  0x9f   : > { %v1792_v57 = vpop.f32.mrf.mxu2  ;;  %v1794_v58 = vpop.f32.mrf.mxu1 }
  0xa1   : > { %v1796_v59 = vpop.f32.mrf.mxu3 }
  0xa2   : > { %1447 = vmatmul.msk.f32.gmra.mxu1 %vm377_vm0, %v672_v53 }
  0xa4   : > { %1464 = vmatmul.msk.f32.gmra.mxu2 %vm377_vm0, %v674_v60 }
  0xa6   : > { %1481 = vmatmul.msk.f32.gmra.mxu3 %vm377_vm0, %v1731_v34  ;;  %v500_v6 = vpop.f32.mrf.mxu0 }
  0xa7   : > { %v1802_v61 = vpop.f32.mrf.mxu2  ;;  %v1804_v62 = vpop.f32.mrf.mxu1 }
  0xa9   : > { %v1806_v63 = vpop.f32.mrf.mxu3 }
  0xaa   : > { %1448 = vmatmul.msk.f32.gmra.mxu1 %vm377_vm0, %v673_v56 }
  0xac   : > { %1465 = vmatmul.msk.f32.gmra.mxu2 %vm377_vm0, %v675_v0 }
  0xae   : > { %1482 = vmatmul.msk.f32.gmra.mxu3 %vm377_vm0, %v822_v1  ;;  %v503_v12 = vpop.f32.mrf.mxu0 }
  0xaf   : > { %v1811_v2 = vpop.f32.mrf.mxu2  ;;  %v1813_v3 = vpop.f32.mrf.mxu1 }
  0xb1   : > { %v1815_v4 = vpop.f32.mrf.mxu3 }
  0xb2   : > { %1449 = vmatmul.msk.f32.gmra.mxu1 %vm377_vm0, %v674_v60 }
  0xb4   : > { %1466 = vmatmul.msk.f32.gmra.mxu2 %vm377_vm0, %v676_v5 }
  0xb6   : > { %1483 = vmatmul.msk.f32.gmra.mxu3 %vm377_vm0, %v823_v7  ;;  %v506_v22 = vpop.f32.mrf.mxu0 }
  0xb7   : > { %v1820_v8 = vpop.f32.mrf.mxu2  ;;  %v613_v9 = vpop.f32.mrf.mxu1 }
  0xb8   : > { %v614_v11 = vadd.f32 %v613_v9, %v500_v6 }
  0xb9   : > { %v1822_v10 = vpop.f32.mrf.mxu3 }
  0xbe   : > { %v509_v35 = vpop.f32.mrf.mxu0 }
  0xbf   : > { %v744_v13 = vpop.f32.mrf.mxu2  ;;  %v616_v14 = vpop.f32.mrf.mxu1 }
  0xc0   : > { %v792_v15 = vadd.f32 %v744_v13, %v614_v11  ;;  %v617_v20 = vadd.f32 %v616_v14, %v503_v12 }
  0xc1   : > { %v891_v17 = vpop.f32.mrf.mxu3 }
  0xc2   : > { %v939_v18 = vadd.f32 %v891_v17, %v792_v15 }
  0xc4   : > { %v1830_v19 = vadd.f32 %v1827_v16, %v939_v18 }
  0xc6   : > { %v975_v21 = vmul.f32 %v1830_v19, %v1830_v19 }
  0xc7   : > { %v747_v23 = vpop.f32.mrf.mxu2  ;;  %v619_v24 = vpop.f32.mrf.mxu1 }
  0xc8   : > { %v793_v25 = vadd.f32 %v747_v23, %v617_v20  ;;  %1484 = vmatmul.msk.f32.vlgmr.msrb.gmra.mxu0 %vm997_vm1, %v975_v21  ;;  %v620_v29 = vadd.f32 %v619_v24, %v506_v22 }
  0xc9   : > { %v894_v26 = vpop.f32.mrf.mxu3 }
  0xca   : > { %v940_v27 = vadd.f32 %v894_v26, %v793_v25 }
  0xcc   : > { %v1836_v28 = vadd.f32 %v1827_v16, %v940_v27 }
  0xce   : > { %v976_v30 = vmul.f32 %v1836_v28, %v1836_v28 }
  0xcf   : > { %v750_v31 = vpop.f32.mrf.mxu2  ;;  %v622_v32 = vpop.f32.mrf.mxu1 }
  0xd0   : > { %v794_v33 = vadd.f32 %v750_v31, %v620_v29  ;;  %1485 = vmatmul.msk.f32.gmra.mxu0 %vm997_vm1, %v976_v30  ;;  %v623_v38 = vadd.f32 %v622_v32, %v509_v35 }
  0xd1   : > { %v897_v34 = vpop.f32.mrf.mxu3 }
  0xd2   : > { %v941_v36 = vadd.f32 %v897_v34, %v794_v33 }
  0xd4   : > { %v1842_v37 = vadd.f32 %v1827_v16, %v941_v36 }
  0xd6   : > { %v977_v39 = vmul.f32 %v1842_v37, %v1842_v37 }
  0xd7   : > { %v753_v40 = vpop.f32.mrf.mxu2  ;;  %v625_v41 = vpop.f32.mrf.mxu1 }
  0xd8   : > { %v795_v42 = vadd.f32 %v753_v40, %v623_v38  ;;  %1486 = vmatmul.msk.f32.gmra.mxu0 %vm997_vm1, %v977_v39  ;;  %v626_v46 = vadd.f32 %v625_v41, %v1783_v54 }
  0xd9   : > { %v900_v43 = vpop.f32.mrf.mxu3 }
  0xda   : > { %v942_v44 = vadd.f32 %v900_v43, %v795_v42 }
  0xdc   : > { %v1848_v45 = vadd.f32 %v1827_v16, %v942_v44 }
  0xde   : > { %v978_v47 = vmul.f32 %v1848_v45, %v1848_v45 }
  0xdf   : > { %v756_v48 = vpop.f32.mrf.mxu2  ;;  %v628_v49 = vpop.f32.mrf.mxu1 }
  0xe0   : > { %v796_v50 = vadd.f32 %v756_v48, %v626_v46  ;;  %1487 = vmatmul.msk.f32.gmra.mxu0 %vm997_vm1, %v978_v47  ;;  %v629_v55 = vadd.f32 %v628_v49, %v1794_v58 }
  0xe1   : > { %v903_v51 = vpop.f32.mrf.mxu3 }
  0xe2   : > { %v943_v52 = vadd.f32 %v903_v51, %v796_v50 }
  0xe4   : > { %v1855_v53 = vadd.f32 %v1827_v16, %v943_v52 }
  0xe6   : > { %v979_v56 = vmul.f32 %v1855_v53, %v1855_v53 }
  0xe7   : > { %v759_v60 = vpop.f32.mrf.mxu2  ;;  %v631_v54 = vpop.f32.mrf.mxu1 }
  0xe8   : > { %v797_v0 = vadd.f32 %v759_v60, %v629_v55  ;;  %1488 = vmatmul.msk.f32.gmra.mxu0 %vm997_vm1, %v979_v56  ;;  %v632_v7 = vadd.f32 %v631_v54, %v1804_v62 }
  0xe9   : > { %v906_v1 = vpop.f32.mrf.mxu3 }
  0xea   : > { %v944_v5 = vadd.f32 %v906_v1, %v797_v0 }
  0xec   : > { %v1862_v6 = vadd.f32 %v1827_v16, %v944_v5 }
  0xee   : > { %v980_v9 = vmul.f32 %v1862_v6, %v1862_v6 }
  0xef   : > { %v762_v11 = vpop.f32.mrf.mxu2  ;;  %v634_v58 = vpop.f32.mrf.mxu1 }
  0xf0   : > { %v798_v12 = vadd.f32 %v762_v11, %v632_v7  ;;  %1489 = vmatmul.msk.f32.gmra.mxu0 %vm997_vm1, %v980_v9  ;;  %v635_v17 = vadd.f32 %v634_v58, %v1813_v3 }
  0xf1   : > { %v909_v13 = vpop.f32.mrf.mxu3 }
  0xf2   : > { %v945_v14 = vadd.f32 %v909_v13, %v798_v12 }
  0xf4   : > { %v1869_v15 = vadd.f32 %v1827_v16, %v945_v14 }
  0xf6   : > { %v981_v18 = vmul.f32 %v1869_v15, %v1869_v15 }
  0xf7   : > { %v765_v20 = vpop.f32.mrf.mxu2  ;;  %v637_v62 = vpop.f32.mrf.mxu1 }
  0xf8   : > { %v799_v21 = vadd.f32 %v765_v20, %v635_v17  ;;  %1490 = vmatmul.msk.f32.gmra.mxu0 %vm997_vm1, %v981_v18  ;;  %v638_v25 = vadd.f32 %v637_v62, %v1792_v57 }
  0xf9   : > { %v912_v22 = vpop.f32.mrf.mxu3 }
  0xfa   : > { %v946_v23 = vadd.f32 %v912_v22, %v799_v21 }
  0xfc   : > { %v1876_v24 = vadd.f32 %v1827_v16, %v946_v23 }
  0xfe   : > { %v982_v26 = vmul.f32 %v1876_v24, %v1876_v24 }
  0xff   : > { %v768_v27 = vpop.f32.mrf.mxu2  ;;  %v640_v3 = vpop.f32.mrf.mxu1 }
 0x100   : > { %v800_v29 = vadd.f32 %v768_v27, %v638_v25  ;;  %1491 = vmatmul.msk.f32.gmra.mxu0 %vm997_vm1, %v982_v26  ;;  %v641_v33 = vadd.f32 %v640_v3, %v1802_v61 }
 0x101   : > { %v915_v30 = vpop.f32.mrf.mxu3 }
 0x102   : > { %v947_v31 = vadd.f32 %v915_v30, %v800_v29 }
 0x104   : > { %v1883_v32 = vadd.f32 %v1827_v16, %v947_v31 }
 0x106   : > { %v983_v34 = vmul.f32 %v1883_v32, %v1883_v32 }
 0x107   : > { %v771_v35 = vpop.f32.mrf.mxu2  ;;  %v643_v57 = vpop.f32.mrf.mxu1 }
 0x108   : > { %v801_v36 = vadd.f32 %v771_v35, %v641_v33  ;;  %1492 = vmatmul.msk.f32.gmra.mxu0 %vm997_vm1, %v983_v34  ;;  %v644_v41 = vadd.f32 %v643_v57, %v1811_v2 }
 0x109   : > { %v918_v38 = vpop.f32.mrf.mxu3 }
 0x10a   : > { %v948_v39 = vadd.f32 %v918_v38, %v801_v36 }
 0x10c   : > { %v1890_v40 = vadd.f32 %v1827_v16, %v948_v39 }
 0x10e   : > { %v984_v42 = vmul.f32 %v1890_v40, %v1890_v40 }
 0x10f   : > { %v774_v43 = vpop.f32.mrf.mxu2  ;;  %v646_v61 = vpop.f32.mrf.mxu1 }
 0x110   : > { %v802_v44 = vadd.f32 %v774_v43, %v644_v41  ;;  %1493 = vmatmul.msk.f32.gmra.mxu0 %vm997_vm1, %v984_v42  ;;  %v647_v49 = vadd.f32 %v646_v61, %v1820_v8 }
 0x111   : > { %v921_v46 = vpop.f32.mrf.mxu3 }
 0x112   : > { %v949_v47 = vadd.f32 %v921_v46, %v802_v44 }
 0x114   : > { %v1897_v48 = vadd.f32 %v1827_v16, %v949_v47 }
 0x116   : > { %v985_v50 = vmul.f32 %v1897_v48, %v1897_v48 }
 0x117   : > { %v777_v51 = vpop.f32.mrf.mxu2  ;;  %v649_v2 = vpop.f32.mrf.mxu1 }
 0x118   : > { %v803_v52 = vadd.f32 %v777_v51, %v647_v49  ;;  %1494 = vmatmul.msk.f32.gmra.mxu0 %vm997_vm1, %v985_v50  ;;  %v650_v54 = vadd.f32 %v649_v2, %v1796_v59 }
 0x119   : > { %v924_v55 = vpop.f32.mrf.mxu3 }
 0x11a   : > { %v950_v56 = vadd.f32 %v924_v55, %v803_v52 }
 0x11c   : > { %v1904_v60 = vadd.f32 %v1827_v16, %v950_v56 }
 0x11e   : > { %v986_v0 = vmul.f32 %v1904_v60, %v1904_v60 }
 0x11f   : > { %v780_v1 = vpop.f32.mrf.mxu2  ;;  %v652_v8 = vpop.f32.mrf.mxu1 }
 0x120   : > { %v804_v5 = vadd.f32 %v780_v1, %v650_v54  ;;  %1495 = vmatmul.msk.f32.gmra.mxu0 %vm997_vm1, %v986_v0  ;;  %v653_v58 = vadd.f32 %v652_v8, %v1806_v63 }
 0x121   : > { %v927_v7 = vpop.f32.mrf.mxu3 }
 0x122   : > { %v951_v9 = vadd.f32 %v927_v7, %v804_v5 }
 0x124   : > { %v1911_v11 = vadd.f32 %v1827_v16, %v951_v9 }
 0x126   : > { %v987_v12 = vmul.f32 %v1911_v11, %v1911_v11 }
 0x127   : > { %v783_v13 = vpop.f32.mrf.mxu2  ;;  %v655_v14 = vpop.f32.mrf.mxu1 }
 0x128   : > { %v805_v59 = vadd.f32 %v783_v13, %v653_v58  ;;  %1496 = vmatmul.msk.f32.gmra.mxu0 %vm997_vm1, %v987_v12  ;;  %v656_v62 = vadd.f32 %v655_v14, %v1815_v4 }
 0x129   : > { %v930_v17 = vpop.f32.mrf.mxu3 }
 0x12a   : > { %v952_v18 = vadd.f32 %v930_v17, %v805_v59 }
 0x12c   : > { %v1918_v20 = vadd.f32 %v1827_v16, %v952_v18 }
 0x12e   : > { %v988_v21 = vmul.f32 %v1918_v20, %v1918_v20 }
 0x12f   : > { %v786_v22 = vpop.f32.mrf.mxu2  ;;  %v658_v26 = vpop.f32.mrf.mxu1 }
 0x130   : > { %v806_v63 = vadd.f32 %v786_v22, %v656_v62  ;;  %1497 = vmatmul.msk.f32.gmra.mxu0 %vm997_vm1, %v988_v21  ;;  %v659_v3 = vadd.f32 %v658_v26, %v1822_v10  ;;  %v1940_v10 = vld [vmem:[%s2026_s5] ss:$0 sm:$0xff] }
 0x131   : > { %v933_v23 = vpop.f32.mrf.mxu3 }
 0x132   : > { %v953_v25 = vadd.f32 %v933_v23, %v806_v63 }
 0x134   : > { %v1925_v27 = vadd.f32 %v1827_v16, %v953_v25 }
 0x136   : > { %v989_v29 = vmul.f32 %v1925_v27, %v1925_v27 }
 0x137   : > { %v789_v30 = vpop.f32.mrf.mxu2 }
 0x138   : > { %v807_v4 = vadd.f32 %v789_v30, %v659_v3  ;;  %1498 = vmatmul.msk.f32.gmra.mxu0 %vm997_vm1, %v989_v29 }
 0x139   : > { %v936_v31 = vpop.f32.mrf.mxu3 }
 0x13a   : > { %v954_v33 = vadd.f32 %v936_v31, %v807_v4 }
 0x13c   : > { %v1932_v34 = vadd.f32 %v1827_v16, %v954_v33 }
 0x13e   : > { %v990_v35 = vmul.f32 %v1932_v34, %v1932_v34 }
 0x140   : > { %1499 = vmatmul.msk.f32.gmra.mxu0 %vm997_vm1, %v990_v35 }
 0x145   : > { %v1063_v57 = vpop.f32.mrf.mxu0 }
 0x146   : > { %v1064_v36 = vadd.f32 %v1940_v10, %v1063_v57 }
 0x148   : > { %1538 = vrsqrt.f32 %v1064_v36  ;;  %vm1117_vm3 = vweird.f32 %v1064_v36 }
 0x14d   : > { %v1066_v38 = vpop.f32.mrf.mxu0 }
 0x14e   : > { %v1539_v39 = vpop.eup %1538  ;;  %v1067_v16 = vadd.f32 %v1940_v10, %v1066_v38 }
 0x14f   : > { %v1112_v41 = vmul.f32 %v1539_v39, %v1064_v36  ;;  %vm1118_vm2 = vweird.f32 %v1539_v39 }
 0x150   : > { %1540 = vrsqrt.f32 %v1067_v16  ;;  %vm1119_vm4 = vmor %vm1117_vm3, %vm1118_vm2  ;;  %vm1127_vm6 = vweird.f32 %v1067_v16 }
 0x151   : > { %v1113_v42 = vmul.f32 %v1539_v39, %v1112_v41 }
 0x153   : > { %v1114_v43 = vmul.f32 0.5, %v1113_v42 }
 0x155   : > { %v1115_v61 = vsub.f32 1.5, %v1114_v43  ;;  %v1069_v44 = vpop.f32.mrf.mxu0 }
 0x156   : > { %v1541_v46 = vpop.eup %1540  ;;  %v1070_v47 = vadd.f32 %v1940_v10, %v1069_v44 }
 0x157   : > { %v1116_v49 = vmul.f32 %v1539_v39, %v1115_v61  ;;  %v1122_v50 = vmul.f32 %v1541_v46, %v1067_v16  ;;  %vm1128_vm5 = vweird.f32 %v1541_v46 }
 0x158   : > { %1542 = vrsqrt.f32 %v1070_v47  ;;  %vm1129_vm7 = vmor %vm1127_vm6, %vm1128_vm5  ;;  %vm1137_vm9 = vweird.f32 %v1070_v47 }
 0x159   : > { %v1120_v51 = vsel %vm1119_vm4, %v1539_v39, %v1116_v49  ;;  %v1123_v2 = vmul.f32 %v1541_v46, %v1122_v50 }
 0x15a   : > { %v1271_v52 = vmul.f32 %v1120_v51, %v1830_v19 }
 0x15b   : > { %v1124_v55 = vmul.f32 0.5, %v1123_v2 }
 0x15c   : > { %1287 = vst.msk [vmem:[%s1949_s8] sm:$0xff] %vm997_vm1, %v1271_v52 }
 0x15d   : > { %v1125_v56 = vsub.f32 1.5, %v1124_v55  ;;  %v1072_v54 = vpop.f32.mrf.mxu0 }
 0x15e   : > { %v1543_v0 = vpop.eup %1542  ;;  %v1073_v1 = vadd.f32 %v1940_v10, %v1072_v54 }
 0x15f   : > { %v1126_v8 = vmul.f32 %v1541_v46, %v1125_v56  ;;  %v1132_v5 = vmul.f32 %v1543_v0, %v1070_v47  ;;  %vm1138_vm8 = vweird.f32 %v1543_v0 }
 0x160   : > { %1544 = vrsqrt.f32 %v1073_v1  ;;  %vm1139_vm10 = vmor %vm1137_vm9, %vm1138_vm8  ;;  %vm1147_vm12 = vweird.f32 %v1073_v1 }
 0x161   : > { %v1130_v7 = vsel %vm1129_vm7, %v1541_v46, %v1126_v8  ;;  %v1133_v9 = vmul.f32 %v1543_v0, %v1132_v5 }
 0x162   : > { %v1272_v58 = vmul.f32 %v1130_v7, %v1836_v28 }
 0x163   : > { %v1134_v19 = vmul.f32 0.5, %v1133_v9 }
 0x164   : > { %1288 = vst.msk [vmem:[%s1949_s8 + $0x8] sm:$0xff] %vm997_vm1, %v1272_v58 }
 0x165   : > { %v1135_v12 = vsub.f32 1.5, %v1134_v19  ;;  %v1075_v13 = vpop.f32.mrf.mxu0 }
 0x166   : > { %v1545_v59 = vpop.eup %1544  ;;  %v1076_v14 = vadd.f32 %v1940_v10, %v1075_v13 }
 0x167   : > { %v1136_v17 = vmul.f32 %v1543_v0, %v1135_v12  ;;  %v1142_v18 = vmul.f32 %v1545_v59, %v1073_v1  ;;  %vm1148_vm11 = vweird.f32 %v1545_v59 }
 0x168   : > { %1546 = vrsqrt.f32 %v1076_v14  ;;  %vm1149_vm13 = vmor %vm1147_vm12, %vm1148_vm11  ;;  %vm1157_vm15 = vweird.f32 %v1076_v14 }
 0x169   : > { %v1140_v62 = vsel %vm1139_vm10, %v1543_v0, %v1136_v17  ;;  %v1143_v21 = vmul.f32 %v1545_v59, %v1142_v18 }
 0x16a   : > { %v1273_v22 = vmul.f32 %v1140_v62, %v1842_v37 }
 0x16b   : > { %v1144_v28 = vmul.f32 0.5, %v1143_v21 }
 0x16c   : > { %1289 = vst.msk [vmem:[%s1949_s8 + $0x10] sm:$0xff] %vm997_vm1, %v1273_v22 }
 0x16d   : > { %v1145_v63 = vsub.f32 1.5, %v1144_v28  ;;  %v1078_v23 = vpop.f32.mrf.mxu0 }
 0x16e   : > { %v1547_v25 = vpop.eup %1546  ;;  %v1079_v26 = vadd.f32 %v1940_v10, %v1078_v23 }
 0x16f   : > { %v1146_v3 = vmul.f32 %v1545_v59, %v1145_v63  ;;  %v1152_v29 = vmul.f32 %v1547_v25, %v1076_v14  ;;  %vm1158_vm14 = vweird.f32 %v1547_v25 }
 0x170   : > { %1548 = vrsqrt.f32 %v1079_v26  ;;  %vm1159_vm0 = vmor %vm1157_vm15, %vm1158_vm14  ;;  %vm1167_vm3 = vweird.f32 %v1079_v26 }
 0x171   : > { %v1150_v30 = vsel %vm1149_vm13, %v1545_v59, %v1146_v3  ;;  %v1153_v4 = vmul.f32 %v1547_v25, %v1152_v29 }
 0x172   : > { %v1274_v31 = vmul.f32 %v1150_v30, %v1848_v45 }
 0x173   : > { %v1154_v37 = vmul.f32 0.5, %v1153_v4 }
 0x174   : > { %1290 = vst.msk [vmem:[%s1949_s8 + $0x18] sm:$0xff] %vm997_vm1, %v1274_v31 }
 0x175   : > { %v1155_v33 = vsub.f32 1.5, %v1154_v37  ;;  %v1081_v35 = vpop.f32.mrf.mxu0 }
 0x176   : > { %v1549_v57 = vpop.eup %1548  ;;  %v1082_v36 = vadd.f32 %v1940_v10, %v1081_v35 }
 0x177   : > { %v1156_v38 = vmul.f32 %v1547_v25, %v1155_v33  ;;  %v1162_v39 = vmul.f32 %v1549_v57, %v1079_v26  ;;  %vm1168_vm2 = vweird.f32 %v1549_v57 }
 0x178   : > { %1550 = vrsqrt.f32 %v1082_v36  ;;  %vm1169_vm4 = vmor %vm1167_vm3, %vm1168_vm2  ;;  %vm1177_vm6 = vweird.f32 %v1082_v36 }
 0x179   : > { %v1160_v16 = vsel %vm1159_vm0, %v1547_v25, %v1156_v38  ;;  %v1163_v41 = vmul.f32 %v1549_v57, %v1162_v39 }
 0x17a   : > { %v1275_v42 = vmul.f32 %v1160_v16, %v1855_v53 }
 0x17b   : > { %v1164_v45 = vmul.f32 0.5, %v1163_v41 }
 0x17c   : > { %1291 = vst.msk [vmem:[%s1949_s8 + $0x20] sm:$0xff] %vm997_vm1, %v1275_v42 }
 0x17d   : > { %v1165_v43 = vsub.f32 1.5, %v1164_v45  ;;  %v1084_v61 = vpop.f32.mrf.mxu0 }
 0x17e   : > { %v1551_v44 = vpop.eup %1550  ;;  %v1085_v46 = vadd.f32 %v1940_v10, %v1084_v61 }
 0x17f   : > { %v1166_v47 = vmul.f32 %v1549_v57, %v1165_v43  ;;  %v1172_v49 = vmul.f32 %v1551_v44, %v1082_v36  ;;  %vm1178_vm5 = vweird.f32 %v1551_v44 }
 0x180   : > { %1552 = vrsqrt.f32 %v1085_v46  ;;  %vm1179_vm7 = vmor %vm1177_vm6, %vm1178_vm5  ;;  %vm1187_vm9 = vweird.f32 %v1085_v46 }
 0x181   : > { %v1170_v50 = vsel %vm1169_vm4, %v1549_v57, %v1166_v47  ;;  %v1173_v51 = vmul.f32 %v1551_v44, %v1172_v49 }
 0x182   : > { %v1276_v2 = vmul.f32 %v1170_v50, %v1862_v6 }
 0x183   : > { %v1174_v53 = vmul.f32 0.5, %v1173_v51 }
 0x184   : > { %1292 = vst.msk [vmem:[%s1949_s8 + $0x28] sm:$0xff] %vm997_vm1, %v1276_v2 }
 0x185   : > { %v1175_v52 = vsub.f32 1.5, %v1174_v53  ;;  %v1087_v55 = vpop.f32.mrf.mxu0 }
 0x186   : > { %v1553_v56 = vpop.eup %1552  ;;  %v1088_v54 = vadd.f32 %v1940_v10, %v1087_v55 }
 0x187   : > { %v1176_v0 = vmul.f32 %v1551_v44, %v1175_v52  ;;  %v1182_v1 = vmul.f32 %v1553_v56, %v1085_v46  ;;  %vm1188_vm8 = vweird.f32 %v1553_v56 }
 0x188   : > { %1554 = vrsqrt.f32 %v1088_v54  ;;  %vm1189_vm10 = vmor %vm1187_vm9, %vm1188_vm8  ;;  %vm1197_vm12 = vweird.f32 %v1088_v54 }
 0x189   : > { %v1180_v8 = vsel %vm1179_vm7, %v1551_v44, %v1176_v0  ;;  %v1183_v5 = vmul.f32 %v1553_v56, %v1182_v1 }
 0x18a   : > { %v1277_v7 = vmul.f32 %v1180_v8, %v1869_v15 }
 0x18b   : > { %v1184_v6 = vmul.f32 0.5, %v1183_v5 }
 0x18c   : > { %1293 = vst.msk [vmem:[%s1949_s8 + $0x30] sm:$0xff] %vm997_vm1, %v1277_v7 }
 0x18d   : > { %v1185_v9 = vsub.f32 1.5, %v1184_v6  ;;  %v1090_v58 = vpop.f32.mrf.mxu0 }
 0x18e   : > { %v1555_v19 = vpop.eup %1554  ;;  %v1091_v12 = vadd.f32 %v1940_v10, %v1090_v58 }
 0x18f   : > { %v1186_v13 = vmul.f32 %v1553_v56, %v1185_v9  ;;  %v1192_v59 = vmul.f32 %v1555_v19, %v1088_v54  ;;  %vm1198_vm11 = vweird.f32 %v1555_v19 }
 0x190   : > { %1556 = vrsqrt.f32 %v1091_v12  ;;  %vm1199_vm13 = vmor %vm1197_vm12, %vm1198_vm11  ;;  %vm1207_vm15 = vweird.f32 %v1091_v12 }
 0x191   : > { %v1190_v14 = vsel %vm1189_vm10, %v1553_v56, %v1186_v13  ;;  %v1193_v17 = vmul.f32 %v1555_v19, %v1192_v59 }
 0x192   : > { %v1278_v18 = vmul.f32 %v1190_v14, %v1876_v24 }
 0x193   : > { %v1194_v15 = vmul.f32 0.5, %v1193_v17 }
 0x194   : > { %1294 = vst.msk [vmem:[%s1949_s8 + $0x38] sm:$0xff] %vm997_vm1, %v1278_v18 }
 0x195   : > { %v1195_v62 = vsub.f32 1.5, %v1194_v15  ;;  %v1093_v21 = vpop.f32.mrf.mxu0 }
 0x196   : > { %v1557_v22 = vpop.eup %1556  ;;  %v1094_v28 = vadd.f32 %v1940_v10, %v1093_v21 }
 0x197   : > { %v1196_v63 = vmul.f32 %v1555_v19, %v1195_v62  ;;  %v1202_v23 = vmul.f32 %v1557_v22, %v1091_v12  ;;  %vm1208_vm14 = vweird.f32 %v1557_v22 }
 0x198   : > { %1558 = vrsqrt.f32 %v1094_v28  ;;  %vm1209_vm0 = vmor %vm1207_vm15, %vm1208_vm14  ;;  %vm1217_vm3 = vweird.f32 %v1094_v28 }
 0x199   : > { %v1200_v25 = vsel %vm1199_vm13, %v1555_v19, %v1196_v63  ;;  %v1203_v26 = vmul.f32 %v1557_v22, %v1202_v23 }
 0x19a   : > { %v1279_v3 = vmul.f32 %v1200_v25, %v1883_v32 }
 0x19b   : > { %v1204_v24 = vmul.f32 0.5, %v1203_v26 }
 0x19c   : > { %1295 = vst.msk [vmem:[%s1949_s8 + $0x40] sm:$0xff] %vm997_vm1, %v1279_v3 }
 0x19d   : > { %v1205_v29 = vsub.f32 1.5, %v1204_v24  ;;  %v1096_v30 = vpop.f32.mrf.mxu0 }
 0x19e   : > { %v1559_v4 = vpop.eup %1558  ;;  %v1097_v31 = vadd.f32 %v1940_v10, %v1096_v30 }
 0x19f   : > { %v1206_v37 = vmul.f32 %v1557_v22, %v1205_v29  ;;  %v1212_v33 = vmul.f32 %v1559_v4, %v1094_v28  ;;  %vm1218_vm2 = vweird.f32 %v1559_v4 }
 0x1a0   : > { %1560 = vrsqrt.f32 %v1097_v31  ;;  %vm1219_vm4 = vmor %vm1217_vm3, %vm1218_vm2  ;;  %vm1227_vm6 = vweird.f32 %v1097_v31 }
 0x1a1   : > { %v1210_v35 = vsel %vm1209_vm0, %v1557_v22, %v1206_v37  ;;  %v1213_v57 = vmul.f32 %v1559_v4, %v1212_v33 }
 0x1a2   : > { %v1280_v36 = vmul.f32 %v1210_v35, %v1890_v40 }
 0x1a3   : > { %v1214_v32 = vmul.f32 0.5, %v1213_v57 }
 0x1a4   : > { %1296 = vst.msk [vmem:[%s1949_s8 + $0x48] sm:$0xff] %vm997_vm1, %v1280_v36 }
 0x1a5   : > { %v1215_v38 = vsub.f32 1.5, %v1214_v32  ;;  %v1099_v39 = vpop.f32.mrf.mxu0 }
 0x1a6   : > { %v1561_v16 = vpop.eup %1560  ;;  %v1100_v41 = vadd.f32 %v1940_v10, %v1099_v39 }
 0x1a7   : > { %v1216_v42 = vmul.f32 %v1559_v4, %v1215_v38  ;;  %v1222_v45 = vmul.f32 %v1561_v16, %v1097_v31  ;;  %vm1228_vm5 = vweird.f32 %v1561_v16 }
 0x1a8   : > { %1562 = vrsqrt.f32 %v1100_v41  ;;  %vm1229_vm7 = vmor %vm1227_vm6, %vm1228_vm5  ;;  %vm1237_vm9 = vweird.f32 %v1100_v41 }
 0x1a9   : > { %v1220_v43 = vsel %vm1219_vm4, %v1559_v4, %v1216_v42  ;;  %v1223_v61 = vmul.f32 %v1561_v16, %v1222_v45 }
 0x1aa   : > { %v1281_v44 = vmul.f32 %v1220_v43, %v1897_v48 }
 0x1ab   : > { %v1224_v40 = vmul.f32 0.5, %v1223_v61 }
 0x1ac   : > { %1297 = vst.msk [vmem:[%s1949_s8 + $0x50] sm:$0xff] %vm997_vm1, %v1281_v44 }
 0x1ad   : > { %v1225_v46 = vsub.f32 1.5, %v1224_v40  ;;  %v1102_v47 = vpop.f32.mrf.mxu0 }
 0x1ae   : > { %v1563_v49 = vpop.eup %1562  ;;  %v1103_v50 = vadd.f32 %v1940_v10, %v1102_v47 }
 0x1af   : > { %v1226_v51 = vmul.f32 %v1561_v16, %v1225_v46  ;;  %v1232_v2 = vmul.f32 %v1563_v49, %v1100_v41  ;;  %vm1238_vm8 = vweird.f32 %v1563_v49 }
 0x1b0   : > { %1564 = vrsqrt.f32 %v1103_v50  ;;  %vm1239_vm10 = vmor %vm1237_vm9, %vm1238_vm8  ;;  %vm1247_vm12 = vweird.f32 %v1103_v50 }
 0x1b1   : > { %v1230_v53 = vsel %vm1229_vm7, %v1561_v16, %v1226_v51  ;;  %v1233_v52 = vmul.f32 %v1563_v49, %v1232_v2 }
 0x1b2   : > { %v1282_v55 = vmul.f32 %v1230_v53, %v1904_v60 }
 0x1b3   : > { %v1234_v48 = vmul.f32 0.5, %v1233_v52 }
 0x1b4   : > { %1298 = vst.msk [vmem:[%s1949_s8 + $0x58] sm:$0xff] %vm997_vm1, %v1282_v55 }
 0x1b5   : > { %v1235_v56 = vsub.f32 1.5, %v1234_v48  ;;  %v1105_v54 = vpop.f32.mrf.mxu0 }
 0x1b6   : > { %v1565_v0 = vpop.eup %1564  ;;  %v1106_v1 = vadd.f32 %v1940_v10, %v1105_v54 }
 0x1b7   : > { %v1236_v8 = vmul.f32 %v1563_v49, %v1235_v56  ;;  %v1242_v5 = vmul.f32 %v1565_v0, %v1103_v50  ;;  %vm1248_vm11 = vweird.f32 %v1565_v0 }
 0x1b8   : > { %1566 = vrsqrt.f32 %v1106_v1  ;;  %vm1249_vm13 = vmor %vm1247_vm12, %vm1248_vm11  ;;  %vm1257_vm15 = vweird.f32 %v1106_v1 }
 0x1b9   : > { %v1240_v7 = vsel %vm1239_vm10, %v1563_v49, %v1236_v8  ;;  %v1243_v6 = vmul.f32 %v1565_v0, %v1242_v5 }
 0x1ba   : > { %v1283_v9 = vmul.f32 %v1240_v7, %v1911_v11 }
 0x1bb   : > { %v1244_v60 = vmul.f32 0.5, %v1243_v6 }
 0x1bc   : > { %1299 = vst.msk [vmem:[%s1949_s8 + $0x60] sm:$0xff] %vm997_vm1, %v1283_v9 }
 0x1bd   : > { %v1245_v58 = vsub.f32 1.5, %v1244_v60  ;;  %v1108_v19 = vpop.f32.mrf.mxu0 }
 0x1be   : > { %v1567_v12 = vpop.eup %1566  ;;  %v1109_v13 = vadd.f32 %v1940_v10, %v1108_v19 }
 0x1bf   : > { %v1246_v59 = vmul.f32 %v1565_v0, %v1245_v58  ;;  %v1252_v14 = vmul.f32 %v1567_v12, %v1106_v1  ;;  %vm1258_vm14 = vweird.f32 %v1567_v12 }
 0x1c0   : > { %1568 = vrsqrt.f32 %v1109_v13  ;;  %vm1259_vm0 = vmor %vm1257_vm15, %vm1258_vm14  ;;  %vm1267_vm3 = vweird.f32 %v1109_v13 }
 0x1c1   : > { %v1250_v17 = vsel %vm1249_vm13, %v1565_v0, %v1246_v59  ;;  %v1253_v18 = vmul.f32 %v1567_v12, %v1252_v14 }
 0x1c2   : > { %v1284_v11 = vmul.f32 %v1250_v17, %v1918_v20 }
 0x1c3   : > { %v1254_v15 = vmul.f32 0.5, %v1253_v18 }
 0x1c4   : > { %1300 = vst.msk [vmem:[%s1949_s8 + $0x68] sm:$0xff] %vm997_vm1, %v1284_v11 }
 0x1c5   : > { %v1255_v62 = vsub.f32 1.5, %v1254_v15 }
 0x1c6   : > { %v1569_v21 = vpop.eup %1568 }
 0x1c7   : > { %v1256_v22 = vmul.f32 %v1567_v12, %v1255_v62  ;;  %v1262_v10 = vmul.f32 %v1569_v21, %v1109_v13  ;;  %vm1268_vm2 = vweird.f32 %v1569_v21 }
 0x1c8   : > { %vm1269_vm4 = vmor %vm1267_vm3, %vm1268_vm2 }
 0x1c9   : > { %v1260_v28 = vsel %vm1259_vm0, %v1567_v12, %v1256_v22  ;;  %v1263_v63 = vmul.f32 %v1569_v21, %v1262_v10 }
 0x1ca   : > { %v1285_v23 = vmul.f32 %v1260_v28, %v1925_v27 }
 0x1cb   : > { %v1264_v25 = vmul.f32 0.5, %v1263_v63 }
 0x1cc   : > { %1301 = vst.msk [vmem:[%s1949_s8 + $0x70] sm:$0xff] %vm997_vm1, %v1285_v23 }
 0x1cd   : > { %v1265_v26 = vsub.f32 1.5, %v1264_v25 }
 0x1cf   : > { %v1266_v20 = vmul.f32 %v1569_v21, %v1265_v26 }
 0x1d1   : > { %v1270_v3 = vsel %vm1269_vm4, %v1569_v21, %v1266_v20 }
 0x1d2   : > { %v1286_v24 = vmul.f32 %v1270_v3, %v1932_v34 }
 0x1d4   : > { %1302 = vst.msk [vmem:[%s1949_s8 + $0x78] sm:$0xff] %vm997_vm1, %v1286_v24 }
 0x1d5 PF: > { %s16_s23 = sadd.s32 1, %s1592_s23   ;;  %s2028_s21 = smov %s1588_s22 }
 0x1d6   : > { %p13_p5 = scmp.ge.s32.totalorder %s16_s23, 4   ;;  %s2029_s22 = smov %s2031_s24 }
 0x1d8   :  { %15 = sbr.rel (!%p13_p5) target bundleno = 2 (0x2), region = 80 }

// kernel: mv_res_encoder_forward.11
= control target key start
LH: loop header
LB: loop body
LE: loop exit
PB: predicated region body
PF: predicated region fallthrough
CT: control target
= control target key end

     0   :  { %s2207_s18 = smov 0   ;;  %s2209_s19 = smov 0   ;;  %s2843_s0 = inlined_call_operand.vmem [shape: f32[2,160,16], index: 0, kind: input, shape index: {}, may-alias: {0,1,2}]   ;;  %s2844_s1 = inlined_call_operand.vmem [shape: f32[2,160,16], index: 1, kind: input, shape index: {}, may-alias: {0,1,2}]   ;;  %s2845_s2 = inlined_call_operand.vmem [shape: f32[2,160,16], index: 2, kind: input, shape index: {}, may-alias: {0,1,2}]   ;;  %s2846_s3 = inlined_call_operand.vmem [shape: f32[9,16,16], index: 3, kind: input, shape index: {}]   ;;  %s2847_s4 = inlined_call_operand.vmem [shape: f32[1,16], index: 4, kind: input, shape index: {}]   ;;  %s2848_s5 = inlined_call_operand.vmem [shape: f32[2,128,16], index: 5, kind: output, shape index: {}]  }
   0x1   :  { %s2211_s20 = smov 0  }
   0x2 LB: > { %s27_s21 = sadd.s32 1, %s2170_s19  ;;  %p1944_p0 = scmp.ge.s32.totalorder %s2174_s20, 1  ;;  %s2174_s20 = sphi %s2211_s20, %s15_s20   ;;  %s2170_s19 = sphi %s2209_s19, %s2854_s19   ;;  %s2166_s18 = sphi %s2207_s18, %s2853_s18  }
   0x3   : > { %p29_p1 = scmp.ge.s32.totalorder %s27_s21, 2  ;;  %p270_p2 = scmp.lt.s32.totalorder %s2174_s20, 3 }
   0x5   : > { %s2856_s21 = smov (%p29_p1, %s27_s21), 0  ;;  %p271_p3 = pnand %p1944_p0, %p270_p2 }
   0x7   : > { %274 = sbr.rel (%p271_p3) target bundleno = 454 (0x1c6), region = 40 }
   0xc   : > { %v1951_v0 = vld [vmem:[%s2846_s3 + $0x18] sm:$0xff]  ;;  %v1950_v1 = vld [vmem:[%s2846_s3 + $0x10] sm:$0xff]  ;;  %p338_p4 = scmp.lt.s32.totalorder %s2166_s18, 1  ;;  %v1985_v2 = vld [vmem:[%s2846_s3 + $0x28] sm:$0xff]  ;;  %vm407_vm0 = vcmask 130048  }
   0xd   : > { %2117 = vmatpush.msra.mxu1 %v1951_v0  ;;  %2118 = vmatpush.msra.mxu2 %v1951_v0  ;;  %v2003_v3 = vld [vmem:[%s2846_s3 + $0x38] sm:$0xff]  ;;  %v451_v4 = vld [vmem:[%s2846_s3 + $0x8] sm:$0xff]  ;;  %v1984_v5 = vld [vmem:[%s2846_s3 + $0x20] sm:$0xff] }
   0xe   : > { %2119 = vmatpush.msra.mxu3 %v1951_v0  ;;  %s2858_s18 = smov (!%p338_p4, %s2166_s18), 1  ;;  %533 = vmatpush.msra.mxu0 %v1951_v0  ;;  %v2021_v6 = vld [vmem:[%s2846_s3 + $0x48] sm:$0xff]  ;;  %v2002_v7 = vld [vmem:[%s2846_s3 + $0x30] sm:$0xff]  ;;  %v450_v8 = vld [vmem:[%s2846_s3] sm:$0xff] }
   0xf   : > { %2120 = vmatpush.msra.mxu1 %v1950_v1  ;;  %2121 = vmatpush.msra.mxu2 %v1950_v1  ;;  %s2246_s9 = smul.u32 160, %s2858_s18  ;;  %v2020_v18 = vld [vmem:[%s2846_s3 + $0x40] sm:$0xff]  ;;  %v2057_v27 = vld [vmem:[%s2846_s3 + $0x68] sm:$0xff]  ;;  %v2075_v31 = vld [vmem:[%s2846_s3 + $0x78] sm:$0xff]  ;;  %s2116_s30 = sshll.u32 %s2858_s18, 7 }
  0x10   : > { %2122 = vmatpush.msra.mxu3 %v1950_v1  ;;  %534 = vmatpush.msra.mxu0 %v1950_v1  ;;  %v2039_v32 = vld [vmem:[%s2846_s3 + $0x58] sm:$0xff]  ;;  %v2093_v37 = vld [vmem:[%s2846_s3 + $0x88] sm:$0xff]  ;;  %v2056_v59 = vld [vmem:[%s2846_s3 + $0x60] sm:$0xff]  ;;  %s2771_s8 = scalar_lea.vmem %s2848_s5, %s2116_s30 }
  0x11   : > { %778 = vmatpush.msrb.mxu2 %v1985_v2  ;;  %646 = vmatpush.msrb.mxu1 %v451_v4  ;;  %s2261_s22 = scalar_lea.vmem %s2843_s0, %s2246_s9  ;;  %s2113_s25 = sadd.s32 128, %s2246_s9  ;;  %v2074_v60 = vld [vmem:[%s2846_s3 + $0x70] sm:$0xff]  ;;  %v2092_v0 = vld [vmem:[%s2846_s3 + $0x80] sm:$0xff] }
  0x12   : > { %926 = vmatpush.msrb.mxu3 %v2003_v3  ;;  %v395_v9 = vld [vmem:[%s2261_s22 + $0x20] sm:$0xff]  ;;  %v396_v10 = vld [vmem:[%s2261_s22 + $0x28] sm:$0xff]  ;;  %1074 = vmatpush.msrb.mxu0 %v2021_v6  ;;  %v397_v15 = vld [vmem:[%s2261_s22 + $0x30] sm:$0xff]  ;;  %s2301_s28 = scalar_lea.vmem %s2844_s1, %s2113_s25  ;;  %s2115_s25 = sadd.s32 144, %s2246_s9 }
  0x13   : > { %779 = vmatpush.msrb.mxu2 %v1984_v5  ;;  %v399_v11 = vld [vmem:[%s2261_s22 + $0x40] sm:$0xff]  ;;  %412 = vst.msk [vmem:[#allocation2 + $0x20] sm:$0xff] %vm407_vm0, %v395_v9  ;;  %v400_v12 = vld [vmem:[%s2261_s22 + $0x48] sm:$0xff]  ;;  %647 = vmatpush.msrb.mxu1 %v450_v8  ;;  %v401_v16 = vld [vmem:[%s2261_s22 + $0x50] sm:$0xff]  ;;  %s2506_s29 = scalar_lea.vmem %s2845_s2, %s2115_s25 }
  0x14   : > { %927 = vmatpush.msrb.mxu3 %v2002_v7  ;;  %413 = vst.msk [vmem:[#allocation2 + $0x28] sm:$0xff] %vm407_vm0, %v396_v10  ;;  %v403_v13 = vld [vmem:[%s2261_s22 + $0x60] sm:$0xff]  ;;  %v404_v14 = vld [vmem:[%s2261_s22 + $0x68] sm:$0xff]  ;;  %1075 = vmatpush.msrb.mxu0 %v2020_v18  ;;  %v405_v20 = vld [vmem:[%s2261_s22 + $0x70] sm:$0xff] }
  0x15   : > { %416 = vst.msk [vmem:[#allocation2 + $0x40] sm:$0xff] %vm407_vm0, %v399_v11  ;;  %v391_v17 = vld [vmem:[%s2261_s22] sm:$0xff]  ;;  %v392_v19 = vld [vmem:[%s2261_s22 + $0x8] sm:$0xff]  ;;  %v398_v22 = vld [vmem:[%s2261_s22 + $0x38] sm:$0xff] }
  0x16   : > { %417 = vst.msk [vmem:[#allocation2 + $0x48] sm:$0xff] %vm407_vm0, %v400_v12  ;;  %v402_v23 = vld [vmem:[%s2261_s22 + $0x58] sm:$0xff]  ;;  %v393_v25 = vld [vmem:[%s2261_s22 + $0x10] sm:$0xff]  ;;  %v424_v30 = vld [vmem:[%s2301_s28] sm:$0xff] }
  0x17   : > { %420 = vst.msk [vmem:[#allocation2 + $0x60] sm:$0xff] %vm407_vm0, %v403_v13  ;;  %v406_v26 = vld [vmem:[%s2261_s22 + $0x78] sm:$0xff]  ;;  %v2038_v61 = vld [vmem:[%s2846_s3 + $0x50] sm:$0xff]  ;;  %v425_v11 = vld [vmem:[%s2301_s28 + $0x8] sm:$0xff] }
  0x18   : > { %421 = vst.msk [vmem:[#allocation2 + $0x68] sm:$0xff] %vm407_vm0, %v404_v14  ;;  %v394_v29 = vld [vmem:[%s2261_s22 + $0x18] sm:$0xff]  ;;  %v428_v14 = vld [vmem:[%s2506_s29] sm:$0xff] }
  0x19   : > { %414 = vst.msk [vmem:[#allocation2 + $0x30] sm:$0xff] %vm407_vm0, %v397_v15 }
  0x1a   : > { %418 = vst.msk [vmem:[#allocation2 + $0x50] sm:$0xff] %vm407_vm0, %v401_v16  ;;  %v2381_v54 = vld [vmem:[#allocation2 + $0x20] sm:$0xff] }
  0x1b   : > { %v2286_v21 = vld [vmem:[#allocation2 + $0x21] sm:$0xff]  ;;  %408 = vst.msk [vmem:[#allocation2] sm:$0xff] %vm407_vm0, %v391_v17 }
  0x1c   : > { %1956 = vmatmul.msk.f32.vlgmr.msra.gmra.mxu1 %vm407_vm0, %v2286_v21  ;;  %409 = vst.msk [vmem:[#allocation2 + $0x8] sm:$0xff] %vm407_vm0, %v392_v19  ;;  %v2392_v56 = vld [vmem:[#allocation2 + $0x28] sm:$0xff]  ;;  %v2440_v2 = vld [vmem:[#allocation2 + $0x40] sm:$0xff] }
  0x1d   : > { %v2294_v24 = vld [vmem:[#allocation2 + $0x41] sm:$0xff]  ;;  %422 = vst.msk [vmem:[#allocation2 + $0x70] sm:$0xff] %vm407_vm0, %v405_v20  ;;  %1222 = vmatpush.msra.mxu1 %v2039_v32 }
  0x1e   : > { %1960 = vmatmul.msk.f32.vlgmr.msra.gmra.mxu2 %vm407_vm0, %v2294_v24  ;;  %415 = vst.msk [vmem:[#allocation2 + $0x38] sm:$0xff] %vm407_vm0, %v398_v22  ;;  %v2398_v57 = vld [vmem:[#allocation2 + $0x22] sm:$0xff] }
  0x1f   : > { %v2310_v28 = vld [vmem:[#allocation2 + $0x61] sm:$0xff]  ;;  %419 = vst.msk [vmem:[#allocation2 + $0x58] sm:$0xff] %vm407_vm0, %v402_v23  ;;  %1370 = vmatpush.msra.mxu2 %v2057_v27  ;;  %1223 = vmatpush.msra.mxu1 %v2038_v61 }
  0x20   : > { %1964 = vmatmul.msk.f32.vlgmr.msra.gmra.mxu3 %vm407_vm0, %v2310_v28  ;;  %410 = vst.msk [vmem:[#allocation2 + $0x10] sm:$0xff] %vm407_vm0, %v393_v25  ;;  %v2324_v33 = vld [vmem:[#allocation2 + $0x29] sm:$0xff]  ;;  %v2488_v10 = vld [vmem:[#allocation2 + $0x60] sm:$0xff] }
  0x21   : > { %423 = vst.msk [vmem:[#allocation2 + $0x78] sm:$0xff] %vm407_vm0, %v406_v26  ;;  %1518 = vmatpush.msra.mxu3 %v2075_v31  ;;  %v2328_v34 = vld [vmem:[#allocation2 + $0x49] sm:$0xff]  ;;  %1371 = vmatpush.msra.mxu2 %v2056_v59 }
  0x22   : > { %411 = vst.msk [vmem:[#allocation2 + $0x18] sm:$0xff] %vm407_vm0, %v394_v29  ;;  %v434_v46 = vld [vmem:[#allocation2] sm:$0xff]  ;;  %v2404_v58 = vld [vmem:[#allocation2 + $0x30] sm:$0xff]  ;;  %v2452_v4 = vld [vmem:[#allocation2 + $0x48] sm:$0xff] }
  0x23   : > { %v452_v35 = vld [vmem:[#allocation2 + $0x1] sm:$0xff]  ;;  %426 = vst.msk [vmem:[#allocation2 + $0x80] sm:$0xff] %vm407_vm0, %v424_v30  ;;  %1519 = vmatpush.msra.mxu3 %v2074_v60  ;;  %v2419_v62 = vld [vmem:[#allocation2 + $0x2a] sm:$0xff] }
  0x24   : > { %1957 = vmatmul.msk.f32.gmra.mxu1 %vm407_vm0, %v2324_v33  ;;  %1952 = vmatmul.msk.f32.vlgmr.msra.gmra.mxu0 %vm407_vm0, %v452_v35  ;;  %v2334_v36 = vld [vmem:[#allocation2 + $0x69] sm:$0xff]  ;;  %427 = vst.msk [vmem:[#allocation2 + $0x88] sm:$0xff] %vm407_vm0, %v425_v11 }
  0x25   : > { %v2343_v38 = vld [vmem:[#allocation2 + $0x31] sm:$0xff]  ;;  %1666 = vmatpush.msra.mxu0 %v2093_v37  ;;  %v2356_v42 = vld [vmem:[#allocation2 + $0x39] sm:$0xff]  ;;  %v697_v48 = vld [vmem:[#allocation2 + $0x2] sm:$0xff]  ;;  %430 = vst.msk [vmem:[#allocation2 + $0x90] sm:$0xff] %vm407_vm0, %v428_v14 }
  0x26   : > { %1961 = vmatmul.msk.f32.gmra.mxu2 %vm407_vm0, %v2328_v34  ;;  %v2345_v40 = vld [vmem:[#allocation2 + $0x51] sm:$0xff]  ;;  %v2358_v44 = vld [vmem:[#allocation2 + $0x59] sm:$0xff]  ;;  %v435_v50 = vld [vmem:[#allocation2 + $0x8] sm:$0xff] }
  0x27   : > { %v453_v39 = vld [vmem:[#allocation2 + $0x9] sm:$0xff]  ;;  %v2425_v63 = vld [vmem:[#allocation2 + $0x38] sm:$0xff]  ;;  %1667 = vmatpush.msra.mxu0 %v2092_v0 }
  0x28   : > { %1965 = vmatmul.msk.f32.gmra.mxu3 %vm407_vm0, %v2334_v36  ;;  %v2350_v41 = vld [vmem:[#allocation2 + $0x71] sm:$0xff]  ;;  %v2446_v3 = vld [vmem:[#allocation2 + $0x3a] sm:$0xff]  ;;  %v2458_v5 = vld [vmem:[#allocation2 + $0x42] sm:$0xff] }
  0x29   : > { %v454_v43 = vld [vmem:[#allocation2 + $0x11] sm:$0xff]  ;;  %v455_v47 = vld [vmem:[#allocation2 + $0x19] sm:$0xff]  ;;  %v2508_v13 = vld [vmem:[#allocation2 + $0x68] sm:$0xff] }
  0x2a   : > { %v2363_v45 = vld [vmem:[#allocation2 + $0x79] sm:$0xff]  ;;  %v845_v49 = vld [vmem:[#allocation2 + $0x10] sm:$0xff]  ;;  %v2518_v16 = vld [vmem:[#allocation2 + $0x62] sm:$0xff] }
  0x2b   : > { %v698_v51 = vld [vmem:[#allocation2 + $0xa] sm:$0xff]  ;;  %v846_v52 = vld [vmem:[#allocation2 + $0x18] sm:$0xff]  ;;  %v2560_v32 = vld [vmem:[#allocation2 + $0x80] sm:$0xff] }
  0x2c   : > { %1958 = vmatmul.msk.f32.gmra.mxu1 %vm407_vm0, %v2343_v38  ;;  %1953 = vmatmul.msk.f32.gmra.mxu0 %vm407_vm0, %v453_v39  ;;  %v2377_v53 = vld [vmem:[#allocation2 + $0x12] sm:$0xff]  ;;  %v2387_v55 = vld [vmem:[#allocation2 + $0x1a] sm:$0xff]  ;;  %v2470_v7 = vld [vmem:[#allocation2 + $0x4a] sm:$0xff] }
  0x2d   : > { %v2434_v1 = vld [vmem:[#allocation2 + $0x32] sm:$0xff]  ;;  %v2497_v12 = vld [vmem:[#allocation2 + $0x5a] sm:$0xff]  ;;  %v2536_v23 = vld [vmem:[#allocation2 + $0x6a] sm:$0xff] }
  0x2e   : > { %1962 = vmatmul.msk.f32.gmra.mxu2 %vm407_vm0, %v2345_v40  ;;  %v2464_v6 = vld [vmem:[#allocation2 + $0x50] sm:$0xff]  ;;  %v2476_v8 = vld [vmem:[#allocation2 + $0x58] sm:$0xff]  ;;  %v2570_v39 = vld [vmem:[#allocation2 + $0x81] sm:$0xff] }
  0x2f   : > { %v2482_v9 = vld [vmem:[#allocation2 + $0x52] sm:$0xff] }
  0x30   : > { %1966 = vmatmul.msk.f32.gmra.mxu3 %vm407_vm0, %v2350_v41  ;;  %v2524_v17 = vld [vmem:[#allocation2 + $0x70] sm:$0xff]  ;;  %v2542_v25 = vld [vmem:[#allocation2 + $0x78] sm:$0xff] }
  0x31   : > { %v2554_v31 = vld [vmem:[#allocation2 + $0x72] sm:$0xff] }
  0x34   : > { %1959 = vmatmul.msk.f32.gmra.mxu1 %vm407_vm0, %v2356_v42  ;;  %1954 = vmatmul.msk.f32.gmra.mxu0 %vm407_vm0, %v454_v43 }
  0x36   : > { %1963 = vmatmul.msk.f32.gmra.mxu2 %vm407_vm0, %v2358_v44 }
  0x38   : > { %1967 = vmatmul.msk.f32.gmra.mxu3 %vm407_vm0, %v2363_v45 }
  0x3c   : > { %1968 = vmatmul.msk.f32.vlgmr.msrb.gmra.mxu1 %vm407_vm0, %v434_v46  ;;  %1955 = vmatmul.msk.f32.gmra.mxu0 %vm407_vm0, %v455_v47 }
  0x3e   : > { %1986 = vmatmul.msk.f32.vlgmr.msrb.gmra.mxu2 %vm407_vm0, %v697_v48  ;;  %v2580_v48 = vld [vmem:[#allocation2 + $0x88] sm:$0xff] }
  0x40   : > { %2004 = vmatmul.msk.f32.vlgmr.msrb.gmra.mxu3 %vm407_vm0, %v845_v49 }
  0x44   : > { %1969 = vmatmul.msk.f32.gmra.mxu1 %vm407_vm0, %v435_v50  ;;  %2022 = vmatmul.msk.f32.vlgmr.msrb.gmra.mxu0 %vm407_vm0, %v454_v43 }
  0x46   : > { %1987 = vmatmul.msk.f32.gmra.mxu2 %vm407_vm0, %v698_v51  ;;  %v2588_v51 = vld [vmem:[#allocation2 + $0x89] sm:$0xff] }
  0x48   : > { %2005 = vmatmul.msk.f32.gmra.mxu3 %vm407_vm0, %v846_v52 }
  0x4c   : > { %1970 = vmatmul.msk.f32.gmra.mxu1 %vm407_vm0, %v845_v49  ;;  %2023 = vmatmul.msk.f32.gmra.mxu0 %vm407_vm0, %v455_v47  ;;  %v2574_v47 = vld [vmem:[#allocation2 + $0x7a] sm:$0xff] }
  0x4e   : > { %1988 = vmatmul.msk.f32.gmra.mxu2 %vm407_vm0, %v2377_v53 }
  0x50   : > { %2006 = vmatmul.msk.f32.gmra.mxu3 %vm407_vm0, %v2381_v54 }
  0x54   : > { %1971 = vmatmul.msk.f32.gmra.mxu1 %vm407_vm0, %v846_v52  ;;  %2024 = vmatmul.msk.f32.gmra.mxu0 %vm407_vm0, %v2286_v21 }
  0x56   : > { %1989 = vmatmul.msk.f32.gmra.mxu2 %vm407_vm0, %v2387_v55 }
  0x58   : > { %2007 = vmatmul.msk.f32.gmra.mxu3 %vm407_vm0, %v2392_v56 }
  0x5c   : > { %1972 = vmatmul.msk.f32.gmra.mxu1 %vm407_vm0, %v2381_v54  ;;  %2025 = vmatmul.msk.f32.gmra.mxu0 %vm407_vm0, %v2324_v33 }
  0x5e   : > { %1990 = vmatmul.msk.f32.gmra.mxu2 %vm407_vm0, %v2398_v57 }
  0x60   : > { %2008 = vmatmul.msk.f32.gmra.mxu3 %vm407_vm0, %v2404_v58 }
  0x64   : > { %1973 = vmatmul.msk.f32.gmra.mxu1 %vm407_vm0, %v2392_v56  ;;  %2026 = vmatmul.msk.f32.gmra.mxu0 %vm407_vm0, %v2343_v38 }
  0x66   : > { %1991 = vmatmul.msk.f32.gmra.mxu2 %vm407_vm0, %v2419_v62 }
  0x68   : > { %2009 = vmatmul.msk.f32.gmra.mxu3 %vm407_vm0, %v2425_v63 }
  0x6c   : > { %1974 = vmatmul.msk.f32.gmra.mxu1 %vm407_vm0, %v2404_v58  ;;  %2027 = vmatmul.msk.f32.gmra.mxu0 %vm407_vm0, %v2356_v42 }
  0x6e   : > { %1992 = vmatmul.msk.f32.gmra.mxu2 %vm407_vm0, %v2434_v1 }
  0x70   : > { %2010 = vmatmul.msk.f32.gmra.mxu3 %vm407_vm0, %v2440_v2 }
  0x74   : > { %1975 = vmatmul.msk.f32.gmra.mxu1 %vm407_vm0, %v2425_v63  ;;  %2028 = vmatmul.msk.f32.gmra.mxu0 %vm407_vm0, %v2294_v24 }
  0x76   : > { %1993 = vmatmul.msk.f32.gmra.mxu2 %vm407_vm0, %v2446_v3 }
  0x78   : > { %2011 = vmatmul.msk.f32.gmra.mxu3 %vm407_vm0, %v2452_v4 }
  0x7c   : > { %1976 = vmatmul.msk.f32.gmra.mxu1 %vm407_vm0, %v2440_v2  ;;  %2029 = vmatmul.msk.f32.gmra.mxu0 %vm407_vm0, %v2328_v34 }
  0x7e   : > { %1994 = vmatmul.msk.f32.gmra.mxu2 %vm407_vm0, %v2458_v5 }
  0x80   : > { %2012 = vmatmul.msk.f32.gmra.mxu3 %vm407_vm0, %v2464_v6 }
  0x84   : > { %1977 = vmatmul.msk.f32.gmra.mxu1 %vm407_vm0, %v2452_v4  ;;  %2030 = vmatmul.msk.f32.gmra.mxu0 %vm407_vm0, %v2345_v40 }
  0x86   : > { %1995 = vmatmul.msk.f32.gmra.mxu2 %vm407_vm0, %v2470_v7 }
  0x88   : > { %2013 = vmatmul.msk.f32.gmra.mxu3 %vm407_vm0, %v2476_v8 }
  0x8c   : > { %1978 = vmatmul.msk.f32.gmra.mxu1 %vm407_vm0, %v2464_v6  ;;  %2031 = vmatmul.msk.f32.gmra.mxu0 %vm407_vm0, %v2358_v44 }
  0x8e   : > { %1996 = vmatmul.msk.f32.gmra.mxu2 %vm407_vm0, %v2482_v9 }
  0x90   : > { %2014 = vmatmul.msk.f32.gmra.mxu3 %vm407_vm0, %v2488_v10 }
  0x94   : > { %1979 = vmatmul.msk.f32.gmra.mxu1 %vm407_vm0, %v2476_v8  ;;  %2032 = vmatmul.msk.f32.gmra.mxu0 %vm407_vm0, %v2310_v28 }
  0x96   : > { %1997 = vmatmul.msk.f32.gmra.mxu2 %vm407_vm0, %v2497_v12 }
  0x98   : > { %2015 = vmatmul.msk.f32.gmra.mxu3 %vm407_vm0, %v2508_v13 }
  0x99   : > { %v2516_v15 = vpop.f32.mrf.mxu1 }
  0x9c   : > { %1980 = vmatmul.msk.f32.gmra.mxu1 %vm407_vm0, %v2488_v10  ;;  %2033 = vmatmul.msk.f32.gmra.mxu0 %vm407_vm0, %v2334_v36 }
  0x9e   : > { %1998 = vmatmul.msk.f32.gmra.mxu2 %vm407_vm0, %v2518_v16 }
  0xa0   : > { %2016 = vmatmul.msk.f32.gmra.mxu3 %vm407_vm0, %v2524_v17 }
  0xa1   : > { %v2530_v18 = vpop.f32.mrf.mxu2  ;;  %v2532_v19 = vpop.f32.mrf.mxu1 }
  0xa2   : > { %v536_v20 = vpop.f32.mrf.mxu0 }
  0xa3   : > { %v2534_v22 = vpop.f32.mrf.mxu3 }
  0xa4   : > { %1981 = vmatmul.msk.f32.gmra.mxu1 %vm407_vm0, %v2508_v13  ;;  %2034 = vmatmul.msk.f32.gmra.mxu0 %vm407_vm0, %v2350_v41 }
  0xa6   : > { %1999 = vmatmul.msk.f32.gmra.mxu2 %vm407_vm0, %v2536_v23 }
  0xa8   : > { %2017 = vmatmul.msk.f32.gmra.mxu3 %vm407_vm0, %v2542_v25 }
  0xa9   : > { %v2548_v26 = vpop.f32.mrf.mxu2  ;;  %v2550_v27 = vpop.f32.mrf.mxu1 }
  0xaa   : > { %v539_v29 = vpop.f32.mrf.mxu0 }
  0xab   : > { %v2552_v30 = vpop.f32.mrf.mxu3 }
  0xac   : > { %2849 = vst [vmem:[#allocation3_spill] sm:$0xff] %v2552_v30  ;;  %1982 = vmatmul.msk.f32.gmra.mxu1 %vm407_vm0, %v2524_v17  ;;  %2035 = vmatmul.msk.f32.gmra.mxu0 %vm407_vm0, %v2363_v45 }
  0xae   : > { %2000 = vmatmul.msk.f32.gmra.mxu2 %vm407_vm0, %v2554_v31 }
  0xb0   : > { %2018 = vmatmul.msk.f32.gmra.mxu3 %vm407_vm0, %v2560_v32 }
  0xb1   : > { %v2566_v35 = vpop.f32.mrf.mxu2  ;;  %v2568_v37 = vpop.f32.mrf.mxu1 }
  0xb2   : > { %v542_v43 = vpop.f32.mrf.mxu0 }
  0xb3   : > { %v2572_v46 = vpop.f32.mrf.mxu3 }
  0xb4   : > { %2850 = vst [vmem:[#allocation4_spill] sm:$0xff] %v2572_v46  ;;  %1983 = vmatmul.msk.f32.gmra.mxu1 %vm407_vm0, %v2542_v25  ;;  %2036 = vmatmul.msk.f32.gmra.mxu0 %vm407_vm0, %v2570_v39 }
  0xb6   : > { %2001 = vmatmul.msk.f32.gmra.mxu2 %vm407_vm0, %v2574_v47 }
  0xb8   : > { %2019 = vmatmul.msk.f32.gmra.mxu3 %vm407_vm0, %v2580_v48 }
  0xb9   : > { %v2586_v49 = vpop.f32.mrf.mxu2  ;;  %v649_v50 = vpop.f32.mrf.mxu1 }
  0xba   : > { %v545_v52 = vpop.f32.mrf.mxu0  ;;  %v650_v60 = vadd.f32 %v649_v50, %v536_v20 }
  0xbb   : > { %v2590_v59 = vpop.f32.mrf.mxu3 }
  0xbc   : > { %2040 = vmatmul.msk.f32.vlgmr.msra.gmra.mxu1 %vm407_vm0, %v2377_v53  ;;  %2037 = vmatmul.msk.f32.gmra.mxu0 %vm407_vm0, %v2588_v51 }
  0xbe   : > { %2058 = vmatmul.msk.f32.vlgmr.msra.gmra.mxu2 %vm407_vm0, %v2381_v54 }
  0xc0   : > { %2076 = vmatmul.msk.f32.vlgmr.msra.gmra.mxu3 %vm407_vm0, %v2286_v21 }
  0xc1   : > { %v781_v61 = vpop.f32.mrf.mxu2  ;;  %v652_v0 = vpop.f32.mrf.mxu1 }
  0xc2   : > { %v829_v11 = vadd.f32 %v781_v61, %v650_v60  ;;  %v1077_v14 = vpop.f32.mrf.mxu0  ;;  %v653_v54 = vadd.f32 %v652_v0, %v539_v29 }
  0xc3   : > { %v929_v46 = vpop.f32.mrf.mxu3 }
  0xc4   : > { %v977_v30 = vadd.f32 %v929_v46, %v829_v11  ;;  %2041 = vmatmul.msk.f32.gmra.mxu1 %vm407_vm0, %v2387_v55  ;;  %2094 = vmatmul.msk.f32.vlgmr.msra.gmra.mxu0 %vm407_vm0, %v2398_v57 }
  0xc6   : > { %v2604_v53 = vadd.f32 %v1077_v14, %v977_v30  ;;  %2059 = vmatmul.msk.f32.gmra.mxu2 %vm407_vm0, %v2392_v56 }
  0xc8   : > { %2077 = vmatmul.msk.f32.gmra.mxu3 %vm407_vm0, %v2324_v33 }
  0xc9   : > { %v784_v21 = vpop.f32.mrf.mxu2  ;;  %v655_v20 = vpop.f32.mrf.mxu1 }
  0xca   : > { %v830_v50 = vadd.f32 %v784_v21, %v653_v54  ;;  %v1080_v60 = vpop.f32.mrf.mxu0  ;;  %v656_v56 = vadd.f32 %v655_v20, %v542_v43 }
  0xcb   : > { %v932_v46 = vpop.f32.mrf.mxu3 }
  0xcc   : > { %v978_v61 = vadd.f32 %v932_v46, %v830_v50  ;;  %2042 = vmatmul.msk.f32.gmra.mxu1 %vm407_vm0, %v2398_v57  ;;  %2095 = vmatmul.msk.f32.gmra.mxu0 %vm407_vm0, %v2419_v62 }
  0xce   : > { %v2614_v55 = vadd.f32 %v1080_v60, %v978_v61  ;;  %2060 = vmatmul.msk.f32.gmra.mxu2 %vm407_vm0, %v2404_v58 }
  0xd0   : > { %2078 = vmatmul.msk.f32.gmra.mxu3 %vm407_vm0, %v2343_v38 }
  0xd1   : > { %v787_v33 = vpop.f32.mrf.mxu2  ;;  %v658_v29 = vpop.f32.mrf.mxu1 }
  0xd2   : > { %v831_v30 = vadd.f32 %v787_v33, %v656_v56  ;;  %v1083_v0 = vpop.f32.mrf.mxu0  ;;  %v659_v58 = vadd.f32 %v658_v29, %v545_v52 }
  0xd3   : > { %v935_v11 = vpop.f32.mrf.mxu3 }
  0xd4   : > { %v979_v14 = vadd.f32 %v935_v11, %v831_v30  ;;  %2043 = vmatmul.msk.f32.gmra.mxu1 %vm407_vm0, %v2419_v62  ;;  %2096 = vmatmul.msk.f32.gmra.mxu0 %vm407_vm0, %v2434_v1 }
  0xd6   : > { %v2624_v57 = vadd.f32 %v1083_v0, %v979_v14  ;;  %2061 = vmatmul.msk.f32.gmra.mxu2 %vm407_vm0, %v2425_v63 }
  0xd8   : > { %2079 = vmatmul.msk.f32.gmra.mxu3 %vm407_vm0, %v2356_v42 }
  0xd9   : > { %v790_v38 = vpop.f32.mrf.mxu2  ;;  %v661_v43 = vpop.f32.mrf.mxu1 }
  0xda   : > { %v832_v54 = vadd.f32 %v790_v38, %v659_v58  ;;  %v1086_v21 = vpop.f32.mrf.mxu0  ;;  %v662_v63 = vadd.f32 %v661_v43, %v2516_v15 }
  0xdb   : > { %v938_v20 = vpop.f32.mrf.mxu3 }
  0xdc   : > { %v980_v50 = vadd.f32 %v938_v20, %v832_v54  ;;  %2044 = vmatmul.msk.f32.gmra.mxu1 %vm407_vm0, %v2434_v1  ;;  %2097 = vmatmul.msk.f32.gmra.mxu0 %vm407_vm0, %v2446_v3 }
  0xde   : > { %v2634_v62 = vadd.f32 %v1086_v21, %v980_v50  ;;  %2062 = vmatmul.msk.f32.gmra.mxu2 %vm407_vm0, %v2440_v2 }
  0xe0   : > { %2080 = vmatmul.msk.f32.gmra.mxu3 %vm407_vm0, %v2294_v24 }
  0xe1   : > { %v793_v42 = vpop.f32.mrf.mxu2  ;;  %v664_v52 = vpop.f32.mrf.mxu1 }
  0xe2   : > { %v833_v60 = vadd.f32 %v793_v42, %v662_v63  ;;  %v1089_v46 = vpop.f32.mrf.mxu0  ;;  %v665_v2 = vadd.f32 %v664_v52, %v2532_v19 }
  0xe3   : > { %v941_v61 = vpop.f32.mrf.mxu3 }
  0xe4   : > { %v981_v56 = vadd.f32 %v941_v61, %v833_v60  ;;  %2045 = vmatmul.msk.f32.gmra.mxu1 %vm407_vm0, %v2446_v3  ;;  %2098 = vmatmul.msk.f32.gmra.mxu0 %vm407_vm0, %v2458_v5 }
  0xe6   : > { %v2645_v1 = vadd.f32 %v1089_v46, %v981_v56  ;;  %2063 = vmatmul.msk.f32.gmra.mxu2 %vm407_vm0, %v2452_v4 }
  0xe8   : > { %2081 = vmatmul.msk.f32.gmra.mxu3 %vm407_vm0, %v2328_v34 }
  0xe9   : > { %v796_v24 = vpop.f32.mrf.mxu2  ;;  %v667_v15 = vpop.f32.mrf.mxu1 }
  0xea   : > { %v834_v33 = vadd.f32 %v796_v24, %v665_v2  ;;  %v1092_v29 = vpop.f32.mrf.mxu0  ;;  %v668_v4 = vadd.f32 %v667_v15, %v2550_v27 }
  0xeb   : > { %v944_v30 = vpop.f32.mrf.mxu3 }
  0xec   : > { %v982_v0 = vadd.f32 %v944_v30, %v834_v33  ;;  %2046 = vmatmul.msk.f32.gmra.mxu1 %vm407_vm0, %v2458_v5  ;;  %2099 = vmatmul.msk.f32.gmra.mxu0 %vm407_vm0, %v2470_v7 }
  0xee   : > { %v2656_v3 = vadd.f32 %v1092_v29, %v982_v0  ;;  %2064 = vmatmul.msk.f32.gmra.mxu2 %vm407_vm0, %v2464_v6 }
  0xf0   : > { %2082 = vmatmul.msk.f32.gmra.mxu3 %vm407_vm0, %v2345_v40 }
  0xf1   : > { %v799_v34 = vpop.f32.mrf.mxu2  ;;  %v670_v19 = vpop.f32.mrf.mxu1 }
  0xf2   : > { %v835_v11 = vadd.f32 %v799_v34, %v668_v4  ;;  %v1095_v14 = vpop.f32.mrf.mxu0  ;;  %v671_v6 = vadd.f32 %v670_v19, %v2568_v37 }
  0xf3   : > { %v947_v58 = vpop.f32.mrf.mxu3 }
  0xf4   : > { %v983_v38 = vadd.f32 %v947_v58, %v835_v11  ;;  %2047 = vmatmul.msk.f32.gmra.mxu1 %vm407_vm0, %v2470_v7  ;;  %2100 = vmatmul.msk.f32.gmra.mxu0 %vm407_vm0, %v2482_v9  ;;  %v1597_v11 = vld [vmem:[#allocation2 + $0x82] sm:$0xff] }
  0xf6   : > { %v2667_v5 = vadd.f32 %v1095_v14, %v983_v38  ;;  %2065 = vmatmul.msk.f32.gmra.mxu2 %vm407_vm0, %v2476_v8 }
  0xf8   : > { %2083 = vmatmul.msk.f32.gmra.mxu3 %vm407_vm0, %v2358_v44 }
  0xf9   : > { %v802_v40 = vpop.f32.mrf.mxu2  ;;  %v673_v27 = vpop.f32.mrf.mxu1 }
  0xfa   : > { %v836_v43 = vadd.f32 %v802_v40, %v671_v6  ;;  %v1098_v54 = vpop.f32.mrf.mxu0  ;;  %v674_v44 = vadd.f32 %v673_v27, %v2530_v18  ;;  %v1598_v27 = vld [vmem:[#allocation2 + $0x8a] sm:$0xff] }
  0xfb   : > { %v950_v21 = vpop.f32.mrf.mxu3 }
  0xfc   : > { %v984_v20 = vadd.f32 %v950_v21, %v836_v43  ;;  %2048 = vmatmul.msk.f32.gmra.mxu1 %vm407_vm0, %v2482_v9  ;;  %2101 = vmatmul.msk.f32.gmra.mxu0 %vm407_vm0, %v2497_v12 }
  0xfe   : > { %v2678_v7 = vadd.f32 %v1098_v54, %v984_v20  ;;  %2066 = vmatmul.msk.f32.gmra.mxu2 %vm407_vm0, %v2488_v10  ;;  %v429_v10 = vld [vmem:[%s2506_s29 + $0x8] sm:$0xff]  ;;  %v1303_v20 = vld [vmem:[#allocation2 + $0x90] sm:$0xff] }
  0xff   : > { %431 = vst.msk [vmem:[#allocation2 + $0x98] sm:$0xff] %vm407_vm0, %v429_v10 }
 0x100   : > { %2084 = vmatmul.msk.f32.gmra.mxu3 %vm407_vm0, %v2310_v28 }
 0x101   : > { %v805_v8 = vpop.f32.mrf.mxu2  ;;  %v676_v37 = vpop.f32.mrf.mxu1 }
 0x102   : > { %v837_v50 = vadd.f32 %v805_v8, %v674_v44  ;;  %v1101_v63 = vpop.f32.mrf.mxu0  ;;  %v677_v28 = vadd.f32 %v676_v37, %v2548_v26  ;;  %v2176_v26 = vmov 0.0  }
 0x103   : > { %v953_v42 = vpop.f32.mrf.mxu3  ;;  %432 = vst.msk [vmem:[#allocation2 + $0xa0] sm:$0xff] %vm407_vm0, %v2176_v26 }
 0x104   : > { %v985_v9 = vadd.f32 %v953_v42, %v837_v50  ;;  %2049 = vmatmul.msk.f32.gmra.mxu1 %vm407_vm0, %v2497_v12  ;;  %2102 = vmatmul.msk.f32.gmra.mxu0 %vm407_vm0, %v2518_v16 }
 0x106   : > { %v2689_v52 = vadd.f32 %v1101_v63, %v985_v9  ;;  %2067 = vmatmul.msk.f32.gmra.mxu2 %vm407_vm0, %v2508_v13  ;;  %v1451_v44 = vld [vmem:[#allocation2 + $0x91] sm:$0xff] }
 0x107   : > { %v1599_v63 = vld [vmem:[#allocation2 + $0x92] sm:$0xff] }
 0x108   : > { %2085 = vmatmul.msk.f32.gmra.mxu3 %vm407_vm0, %v2334_v36 }
 0x109   : > { %v808_v18 = vpop.f32.mrf.mxu2  ;;  %v679_v60 = vpop.f32.mrf.mxu1 }
 0x10a   : > { %v838_v46 = vadd.f32 %v808_v18, %v677_v28  ;;  %v1104_v12 = vpop.f32.mrf.mxu0  ;;  %v680_v36 = vadd.f32 %v679_v60, %v2566_v35  ;;  %v1304_v28 = vld [vmem:[#allocation2 + $0x98] sm:$0xff] }
 0x10b   : > { %v956_v61 = vpop.f32.mrf.mxu3  ;;  %v1452_v60 = vld [vmem:[#allocation2 + $0x99] sm:$0xff] }
 0x10c   : > { %v986_v56 = vadd.f32 %v956_v61, %v838_v46  ;;  %2050 = vmatmul.msk.f32.gmra.mxu1 %vm407_vm0, %v2518_v16  ;;  %2103 = vmatmul.msk.f32.gmra.mxu0 %vm407_vm0, %v2536_v23 }
 0x10e   : > { %v2702_v13 = vadd.f32 %v1104_v12, %v986_v56  ;;  %2068 = vmatmul.msk.f32.gmra.mxu2 %vm407_vm0, %v2524_v17 }
 0x110   : > { %2086 = vmatmul.msk.f32.gmra.mxu3 %vm407_vm0, %v2350_v41 }
 0x111   : > { %v811_v2 = vpop.f32.mrf.mxu2  ;;  %v682_v24 = vpop.f32.mrf.mxu1 }
 0x112   : > { %v839_v15 = vadd.f32 %v811_v2, %v680_v36  ;;  %v1107_v16 = vpop.f32.mrf.mxu0  ;;  %v683_v41 = vadd.f32 %v682_v24, %v2586_v49  ;;  %v1600_v36 = vld [vmem:[#allocation2 + $0x9a] sm:$0xff] }
 0x113   : > { %v959_v33 = vpop.f32.mrf.mxu3 }
 0x114   : > { %v987_v29 = vadd.f32 %v959_v33, %v839_v15  ;;  %2051 = vmatmul.msk.f32.gmra.mxu1 %vm407_vm0, %v2536_v23  ;;  %2104 = vmatmul.msk.f32.gmra.mxu0 %vm407_vm0, %v2554_v31 }
 0x116   : > { %v2714_v17 = vadd.f32 %v1107_v16, %v987_v29  ;;  %2069 = vmatmul.msk.f32.gmra.mxu2 %vm407_vm0, %v2542_v25 }
 0x118   : > { %2087 = vmatmul.msk.f32.gmra.mxu3 %vm407_vm0, %v2363_v45 }
 0x119   : > { %v814_v35 = vpop.f32.mrf.mxu2  ;;  %v685_v30 = vpop.f32.mrf.mxu1 }
 0x11a   : > { %v840_v0 = vadd.f32 %v814_v35, %v683_v41  ;;  %v1110_v4 = vpop.f32.mrf.mxu0  ;;  %v686_v25 = vadd.f32 %v685_v30, %v2534_v22  ;;  %v2851_v22 = vld [vmem:[#allocation3_spill] sm:$0xff] }
 0x11b   : > { %v962_v34 = vpop.f32.mrf.mxu3 }
 0x11c   : > { %v988_v19 = vadd.f32 %v962_v34, %v840_v0  ;;  %2052 = vmatmul.msk.f32.gmra.mxu1 %vm407_vm0, %v2554_v31  ;;  %2105 = vmatmul.msk.f32.gmra.mxu0 %vm407_vm0, %v2574_v47 }
 0x11e   : > { %v2725_v23 = vadd.f32 %v1110_v4, %v988_v19  ;;  %2070 = vmatmul.msk.f32.gmra.mxu2 %vm407_vm0, %v2560_v32  ;;  %v2763_v4 = vld [vmem:[%s2847_s4] ss:$0 sm:$0xff] }
 0x120   : > { %2088 = vmatmul.msk.f32.gmra.mxu3 %vm407_vm0, %v2570_v39 }
 0x121   : > { %v817_v45 = vpop.f32.mrf.mxu2  ;;  %v688_v49 = vpop.f32.mrf.mxu1 }
 0x122   : > { %v841_v14 = vadd.f32 %v817_v45, %v686_v25  ;;  %v1113_v58 = vpop.f32.mrf.mxu0  ;;  %v689_v32 = vadd.f32 %v688_v49, %v2851_v22 }
 0x123   : > { %v965_v38 = vpop.f32.mrf.mxu3 }
 0x124   : > { %v989_v31 = vadd.f32 %v965_v38, %v841_v14  ;;  %2053 = vmatmul.msk.f32.gmra.mxu1 %vm407_vm0, %v2574_v47  ;;  %2106 = vmatmul.msk.f32.gmra.mxu0 %vm407_vm0, %v1597_v11 }
 0x126   : > { %v2735_v6 = vadd.f32 %v1113_v58, %v989_v31  ;;  %2071 = vmatmul.msk.f32.gmra.mxu2 %vm407_vm0, %v2580_v48  ;;  %v2852_v48 = vld [vmem:[#allocation4_spill] sm:$0xff] }
 0x128   : > { %2089 = vmatmul.msk.f32.gmra.mxu3 %vm407_vm0, %v2588_v51 }
 0x129   : > { %v820_v39 = vpop.f32.mrf.mxu2  ;;  %v691_v40 = vpop.f32.mrf.mxu1 }
 0x12a   : > { %v842_v43 = vadd.f32 %v820_v39, %v689_v32  ;;  %v1116_v54 = vpop.f32.mrf.mxu0  ;;  %v692_v37 = vadd.f32 %v691_v40, %v2852_v48 }
 0x12b   : > { %v968_v21 = vpop.f32.mrf.mxu3 }
 0x12c   : > { %v990_v47 = vadd.f32 %v968_v21, %v842_v43  ;;  %2054 = vmatmul.msk.f32.gmra.mxu1 %vm407_vm0, %v1597_v11  ;;  %2107 = vmatmul.msk.f32.gmra.mxu0 %vm407_vm0, %v1598_v27 }
 0x12e   : > { %v2744_v8 = vadd.f32 %v1116_v54, %v990_v47  ;;  %2072 = vmatmul.msk.f32.gmra.mxu2 %vm407_vm0, %v1303_v20 }
 0x130   : > { %2090 = vmatmul.msk.f32.gmra.mxu3 %vm407_vm0, %v1451_v44 }
 0x131   : > { %v823_v51 = vpop.f32.mrf.mxu2  ;;  %v694_v50 = vpop.f32.mrf.mxu1 }
 0x132   : > { %v843_v42 = vadd.f32 %v823_v51, %v692_v37  ;;  %v1119_v9 = vpop.f32.mrf.mxu0  ;;  %v695_v12 = vadd.f32 %v694_v50, %v2590_v59 }
 0x133   : > { %v971_v10 = vpop.f32.mrf.mxu3 }
 0x134   : > { %v991_v18 = vadd.f32 %v971_v10, %v843_v42  ;;  %2055 = vmatmul.msk.f32.gmra.mxu1 %vm407_vm0, %v1598_v27  ;;  %2108 = vmatmul.msk.f32.gmra.mxu0 %vm407_vm0, %v1599_v63 }
 0x136   : > { %v2751_v46 = vadd.f32 %v1119_v9, %v991_v18  ;;  %2073 = vmatmul.msk.f32.gmra.mxu2 %vm407_vm0, %v1304_v28 }
 0x138   : > { %2091 = vmatmul.msk.f32.gmra.mxu3 %vm407_vm0, %v1452_v60 }
 0x139   : > { %v826_v61 = vpop.f32.mrf.mxu2  ;;  %v1225_v56 = vpop.f32.mrf.mxu1 }
 0x13a   : > { %v844_v26 = vadd.f32 %v826_v61, %v695_v12  ;;  %v1122_v2 = vpop.f32.mrf.mxu0  ;;  %v1273_v33 = vadd.f32 %v1225_v56, %v2604_v53 }
 0x13b   : > { %v974_v24 = vpop.f32.mrf.mxu3 }
 0x13c   : > { %v992_v15 = vadd.f32 %v974_v24, %v844_v26  ;;  %2109 = vmatmul.msk.f32.gmra.mxu0 %vm407_vm0, %v1600_v36 }
 0x13e   : > { %v2757_v16 = vadd.f32 %v1122_v2, %v992_v15 }
 0x141   : > { %v1373_v29 = vpop.f32.mrf.mxu2  ;;  %v1228_v41 = vpop.f32.mrf.mxu1 }
 0x142   : > { %v1421_v35 = vadd.f32 %v1373_v29, %v1273_v33  ;;  %v1669_v59 = vpop.f32.mrf.mxu0  ;;  %v1274_v19 = vadd.f32 %v1228_v41, %v2614_v55 }
 0x143   : > { %v1521_v30 = vpop.f32.mrf.mxu3 }
 0x144   : > { %v1569_v0 = vadd.f32 %v1521_v30, %v1421_v35 }
 0x146   : > { %v1717_v34 = vadd.f32 %v1669_v59, %v1569_v0 }
 0x148   : > { %v1737_v25 = vadd.f32 %v2763_v4, %v1717_v34 }
 0x149   : > { %v1376_v45 = vpop.f32.mrf.mxu2  ;;  %v1231_v49 = vpop.f32.mrf.mxu1 }
 0x14a   : > { %vm1753_vm1 = vcmp.ge.f32.partialorder %v1737_v25, 0.0  ;;  %v1769_v53 = vmul.f32 0.01, %v1737_v25  ;;  %v1422_v11 = vadd.f32 %v1376_v45, %v1274_v19  ;;  %v1672_v14 = vpop.f32.mrf.mxu0  ;;  %v1275_v22 = vadd.f32 %v1231_v49, %v2624_v57 }
 0x14b   : > { %v1524_v58 = vpop.f32.mrf.mxu3 }
 0x14c   : > { %v1785_v38 = vsel %vm1753_vm1, %v1737_v25, %v1769_v53  ;;  %v1570_v31 = vadd.f32 %v1524_v58, %v1422_v11 }
 0x14d   : > { %1801 = vst.msk [vmem:[%s2771_s8] sm:$0xff] %vm407_vm0, %v1785_v38 }
 0x14e   : > { %v1718_v55 = vadd.f32 %v1672_v14, %v1570_v31 }
 0x150   : > { %v1738_v32 = vadd.f32 %v2763_v4, %v1718_v55 }
 0x151   : > { %v1379_v39 = vpop.f32.mrf.mxu2  ;;  %v1234_v40 = vpop.f32.mrf.mxu1 }
 0x152   : > { %vm1754_vm2 = vcmp.ge.f32.partialorder %v1738_v32, 0.0  ;;  %v1770_v27 = vmul.f32 0.01, %v1738_v32  ;;  %v1423_v43 = vadd.f32 %v1379_v39, %v1275_v22  ;;  %v1675_v54 = vpop.f32.mrf.mxu0  ;;  %v1276_v48 = vadd.f32 %v1234_v40, %v2634_v62 }
 0x153   : > { %v1527_v21 = vpop.f32.mrf.mxu3 }
 0x154   : > { %v1786_v20 = vsel %vm1754_vm2, %v1738_v32, %v1770_v27  ;;  %v1571_v47 = vadd.f32 %v1527_v21, %v1423_v43 }
 0x155   : > { %1802 = vst.msk [vmem:[%s2771_s8 + $0x8] sm:$0xff] %vm407_vm0, %v1786_v20 }
 0x156   : > { %v1719_v44 = vadd.f32 %v1675_v54, %v1571_v47 }
 0x158   : > { %v1739_v37 = vadd.f32 %v2763_v4, %v1719_v44 }
 0x159   : > { %v1382_v57 = vpop.f32.mrf.mxu2  ;;  %v1237_v51 = vpop.f32.mrf.mxu1 }
 0x15a   : > { %vm1755_vm3 = vcmp.ge.f32.partialorder %v1739_v37, 0.0  ;;  %v1771_v50 = vmul.f32 0.01, %v1739_v37  ;;  %v1424_v63 = vadd.f32 %v1382_v57, %v1276_v48  ;;  %v1678_v42 = vpop.f32.mrf.mxu0  ;;  %v1277_v60 = vadd.f32 %v1237_v51, %v2645_v1 }
 0x15b   : > { %v1530_v9 = vpop.f32.mrf.mxu3 }
 0x15c   : > { %v1787_v10 = vsel %vm1755_vm3, %v1739_v37, %v1771_v50  ;;  %v1572_v28 = vadd.f32 %v1530_v9, %v1424_v63 }
 0x15d   : > { %1803 = vst.msk [vmem:[%s2771_s8 + $0x10] sm:$0xff] %vm407_vm0, %v1787_v10 }
 0x15e   : > { %v1720_v18 = vadd.f32 %v1678_v42, %v1572_v28 }
 0x160   : > { %v1740_v12 = vadd.f32 %v2763_v4, %v1720_v18 }
 0x161   : > { %v1385_v62 = vpop.f32.mrf.mxu2  ;;  %v1240_v61 = vpop.f32.mrf.mxu1 }
 0x162   : > { %vm1756_vm4 = vcmp.ge.f32.partialorder %v1740_v12, 0.0  ;;  %v1772_v56 = vmul.f32 0.01, %v1740_v12  ;;  %v1425_v36 = vadd.f32 %v1385_v62, %v1277_v60  ;;  %v1681_v26 = vpop.f32.mrf.mxu0  ;;  %v1278_v29 = vadd.f32 %v1240_v61, %v2656_v3 }
 0x163   : > { %v1533_v2 = vpop.f32.mrf.mxu3 }
 0x164   : > { %v1788_v24 = vsel %vm1756_vm4, %v1740_v12, %v1772_v56  ;;  %v1573_v15 = vadd.f32 %v1533_v2, %v1425_v36 }
 0x165   : > { %1804 = vst.msk [vmem:[%s2771_s8 + $0x18] sm:$0xff] %vm407_vm0, %v1788_v24 }
 0x166   : > { %v1721_v33 = vadd.f32 %v1681_v26, %v1573_v15 }
 0x168   : > { %v1741_v41 = vadd.f32 %v2763_v4, %v1721_v33 }
 0x169   : > { %v1388_v1 = vpop.f32.mrf.mxu2  ;;  %v1243_v35 = vpop.f32.mrf.mxu1 }
 0x16a   : > { %vm1757_vm5 = vcmp.ge.f32.partialorder %v1741_v41, 0.0  ;;  %v1773_v59 = vmul.f32 0.01, %v1741_v41  ;;  %v1426_v30 = vadd.f32 %v1388_v1, %v1278_v29  ;;  %v1684_v0 = vpop.f32.mrf.mxu0  ;;  %v1279_v49 = vadd.f32 %v1243_v35, %v2667_v5 }
 0x16b   : > { %v1536_v34 = vpop.f32.mrf.mxu3 }
 0x16c   : > { %v1789_v19 = vsel %vm1757_vm5, %v1741_v41, %v1773_v59  ;;  %v1574_v25 = vadd.f32 %v1536_v34, %v1426_v30 }
 0x16d   : > { %1805 = vst.msk [vmem:[%s2771_s8 + $0x20] sm:$0xff] %vm407_vm0, %v1789_v19 }
 0x16e   : > { %v1722_v45 = vadd.f32 %v1684_v0, %v1574_v25 }
 0x170   : > { %v1742_v53 = vadd.f32 %v2763_v4, %v1722_v45 }
 0x171   : > { %v1391_v3 = vpop.f32.mrf.mxu2  ;;  %v1246_v11 = vpop.f32.mrf.mxu1 }
 0x172   : > { %vm1758_vm6 = vcmp.ge.f32.partialorder %v1742_v53, 0.0  ;;  %v1774_v14 = vmul.f32 0.01, %v1742_v53  ;;  %v1427_v58 = vadd.f32 %v1391_v3, %v1279_v49  ;;  %v1687_v38 = vpop.f32.mrf.mxu0  ;;  %v1280_v39 = vadd.f32 %v1246_v11, %v2678_v7 }
 0x173   : > { %v1539_v31 = vpop.f32.mrf.mxu3 }
 0x174   : > { %v1790_v55 = vsel %vm1758_vm6, %v1742_v53, %v1774_v14  ;;  %v1575_v22 = vadd.f32 %v1539_v31, %v1427_v58 }
 0x175   : > { %1806 = vst.msk [vmem:[%s2771_s8 + $0x28] sm:$0xff] %vm407_vm0, %v1790_v55 }
 0x176   : > { %v1723_v32 = vadd.f32 %v1687_v38, %v1575_v22 }
 0x178   : > { %v1743_v40 = vadd.f32 %v2763_v4, %v1723_v32 }
 0x179   : > { %v1394_v5 = vpop.f32.mrf.mxu2  ;;  %v1249_v27 = vpop.f32.mrf.mxu1 }
 0x17a   : > { %vm1759_vm7 = vcmp.ge.f32.partialorder %v1743_v40, 0.0  ;;  %v1775_v43 = vmul.f32 0.01, %v1743_v40  ;;  %v1428_v54 = vadd.f32 %v1394_v5, %v1280_v39  ;;  %v1690_v21 = vpop.f32.mrf.mxu0  ;;  %v1281_v37 = vadd.f32 %v1249_v27, %v2689_v52 }
 0x17b   : > { %v1542_v20 = vpop.f32.mrf.mxu3 }
 0x17c   : > { %v1791_v47 = vsel %vm1759_vm7, %v1743_v40, %v1775_v43  ;;  %v1576_v44 = vadd.f32 %v1542_v20, %v1428_v54 }
 0x17d   : > { %1807 = vst.msk [vmem:[%s2771_s8 + $0x30] sm:$0xff] %vm407_vm0, %v1791_v47 }
 0x17e   : > { %v1724_v48 = vadd.f32 %v1690_v21, %v1576_v44 }
 0x180   : > { %v1744_v57 = vadd.f32 %v2763_v4, %v1724_v48 }
 0x181   : > { %v1397_v7 = vpop.f32.mrf.mxu2  ;;  %v1252_v51 = vpop.f32.mrf.mxu1 }
 0x182   : > { %vm1760_vm8 = vcmp.ge.f32.partialorder %v1744_v57, 0.0  ;;  %v1776_v50 = vmul.f32 0.01, %v1744_v57  ;;  %v1429_v63 = vadd.f32 %v1397_v7, %v1281_v37  ;;  %v1693_v42 = vpop.f32.mrf.mxu0  ;;  %v1282_v60 = vadd.f32 %v1252_v51, %v2702_v13 }
 0x183   : > { %v1545_v9 = vpop.f32.mrf.mxu3 }
 0x184   : > { %v1792_v10 = vsel %vm1760_vm8, %v1744_v57, %v1776_v50  ;;  %v1577_v28 = vadd.f32 %v1545_v9, %v1429_v63 }
 0x185   : > { %1808 = vst.msk [vmem:[%s2771_s8 + $0x38] sm:$0xff] %vm407_vm0, %v1792_v10 }
 0x186   : > { %v1725_v18 = vadd.f32 %v1693_v42, %v1577_v28 }
 0x188   : > { %v1745_v12 = vadd.f32 %v2763_v4, %v1725_v18 }
 0x189   : > { %v1400_v52 = vpop.f32.mrf.mxu2  ;;  %v1255_v62 = vpop.f32.mrf.mxu1 }
 0x18a   : > { %vm1761_vm9 = vcmp.ge.f32.partialorder %v1745_v12, 0.0  ;;  %v1777_v61 = vmul.f32 0.01, %v1745_v12  ;;  %v1430_v56 = vadd.f32 %v1400_v52, %v1282_v60  ;;  %v1696_v36 = vpop.f32.mrf.mxu0  ;;  %v1283_v33 = vadd.f32 %v1255_v62, %v2714_v17 }
 0x18b   : > { %v1548_v26 = vpop.f32.mrf.mxu3 }
 0x18c   : > { %v1793_v2 = vsel %vm1761_vm9, %v1745_v12, %v1777_v61  ;;  %v1578_v24 = vadd.f32 %v1548_v26, %v1430_v56 }
 0x18d   : > { %1809 = vst.msk [vmem:[%s2771_s8 + $0x40] sm:$0xff] %vm407_vm0, %v1793_v2 }
 0x18e   : > { %v1726_v15 = vadd.f32 %v1696_v36, %v1578_v24 }
 0x190   : > { %v1746_v29 = vadd.f32 %v2763_v4, %v1726_v15 }
 0x191   : > { %v1403_v13 = vpop.f32.mrf.mxu2  ;;  %v1258_v41 = vpop.f32.mrf.mxu1 }
 0x192   : > { %vm1762_vm10 = vcmp.ge.f32.partialorder %v1746_v29, 0.0  ;;  %v1778_v1 = vmul.f32 0.01, %v1746_v29  ;;  %v1431_v35 = vadd.f32 %v1403_v13, %v1283_v33  ;;  %v1699_v59 = vpop.f32.mrf.mxu0  ;;  %v1284_v25 = vadd.f32 %v1258_v41, %v2725_v23 }
 0x193   : > { %v1551_v30 = vpop.f32.mrf.mxu3 }
 0x194   : > { %v1794_v0 = vsel %vm1762_vm10, %v1746_v29, %v1778_v1  ;;  %v1579_v34 = vadd.f32 %v1551_v30, %v1431_v35 }
 0x195   : > { %1810 = vst.msk [vmem:[%s2771_s8 + $0x48] sm:$0xff] %vm407_vm0, %v1794_v0 }
 0x196   : > { %v1727_v19 = vadd.f32 %v1699_v59, %v1579_v34 }
 0x198   : > { %v1747_v45 = vadd.f32 %v2763_v4, %v1727_v19 }
 0x199   : > { %v1406_v17 = vpop.f32.mrf.mxu2  ;;  %v1261_v49 = vpop.f32.mrf.mxu1 }
 0x19a   : > { %vm1763_vm11 = vcmp.ge.f32.partialorder %v1747_v45, 0.0  ;;  %v1779_v53 = vmul.f32 0.01, %v1747_v45  ;;  %v1432_v3 = vadd.f32 %v1406_v17, %v1284_v25  ;;  %v1702_v11 = vpop.f32.mrf.mxu0  ;;  %v1285_v55 = vadd.f32 %v1261_v49, %v2735_v6 }
 0x19b   : > { %v1554_v14 = vpop.f32.mrf.mxu3 }
 0x19c   : > { %v1795_v58 = vsel %vm1763_vm11, %v1747_v45, %v1779_v53  ;;  %v1580_v38 = vadd.f32 %v1554_v14, %v1432_v3 }
 0x19d   : > { %1811 = vst.msk [vmem:[%s2771_s8 + $0x50] sm:$0xff] %vm407_vm0, %v1795_v58 }
 0x19e   : > { %v1728_v31 = vadd.f32 %v1702_v11, %v1580_v38 }
 0x1a0   : > { %v1748_v22 = vadd.f32 %v2763_v4, %v1728_v31 }
 0x1a1   : > { %v1409_v23 = vpop.f32.mrf.mxu2  ;;  %v1264_v32 = vpop.f32.mrf.mxu1 }
 0x1a2   : > { %vm1764_vm12 = vcmp.ge.f32.partialorder %v1748_v22, 0.0  ;;  %v1780_v39 = vmul.f32 0.01, %v1748_v22  ;;  %v1433_v40 = vadd.f32 %v1409_v23, %v1285_v55  ;;  %v1705_v5 = vpop.f32.mrf.mxu0  ;;  %v1286_v20 = vadd.f32 %v1264_v32, %v2744_v8 }
 0x1a3   : > { %v1557_v27 = vpop.f32.mrf.mxu3 }
 0x1a4   : > { %v1796_v43 = vsel %vm1764_vm12, %v1748_v22, %v1780_v39  ;;  %v1581_v54 = vadd.f32 %v1557_v27, %v1433_v40 }
 0x1a5   : > { %1812 = vst.msk [vmem:[%s2771_s8 + $0x58] sm:$0xff] %vm407_vm0, %v1796_v43 }
 0x1a6   : > { %v1729_v21 = vadd.f32 %v1705_v5, %v1581_v54 }
 0x1a8   : > { %v1749_v47 = vadd.f32 %v2763_v4, %v1729_v21 }
 0x1a9   : > { %v1412_v6 = vpop.f32.mrf.mxu2  ;;  %v1267_v57 = vpop.f32.mrf.mxu1 }
 0x1aa   : > { %vm1765_vm13 = vcmp.ge.f32.partialorder %v1749_v47, 0.0  ;;  %v1781_v44 = vmul.f32 0.01, %v1749_v47  ;;  %v1434_v48 = vadd.f32 %v1412_v6, %v1286_v20  ;;  %v1708_v37 = vpop.f32.mrf.mxu0  ;;  %v1287_v42 = vadd.f32 %v1267_v57, %v2751_v46 }
 0x1ab   : > { %v1560_v7 = vpop.f32.mrf.mxu3 }
 0x1ac   : > { %v1797_v51 = vsel %vm1765_vm13, %v1749_v47, %v1781_v44  ;;  %v1582_v50 = vadd.f32 %v1560_v7, %v1434_v48 }
 0x1ad   : > { %1813 = vst.msk [vmem:[%s2771_s8 + $0x60] sm:$0xff] %vm407_vm0, %v1797_v51 }
 0x1ae   : > { %v1730_v63 = vadd.f32 %v1708_v37, %v1582_v50 }
 0x1b0   : > { %v1750_v9 = vadd.f32 %v2763_v4, %v1730_v63 }
 0x1b1   : > { %v1415_v8 = vpop.f32.mrf.mxu2  ;;  %v1270_v62 = vpop.f32.mrf.mxu1 }
 0x1b2   : > { %vm1766_vm14 = vcmp.ge.f32.partialorder %v1750_v9, 0.0  ;;  %v1782_v10 = vmul.f32 0.01, %v1750_v9  ;;  %v1435_v28 = vadd.f32 %v1415_v8, %v1287_v42  ;;  %v1711_v18 = vpop.f32.mrf.mxu0  ;;  %v1288_v56 = vadd.f32 %v1270_v62, %v2757_v16 }
 0x1b3   : > { %v1563_v60 = vpop.f32.mrf.mxu3 }
 0x1b4   : > { %v1798_v12 = vsel %vm1766_vm14, %v1750_v9, %v1782_v10  ;;  %v1583_v52 = vadd.f32 %v1563_v60, %v1435_v28 }
 0x1b5   : > { %1814 = vst.msk [vmem:[%s2771_s8 + $0x68] sm:$0xff] %vm407_vm0, %v1798_v12 }
 0x1b6   : > { %v1731_v61 = vadd.f32 %v1711_v18, %v1583_v52 }
 0x1b8   : > { %v1751_v46 = vadd.f32 %v2763_v4, %v1731_v61 }
 0x1b9   : > { %v1418_v36 = vpop.f32.mrf.mxu2 }
 0x1ba   : > { %vm1767_vm15 = vcmp.ge.f32.partialorder %v1751_v46, 0.0  ;;  %v1783_v26 = vmul.f32 0.01, %v1751_v46  ;;  %v1436_v2 = vadd.f32 %v1418_v36, %v1288_v56  ;;  %v1714_v15 = vpop.f32.mrf.mxu0 }
 0x1bb   : > { %v1566_v24 = vpop.f32.mrf.mxu3 }
 0x1bc   : > { %v1799_v33 = vsel %vm1767_vm15, %v1751_v46, %v1783_v26  ;;  %v1584_v29 = vadd.f32 %v1566_v24, %v1436_v2 }
 0x1bd   : > { %1815 = vst.msk [vmem:[%s2771_s8 + $0x70] sm:$0xff] %vm407_vm0, %v1799_v33 }
 0x1be   : > { %v1732_v13 = vadd.f32 %v1714_v15, %v1584_v29 }
 0x1c0   : > { %v1752_v41 = vadd.f32 %v2763_v4, %v1732_v13 }
 0x1c2   : > { %vm1768_vm1 = vcmp.ge.f32.partialorder %v1752_v41, 0.0  ;;  %v1784_v1 = vmul.f32 0.01, %v1752_v41 }
 0x1c4   : > { %v1800_v35 = vsel %vm1768_vm1, %v1752_v41, %v1784_v1 }
 0x1c5   : > { %1816 = vst.msk [vmem:[%s2771_s8 + $0x78] sm:$0xff] %vm407_vm0, %v1800_v35 }
 0x1c6 PF: > { %s15_s20 = sadd.s32 1, %s2174_s20   ;;  %s2853_s18 = smov %s2170_s19 }
 0x1c7   : > { %p12_p5 = scmp.ge.s32.totalorder %s15_s20, 4   ;;  %s2854_s19 = smov %s2856_s21 }
 0x1c9   :  { %14 = sbr.rel (!%p12_p5) target bundleno = 2 (0x2), region = 84 }

// kernel: mv_res_encoder_forward.12
= control target key start
LH: loop header
LB: loop body
LE: loop exit
PB: predicated region body
PF: predicated region fallthrough
CT: control target
= control target key end

     0   :  { %s2328_s21 = smov 0   ;;  %s2330_s22 = smov 0   ;;  %s2985_s0 = inlined_call_operand.vmem [shape: f32[2,160,16], index: 0, kind: input, shape index: {}, may-alias: {0,1,2}]   ;;  %s2986_s1 = inlined_call_operand.vmem [shape: f32[2,160,16], index: 1, kind: input, shape index: {}, may-alias: {0,1,2}]   ;;  %s2987_s2 = inlined_call_operand.vmem [shape: f32[2,160,16], index: 2, kind: input, shape index: {}, may-alias: {0,1,2}]   ;;  %s2988_s3 = inlined_call_operand.vmem [shape: f32[9,16,16], index: 3, kind: input, shape index: {}]   ;;  %s2989_s4 = inlined_call_operand.vmem [shape: f32[1,16], index: 4, kind: input, shape index: {}]   ;;  %s2990_s5 = inlined_call_operand.vmem [shape: f32[2,128,16], index: 5, kind: input, shape index: {}]   ;;  %s2991_s6 = inlined_call_operand.vmem [shape: f32[2,128,16], index: 6, kind: output, shape index: {}]  }
   0x1   :  { %s2332_s23 = smov 0  }
   0x2 LB: > { %s28_s24 = sadd.s32 1, %s2286_s22  ;;  %p2057_p0 = scmp.ge.s32.totalorder %s2290_s23, 1  ;;  %s2290_s23 = sphi %s2332_s23, %s16_s23   ;;  %s2286_s22 = sphi %s2330_s22, %s2997_s22   ;;  %s2282_s21 = sphi %s2328_s21, %s2996_s21  }
   0x3   : > { %p30_p1 = scmp.ge.s32.totalorder %s28_s24, 2  ;;  %p312_p2 = scmp.lt.s32.totalorder %s2290_s23, 3 }
   0x5   : > { %s2999_s24 = smov (%p30_p1, %s28_s24), 0  ;;  %p313_p3 = pnand %p2057_p0, %p312_p2 }
   0x7   : > { %316 = sbr.rel (%p313_p3) target bundleno = 456 (0x1c8), region = 44 }
   0xc   : > { %v2066_v0 = vld [vmem:[%s2988_s3 + $0x18] sm:$0xff]  ;;  %v2065_v1 = vld [vmem:[%s2988_s3 + $0x10] sm:$0xff]  ;;  %p391_p4 = scmp.lt.s32.totalorder %s2282_s21, 1  ;;  %v2100_v2 = vld [vmem:[%s2988_s3 + $0x28] sm:$0xff]  ;;  %vm470_vm0 = vcmask 130048  }
   0xd   : > { %2233 = vmatpush.msra.mxu1 %v2066_v0  ;;  %2234 = vmatpush.msra.mxu2 %v2066_v0  ;;  %v2118_v3 = vld [vmem:[%s2988_s3 + $0x38] sm:$0xff]  ;;  %v514_v4 = vld [vmem:[%s2988_s3 + $0x8] sm:$0xff]  ;;  %v2099_v5 = vld [vmem:[%s2988_s3 + $0x20] sm:$0xff] }
   0xe   : > { %2235 = vmatpush.msra.mxu3 %v2066_v0  ;;  %s3001_s21 = smov (!%p391_p4, %s2282_s21), 1  ;;  %596 = vmatpush.msra.mxu0 %v2066_v0  ;;  %v2136_v6 = vld [vmem:[%s2988_s3 + $0x48] sm:$0xff]  ;;  %v2117_v7 = vld [vmem:[%s2988_s3 + $0x30] sm:$0xff]  ;;  %v513_v8 = vld [vmem:[%s2988_s3] sm:$0xff] }
   0xf   : > { %2236 = vmatpush.msra.mxu1 %v2065_v1  ;;  %2237 = vmatpush.msra.mxu2 %v2065_v1  ;;  %s2367_s13 = smul.u32 160, %s3001_s21  ;;  %v2135_v18 = vld [vmem:[%s2988_s3 + $0x40] sm:$0xff]  ;;  %v2172_v27 = vld [vmem:[%s2988_s3 + $0x68] sm:$0xff]  ;;  %v2190_v31 = vld [vmem:[%s2988_s3 + $0x78] sm:$0xff] }
  0x10   : > { %2238 = vmatpush.msra.mxu3 %v2065_v1  ;;  %597 = vmatpush.msra.mxu0 %v2065_v1  ;;  %v2154_v32 = vld [vmem:[%s2988_s3 + $0x58] sm:$0xff]  ;;  %v2208_v37 = vld [vmem:[%s2988_s3 + $0x88] sm:$0xff]  ;;  %v2171_v59 = vld [vmem:[%s2988_s3 + $0x60] sm:$0xff] }
  0x11   : > { %841 = vmatpush.msrb.mxu2 %v2100_v2  ;;  %709 = vmatpush.msrb.mxu1 %v514_v4  ;;  %s2382_s26 = scalar_lea.vmem %s2985_s0, %s2367_s13  ;;  %s2228_s29 = sadd.s32 128, %s2367_s13  ;;  %v2189_v60 = vld [vmem:[%s2988_s3 + $0x70] sm:$0xff]  ;;  %v2207_v0 = vld [vmem:[%s2988_s3 + $0x80] sm:$0xff] }
  0x12   : > { %989 = vmatpush.msrb.mxu3 %v2118_v3  ;;  %v458_v9 = vld [vmem:[%s2382_s26 + $0x20] sm:$0xff]  ;;  %v459_v10 = vld [vmem:[%s2382_s26 + $0x28] sm:$0xff]  ;;  %1137 = vmatpush.msrb.mxu0 %v2136_v6  ;;  %v460_v15 = vld [vmem:[%s2382_s26 + $0x30] sm:$0xff]  ;;  %s2422_s8 = scalar_lea.vmem %s2986_s1, %s2228_s29  ;;  %s2230_s30 = sadd.s32 144, %s2367_s13 }
  0x13   : > { %842 = vmatpush.msrb.mxu2 %v2099_v5  ;;  %v462_v11 = vld [vmem:[%s2382_s26 + $0x40] sm:$0xff]  ;;  %475 = vst.msk [vmem:[#allocation2 + $0x20] sm:$0xff] %vm470_vm0, %v458_v9  ;;  %v463_v12 = vld [vmem:[%s2382_s26 + $0x48] sm:$0xff]  ;;  %710 = vmatpush.msrb.mxu1 %v513_v8  ;;  %v464_v16 = vld [vmem:[%s2382_s26 + $0x50] sm:$0xff]  ;;  %s2627_s10 = scalar_lea.vmem %s2987_s2, %s2230_s30  ;;  %s2231_s13 = sshll.u32 %s3001_s21, 7 }
  0x14   : > { %990 = vmatpush.msrb.mxu3 %v2117_v7  ;;  %476 = vst.msk [vmem:[#allocation2 + $0x28] sm:$0xff] %vm470_vm0, %v459_v10  ;;  %v466_v13 = vld [vmem:[%s2382_s26 + $0x60] sm:$0xff]  ;;  %v467_v14 = vld [vmem:[%s2382_s26 + $0x68] sm:$0xff]  ;;  %1138 = vmatpush.msrb.mxu0 %v2135_v18  ;;  %v468_v20 = vld [vmem:[%s2382_s26 + $0x70] sm:$0xff]  ;;  %s2885_s12 = scalar_lea.vmem %s2990_s5, %s2231_s13  ;;  %s2898_s17 = scalar_lea.vmem %s2991_s6, %s2231_s13 }
  0x15   : > { %479 = vst.msk [vmem:[#allocation2 + $0x40] sm:$0xff] %vm470_vm0, %v462_v11  ;;  %v454_v17 = vld [vmem:[%s2382_s26] sm:$0xff]  ;;  %v455_v19 = vld [vmem:[%s2382_s26 + $0x8] sm:$0xff]  ;;  %v461_v22 = vld [vmem:[%s2382_s26 + $0x38] sm:$0xff] }
  0x16   : > { %480 = vst.msk [vmem:[#allocation2 + $0x48] sm:$0xff] %vm470_vm0, %v463_v12  ;;  %v465_v23 = vld [vmem:[%s2382_s26 + $0x58] sm:$0xff]  ;;  %v456_v25 = vld [vmem:[%s2382_s26 + $0x10] sm:$0xff]  ;;  %v487_v30 = vld [vmem:[%s2422_s8] sm:$0xff] }
  0x17   : > { %483 = vst.msk [vmem:[#allocation2 + $0x60] sm:$0xff] %vm470_vm0, %v466_v13  ;;  %v469_v26 = vld [vmem:[%s2382_s26 + $0x78] sm:$0xff]  ;;  %v2153_v61 = vld [vmem:[%s2988_s3 + $0x50] sm:$0xff]  ;;  %v488_v11 = vld [vmem:[%s2422_s8 + $0x8] sm:$0xff] }
  0x18   : > { %484 = vst.msk [vmem:[#allocation2 + $0x68] sm:$0xff] %vm470_vm0, %v467_v14  ;;  %v457_v29 = vld [vmem:[%s2382_s26 + $0x18] sm:$0xff]  ;;  %v491_v14 = vld [vmem:[%s2627_s10] sm:$0xff] }
  0x19   : > { %477 = vst.msk [vmem:[#allocation2 + $0x30] sm:$0xff] %vm470_vm0, %v460_v15 }
  0x1a   : > { %481 = vst.msk [vmem:[#allocation2 + $0x50] sm:$0xff] %vm470_vm0, %v464_v16  ;;  %v2502_v54 = vld [vmem:[#allocation2 + $0x20] sm:$0xff] }
  0x1b   : > { %v2407_v21 = vld [vmem:[#allocation2 + $0x21] sm:$0xff]  ;;  %471 = vst.msk [vmem:[#allocation2] sm:$0xff] %vm470_vm0, %v454_v17 }
  0x1c   : > { %2071 = vmatmul.msk.f32.vlgmr.msra.gmra.mxu1 %vm470_vm0, %v2407_v21  ;;  %472 = vst.msk [vmem:[#allocation2 + $0x8] sm:$0xff] %vm470_vm0, %v455_v19  ;;  %v2513_v56 = vld [vmem:[#allocation2 + $0x28] sm:$0xff]  ;;  %v2561_v2 = vld [vmem:[#allocation2 + $0x40] sm:$0xff] }
  0x1d   : > { %v2415_v24 = vld [vmem:[#allocation2 + $0x41] sm:$0xff]  ;;  %485 = vst.msk [vmem:[#allocation2 + $0x70] sm:$0xff] %vm470_vm0, %v468_v20  ;;  %1285 = vmatpush.msra.mxu1 %v2154_v32 }
  0x1e   : > { %2075 = vmatmul.msk.f32.vlgmr.msra.gmra.mxu2 %vm470_vm0, %v2415_v24  ;;  %478 = vst.msk [vmem:[#allocation2 + $0x38] sm:$0xff] %vm470_vm0, %v461_v22  ;;  %v2519_v57 = vld [vmem:[#allocation2 + $0x22] sm:$0xff] }
  0x1f   : > { %v2431_v28 = vld [vmem:[#allocation2 + $0x61] sm:$0xff]  ;;  %482 = vst.msk [vmem:[#allocation2 + $0x58] sm:$0xff] %vm470_vm0, %v465_v23  ;;  %1433 = vmatpush.msra.mxu2 %v2172_v27  ;;  %1286 = vmatpush.msra.mxu1 %v2153_v61 }
  0x20   : > { %2079 = vmatmul.msk.f32.vlgmr.msra.gmra.mxu3 %vm470_vm0, %v2431_v28  ;;  %473 = vst.msk [vmem:[#allocation2 + $0x10] sm:$0xff] %vm470_vm0, %v456_v25  ;;  %v2445_v33 = vld [vmem:[#allocation2 + $0x29] sm:$0xff]  ;;  %v2609_v10 = vld [vmem:[#allocation2 + $0x60] sm:$0xff] }
  0x21   : > { %486 = vst.msk [vmem:[#allocation2 + $0x78] sm:$0xff] %vm470_vm0, %v469_v26  ;;  %1581 = vmatpush.msra.mxu3 %v2190_v31  ;;  %v2449_v34 = vld [vmem:[#allocation2 + $0x49] sm:$0xff]  ;;  %1434 = vmatpush.msra.mxu2 %v2171_v59 }
  0x22   : > { %474 = vst.msk [vmem:[#allocation2 + $0x18] sm:$0xff] %vm470_vm0, %v457_v29  ;;  %v497_v46 = vld [vmem:[#allocation2] sm:$0xff]  ;;  %v2525_v58 = vld [vmem:[#allocation2 + $0x30] sm:$0xff]  ;;  %v2573_v4 = vld [vmem:[#allocation2 + $0x48] sm:$0xff] }
  0x23   : > { %v515_v35 = vld [vmem:[#allocation2 + $0x1] sm:$0xff]  ;;  %489 = vst.msk [vmem:[#allocation2 + $0x80] sm:$0xff] %vm470_vm0, %v487_v30  ;;  %1582 = vmatpush.msra.mxu3 %v2189_v60  ;;  %v2540_v62 = vld [vmem:[#allocation2 + $0x2a] sm:$0xff] }
  0x24   : > { %2072 = vmatmul.msk.f32.gmra.mxu1 %vm470_vm0, %v2445_v33  ;;  %2067 = vmatmul.msk.f32.vlgmr.msra.gmra.mxu0 %vm470_vm0, %v515_v35  ;;  %v2455_v36 = vld [vmem:[#allocation2 + $0x69] sm:$0xff]  ;;  %490 = vst.msk [vmem:[#allocation2 + $0x88] sm:$0xff] %vm470_vm0, %v488_v11 }
  0x25   : > { %v2464_v38 = vld [vmem:[#allocation2 + $0x31] sm:$0xff]  ;;  %1729 = vmatpush.msra.mxu0 %v2208_v37  ;;  %v2477_v42 = vld [vmem:[#allocation2 + $0x39] sm:$0xff]  ;;  %v760_v48 = vld [vmem:[#allocation2 + $0x2] sm:$0xff]  ;;  %493 = vst.msk [vmem:[#allocation2 + $0x90] sm:$0xff] %vm470_vm0, %v491_v14 }
  0x26   : > { %2076 = vmatmul.msk.f32.gmra.mxu2 %vm470_vm0, %v2449_v34  ;;  %v2466_v40 = vld [vmem:[#allocation2 + $0x51] sm:$0xff]  ;;  %v2479_v44 = vld [vmem:[#allocation2 + $0x59] sm:$0xff]  ;;  %v498_v50 = vld [vmem:[#allocation2 + $0x8] sm:$0xff] }
  0x27   : > { %v516_v39 = vld [vmem:[#allocation2 + $0x9] sm:$0xff]  ;;  %v2546_v63 = vld [vmem:[#allocation2 + $0x38] sm:$0xff]  ;;  %1730 = vmatpush.msra.mxu0 %v2207_v0 }
  0x28   : > { %2080 = vmatmul.msk.f32.gmra.mxu3 %vm470_vm0, %v2455_v36  ;;  %v2471_v41 = vld [vmem:[#allocation2 + $0x71] sm:$0xff]  ;;  %v2567_v3 = vld [vmem:[#allocation2 + $0x3a] sm:$0xff]  ;;  %v2579_v5 = vld [vmem:[#allocation2 + $0x42] sm:$0xff] }
  0x29   : > { %v517_v43 = vld [vmem:[#allocation2 + $0x11] sm:$0xff]  ;;  %v518_v47 = vld [vmem:[#allocation2 + $0x19] sm:$0xff]  ;;  %v2629_v13 = vld [vmem:[#allocation2 + $0x68] sm:$0xff] }
  0x2a   : > { %v2484_v45 = vld [vmem:[#allocation2 + $0x79] sm:$0xff]  ;;  %v908_v49 = vld [vmem:[#allocation2 + $0x10] sm:$0xff]  ;;  %v2639_v16 = vld [vmem:[#allocation2 + $0x62] sm:$0xff] }
  0x2b   : > { %v761_v51 = vld [vmem:[#allocation2 + $0xa] sm:$0xff]  ;;  %v909_v52 = vld [vmem:[#allocation2 + $0x18] sm:$0xff]  ;;  %v2681_v32 = vld [vmem:[#allocation2 + $0x80] sm:$0xff] }
  0x2c   : > { %2073 = vmatmul.msk.f32.gmra.mxu1 %vm470_vm0, %v2464_v38  ;;  %2068 = vmatmul.msk.f32.gmra.mxu0 %vm470_vm0, %v516_v39  ;;  %v2498_v53 = vld [vmem:[#allocation2 + $0x12] sm:$0xff]  ;;  %v2508_v55 = vld [vmem:[#allocation2 + $0x1a] sm:$0xff]  ;;  %v2591_v7 = vld [vmem:[#allocation2 + $0x4a] sm:$0xff] }
  0x2d   : > { %v2555_v1 = vld [vmem:[#allocation2 + $0x32] sm:$0xff]  ;;  %v2618_v12 = vld [vmem:[#allocation2 + $0x5a] sm:$0xff]  ;;  %v2657_v23 = vld [vmem:[#allocation2 + $0x6a] sm:$0xff] }
  0x2e   : > { %2077 = vmatmul.msk.f32.gmra.mxu2 %vm470_vm0, %v2466_v40  ;;  %v2585_v6 = vld [vmem:[#allocation2 + $0x50] sm:$0xff]  ;;  %v2597_v8 = vld [vmem:[#allocation2 + $0x58] sm:$0xff]  ;;  %v2691_v39 = vld [vmem:[#allocation2 + $0x81] sm:$0xff] }
  0x2f   : > { %v2603_v9 = vld [vmem:[#allocation2 + $0x52] sm:$0xff] }
  0x30   : > { %2081 = vmatmul.msk.f32.gmra.mxu3 %vm470_vm0, %v2471_v41  ;;  %v2645_v17 = vld [vmem:[#allocation2 + $0x70] sm:$0xff]  ;;  %v2663_v25 = vld [vmem:[#allocation2 + $0x78] sm:$0xff] }
  0x31   : > { %v2675_v31 = vld [vmem:[#allocation2 + $0x72] sm:$0xff] }
  0x34   : > { %2074 = vmatmul.msk.f32.gmra.mxu1 %vm470_vm0, %v2477_v42  ;;  %2069 = vmatmul.msk.f32.gmra.mxu0 %vm470_vm0, %v517_v43 }
  0x36   : > { %2078 = vmatmul.msk.f32.gmra.mxu2 %vm470_vm0, %v2479_v44 }
  0x38   : > { %2082 = vmatmul.msk.f32.gmra.mxu3 %vm470_vm0, %v2484_v45 }
  0x3c   : > { %2083 = vmatmul.msk.f32.vlgmr.msrb.gmra.mxu1 %vm470_vm0, %v497_v46  ;;  %2070 = vmatmul.msk.f32.gmra.mxu0 %vm470_vm0, %v518_v47 }
  0x3e   : > { %2101 = vmatmul.msk.f32.vlgmr.msrb.gmra.mxu2 %vm470_vm0, %v760_v48  ;;  %v2701_v48 = vld [vmem:[#allocation2 + $0x88] sm:$0xff] }
  0x40   : > { %2119 = vmatmul.msk.f32.vlgmr.msrb.gmra.mxu3 %vm470_vm0, %v908_v49 }
  0x44   : > { %2084 = vmatmul.msk.f32.gmra.mxu1 %vm470_vm0, %v498_v50  ;;  %2137 = vmatmul.msk.f32.vlgmr.msrb.gmra.mxu0 %vm470_vm0, %v517_v43 }
  0x46   : > { %2102 = vmatmul.msk.f32.gmra.mxu2 %vm470_vm0, %v761_v51  ;;  %v2709_v51 = vld [vmem:[#allocation2 + $0x89] sm:$0xff] }
  0x48   : > { %2120 = vmatmul.msk.f32.gmra.mxu3 %vm470_vm0, %v909_v52 }
  0x4c   : > { %2085 = vmatmul.msk.f32.gmra.mxu1 %vm470_vm0, %v908_v49  ;;  %2138 = vmatmul.msk.f32.gmra.mxu0 %vm470_vm0, %v518_v47  ;;  %v2695_v47 = vld [vmem:[#allocation2 + $0x7a] sm:$0xff] }
  0x4e   : > { %2103 = vmatmul.msk.f32.gmra.mxu2 %vm470_vm0, %v2498_v53 }
  0x50   : > { %2121 = vmatmul.msk.f32.gmra.mxu3 %vm470_vm0, %v2502_v54 }
  0x54   : > { %2086 = vmatmul.msk.f32.gmra.mxu1 %vm470_vm0, %v909_v52  ;;  %2139 = vmatmul.msk.f32.gmra.mxu0 %vm470_vm0, %v2407_v21 }
  0x56   : > { %2104 = vmatmul.msk.f32.gmra.mxu2 %vm470_vm0, %v2508_v55 }
  0x58   : > { %2122 = vmatmul.msk.f32.gmra.mxu3 %vm470_vm0, %v2513_v56 }
  0x5c   : > { %2087 = vmatmul.msk.f32.gmra.mxu1 %vm470_vm0, %v2502_v54  ;;  %2140 = vmatmul.msk.f32.gmra.mxu0 %vm470_vm0, %v2445_v33 }
  0x5e   : > { %2105 = vmatmul.msk.f32.gmra.mxu2 %vm470_vm0, %v2519_v57 }
  0x60   : > { %2123 = vmatmul.msk.f32.gmra.mxu3 %vm470_vm0, %v2525_v58 }
  0x64   : > { %2088 = vmatmul.msk.f32.gmra.mxu1 %vm470_vm0, %v2513_v56  ;;  %2141 = vmatmul.msk.f32.gmra.mxu0 %vm470_vm0, %v2464_v38 }
  0x66   : > { %2106 = vmatmul.msk.f32.gmra.mxu2 %vm470_vm0, %v2540_v62 }
  0x68   : > { %2124 = vmatmul.msk.f32.gmra.mxu3 %vm470_vm0, %v2546_v63 }
  0x6c   : > { %2089 = vmatmul.msk.f32.gmra.mxu1 %vm470_vm0, %v2525_v58  ;;  %2142 = vmatmul.msk.f32.gmra.mxu0 %vm470_vm0, %v2477_v42 }
  0x6e   : > { %2107 = vmatmul.msk.f32.gmra.mxu2 %vm470_vm0, %v2555_v1 }
  0x70   : > { %2125 = vmatmul.msk.f32.gmra.mxu3 %vm470_vm0, %v2561_v2 }
  0x74   : > { %2090 = vmatmul.msk.f32.gmra.mxu1 %vm470_vm0, %v2546_v63  ;;  %2143 = vmatmul.msk.f32.gmra.mxu0 %vm470_vm0, %v2415_v24 }
  0x76   : > { %2108 = vmatmul.msk.f32.gmra.mxu2 %vm470_vm0, %v2567_v3 }
  0x78   : > { %2126 = vmatmul.msk.f32.gmra.mxu3 %vm470_vm0, %v2573_v4 }
  0x7c   : > { %2091 = vmatmul.msk.f32.gmra.mxu1 %vm470_vm0, %v2561_v2  ;;  %2144 = vmatmul.msk.f32.gmra.mxu0 %vm470_vm0, %v2449_v34 }
  0x7e   : > { %2109 = vmatmul.msk.f32.gmra.mxu2 %vm470_vm0, %v2579_v5 }
  0x80   : > { %2127 = vmatmul.msk.f32.gmra.mxu3 %vm470_vm0, %v2585_v6 }
  0x84   : > { %2092 = vmatmul.msk.f32.gmra.mxu1 %vm470_vm0, %v2573_v4  ;;  %2145 = vmatmul.msk.f32.gmra.mxu0 %vm470_vm0, %v2466_v40 }
  0x86   : > { %2110 = vmatmul.msk.f32.gmra.mxu2 %vm470_vm0, %v2591_v7 }
  0x88   : > { %2128 = vmatmul.msk.f32.gmra.mxu3 %vm470_vm0, %v2597_v8 }
  0x8c   : > { %2093 = vmatmul.msk.f32.gmra.mxu1 %vm470_vm0, %v2585_v6  ;;  %2146 = vmatmul.msk.f32.gmra.mxu0 %vm470_vm0, %v2479_v44 }
  0x8e   : > { %2111 = vmatmul.msk.f32.gmra.mxu2 %vm470_vm0, %v2603_v9 }
  0x90   : > { %2129 = vmatmul.msk.f32.gmra.mxu3 %vm470_vm0, %v2609_v10 }
  0x94   : > { %2094 = vmatmul.msk.f32.gmra.mxu1 %vm470_vm0, %v2597_v8  ;;  %2147 = vmatmul.msk.f32.gmra.mxu0 %vm470_vm0, %v2431_v28 }
  0x96   : > { %2112 = vmatmul.msk.f32.gmra.mxu2 %vm470_vm0, %v2618_v12 }
  0x98   : > { %2130 = vmatmul.msk.f32.gmra.mxu3 %vm470_vm0, %v2629_v13 }
  0x99   : > { %v2637_v15 = vpop.f32.mrf.mxu1 }
  0x9c   : > { %2095 = vmatmul.msk.f32.gmra.mxu1 %vm470_vm0, %v2609_v10  ;;  %2148 = vmatmul.msk.f32.gmra.mxu0 %vm470_vm0, %v2455_v36 }
  0x9e   : > { %2113 = vmatmul.msk.f32.gmra.mxu2 %vm470_vm0, %v2639_v16 }
  0xa0   : > { %2131 = vmatmul.msk.f32.gmra.mxu3 %vm470_vm0, %v2645_v17 }
  0xa1   : > { %v2651_v18 = vpop.f32.mrf.mxu2  ;;  %v2653_v19 = vpop.f32.mrf.mxu1 }
  0xa2   : > { %v599_v20 = vpop.f32.mrf.mxu0 }
  0xa3   : > { %v2655_v22 = vpop.f32.mrf.mxu3 }
  0xa4   : > { %2096 = vmatmul.msk.f32.gmra.mxu1 %vm470_vm0, %v2629_v13  ;;  %2149 = vmatmul.msk.f32.gmra.mxu0 %vm470_vm0, %v2471_v41 }
  0xa6   : > { %2114 = vmatmul.msk.f32.gmra.mxu2 %vm470_vm0, %v2657_v23 }
  0xa8   : > { %2132 = vmatmul.msk.f32.gmra.mxu3 %vm470_vm0, %v2663_v25 }
  0xa9   : > { %v2669_v26 = vpop.f32.mrf.mxu2  ;;  %v2671_v27 = vpop.f32.mrf.mxu1 }
  0xaa   : > { %v602_v29 = vpop.f32.mrf.mxu0 }
  0xab   : > { %v2673_v30 = vpop.f32.mrf.mxu3 }
  0xac   : > { %2992 = vst [vmem:[#allocation3_spill] sm:$0xff] %v2673_v30  ;;  %2097 = vmatmul.msk.f32.gmra.mxu1 %vm470_vm0, %v2645_v17  ;;  %2150 = vmatmul.msk.f32.gmra.mxu0 %vm470_vm0, %v2484_v45 }
  0xae   : > { %2115 = vmatmul.msk.f32.gmra.mxu2 %vm470_vm0, %v2675_v31 }
  0xb0   : > { %2133 = vmatmul.msk.f32.gmra.mxu3 %vm470_vm0, %v2681_v32 }
  0xb1   : > { %v2687_v35 = vpop.f32.mrf.mxu2  ;;  %v2689_v37 = vpop.f32.mrf.mxu1 }
  0xb2   : > { %v605_v43 = vpop.f32.mrf.mxu0 }
  0xb3   : > { %v2693_v46 = vpop.f32.mrf.mxu3 }
  0xb4   : > { %2993 = vst [vmem:[#allocation4_spill] sm:$0xff] %v2693_v46  ;;  %2098 = vmatmul.msk.f32.gmra.mxu1 %vm470_vm0, %v2663_v25  ;;  %2151 = vmatmul.msk.f32.gmra.mxu0 %vm470_vm0, %v2691_v39 }
  0xb6   : > { %2116 = vmatmul.msk.f32.gmra.mxu2 %vm470_vm0, %v2695_v47 }
  0xb8   : > { %2134 = vmatmul.msk.f32.gmra.mxu3 %vm470_vm0, %v2701_v48 }
  0xb9   : > { %v2707_v49 = vpop.f32.mrf.mxu2  ;;  %v712_v50 = vpop.f32.mrf.mxu1 }
  0xba   : > { %v608_v52 = vpop.f32.mrf.mxu0  ;;  %v713_v60 = vadd.f32 %v712_v50, %v599_v20 }
  0xbb   : > { %v2711_v59 = vpop.f32.mrf.mxu3 }
  0xbc   : > { %2155 = vmatmul.msk.f32.vlgmr.msra.gmra.mxu1 %vm470_vm0, %v2498_v53  ;;  %2152 = vmatmul.msk.f32.gmra.mxu0 %vm470_vm0, %v2709_v51 }
  0xbe   : > { %2173 = vmatmul.msk.f32.vlgmr.msra.gmra.mxu2 %vm470_vm0, %v2502_v54 }
  0xc0   : > { %2191 = vmatmul.msk.f32.vlgmr.msra.gmra.mxu3 %vm470_vm0, %v2407_v21 }
  0xc1   : > { %v844_v61 = vpop.f32.mrf.mxu2  ;;  %v715_v0 = vpop.f32.mrf.mxu1 }
  0xc2   : > { %v892_v11 = vadd.f32 %v844_v61, %v713_v60  ;;  %v1140_v14 = vpop.f32.mrf.mxu0  ;;  %v716_v54 = vadd.f32 %v715_v0, %v602_v29 }
  0xc3   : > { %v992_v46 = vpop.f32.mrf.mxu3 }
  0xc4   : > { %v1040_v30 = vadd.f32 %v992_v46, %v892_v11  ;;  %2156 = vmatmul.msk.f32.gmra.mxu1 %vm470_vm0, %v2508_v55  ;;  %2209 = vmatmul.msk.f32.vlgmr.msra.gmra.mxu0 %vm470_vm0, %v2519_v57 }
  0xc6   : > { %v2725_v53 = vadd.f32 %v1140_v14, %v1040_v30  ;;  %2174 = vmatmul.msk.f32.gmra.mxu2 %vm470_vm0, %v2513_v56 }
  0xc8   : > { %2192 = vmatmul.msk.f32.gmra.mxu3 %vm470_vm0, %v2445_v33 }
  0xc9   : > { %v847_v21 = vpop.f32.mrf.mxu2  ;;  %v718_v20 = vpop.f32.mrf.mxu1 }
  0xca   : > { %v893_v50 = vadd.f32 %v847_v21, %v716_v54  ;;  %v1143_v60 = vpop.f32.mrf.mxu0  ;;  %v719_v56 = vadd.f32 %v718_v20, %v605_v43 }
  0xcb   : > { %v995_v46 = vpop.f32.mrf.mxu3 }
  0xcc   : > { %v1041_v61 = vadd.f32 %v995_v46, %v893_v50  ;;  %2157 = vmatmul.msk.f32.gmra.mxu1 %vm470_vm0, %v2519_v57  ;;  %2210 = vmatmul.msk.f32.gmra.mxu0 %vm470_vm0, %v2540_v62 }
  0xce   : > { %v2735_v55 = vadd.f32 %v1143_v60, %v1041_v61  ;;  %2175 = vmatmul.msk.f32.gmra.mxu2 %vm470_vm0, %v2525_v58 }
  0xd0   : > { %2193 = vmatmul.msk.f32.gmra.mxu3 %vm470_vm0, %v2464_v38 }
  0xd1   : > { %v850_v33 = vpop.f32.mrf.mxu2  ;;  %v721_v29 = vpop.f32.mrf.mxu1 }
  0xd2   : > { %v894_v30 = vadd.f32 %v850_v33, %v719_v56  ;;  %v1146_v0 = vpop.f32.mrf.mxu0  ;;  %v722_v58 = vadd.f32 %v721_v29, %v608_v52 }
  0xd3   : > { %v998_v11 = vpop.f32.mrf.mxu3 }
  0xd4   : > { %v1042_v14 = vadd.f32 %v998_v11, %v894_v30  ;;  %2158 = vmatmul.msk.f32.gmra.mxu1 %vm470_vm0, %v2540_v62  ;;  %2211 = vmatmul.msk.f32.gmra.mxu0 %vm470_vm0, %v2555_v1 }
  0xd6   : > { %v2745_v57 = vadd.f32 %v1146_v0, %v1042_v14  ;;  %2176 = vmatmul.msk.f32.gmra.mxu2 %vm470_vm0, %v2546_v63 }
  0xd8   : > { %2194 = vmatmul.msk.f32.gmra.mxu3 %vm470_vm0, %v2477_v42 }
  0xd9   : > { %v853_v38 = vpop.f32.mrf.mxu2  ;;  %v724_v43 = vpop.f32.mrf.mxu1 }
  0xda   : > { %v895_v54 = vadd.f32 %v853_v38, %v722_v58  ;;  %v1149_v21 = vpop.f32.mrf.mxu0  ;;  %v725_v63 = vadd.f32 %v724_v43, %v2637_v15 }
  0xdb   : > { %v1001_v20 = vpop.f32.mrf.mxu3 }
  0xdc   : > { %v1043_v50 = vadd.f32 %v1001_v20, %v895_v54  ;;  %2159 = vmatmul.msk.f32.gmra.mxu1 %vm470_vm0, %v2555_v1  ;;  %2212 = vmatmul.msk.f32.gmra.mxu0 %vm470_vm0, %v2567_v3 }
  0xde   : > { %v2755_v62 = vadd.f32 %v1149_v21, %v1043_v50  ;;  %2177 = vmatmul.msk.f32.gmra.mxu2 %vm470_vm0, %v2561_v2 }
  0xe0   : > { %2195 = vmatmul.msk.f32.gmra.mxu3 %vm470_vm0, %v2415_v24 }
  0xe1   : > { %v856_v42 = vpop.f32.mrf.mxu2  ;;  %v727_v52 = vpop.f32.mrf.mxu1 }
  0xe2   : > { %v896_v60 = vadd.f32 %v856_v42, %v725_v63  ;;  %v1152_v46 = vpop.f32.mrf.mxu0  ;;  %v728_v2 = vadd.f32 %v727_v52, %v2653_v19 }
  0xe3   : > { %v1004_v61 = vpop.f32.mrf.mxu3 }
  0xe4   : > { %v1044_v56 = vadd.f32 %v1004_v61, %v896_v60  ;;  %2160 = vmatmul.msk.f32.gmra.mxu1 %vm470_vm0, %v2567_v3  ;;  %2213 = vmatmul.msk.f32.gmra.mxu0 %vm470_vm0, %v2579_v5 }
  0xe6   : > { %v2766_v1 = vadd.f32 %v1152_v46, %v1044_v56  ;;  %2178 = vmatmul.msk.f32.gmra.mxu2 %vm470_vm0, %v2573_v4 }
  0xe8   : > { %2196 = vmatmul.msk.f32.gmra.mxu3 %vm470_vm0, %v2449_v34 }
  0xe9   : > { %v859_v24 = vpop.f32.mrf.mxu2  ;;  %v730_v15 = vpop.f32.mrf.mxu1 }
  0xea   : > { %v897_v33 = vadd.f32 %v859_v24, %v728_v2  ;;  %v1155_v29 = vpop.f32.mrf.mxu0  ;;  %v731_v4 = vadd.f32 %v730_v15, %v2671_v27 }
  0xeb   : > { %v1007_v30 = vpop.f32.mrf.mxu3 }
  0xec   : > { %v1045_v0 = vadd.f32 %v1007_v30, %v897_v33  ;;  %2161 = vmatmul.msk.f32.gmra.mxu1 %vm470_vm0, %v2579_v5  ;;  %2214 = vmatmul.msk.f32.gmra.mxu0 %vm470_vm0, %v2591_v7 }
  0xee   : > { %v2777_v3 = vadd.f32 %v1155_v29, %v1045_v0  ;;  %2179 = vmatmul.msk.f32.gmra.mxu2 %vm470_vm0, %v2585_v6 }
  0xf0   : > { %2197 = vmatmul.msk.f32.gmra.mxu3 %vm470_vm0, %v2466_v40 }
  0xf1   : > { %v862_v34 = vpop.f32.mrf.mxu2  ;;  %v733_v19 = vpop.f32.mrf.mxu1 }
  0xf2   : > { %v898_v11 = vadd.f32 %v862_v34, %v731_v4  ;;  %v1158_v14 = vpop.f32.mrf.mxu0  ;;  %v734_v6 = vadd.f32 %v733_v19, %v2689_v37 }
  0xf3   : > { %v1010_v58 = vpop.f32.mrf.mxu3 }
  0xf4   : > { %v1046_v38 = vadd.f32 %v1010_v58, %v898_v11  ;;  %2162 = vmatmul.msk.f32.gmra.mxu1 %vm470_vm0, %v2591_v7  ;;  %2215 = vmatmul.msk.f32.gmra.mxu0 %vm470_vm0, %v2603_v9  ;;  %v1660_v11 = vld [vmem:[#allocation2 + $0x82] sm:$0xff] }
  0xf6   : > { %v2788_v5 = vadd.f32 %v1158_v14, %v1046_v38  ;;  %2180 = vmatmul.msk.f32.gmra.mxu2 %vm470_vm0, %v2597_v8 }
  0xf8   : > { %2198 = vmatmul.msk.f32.gmra.mxu3 %vm470_vm0, %v2479_v44 }
  0xf9   : > { %v865_v40 = vpop.f32.mrf.mxu2  ;;  %v736_v27 = vpop.f32.mrf.mxu1 }
  0xfa   : > { %v899_v43 = vadd.f32 %v865_v40, %v734_v6  ;;  %v1161_v54 = vpop.f32.mrf.mxu0  ;;  %v737_v44 = vadd.f32 %v736_v27, %v2651_v18  ;;  %v1661_v27 = vld [vmem:[#allocation2 + $0x8a] sm:$0xff] }
  0xfb   : > { %v1013_v21 = vpop.f32.mrf.mxu3 }
  0xfc   : > { %v1047_v20 = vadd.f32 %v1013_v21, %v899_v43  ;;  %2163 = vmatmul.msk.f32.gmra.mxu1 %vm470_vm0, %v2603_v9  ;;  %2216 = vmatmul.msk.f32.gmra.mxu0 %vm470_vm0, %v2618_v12 }
  0xfe   : > { %v2799_v7 = vadd.f32 %v1161_v54, %v1047_v20  ;;  %2181 = vmatmul.msk.f32.gmra.mxu2 %vm470_vm0, %v2609_v10  ;;  %v492_v10 = vld [vmem:[%s2627_s10 + $0x8] sm:$0xff]  ;;  %v1366_v20 = vld [vmem:[#allocation2 + $0x90] sm:$0xff] }
  0xff   : > { %494 = vst.msk [vmem:[#allocation2 + $0x98] sm:$0xff] %vm470_vm0, %v492_v10 }
 0x100   : > { %2199 = vmatmul.msk.f32.gmra.mxu3 %vm470_vm0, %v2431_v28 }
 0x101   : > { %v868_v8 = vpop.f32.mrf.mxu2  ;;  %v739_v37 = vpop.f32.mrf.mxu1 }
 0x102   : > { %v900_v50 = vadd.f32 %v868_v8, %v737_v44  ;;  %v1164_v63 = vpop.f32.mrf.mxu0  ;;  %v740_v28 = vadd.f32 %v739_v37, %v2669_v26  ;;  %v2292_v26 = vmov 0.0  }
 0x103   : > { %v1016_v42 = vpop.f32.mrf.mxu3  ;;  %495 = vst.msk [vmem:[#allocation2 + $0xa0] sm:$0xff] %vm470_vm0, %v2292_v26 }
 0x104   : > { %v1048_v9 = vadd.f32 %v1016_v42, %v900_v50  ;;  %2164 = vmatmul.msk.f32.gmra.mxu1 %vm470_vm0, %v2618_v12  ;;  %2217 = vmatmul.msk.f32.gmra.mxu0 %vm470_vm0, %v2639_v16 }
 0x106   : > { %v2810_v52 = vadd.f32 %v1164_v63, %v1048_v9  ;;  %2182 = vmatmul.msk.f32.gmra.mxu2 %vm470_vm0, %v2629_v13  ;;  %v1514_v44 = vld [vmem:[#allocation2 + $0x91] sm:$0xff] }
 0x107   : > { %v1662_v63 = vld [vmem:[#allocation2 + $0x92] sm:$0xff] }
 0x108   : > { %2200 = vmatmul.msk.f32.gmra.mxu3 %vm470_vm0, %v2455_v36 }
 0x109   : > { %v871_v18 = vpop.f32.mrf.mxu2  ;;  %v742_v60 = vpop.f32.mrf.mxu1 }
 0x10a   : > { %v901_v46 = vadd.f32 %v871_v18, %v740_v28  ;;  %v1167_v12 = vpop.f32.mrf.mxu0  ;;  %v743_v36 = vadd.f32 %v742_v60, %v2687_v35  ;;  %v1367_v28 = vld [vmem:[#allocation2 + $0x98] sm:$0xff] }
 0x10b   : > { %v1019_v61 = vpop.f32.mrf.mxu3  ;;  %v1515_v60 = vld [vmem:[#allocation2 + $0x99] sm:$0xff] }
 0x10c   : > { %v1049_v56 = vadd.f32 %v1019_v61, %v901_v46  ;;  %2165 = vmatmul.msk.f32.gmra.mxu1 %vm470_vm0, %v2639_v16  ;;  %2218 = vmatmul.msk.f32.gmra.mxu0 %vm470_vm0, %v2657_v23 }
 0x10e   : > { %v2823_v13 = vadd.f32 %v1167_v12, %v1049_v56  ;;  %2183 = vmatmul.msk.f32.gmra.mxu2 %vm470_vm0, %v2645_v17 }
 0x110   : > { %2201 = vmatmul.msk.f32.gmra.mxu3 %vm470_vm0, %v2471_v41 }
 0x111   : > { %v874_v2 = vpop.f32.mrf.mxu2  ;;  %v745_v24 = vpop.f32.mrf.mxu1 }
 0x112   : > { %v902_v15 = vadd.f32 %v874_v2, %v743_v36  ;;  %v1170_v16 = vpop.f32.mrf.mxu0  ;;  %v746_v41 = vadd.f32 %v745_v24, %v2707_v49  ;;  %v1663_v36 = vld [vmem:[#allocation2 + $0x9a] sm:$0xff] }
 0x113   : > { %v1022_v33 = vpop.f32.mrf.mxu3 }
 0x114   : > { %v1050_v29 = vadd.f32 %v1022_v33, %v902_v15  ;;  %2166 = vmatmul.msk.f32.gmra.mxu1 %vm470_vm0, %v2657_v23  ;;  %2219 = vmatmul.msk.f32.gmra.mxu0 %vm470_vm0, %v2675_v31 }
 0x116   : > { %v2835_v17 = vadd.f32 %v1170_v16, %v1050_v29  ;;  %2184 = vmatmul.msk.f32.gmra.mxu2 %vm470_vm0, %v2663_v25 }
 0x118   : > { %2202 = vmatmul.msk.f32.gmra.mxu3 %vm470_vm0, %v2484_v45 }
 0x119   : > { %v877_v35 = vpop.f32.mrf.mxu2  ;;  %v748_v30 = vpop.f32.mrf.mxu1 }
 0x11a   : > { %v903_v0 = vadd.f32 %v877_v35, %v746_v41  ;;  %v1173_v4 = vpop.f32.mrf.mxu0  ;;  %v749_v25 = vadd.f32 %v748_v30, %v2655_v22  ;;  %v2994_v22 = vld [vmem:[#allocation3_spill] sm:$0xff] }
 0x11b   : > { %v1025_v34 = vpop.f32.mrf.mxu3 }
 0x11c   : > { %v1051_v19 = vadd.f32 %v1025_v34, %v903_v0  ;;  %2167 = vmatmul.msk.f32.gmra.mxu1 %vm470_vm0, %v2675_v31  ;;  %2220 = vmatmul.msk.f32.gmra.mxu0 %vm470_vm0, %v2695_v47 }
 0x11e   : > { %v2846_v23 = vadd.f32 %v1173_v4, %v1051_v19  ;;  %2185 = vmatmul.msk.f32.gmra.mxu2 %vm470_vm0, %v2681_v32  ;;  %v2890_v4 = vld [vmem:[%s2989_s4] ss:$0 sm:$0xff] }
 0x120   : > { %2203 = vmatmul.msk.f32.gmra.mxu3 %vm470_vm0, %v2691_v39 }
 0x121   : > { %v880_v45 = vpop.f32.mrf.mxu2  ;;  %v751_v49 = vpop.f32.mrf.mxu1 }
 0x122   : > { %v904_v14 = vadd.f32 %v880_v45, %v749_v25  ;;  %v1176_v58 = vpop.f32.mrf.mxu0  ;;  %v752_v32 = vadd.f32 %v751_v49, %v2994_v22 }
 0x123   : > { %v1028_v38 = vpop.f32.mrf.mxu3 }
 0x124   : > { %v1052_v31 = vadd.f32 %v1028_v38, %v904_v14  ;;  %2168 = vmatmul.msk.f32.gmra.mxu1 %vm470_vm0, %v2695_v47  ;;  %2221 = vmatmul.msk.f32.gmra.mxu0 %vm470_vm0, %v1660_v11 }
 0x126   : > { %v2856_v6 = vadd.f32 %v1176_v58, %v1052_v31  ;;  %2186 = vmatmul.msk.f32.gmra.mxu2 %vm470_vm0, %v2701_v48  ;;  %v2995_v48 = vld [vmem:[#allocation4_spill] sm:$0xff] }
 0x128   : > { %2204 = vmatmul.msk.f32.gmra.mxu3 %vm470_vm0, %v2709_v51 }
 0x129   : > { %v883_v39 = vpop.f32.mrf.mxu2  ;;  %v754_v40 = vpop.f32.mrf.mxu1 }
 0x12a   : > { %v905_v43 = vadd.f32 %v883_v39, %v752_v32  ;;  %v1179_v54 = vpop.f32.mrf.mxu0  ;;  %v755_v37 = vadd.f32 %v754_v40, %v2995_v48 }
 0x12b   : > { %v1031_v21 = vpop.f32.mrf.mxu3 }
 0x12c   : > { %v1053_v47 = vadd.f32 %v1031_v21, %v905_v43  ;;  %2169 = vmatmul.msk.f32.gmra.mxu1 %vm470_vm0, %v1660_v11  ;;  %2222 = vmatmul.msk.f32.gmra.mxu0 %vm470_vm0, %v1661_v27 }
 0x12e   : > { %v2865_v8 = vadd.f32 %v1179_v54, %v1053_v47  ;;  %2187 = vmatmul.msk.f32.gmra.mxu2 %vm470_vm0, %v1366_v20 }
 0x130   : > { %2205 = vmatmul.msk.f32.gmra.mxu3 %vm470_vm0, %v1514_v44 }
 0x131   : > { %v886_v51 = vpop.f32.mrf.mxu2  ;;  %v757_v50 = vpop.f32.mrf.mxu1 }
 0x132   : > { %v906_v42 = vadd.f32 %v886_v51, %v755_v37  ;;  %v1182_v9 = vpop.f32.mrf.mxu0  ;;  %v758_v12 = vadd.f32 %v757_v50, %v2711_v59 }
 0x133   : > { %v1034_v10 = vpop.f32.mrf.mxu3 }
 0x134   : > { %v1054_v18 = vadd.f32 %v1034_v10, %v906_v42  ;;  %2170 = vmatmul.msk.f32.gmra.mxu1 %vm470_vm0, %v1661_v27  ;;  %2223 = vmatmul.msk.f32.gmra.mxu0 %vm470_vm0, %v1662_v63  ;;  %v1818_v63 = vld [vmem:[%s2885_s12 + $0x10] sm:$0xff] }
 0x136   : > { %v2872_v46 = vadd.f32 %v1182_v9, %v1054_v18  ;;  %2188 = vmatmul.msk.f32.gmra.mxu2 %vm470_vm0, %v1367_v28 }
 0x138   : > { %2206 = vmatmul.msk.f32.gmra.mxu3 %vm470_vm0, %v1515_v60 }
 0x139   : > { %v889_v61 = vpop.f32.mrf.mxu2  ;;  %v1288_v56 = vpop.f32.mrf.mxu1 }
 0x13a   : > { %v907_v26 = vadd.f32 %v889_v61, %v758_v12  ;;  %v1185_v2 = vpop.f32.mrf.mxu0  ;;  %v1336_v33 = vadd.f32 %v1288_v56, %v2725_v53  ;;  %v1816_v53 = vld [vmem:[%s2885_s12] sm:$0xff] }
 0x13b   : > { %v1037_v24 = vpop.f32.mrf.mxu3 }
 0x13c   : > { %v1055_v15 = vadd.f32 %v1037_v24, %v907_v26  ;;  %2224 = vmatmul.msk.f32.gmra.mxu0 %vm470_vm0, %v1663_v36 }
 0x13e   : > { %v2878_v16 = vadd.f32 %v1185_v2, %v1055_v15  ;;  %v1819_v2 = vld [vmem:[%s2885_s12 + $0x18] sm:$0xff] }
 0x141   : > { %v1436_v29 = vpop.f32.mrf.mxu2  ;;  %v1291_v41 = vpop.f32.mrf.mxu1 }
 0x142   : > { %v1484_v35 = vadd.f32 %v1436_v29, %v1336_v33  ;;  %v1732_v59 = vpop.f32.mrf.mxu0  ;;  %v1337_v19 = vadd.f32 %v1291_v41, %v2735_v55  ;;  %v1817_v55 = vld [vmem:[%s2885_s12 + $0x8] sm:$0xff] }
 0x143   : > { %v1584_v30 = vpop.f32.mrf.mxu3 }
 0x144   : > { %v1632_v0 = vadd.f32 %v1584_v30, %v1484_v35 }
 0x146   : > { %v1780_v34 = vadd.f32 %v1732_v59, %v1632_v0 }
 0x148   : > { %v1800_v25 = vadd.f32 %v2890_v4, %v1780_v34 }
 0x149   : > { %v1439_v45 = vpop.f32.mrf.mxu2  ;;  %v1294_v49 = vpop.f32.mrf.mxu1 }
 0x14a   : > { %v1832_v11 = vadd.f32 %v1816_v53, %v1800_v25  ;;  %v1485_v14 = vadd.f32 %v1439_v45, %v1337_v19  ;;  %v1735_v58 = vpop.f32.mrf.mxu0  ;;  %v1338_v40 = vadd.f32 %v1294_v49, %v2745_v57  ;;  %v1820_v19 = vld [vmem:[%s2885_s12 + $0x20] sm:$0xff] }
 0x14b   : > { %v1587_v38 = vpop.f32.mrf.mxu3 }
 0x14c   : > { %vm1848_vm1 = vcmp.ge.f32.partialorder %v1832_v11, 0.0  ;;  %v1864_v31 = vmul.f32 0.1, %v1832_v11  ;;  %v1633_v22 = vadd.f32 %v1587_v38, %v1485_v14 }
 0x14e   : > { %v1880_v32 = vsel %vm1848_vm1, %v1832_v11, %v1864_v31  ;;  %v1781_v39 = vadd.f32 %v1735_v58, %v1633_v22 }
 0x14f   : > { %1896 = vst.msk [vmem:[%s2898_s17] sm:$0xff] %vm470_vm0, %v1880_v32 }
 0x150   : > { %v1801_v27 = vadd.f32 %v2890_v4, %v1781_v39 }
 0x151   : > { %v1442_v43 = vpop.f32.mrf.mxu2  ;;  %v1297_v54 = vpop.f32.mrf.mxu1 }
 0x152   : > { %v1833_v21 = vadd.f32 %v1817_v55, %v1801_v27  ;;  %v1486_v20 = vadd.f32 %v1442_v43, %v1338_v40  ;;  %v1738_v47 = vpop.f32.mrf.mxu0  ;;  %v1339_v57 = vadd.f32 %v1297_v54, %v2755_v62  ;;  %v1821_v55 = vld [vmem:[%s2885_s12 + $0x28] sm:$0xff] }
 0x153   : > { %v1590_v44 = vpop.f32.mrf.mxu3 }
 0x154   : > { %vm1849_vm2 = vcmp.ge.f32.partialorder %v1833_v21, 0.0  ;;  %v1865_v48 = vmul.f32 0.1, %v1833_v21  ;;  %v1634_v37 = vadd.f32 %v1590_v44, %v1486_v20 }
 0x156   : > { %v1881_v51 = vsel %vm1849_vm2, %v1833_v21, %v1865_v48  ;;  %v1782_v50 = vadd.f32 %v1738_v47, %v1634_v37 }
 0x157   : > { %1897 = vst.msk [vmem:[%s2898_s17 + $0x8] sm:$0xff] %vm470_vm0, %v1881_v51 }
 0x158   : > { %v1802_v42 = vadd.f32 %v2890_v4, %v1782_v50  ;;  %v1822_v50 = vld [vmem:[%s2885_s12 + $0x30] sm:$0xff] }
 0x159   : > { %v1445_v9 = vpop.f32.mrf.mxu2  ;;  %v1300_v10 = vpop.f32.mrf.mxu1 }
 0x15a   : > { %v1834_v28 = vadd.f32 %v1818_v63, %v1802_v42  ;;  %v1487_v18 = vadd.f32 %v1445_v9, %v1339_v57  ;;  %v1741_v60 = vpop.f32.mrf.mxu0  ;;  %v1340_v62 = vadd.f32 %v1300_v10, %v2766_v1 }
 0x15b   : > { %v1593_v12 = vpop.f32.mrf.mxu3 }
 0x15c   : > { %vm1850_vm3 = vcmp.ge.f32.partialorder %v1834_v28, 0.0  ;;  %v1866_v61 = vmul.f32 0.1, %v1834_v28  ;;  %v1635_v56 = vadd.f32 %v1593_v12, %v1487_v18 }
 0x15e   : > { %v1882_v36 = vsel %vm1850_vm3, %v1834_v28, %v1866_v61  ;;  %v1783_v26 = vadd.f32 %v1741_v60, %v1635_v56 }
 0x15f   : > { %1898 = vst.msk [vmem:[%s2898_s17 + $0x10] sm:$0xff] %vm470_vm0, %v1882_v36  ;;  %v1823_v36 = vld [vmem:[%s2885_s12 + $0x38] sm:$0xff] }
 0x160   : > { %v1803_v24 = vadd.f32 %v2890_v4, %v1783_v26 }
 0x161   : > { %v1448_v15 = vpop.f32.mrf.mxu2  ;;  %v1303_v33 = vpop.f32.mrf.mxu1 }
 0x162   : > { %v1835_v29 = vadd.f32 %v1819_v2, %v1803_v24  ;;  %v1488_v41 = vadd.f32 %v1448_v15, %v1340_v62  ;;  %v1744_v35 = vpop.f32.mrf.mxu0  ;;  %v1341_v1 = vadd.f32 %v1303_v33, %v2777_v3 }
 0x163   : > { %v1596_v59 = vpop.f32.mrf.mxu3 }
 0x164   : > { %vm1851_vm4 = vcmp.ge.f32.partialorder %v1835_v29, 0.0  ;;  %v1867_v30 = vmul.f32 0.1, %v1835_v29  ;;  %v1636_v0 = vadd.f32 %v1596_v59, %v1488_v41 }
 0x166   : > { %v1883_v34 = vsel %vm1851_vm4, %v1835_v29, %v1867_v30  ;;  %v1784_v53 = vadd.f32 %v1744_v35, %v1636_v0  ;;  %v1824_v0 = vld [vmem:[%s2885_s12 + $0x40] sm:$0xff] }
 0x167   : > { %1899 = vst.msk [vmem:[%s2898_s17 + $0x18] sm:$0xff] %vm470_vm0, %v1883_v34 }
 0x168   : > { %v1804_v25 = vadd.f32 %v2890_v4, %v1784_v53 }
 0x169   : > { %v1451_v45 = vpop.f32.mrf.mxu2  ;;  %v1306_v49 = vpop.f32.mrf.mxu1 }
 0x16a   : > { %v1836_v11 = vadd.f32 %v1820_v19, %v1804_v25  ;;  %v1489_v14 = vadd.f32 %v1451_v45, %v1341_v1  ;;  %v1747_v58 = vpop.f32.mrf.mxu0  ;;  %v1342_v3 = vadd.f32 %v1306_v49, %v2788_v5 }
 0x16b   : > { %v1599_v38 = vpop.f32.mrf.mxu3 }
 0x16c   : > { %vm1852_vm5 = vcmp.ge.f32.partialorder %v1836_v11, 0.0  ;;  %v1868_v31 = vmul.f32 0.1, %v1836_v11  ;;  %v1637_v22 = vadd.f32 %v1599_v38, %v1489_v14 }
 0x16e   : > { %v1884_v32 = vsel %vm1852_vm5, %v1836_v11, %v1868_v31  ;;  %v1785_v39 = vadd.f32 %v1747_v58, %v1637_v22  ;;  %v1825_v31 = vld [vmem:[%s2885_s12 + $0x48] sm:$0xff] }
 0x16f   : > { %1900 = vst.msk [vmem:[%s2898_s17 + $0x20] sm:$0xff] %vm470_vm0, %v1884_v32 }
 0x170   : > { %v1805_v40 = vadd.f32 %v2890_v4, %v1785_v39 }
 0x171   : > { %v1454_v27 = vpop.f32.mrf.mxu2  ;;  %v1309_v43 = vpop.f32.mrf.mxu1 }
 0x172   : > { %v1837_v54 = vadd.f32 %v1821_v55, %v1805_v40  ;;  %v1490_v21 = vadd.f32 %v1454_v27, %v1342_v3  ;;  %v1750_v20 = vpop.f32.mrf.mxu0  ;;  %v1343_v5 = vadd.f32 %v1309_v43, %v2799_v7 }
 0x173   : > { %v1602_v47 = vpop.f32.mrf.mxu3 }
 0x174   : > { %vm1853_vm6 = vcmp.ge.f32.partialorder %v1837_v54, 0.0  ;;  %v1869_v44 = vmul.f32 0.1, %v1837_v54  ;;  %v1638_v48 = vadd.f32 %v1602_v47, %v1490_v21  ;;  %v1826_v47 = vld [vmem:[%s2885_s12 + $0x50] sm:$0xff] }
 0x176   : > { %v1885_v37 = vsel %vm1853_vm6, %v1837_v54, %v1869_v44  ;;  %v1786_v51 = vadd.f32 %v1750_v20, %v1638_v48 }
 0x177   : > { %1901 = vst.msk [vmem:[%s2898_s17 + $0x28] sm:$0xff] %vm470_vm0, %v1885_v37 }
 0x178   : > { %v1806_v63 = vadd.f32 %v2890_v4, %v1786_v51 }
 0x179   : > { %v1457_v57 = vpop.f32.mrf.mxu2  ;;  %v1312_v42 = vpop.f32.mrf.mxu1 }
 0x17a   : > { %v1838_v9 = vadd.f32 %v1822_v50, %v1806_v63  ;;  %v1491_v10 = vadd.f32 %v1457_v57, %v1343_v5  ;;  %v1753_v28 = vpop.f32.mrf.mxu0  ;;  %v1344_v7 = vadd.f32 %v1312_v42, %v2810_v52 }
 0x17b   : > { %v1605_v18 = vpop.f32.mrf.mxu3 }
 0x17c   : > { %vm1854_vm7 = vcmp.ge.f32.partialorder %v1838_v9, 0.0  ;;  %v1870_v60 = vmul.f32 0.1, %v1838_v9  ;;  %v1639_v12 = vadd.f32 %v1605_v18, %v1491_v10 }
 0x17e   : > { %v1886_v61 = vsel %vm1854_vm7, %v1838_v9, %v1870_v60  ;;  %v1787_v56 = vadd.f32 %v1753_v28, %v1639_v12  ;;  %v1827_v28 = vld [vmem:[%s2885_s12 + $0x58] sm:$0xff] }
 0x17f   : > { %1902 = vst.msk [vmem:[%s2898_s17 + $0x30] sm:$0xff] %vm470_vm0, %v1886_v61 }
 0x180   : > { %v1807_v26 = vadd.f32 %v2890_v4, %v1787_v56 }
 0x181   : > { %v1460_v2 = vpop.f32.mrf.mxu2  ;;  %v1315_v62 = vpop.f32.mrf.mxu1 }
 0x182   : > { %v1839_v24 = vadd.f32 %v1823_v36, %v1807_v26  ;;  %v1492_v15 = vadd.f32 %v1460_v2, %v1344_v7  ;;  %v1756_v33 = vpop.f32.mrf.mxu0  ;;  %v1345_v52 = vadd.f32 %v1315_v62, %v2823_v13 }
 0x183   : > { %v1608_v29 = vpop.f32.mrf.mxu3 }
 0x184   : > { %vm1855_vm8 = vcmp.ge.f32.partialorder %v1839_v24, 0.0  ;;  %v1871_v41 = vmul.f32 0.1, %v1839_v24  ;;  %v1640_v35 = vadd.f32 %v1608_v29, %v1492_v15  ;;  %v1828_v15 = vld [vmem:[%s2885_s12 + $0x60] sm:$0xff] }
 0x186   : > { %v1887_v59 = vsel %vm1855_vm8, %v1839_v24, %v1871_v41  ;;  %v1788_v30 = vadd.f32 %v1756_v33, %v1640_v35 }
 0x187   : > { %1903 = vst.msk [vmem:[%s2898_s17 + $0x38] sm:$0xff] %vm470_vm0, %v1887_v59 }
 0x188   : > { %v1808_v34 = vadd.f32 %v2890_v4, %v1788_v30 }
 0x189   : > { %v1463_v53 = vpop.f32.mrf.mxu2  ;;  %v1318_v19 = vpop.f32.mrf.mxu1 }
 0x18a   : > { %v1840_v1 = vadd.f32 %v1824_v0, %v1808_v34  ;;  %v1493_v25 = vadd.f32 %v1463_v53, %v1345_v52  ;;  %v1759_v45 = vpop.f32.mrf.mxu0  ;;  %v1346_v13 = vadd.f32 %v1318_v19, %v2835_v17 }
 0x18b   : > { %v1611_v49 = vpop.f32.mrf.mxu3 }
 0x18c   : > { %vm1856_vm9 = vcmp.ge.f32.partialorder %v1840_v1, 0.0  ;;  %v1872_v11 = vmul.f32 0.1, %v1840_v1  ;;  %v1641_v14 = vadd.f32 %v1611_v49, %v1493_v25 }
 0x18e   : > { %v1888_v58 = vsel %vm1856_vm9, %v1840_v1, %v1872_v11  ;;  %v1789_v38 = vadd.f32 %v1759_v45, %v1641_v14  ;;  %v1829_v1 = vld [vmem:[%s2885_s12 + $0x68] sm:$0xff] }
 0x18f   : > { %1904 = vst.msk [vmem:[%s2898_s17 + $0x40] sm:$0xff] %vm470_vm0, %v1888_v58 }
 0x190   : > { %v1809_v22 = vadd.f32 %v2890_v4, %v1789_v38 }
 0x191   : > { %v1466_v32 = vpop.f32.mrf.mxu2  ;;  %v1321_v39 = vpop.f32.mrf.mxu1 }
 0x192   : > { %v1841_v55 = vadd.f32 %v1825_v31, %v1809_v22  ;;  %v1494_v3 = vadd.f32 %v1466_v32, %v1346_v13  ;;  %v1762_v40 = vpop.f32.mrf.mxu0  ;;  %v1347_v17 = vadd.f32 %v1321_v39, %v2846_v23  ;;  %v1830_v39 = vld [vmem:[%s2885_s12 + $0x70] sm:$0xff] }
 0x193   : > { %v1614_v27 = vpop.f32.mrf.mxu3 }
 0x194   : > { %vm1857_vm10 = vcmp.ge.f32.partialorder %v1841_v55, 0.0  ;;  %v1873_v43 = vmul.f32 0.1, %v1841_v55  ;;  %v1642_v54 = vadd.f32 %v1614_v27, %v1494_v3 }
 0x196   : > { %v1889_v21 = vsel %vm1857_vm10, %v1841_v55, %v1873_v43  ;;  %v1790_v20 = vadd.f32 %v1762_v40, %v1642_v54 }
 0x197   : > { %1905 = vst.msk [vmem:[%s2898_s17 + $0x48] sm:$0xff] %vm470_vm0, %v1889_v21 }
 0x198   : > { %v1810_v44 = vadd.f32 %v2890_v4, %v1790_v20 }
 0x199   : > { %v1469_v48 = vpop.f32.mrf.mxu2  ;;  %v1324_v37 = vpop.f32.mrf.mxu1 }
 0x19a   : > { %v1842_v51 = vadd.f32 %v1826_v47, %v1810_v44  ;;  %v1495_v50 = vadd.f32 %v1469_v48, %v1347_v17  ;;  %v1765_v5 = vpop.f32.mrf.mxu0  ;;  %v1348_v23 = vadd.f32 %v1324_v37, %v2856_v6  ;;  %v1831_v44 = vld [vmem:[%s2885_s12 + $0x78] sm:$0xff] }
 0x19b   : > { %v1617_v63 = vpop.f32.mrf.mxu3 }
 0x19c   : > { %vm1858_vm11 = vcmp.ge.f32.partialorder %v1842_v51, 0.0  ;;  %v1874_v57 = vmul.f32 0.1, %v1842_v51  ;;  %v1643_v42 = vadd.f32 %v1617_v63, %v1495_v50 }
 0x19e   : > { %v1890_v9 = vsel %vm1858_vm11, %v1842_v51, %v1874_v57  ;;  %v1791_v10 = vadd.f32 %v1765_v5, %v1643_v42 }
 0x19f   : > { %1906 = vst.msk [vmem:[%s2898_s17 + $0x50] sm:$0xff] %vm470_vm0, %v1890_v9 }
 0x1a0   : > { %v1811_v18 = vadd.f32 %v2890_v4, %v1791_v10 }
 0x1a1   : > { %v1472_v60 = vpop.f32.mrf.mxu2  ;;  %v1327_v12 = vpop.f32.mrf.mxu1 }
 0x1a2   : > { %v1843_v61 = vadd.f32 %v1827_v28, %v1811_v18  ;;  %v1496_v56 = vadd.f32 %v1472_v60, %v1348_v23  ;;  %v1768_v36 = vpop.f32.mrf.mxu0  ;;  %v1349_v6 = vadd.f32 %v1327_v12, %v2865_v8 }
 0x1a3   : > { %v1620_v7 = vpop.f32.mrf.mxu3 }
 0x1a4   : > { %vm1859_vm12 = vcmp.ge.f32.partialorder %v1843_v61, 0.0  ;;  %v1875_v26 = vmul.f32 0.1, %v1843_v61  ;;  %v1644_v2 = vadd.f32 %v1620_v7, %v1496_v56 }
 0x1a6   : > { %v1891_v62 = vsel %vm1859_vm12, %v1843_v61, %v1875_v26  ;;  %v1792_v24 = vadd.f32 %v1768_v36, %v1644_v2 }
 0x1a7   : > { %1907 = vst.msk [vmem:[%s2898_s17 + $0x58] sm:$0xff] %vm470_vm0, %v1891_v62 }
 0x1a8   : > { %v1812_v33 = vadd.f32 %v2890_v4, %v1792_v24 }
 0x1a9   : > { %v1475_v29 = vpop.f32.mrf.mxu2  ;;  %v1330_v30 = vpop.f32.mrf.mxu1 }
 0x1aa   : > { %v1844_v41 = vadd.f32 %v1828_v15, %v1812_v33  ;;  %v1497_v35 = vadd.f32 %v1475_v29, %v1349_v6  ;;  %v1771_v59 = vpop.f32.mrf.mxu0  ;;  %v1350_v8 = vadd.f32 %v1330_v30, %v2872_v46 }
 0x1ab   : > { %v1623_v0 = vpop.f32.mrf.mxu3 }
 0x1ac   : > { %vm1860_vm13 = vcmp.ge.f32.partialorder %v1844_v41, 0.0  ;;  %v1876_v52 = vmul.f32 0.1, %v1844_v41  ;;  %v1645_v34 = vadd.f32 %v1623_v0, %v1497_v35 }
 0x1ae   : > { %v1892_v53 = vsel %vm1860_vm13, %v1844_v41, %v1876_v52  ;;  %v1793_v19 = vadd.f32 %v1771_v59, %v1645_v34 }
 0x1af   : > { %1908 = vst.msk [vmem:[%s2898_s17 + $0x60] sm:$0xff] %vm470_vm0, %v1892_v53 }
 0x1b0   : > { %v1813_v25 = vadd.f32 %v2890_v4, %v1793_v19 }
 0x1b1   : > { %v1478_v45 = vpop.f32.mrf.mxu2  ;;  %v1333_v13 = vpop.f32.mrf.mxu1 }
 0x1b2   : > { %v1845_v49 = vadd.f32 %v1829_v1, %v1813_v25  ;;  %v1498_v11 = vadd.f32 %v1478_v45, %v1350_v8  ;;  %v1774_v14 = vpop.f32.mrf.mxu0  ;;  %v1351_v46 = vadd.f32 %v1333_v13, %v2878_v16 }
 0x1b3   : > { %v1626_v58 = vpop.f32.mrf.mxu3 }
 0x1b4   : > { %vm1861_vm14 = vcmp.ge.f32.partialorder %v1845_v49, 0.0  ;;  %v1877_v38 = vmul.f32 0.1, %v1845_v49  ;;  %v1646_v31 = vadd.f32 %v1626_v58, %v1498_v11 }
 0x1b6   : > { %v1893_v22 = vsel %vm1861_vm14, %v1845_v49, %v1877_v38  ;;  %v1794_v32 = vadd.f32 %v1774_v14, %v1646_v31 }
 0x1b7   : > { %1909 = vst.msk [vmem:[%s2898_s17 + $0x68] sm:$0xff] %vm470_vm0, %v1893_v22 }
 0x1b8   : > { %v1814_v55 = vadd.f32 %v2890_v4, %v1794_v32 }
 0x1b9   : > { %v1481_v3 = vpop.f32.mrf.mxu2 }
 0x1ba   : > { %v1846_v40 = vadd.f32 %v1830_v39, %v1814_v55  ;;  %v1499_v27 = vadd.f32 %v1481_v3, %v1351_v46  ;;  %v1777_v54 = vpop.f32.mrf.mxu0 }
 0x1bb   : > { %v1629_v43 = vpop.f32.mrf.mxu3 }
 0x1bc   : > { %vm1862_vm15 = vcmp.ge.f32.partialorder %v1846_v40, 0.0  ;;  %v1878_v21 = vmul.f32 0.1, %v1846_v40  ;;  %v1647_v20 = vadd.f32 %v1629_v43, %v1499_v27 }
 0x1be   : > { %v1894_v47 = vsel %vm1862_vm15, %v1846_v40, %v1878_v21  ;;  %v1795_v17 = vadd.f32 %v1777_v54, %v1647_v20 }
 0x1bf   : > { %1910 = vst.msk [vmem:[%s2898_s17 + $0x70] sm:$0xff] %vm470_vm0, %v1894_v47 }
 0x1c0   : > { %v1815_v48 = vadd.f32 %v2890_v4, %v1795_v17 }
 0x1c2   : > { %v1847_v37 = vadd.f32 %v1831_v44, %v1815_v48 }
 0x1c4   : > { %vm1863_vm1 = vcmp.ge.f32.partialorder %v1847_v37, 0.0  ;;  %v1879_v16 = vmul.f32 0.1, %v1847_v37 }
 0x1c6   : > { %v1895_v51 = vsel %vm1863_vm1, %v1847_v37, %v1879_v16 }
 0x1c7   : > { %1911 = vst.msk [vmem:[%s2898_s17 + $0x78] sm:$0xff] %vm470_vm0, %v1895_v51 }
 0x1c8 PF: > { %s16_s23 = sadd.s32 1, %s2290_s23   ;;  %s2996_s21 = smov %s2286_s22 }
 0x1c9   : > { %p13_p5 = scmp.ge.s32.totalorder %s16_s23, 4   ;;  %s2997_s22 = smov %s2999_s24 }
 0x1cb   :  { %15 = sbr.rel (!%p13_p5) target bundleno = 2 (0x2), region = 91 }

// kernel: mv_res_encoder_forward.13
= control target key start
LH: loop header
LB: loop body
LE: loop exit
PB: predicated region body
PF: predicated region fallthrough
CT: control target
= control target key end

     0   :  { %s957_s21 = smov 0   ;;  %s959_s22 = smov 0   ;;  %s1240_s0 = inlined_call_operand.vmem [shape: f32[2,40,128], index: 0, kind: input, shape index: {}, may-alias: {0,1}]   ;;  %s1241_s1 = inlined_call_operand.vmem [shape: f32[2,40,128], index: 1, kind: input, shape index: {}, may-alias: {0,1}]   ;;  %s1242_s2 = inlined_call_operand.vmem [shape: f32[4,128,16], index: 2, kind: input, shape index: {}]   ;;  %s1243_s3 = inlined_call_operand.vmem [shape: f32[1,16], index: 3, kind: input, shape index: {}]   ;;  %s1244_s4 = inlined_call_operand.vmem [shape: f32[16,16], index: 4, kind: input, shape index: {}]   ;;  %s1245_s5 = inlined_call_operand.vmem [shape: f32[1,16], index: 5, kind: input, shape index: {}]   ;;  %s1246_s6 = inlined_call_operand.vmem [shape: f32[2,32,16], index: 6, kind: output, shape index: {}]  }
   0x1   :  { %s961_s23 = smov 0  }
   0x2 LB: > { %s28_s24 = sadd.s32 1, %s915_s22  ;;  %p791_p0 = scmp.ge.s32.totalorder %s919_s23, 1  ;;  %s919_s23 = sphi %s961_s23, %s16_s23   ;;  %s915_s22 = sphi %s959_s22, %s1248_s22   ;;  %s911_s21 = sphi %s957_s21, %s1247_s21  }
   0x3   : > { %p30_p1 = scmp.ge.s32.totalorder %s28_s24, 2  ;;  %p264_p2 = scmp.lt.s32.totalorder %s919_s23, 3 }
   0x5   : > { %s1250_s24 = smov (%p30_p1, %s28_s24), 0  ;;  %p265_p3 = pnand %p791_p0, %p264_p2 }
   0x6   : > { %p321_p4 = scmp.lt.s32.totalorder (!%p265_p3), %s911_s21, 1 }
   0x7   : > { %268 = sbr.rel (%p265_p3) target bundleno = 364 (0x16c), region = 44 }
   0xc   : > { %v827_v0 = vld [vmem:[%s1242_s2 + $0x178] sm:$0xff]  ;;  %v826_v1 = vld [vmem:[%s1242_s2 + $0x170] sm:$0xff]  ;;  %v825_v5 = vld [vmem:[%s1242_s2 + $0x168] sm:$0xff]  ;;  %s1252_s21 = smov (!%p321_p4, %s911_s21), 1  ;;  %v921_v43 = vmov 0.0   ;;  %vm592_vm0 = vcmask 130048  }
   0xd   : > { %v843_v2 = vld [vmem:[%s1242_s2 + $0x1f8] sm:$0xff]  ;;  %487 = vmatpush.msra.mxu2 %v827_v0  ;;  %v842_v6 = vld [vmem:[%s1242_s2 + $0x1f0] sm:$0xff]  ;;  %v841_v9 = vld [vmem:[%s1242_s2 + $0x1e8] sm:$0xff]  ;;  %s859_s25 = smul.u32 40, %s1252_s21  ;;  %366 = vst [vmem:[#allocation2 + $0x28] sm:$0xff] %v921_v43  ;;  %s852_s8 = sshll.u32 %s1252_s21, 5 }
   0xe   : > { %541 = vmatpush.msra.mxu3 %v843_v2  ;;  %v811_v3 = vld [vmem:[%s1242_s2 + $0xf8] sm:$0xff]  ;;  %v810_v7 = vld [vmem:[%s1242_s2 + $0xf0] sm:$0xff]  ;;  %v809_v10 = vld [vmem:[%s1242_s2 + $0xe8] sm:$0xff]  ;;  %s1219_s9 = scalar_lea.vmem %s1246_s6, %s852_s8 }
   0xf   : > { %v386_v4 = vld [vmem:[%s1242_s2 + $0x78] sm:$0xff]  ;;  %408 = vmatpush.msra.mxu0 %v811_v3  ;;  %v385_v8 = vld [vmem:[%s1242_s2 + $0x70] sm:$0xff]  ;;  %488 = vmatpush.msra.mxu2 %v826_v1  ;;  %v824_v11 = vld [vmem:[%s1242_s2 + $0x160] sm:$0xff]  ;;  %s1096_s20 = scalar_lea.vmem %s1240_s0, %s859_s25  ;;  %s1098_s26 = sadd.s32 32, %s859_s25 }
  0x10   : > { %437 = vmatpush.msra.mxu1 %v386_v4  ;;  %542 = vmatpush.msra.mxu3 %v842_v6  ;;  %v384_v12 = vld [vmem:[%s1242_s2 + $0x68] sm:$0xff]  ;;  %v840_v13 = vld [vmem:[%s1242_s2 + $0x1e0] sm:$0xff]  ;;  %v823_v16 = vld [vmem:[%s1242_s2 + $0x158] sm:$0xff]  ;;  %s343_s18 = scalar_lea.vmem %s1241_s1, %s1098_s26 }
  0x11   : > { %409 = vmatpush.msra.mxu0 %v810_v7  ;;  %489 = vmatpush.msra.mxu2 %v825_v5  ;;  %v808_v14 = vld [vmem:[%s1242_s2 + $0xe0] sm:$0xff]  ;;  %v839_v17 = vld [vmem:[%s1242_s2 + $0x1d8] sm:$0xff]  ;;  %v822_v20 = vld [vmem:[%s1242_s2 + $0x150] sm:$0xff] }
  0x12   : > { %438 = vmatpush.msra.mxu1 %v385_v8  ;;  %543 = vmatpush.msra.mxu3 %v841_v9  ;;  %v383_v15 = vld [vmem:[%s1242_s2 + $0x60] sm:$0xff]  ;;  %v807_v18 = vld [vmem:[%s1242_s2 + $0xd8] sm:$0xff]  ;;  %v838_v21 = vld [vmem:[%s1242_s2 + $0x1d0] sm:$0xff] }
  0x13   : > { %410 = vmatpush.msra.mxu0 %v809_v10  ;;  %490 = vmatpush.msra.mxu2 %v824_v11  ;;  %v382_v19 = vld [vmem:[%s1242_s2 + $0x58] sm:$0xff]  ;;  %v806_v22 = vld [vmem:[%s1242_s2 + $0xd0] sm:$0xff]  ;;  %v821_v24 = vld [vmem:[%s1242_s2 + $0x148] sm:$0xff] }
  0x14   : > { %439 = vmatpush.msra.mxu1 %v384_v12  ;;  %544 = vmatpush.msra.mxu3 %v840_v13  ;;  %v381_v23 = vld [vmem:[%s1242_s2 + $0x50] sm:$0xff]  ;;  %v837_v25 = vld [vmem:[%s1242_s2 + $0x1c8] sm:$0xff]  ;;  %v820_v28 = vld [vmem:[%s1242_s2 + $0x140] sm:$0xff] }
  0x15   : > { %411 = vmatpush.msra.mxu0 %v808_v14  ;;  %491 = vmatpush.msra.mxu2 %v823_v16  ;;  %v805_v26 = vld [vmem:[%s1242_s2 + $0xc8] sm:$0xff]  ;;  %v836_v29 = vld [vmem:[%s1242_s2 + $0x1c0] sm:$0xff]  ;;  %v819_v32 = vld [vmem:[%s1242_s2 + $0x138] sm:$0xff] }
  0x16   : > { %440 = vmatpush.msra.mxu1 %v383_v15  ;;  %545 = vmatpush.msra.mxu3 %v839_v17  ;;  %v380_v27 = vld [vmem:[%s1242_s2 + $0x48] sm:$0xff]  ;;  %v804_v30 = vld [vmem:[%s1242_s2 + $0xc0] sm:$0xff]  ;;  %v835_v33 = vld [vmem:[%s1242_s2 + $0x1b8] sm:$0xff] }
  0x17   : > { %412 = vmatpush.msra.mxu0 %v807_v18  ;;  %492 = vmatpush.msra.mxu2 %v822_v20  ;;  %v379_v31 = vld [vmem:[%s1242_s2 + $0x40] sm:$0xff]  ;;  %v803_v34 = vld [vmem:[%s1242_s2 + $0xb8] sm:$0xff]  ;;  %v818_v36 = vld [vmem:[%s1242_s2 + $0x130] sm:$0xff] }
  0x18   : > { %441 = vmatpush.msra.mxu1 %v382_v19  ;;  %546 = vmatpush.msra.mxu3 %v838_v21  ;;  %v378_v35 = vld [vmem:[%s1242_s2 + $0x38] sm:$0xff]  ;;  %v834_v37 = vld [vmem:[%s1242_s2 + $0x1b0] sm:$0xff]  ;;  %v817_v40 = vld [vmem:[%s1242_s2 + $0x128] sm:$0xff] }
  0x19   : > { %413 = vmatpush.msra.mxu0 %v806_v22  ;;  %493 = vmatpush.msra.mxu2 %v821_v24  ;;  %v802_v38 = vld [vmem:[%s1242_s2 + $0xb0] sm:$0xff]  ;;  %v816_v41 = vld [vmem:[%s1242_s2 + $0x120] sm:$0xff]  ;;  %v833_v42 = vld [vmem:[%s1242_s2 + $0x1a8] sm:$0xff] }
  0x1a   : > { %442 = vmatpush.msra.mxu1 %v381_v23  ;;  %547 = vmatpush.msra.mxu3 %v837_v25  ;;  %v377_v39 = vld [vmem:[%s1242_s2 + $0x30] sm:$0xff]  ;;  %v801_v44 = vld [vmem:[%s1242_s2 + $0xa8] sm:$0xff]  ;;  %v815_v47 = vld [vmem:[%s1242_s2 + $0x118] sm:$0xff] }
  0x1b   : > { %414 = vmatpush.msra.mxu0 %v805_v26  ;;  %494 = vmatpush.msra.mxu2 %v820_v28  ;;  %v376_v45 = vld [vmem:[%s1242_s2 + $0x28] sm:$0xff]  ;;  %v832_v48 = vld [vmem:[%s1242_s2 + $0x1a0] sm:$0xff]  ;;  %v831_v51 = vld [vmem:[%s1242_s2 + $0x198] sm:$0xff] }
  0x1c   : > { %443 = vmatpush.msra.mxu1 %v380_v27  ;;  %548 = vmatpush.msra.mxu3 %v836_v29  ;;  %v1122_v46 = vld [vmem:[%s1096_s20 + $0x8] sm:$0xff]  ;;  %v800_v49 = vld [vmem:[%s1242_s2 + $0xa0] sm:$0xff]  ;;  %v799_v52 = vld [vmem:[%s1242_s2 + $0x98] sm:$0xff] }
  0x1d   : > { %415 = vmatpush.msra.mxu0 %v804_v30  ;;  %495 = vmatpush.msra.mxu2 %v819_v32  ;;  %v375_v50 = vld [vmem:[%s1242_s2 + $0x20] sm:$0xff]  ;;  %361 = vst [vmem:[#allocation2 + $0x8] sm:$0xff] %v1122_v46  ;;  %v358_v53 = vld [vmem:[%s1096_s20 + $0x10] sm:$0xff]  ;;  %v359_v55 = vld [vmem:[%s1096_s20 + $0x18] sm:$0xff] }
  0x1e   : > { %444 = vmatpush.msra.mxu1 %v379_v31  ;;  %549 = vmatpush.msra.mxu3 %v835_v33  ;;  %362 = vst [vmem:[#allocation2 + $0x10] sm:$0xff] %v358_v53  ;;  %v356_v54 = vld [vmem:[%s1096_s20] sm:$0xff]  ;;  %v374_v57 = vld [vmem:[%s1242_s2 + $0x18] sm:$0xff]  ;;  %v814_v58 = vld [vmem:[%s1242_s2 + $0x110] sm:$0xff] }
  0x1f   : > { %416 = vmatpush.msra.mxu0 %v803_v34  ;;  %496 = vmatpush.msra.mxu2 %v818_v36  ;;  %v364_v56 = vld [vmem:[%s343_s18] sm:$0xff]  ;;  %360 = vst [vmem:[#allocation2] sm:$0xff] %v356_v54  ;;  %v830_v59 = vld [vmem:[%s1242_s2 + $0x190] sm:$0xff]  ;;  %v813_v62 = vld [vmem:[%s1242_s2 + $0x108] sm:$0xff] }
  0x20   : > { %445 = vmatpush.msra.mxu1 %v378_v35  ;;  %550 = vmatpush.msra.mxu3 %v834_v37  ;;  %363 = vst [vmem:[#allocation2 + $0x18] sm:$0xff] %v359_v55  ;;  %v798_v60 = vld [vmem:[%s1242_s2 + $0x90] sm:$0xff]  ;;  %v829_v63 = vld [vmem:[%s1242_s2 + $0x188] sm:$0xff]  ;;  %v812_v2 = vld [vmem:[%s1242_s2 + $0x100] sm:$0xff] }
  0x21   : > { %417 = vmatpush.msra.mxu0 %v802_v38  ;;  %497 = vmatpush.msra.mxu2 %v817_v40  ;;  %v373_v61 = vld [vmem:[%s1242_s2 + $0x10] sm:$0xff]  ;;  %365 = vst [vmem:[#allocation2 + $0x20] sm:$0xff] %v364_v56  ;;  %v797_v0 = vld [vmem:[%s1242_s2 + $0x88] sm:$0xff]  ;;  %v828_v3 = vld [vmem:[%s1242_s2 + $0x180] sm:$0xff] }
  0x22   : > { %446 = vmatpush.msra.mxu1 %v377_v39  ;;  %551 = vmatpush.msra.mxu3 %v833_v42  ;;  %v372_v1 = vld [vmem:[%s1242_s2 + $0x8] sm:$0xff]  ;;  %v796_v5 = vld [vmem:[%s1242_s2 + $0x80] sm:$0xff] }
  0x23   : > { %418 = vmatpush.msra.mxu0 %v801_v44  ;;  %498 = vmatpush.msra.mxu2 %v816_v41  ;;  %v371_v6 = vld [vmem:[%s1242_s2] sm:$0xff]  ;;  %v587_v11 = vld [vmem:[%s1244_s4 + $0x8] sm:$0xff] }
  0x24   : > { %447 = vmatpush.msra.mxu1 %v376_v45  ;;  %552 = vmatpush.msra.mxu3 %v832_v48  ;;  %v586_v12 = vld [vmem:[%s1244_s4] sm:$0xff] }
  0x25   : > { %419 = vmatpush.msra.mxu0 %v800_v49  ;;  %499 = vmatpush.msra.mxu2 %v815_v47  ;;  %v520_v4 = vld [vmem:[#allocation2 + $0x9] sm:$0xff]  ;;  %v887_v19 = vld [vmem:[%s1243_s3] ss:$0 sm:$0xff] }
  0x26   : > { %448 = vmatpush.msra.mxu1 %v375_v50  ;;  %553 = vmatpush.msra.mxu3 %v831_v51  ;;  %v387_v7 = vld [vmem:[#allocation2 + $0x1] sm:$0xff]  ;;  %v888_v50 = vld [vmem:[%s1245_s5] ss:$0 sm:$0xff] }
  0x27   : > { %420 = vmatpush.msra.mxu0 %v799_v52  ;;  %500 = vmatpush.msra.mxu2 %v814_v58  ;;  %v521_v8 = vld [vmem:[#allocation2 + $0x11] sm:$0xff] }
  0x28   : > { %449 = vmatpush.msra.mxu1 %v374_v57  ;;  %554 = vmatpush.msra.mxu3 %v830_v59  ;;  %v522_v9 = vld [vmem:[#allocation2 + $0x19] sm:$0xff]  ;;  %v523_v10 = vld [vmem:[#allocation2 + $0x21] sm:$0xff] }
  0x29   : > { %421 = vmatpush.msra.mxu0 %v798_v60  ;;  %501 = vmatpush.msra.mxu2 %v813_v62 }
  0x2a   : > { %450 = vmatpush.msra.mxu1 %v373_v61  ;;  %555 = vmatpush.msra.mxu3 %v829_v63 }
  0x2b   : > { %422 = vmatpush.msra.mxu0 %v797_v0  ;;  %502 = vmatpush.msra.mxu2 %v812_v2 }
  0x2c   : > { %451 = vmatpush.msra.mxu1 %v372_v1  ;;  %556 = vmatpush.msra.mxu3 %v828_v3 }
  0x2d   : > { %503 = vmatmul.f32.vlgmr.msra.gmra.mxu2 %v1122_v46  ;;  %557 = vmatmul.f32.vlgmr.msra.gmra.mxu3 %v520_v4 }
  0x2e   : > { %423 = vmatpush.msra.mxu0 %v796_v5  ;;  %452 = vmatpush.msra.mxu1 %v371_v6 }
  0x2f   : > { %424 = vmatmul.f32.vlgmr.msra.gmra.mxu0 %v387_v7  ;;  %453 = vmatmul.f32.vlgmr.msra.gmra.mxu1 %v356_v54 }
  0x30   : > { %854 = vmatpush.msrb.mxu2 %v587_v11  ;;  %855 = vmatpush.msrb.mxu3 %v587_v11 }
  0x31   : > { %619 = vmatpush.msrb.mxu0 %v587_v11  ;;  %853 = vmatpush.msrb.mxu1 %v587_v11 }
  0x32   : > { %857 = vmatpush.msrb.mxu2 %v586_v12  ;;  %858 = vmatpush.msrb.mxu3 %v586_v12 }
  0x33   : > { %620 = vmatpush.msrb.mxu0 %v586_v12  ;;  %856 = vmatpush.msrb.mxu1 %v586_v12 }
  0x35   : > { %506 = vmatmul.f32.gmra.mxu2 %v358_v53  ;;  %560 = vmatmul.f32.gmra.mxu3 %v521_v8 }
  0x37   : > { %427 = vmatmul.f32.gmra.mxu0 %v520_v4  ;;  %456 = vmatmul.f32.gmra.mxu1 %v1122_v46 }
  0x3d   : > { %509 = vmatmul.f32.gmra.mxu2 %v359_v55  ;;  %563 = vmatmul.f32.gmra.mxu3 %v522_v9 }
  0x3f   : > { %430 = vmatmul.f32.gmra.mxu0 %v521_v8  ;;  %459 = vmatmul.f32.gmra.mxu1 %v358_v53 }
  0x45   : > { %512 = vmatmul.f32.gmra.mxu2 %v364_v56  ;;  %566 = vmatmul.f32.gmra.mxu3 %v523_v10 }
  0x47   : > { %433 = vmatmul.f32.gmra.mxu0 %v522_v9  ;;  %462 = vmatmul.f32.gmra.mxu1 %v359_v55 }
  0xac   : > { %v425_v13 = vpop.f32.mrf.mxu0  ;;  %v454_v14 = vpop.f32.mrf.mxu1 }
  0xad   : > { %v455_v15 = vadd.f32 %v454_v14, %v425_v13 }
  0xb0   : > { %v504_v16 = vpop.f32.mrf.mxu2  ;;  %v558_v17 = vpop.f32.mrf.mxu3 }
  0xb1   : > { %v516_v18 = vadd.f32 %v504_v16, %v455_v15 }
  0xb3   : > { %v570_v20 = vadd.f32 %v558_v17, %v516_v18 }
  0xb4   : > { %v428_v21 = vpop.f32.mrf.mxu0  ;;  %v457_v22 = vpop.f32.mrf.mxu1 }
  0xb5   : > { %v578_v23 = vadd.f32 %v887_v19, %v570_v20  ;;  %v458_v24 = vadd.f32 %v457_v22, %v428_v21 }
  0xb7   : > { %v582_v25 = vmul.f32 %v578_v23, %v578_v23 }
  0xb8   : > { %v507_v26 = vpop.f32.mrf.mxu2  ;;  %v561_v27 = vpop.f32.mrf.mxu3 }
  0xb9   : > { %v517_v28 = vadd.f32 %v507_v26, %v458_v24  ;;  %844 = vmatmul.msk.f32.vlgmr.msrb.gmra.mxu0 %vm592_vm0, %v582_v25 }
  0xbb   : > { %v571_v29 = vadd.f32 %v561_v27, %v517_v28 }
  0xbc   : > { %v431_v30 = vpop.f32.mrf.mxu0  ;;  %v460_v31 = vpop.f32.mrf.mxu1 }
  0xbd   : > { %v579_v32 = vadd.f32 %v887_v19, %v571_v29  ;;  %v461_v33 = vadd.f32 %v460_v31, %v431_v30 }
  0xbf   : > { %v583_v34 = vmul.f32 %v579_v32, %v579_v32 }
  0xc0   : > { %v510_v35 = vpop.f32.mrf.mxu2  ;;  %v564_v36 = vpop.f32.mrf.mxu3 }
  0xc1   : > { %v518_v37 = vadd.f32 %v510_v35, %v461_v33  ;;  %845 = vmatmul.msk.f32.vlgmr.msrb.gmra.mxu1 %vm592_vm0, %v583_v34 }
  0xc3   : > { %v572_v38 = vadd.f32 %v564_v36, %v518_v37 }
  0xc4   : > { %v434_v39 = vpop.f32.mrf.mxu0  ;;  %v463_v40 = vpop.f32.mrf.mxu1 }
  0xc5   : > { %v1202_v41 = vadd.f32 %v887_v19, %v572_v38  ;;  %v464_v42 = vadd.f32 %v463_v40, %v434_v39 }
  0xc7   : > { %v584_v43 = vmul.f32 %v1202_v41, %v1202_v41 }
  0xc8   : > { %v513_v44 = vpop.f32.mrf.mxu2  ;;  %v567_v45 = vpop.f32.mrf.mxu3 }
  0xc9   : > { %v519_v46 = vadd.f32 %v513_v44, %v464_v42  ;;  %846 = vmatmul.msk.f32.vlgmr.msrb.gmra.mxu2 %vm592_vm0, %v584_v43 }
  0xcb   : > { %v573_v47 = vadd.f32 %v567_v45, %v519_v46 }
  0xcd   : > { %v1207_v48 = vadd.f32 %v887_v19, %v573_v47 }
  0xcf   : > { %v585_v49 = vmul.f32 %v1207_v48, %v1207_v48 }
  0xd1   : > { %847 = vmatmul.msk.f32.vlgmr.msrb.gmra.mxu3 %vm592_vm0, %v585_v49 }
 0x136   : > { %v622_v51 = vpop.f32.mrf.mxu0 }
 0x137   : > { %v623_v52 = vadd.f32 %v888_v50, %v622_v51 }
 0x139   : > { %889 = vrsqrt.f32 %v623_v52  ;;  %vm640_vm2 = vweird.f32 %v623_v52 }
 0x13e   : > { %v625_v53 = vpop.f32.mrf.mxu1 }
 0x13f   : > { %v890_v54 = vpop.eup %889  ;;  %v626_v55 = vadd.f32 %v888_v50, %v625_v53 }
 0x140   : > { %v635_v56 = vmul.f32 %v890_v54, %v623_v52  ;;  %vm641_vm1 = vweird.f32 %v890_v54 }
 0x141   : > { %891 = vrsqrt.f32 %v626_v55  ;;  %vm642_vm3 = vmor %vm640_vm2, %vm641_vm1  ;;  %vm650_vm5 = vweird.f32 %v626_v55 }
 0x142   : > { %v636_v57 = vmul.f32 %v890_v54, %v635_v56 }
 0x144   : > { %v637_v58 = vmul.f32 0.5, %v636_v57 }
 0x146   : > { %v638_v59 = vsub.f32 1.5, %v637_v58 }
 0x147   : > { %v892_v60 = vpop.eup %891 }
 0x148   : > { %v639_v61 = vmul.f32 %v890_v54, %v638_v59  ;;  %v645_v62 = vmul.f32 %v892_v60, %v626_v55  ;;  %vm651_vm4 = vweird.f32 %v892_v60 }
 0x149   : > { %vm652_vm6 = vmor %vm650_vm5, %vm651_vm4 }
 0x14a   : > { %v643_v63 = vsel %vm642_vm3, %v890_v54, %v639_v61  ;;  %v646_v0 = vmul.f32 %v892_v60, %v645_v62 }
 0x14b   : > { %v674_v1 = vmul.f32 %v643_v63, %v578_v23 }
 0x14c   : > { %v647_v2 = vmul.f32 0.5, %v646_v0  ;;  %v628_v3 = vpop.f32.mrf.mxu2 }
 0x14d   : > { %678 = vst.msk [vmem:[%s1219_s9] sm:$0xff] %vm592_vm0, %v674_v1  ;;  %v629_v4 = vadd.f32 %v888_v50, %v628_v3 }
 0x14e   : > { %v648_v5 = vsub.f32 1.5, %v647_v2 }
 0x14f   : > { %893 = vrsqrt.f32 %v629_v4  ;;  %vm660_vm8 = vweird.f32 %v629_v4 }
 0x150   : > { %v649_v6 = vmul.f32 %v892_v60, %v648_v5 }
 0x152   : > { %v653_v7 = vsel %vm652_vm6, %v892_v60, %v649_v6 }
 0x153   : > { %v675_v8 = vmul.f32 %v653_v7, %v579_v32 }
 0x154   : > { %v631_v9 = vpop.f32.mrf.mxu3 }
 0x155   : > { %v894_v10 = vpop.eup %893  ;;  %679 = vst.msk [vmem:[%s1219_s9 + $0x8] sm:$0xff] %vm592_vm0, %v675_v8  ;;  %v632_v11 = vadd.f32 %v888_v50, %v631_v9 }
 0x156   : > { %v655_v12 = vmul.f32 %v894_v10, %v629_v4  ;;  %vm661_vm7 = vweird.f32 %v894_v10 }
 0x157   : > { %895 = vrsqrt.f32 %v632_v11  ;;  %vm662_vm9 = vmor %vm660_vm8, %vm661_vm7  ;;  %vm670_vm11 = vweird.f32 %v632_v11 }
 0x158   : > { %v656_v13 = vmul.f32 %v894_v10, %v655_v12 }
 0x15a   : > { %v657_v14 = vmul.f32 0.5, %v656_v13 }
 0x15c   : > { %v658_v15 = vsub.f32 1.5, %v657_v14 }
 0x15d   : > { %v896_v16 = vpop.eup %895 }
 0x15e   : > { %v659_v17 = vmul.f32 %v894_v10, %v658_v15  ;;  %v665_v18 = vmul.f32 %v896_v16, %v632_v11  ;;  %vm671_vm10 = vweird.f32 %v896_v16 }
 0x15f   : > { %vm672_vm12 = vmor %vm670_vm11, %vm671_vm10 }
 0x160   : > { %v663_v19 = vsel %vm662_vm9, %v894_v10, %v659_v17  ;;  %v666_v20 = vmul.f32 %v896_v16, %v665_v18 }
 0x161   : > { %v676_v21 = vmul.f32 %v663_v19, %v1202_v41 }
 0x162   : > { %v667_v22 = vmul.f32 0.5, %v666_v20 }
 0x163   : > { %680 = vst.msk [vmem:[%s1219_s9 + $0x10] sm:$0xff] %vm592_vm0, %v676_v21 }
 0x164   : > { %v668_v23 = vsub.f32 1.5, %v667_v22 }
 0x166   : > { %v669_v24 = vmul.f32 %v896_v16, %v668_v23 }
 0x168   : > { %v673_v25 = vsel %vm672_vm12, %v896_v16, %v669_v24 }
 0x169   : > { %v677_v26 = vmul.f32 %v673_v25, %v1207_v48 }
 0x16b   : > { %681 = vst.msk [vmem:[%s1219_s9 + $0x18] sm:$0xff] %vm592_vm0, %v677_v26 }
 0x16c PF: > { %s16_s23 = sadd.s32 1, %s919_s23   ;;  %s1247_s21 = smov %s915_s22 }
 0x16d   : > { %p13_p5 = scmp.ge.s32.totalorder %s16_s23, 4   ;;  %s1248_s22 = smov %s1250_s24 }
 0x16f   :  { %15 = sbr.rel (!%p13_p5) target bundleno = 2 (0x2), region = 80 }

// kernel: mv_res_encoder_forward.15
= control target key start
LH: loop header
LB: loop body
LE: loop exit
PB: predicated region body
PF: predicated region fallthrough
CT: control target
= control target key end

     0   :  { %s1257_s21 = smov 0   ;;  %s1259_s22 = smov 0   ;;  %s1424_s0 = inlined_call_operand.vmem [shape: f32[2,48,16], index: 0, kind: input, shape index: {}, may-alias: {0,1,2}]   ;;  %s1425_s1 = inlined_call_operand.vmem [shape: f32[2,48,16], index: 1, kind: input, shape index: {}, may-alias: {0,1,2}]   ;;  %s1426_s2 = inlined_call_operand.vmem [shape: f32[2,48,16], index: 2, kind: input, shape index: {}, may-alias: {0,1,2}]   ;;  %s1427_s3 = inlined_call_operand.vmem [shape: f32[9,16,16], index: 3, kind: input, shape index: {}]   ;;  %s1428_s4 = inlined_call_operand.vmem [shape: f32[1,16], index: 4, kind: input, shape index: {}]   ;;  %s1429_s5 = inlined_call_operand.vmem [shape: f32[2,32,16], index: 5, kind: input, shape index: {}]   ;;  %s1430_s6 = inlined_call_operand.vmem [shape: f32[2,32,16], index: 6, kind: output, shape index: {}]  }
   0x1   :  { %s1261_s23 = smov 0  }
   0x2 LB: > { %s28_s24 = sadd.s32 1, %s1215_s22  ;;  %p1094_p0 = scmp.ge.s32.totalorder %s1219_s23, 1  ;;  %s1219_s23 = sphi %s1261_s23, %s16_s23   ;;  %s1215_s22 = sphi %s1259_s22, %s1432_s22   ;;  %s1211_s21 = sphi %s1257_s21, %s1431_s21  }
   0x3   : > { %p30_p1 = scmp.ge.s32.totalorder %s28_s24, 2  ;;  %p308_p2 = scmp.lt.s32.totalorder %s1219_s23, 3 }
   0x5   : > { %s1434_s24 = smov (%p30_p1, %s28_s24), 0  ;;  %p309_p3 = pnand %p1094_p0, %p308_p2 }
   0x6   : > { %p385_p4 = scmp.lt.s32.totalorder (!%p309_p3), %s1211_s21, 1 }
   0x7   : > { %312 = sbr.rel (%p309_p3) target bundleno = 237 (0xed), region = 44 }
   0xc   : > { %v1103_v0 = vld [vmem:[%s1427_s3 + $0x18] sm:$0xff]  ;;  %v1102_v1 = vld [vmem:[%s1427_s3 + $0x10] sm:$0xff]  ;;  %v1113_v2 = vld [vmem:[%s1427_s3 + $0x28] sm:$0xff]  ;;  %s1436_s21 = smov (!%p385_p4, %s1211_s21), 1  ;;  %vm448_vm0 = vcmask 130048   ;;  %v1221_v35 = vmov 0.0  }
   0xd   : > { %1162 = vmatpush.msra.mxu1 %v1103_v0  ;;  %1163 = vmatpush.msra.mxu2 %v1103_v0  ;;  %v1119_v3 = vld [vmem:[%s1427_s3 + $0x38] sm:$0xff]  ;;  %v463_v4 = vld [vmem:[%s1427_s3 + $0x8] sm:$0xff]  ;;  %v1112_v5 = vld [vmem:[%s1427_s3 + $0x20] sm:$0xff]  ;;  %s1296_s13 = smul.u32 48, %s1436_s21  ;;  %457 = vst.msk [vmem:[#allocation2 + $0x30] sm:$0xff] %vm448_vm0, %v1221_v35 }
   0xe   : > { %1164 = vmatpush.msra.mxu3 %v1103_v0  ;;  %497 = vmatpush.msra.mxu0 %v1103_v0  ;;  %v1118_v6 = vld [vmem:[%s1427_s3 + $0x30] sm:$0xff]  ;;  %v462_v7 = vld [vmem:[%s1427_s3] sm:$0xff]  ;;  %v1125_v8 = vld [vmem:[%s1427_s3 + $0x48] sm:$0xff] }
   0xf   : > { %1165 = vmatpush.msra.mxu1 %v1102_v1  ;;  %1166 = vmatpush.msra.mxu2 %v1102_v1  ;;  %s392_s26 = scalar_lea.vmem %s1424_s0, %s1296_s13  ;;  %s1157_s27 = sadd.s32 32, %s1296_s13  ;;  %v1124_v9 = vld [vmem:[%s1427_s3 + $0x40] sm:$0xff]  ;;  %v1131_v15 = vld [vmem:[%s1427_s3 + $0x58] sm:$0xff]  ;;  %v1137_v17 = vld [vmem:[%s1427_s3 + $0x68] sm:$0xff] }
  0x10   : > { %1167 = vmatpush.msra.mxu3 %v1102_v1  ;;  %498 = vmatpush.msra.mxu0 %v1102_v1  ;;  %v445_v10 = vld [vmem:[%s392_s26 + $0x8] sm:$0xff]  ;;  %v446_v11 = vld [vmem:[%s392_s26 + $0x10] sm:$0xff]  ;;  %v447_v12 = vld [vmem:[%s392_s26 + $0x18] sm:$0xff]  ;;  %s407_s8 = scalar_lea.vmem %s1425_s1, %s1157_s27  ;;  %s1159_s9 = sadd.s32 40, %s1296_s13 }
  0x11   : > { %586 = vmatpush.msrb.mxu2 %v1113_v2  ;;  %538 = vmatpush.msrb.mxu1 %v463_v4  ;;  %450 = vst.msk [vmem:[#allocation2 + $0x8] sm:$0xff] %vm448_vm0, %v445_v10  ;;  %v453_v13 = vld [vmem:[%s407_s8] sm:$0xff]  ;;  %v1143_v19 = vld [vmem:[%s1427_s3 + $0x78] sm:$0xff]  ;;  %s420_s13 = scalar_lea.vmem %s1426_s2, %s1159_s9  ;;  %v1149_v21 = vld [vmem:[%s1427_s3 + $0x88] sm:$0xff]  ;;  %s1160_s9 = sshll.u32 %s1436_s21, 5 }
  0x12   : > { %638 = vmatpush.msrb.mxu3 %v1119_v3  ;;  %690 = vmatpush.msrb.mxu0 %v1125_v8  ;;  %451 = vst.msk [vmem:[#allocation2 + $0x10] sm:$0xff] %vm448_vm0, %v446_v11  ;;  %v444_v14 = vld [vmem:[%s392_s26] sm:$0xff]  ;;  %v1142_v24 = vld [vmem:[%s1427_s3 + $0x70] sm:$0xff]  ;;  %s1393_s12 = scalar_lea.vmem %s1429_s5, %s1160_s9  ;;  %s1402_s17 = scalar_lea.vmem %s1430_s6, %s1160_s9 }
  0x13   : > { %587 = vmatpush.msrb.mxu2 %v1112_v5  ;;  %539 = vmatpush.msrb.mxu1 %v462_v7  ;;  %452 = vst.msk [vmem:[#allocation2 + $0x18] sm:$0xff] %vm448_vm0, %v447_v12  ;;  %v1136_v22 = vld [vmem:[%s1427_s3 + $0x60] sm:$0xff]  ;;  %v1130_v25 = vld [vmem:[%s1427_s3 + $0x50] sm:$0xff] }
  0x14   : > { %639 = vmatpush.msrb.mxu3 %v1118_v6  ;;  %691 = vmatpush.msrb.mxu0 %v1124_v9  ;;  %454 = vst.msk [vmem:[#allocation2 + $0x20] sm:$0xff] %vm448_vm0, %v453_v13  ;;  %v1148_v26 = vld [vmem:[%s1427_s3 + $0x80] sm:$0xff] }
  0x15   : > { %449 = vst.msk [vmem:[#allocation2] sm:$0xff] %vm448_vm0, %v444_v14  ;;  %v455_v27 = vld [vmem:[%s420_s13] sm:$0xff] }
  0x16   : > { %456 = vst.msk [vmem:[#allocation2 + $0x28] sm:$0xff] %vm448_vm0, %v455_v27 }
  0x18   : > { %v605_v30 = vld [vmem:[#allocation2 + $0x8] sm:$0xff] }
  0x19   : > { %v465_v16 = vld [vmem:[#allocation2 + $0x9] sm:$0xff] }
  0x1a   : > { %1105 = vmatmul.msk.f32.vlgmr.msra.gmra.mxu1 %vm448_vm0, %v465_v16  ;;  %v466_v18 = vld [vmem:[#allocation2 + $0x11] sm:$0xff] }
  0x1b   : > { %1106 = vmatmul.msk.f32.vlgmr.msra.gmra.mxu2 %vm448_vm0, %v466_v18  ;;  %v467_v20 = vld [vmem:[#allocation2 + $0x19] sm:$0xff]  ;;  %742 = vmatpush.msra.mxu1 %v1131_v15  ;;  %v554_v31 = vld [vmem:[#allocation2 + $0xa] sm:$0xff] }
  0x1c   : > { %1107 = vmatmul.msk.f32.vlgmr.msra.gmra.mxu3 %vm448_vm0, %v467_v20  ;;  %794 = vmatpush.msra.mxu2 %v1137_v17  ;;  %v464_v23 = vld [vmem:[#allocation2 + $0x1] sm:$0xff]  ;;  %v606_v32 = vld [vmem:[#allocation2 + $0x10] sm:$0xff]  ;;  %v607_v34 = vld [vmem:[#allocation2 + $0x18] sm:$0xff] }
  0x1d   : > { %1104 = vmatmul.msk.f32.vlgmr.msra.gmra.mxu0 %vm448_vm0, %v464_v23  ;;  %846 = vmatpush.msra.mxu3 %v1143_v19  ;;  %v458_v28 = vld [vmem:[#allocation2] sm:$0xff]  ;;  %v555_v33 = vld [vmem:[#allocation2 + $0x12] sm:$0xff]  ;;  %v764_v40 = vld [vmem:[#allocation2 + $0x28] sm:$0xff] }
  0x1e   : > { %898 = vmatpush.msra.mxu0 %v1149_v21  ;;  %795 = vmatpush.msra.mxu2 %v1136_v22  ;;  %v553_v29 = vld [vmem:[#allocation2 + $0x2] sm:$0xff]  ;;  %v556_v36 = vld [vmem:[#allocation2 + $0x1a] sm:$0xff]  ;;  %v868_v42 = vld [vmem:[#allocation2 + $0x2a] sm:$0xff] }
  0x1f   : > { %847 = vmatpush.msra.mxu3 %v1142_v24  ;;  %743 = vmatpush.msra.mxu1 %v1130_v25  ;;  %v608_v37 = vld [vmem:[#allocation2 + $0x20] sm:$0xff]  ;;  %v816_v41 = vld [vmem:[#allocation2 + $0x29] sm:$0xff] }
  0x20   : > { %899 = vmatpush.msra.mxu0 %v1148_v26  ;;  %v660_v38 = vld [vmem:[#allocation2 + $0x21] sm:$0xff]  ;;  %v1196_v15 = vld [vmem:[%s1428_s4] ss:$0 sm:$0xff] }
  0x21   : > { %v712_v39 = vld [vmem:[#allocation2 + $0x22] sm:$0xff] }
  0x22   : > { %1108 = vmatmul.msk.f32.vlgmr.msrb.gmra.mxu1 %vm448_vm0, %v458_v28  ;;  %v925_v19 = vld [vmem:[%s1393_s12] sm:$0xff] }
  0x23   : > { %1114 = vmatmul.msk.f32.vlgmr.msrb.gmra.mxu2 %vm448_vm0, %v553_v29 }
  0x24   : > { %1120 = vmatmul.msk.f32.vlgmr.msrb.gmra.mxu3 %vm448_vm0, %v605_v30 }
  0x25   : > { %1126 = vmatmul.msk.f32.vlgmr.msrb.gmra.mxu0 %vm448_vm0, %v465_v16 }
  0x2a   : > { %1109 = vmatmul.msk.f32.gmra.mxu1 %vm448_vm0, %v605_v30 }
  0x2b   : > { %1115 = vmatmul.msk.f32.gmra.mxu2 %vm448_vm0, %v554_v31 }
  0x2c   : > { %1121 = vmatmul.msk.f32.gmra.mxu3 %vm448_vm0, %v606_v32 }
  0x2d   : > { %1127 = vmatmul.msk.f32.gmra.mxu0 %vm448_vm0, %v466_v18 }
  0x32   : > { %1110 = vmatmul.msk.f32.gmra.mxu1 %vm448_vm0, %v606_v32 }
  0x33   : > { %1116 = vmatmul.msk.f32.gmra.mxu2 %vm448_vm0, %v555_v33 }
  0x34   : > { %1122 = vmatmul.msk.f32.gmra.mxu3 %vm448_vm0, %v607_v34 }
  0x35   : > { %1128 = vmatmul.msk.f32.gmra.mxu0 %vm448_vm0, %v467_v20 }
  0x3a   : > { %1111 = vmatmul.msk.f32.gmra.mxu1 %vm448_vm0, %v607_v34 }
  0x3b   : > { %1117 = vmatmul.msk.f32.gmra.mxu2 %vm448_vm0, %v556_v36 }
  0x3c   : > { %1123 = vmatmul.msk.f32.gmra.mxu3 %vm448_vm0, %v608_v37 }
  0x3d   : > { %1129 = vmatmul.msk.f32.gmra.mxu0 %vm448_vm0, %v660_v38 }
  0x42   : > { %1132 = vmatmul.msk.f32.vlgmr.msra.gmra.mxu1 %vm448_vm0, %v554_v31 }
  0x43   : > { %1138 = vmatmul.msk.f32.vlgmr.msra.gmra.mxu2 %vm448_vm0, %v606_v32 }
  0x44   : > { %1144 = vmatmul.msk.f32.vlgmr.msra.gmra.mxu3 %vm448_vm0, %v466_v18 }
  0x45   : > { %1150 = vmatmul.msk.f32.vlgmr.msra.gmra.mxu0 %vm448_vm0, %v555_v33 }
  0x4a   : > { %1133 = vmatmul.msk.f32.gmra.mxu1 %vm448_vm0, %v555_v33 }
  0x4b   : > { %1139 = vmatmul.msk.f32.gmra.mxu2 %vm448_vm0, %v607_v34 }
  0x4c   : > { %1145 = vmatmul.msk.f32.gmra.mxu3 %vm448_vm0, %v467_v20 }
  0x4d   : > { %1151 = vmatmul.msk.f32.gmra.mxu0 %vm448_vm0, %v556_v36 }
  0x52   : > { %1134 = vmatmul.msk.f32.gmra.mxu1 %vm448_vm0, %v556_v36  ;;  %v926_v36 = vld [vmem:[%s1393_s12 + $0x8] sm:$0xff] }
  0x53   : > { %1140 = vmatmul.msk.f32.gmra.mxu2 %vm448_vm0, %v608_v37 }
  0x54   : > { %1146 = vmatmul.msk.f32.gmra.mxu3 %vm448_vm0, %v660_v38 }
  0x55   : > { %1152 = vmatmul.msk.f32.gmra.mxu0 %vm448_vm0, %v712_v39 }
  0x5a   : > { %1135 = vmatmul.msk.f32.gmra.mxu1 %vm448_vm0, %v712_v39 }
  0x5b   : > { %1141 = vmatmul.msk.f32.gmra.mxu2 %vm448_vm0, %v764_v40 }
  0x5c   : > { %1147 = vmatmul.msk.f32.gmra.mxu3 %vm448_vm0, %v816_v41 }
  0x5d   : > { %1153 = vmatmul.msk.f32.gmra.mxu0 %vm448_vm0, %v868_v42 }
  0x97   : > { %v503_v43 = vpop.f32.mrf.mxu1 }
  0x9a   : > { %v500_v44 = vpop.f32.mrf.mxu0 }
  0x9e   : > { %v506_v45 = vpop.f32.mrf.mxu2 }
  0x9f   : > { %v509_v46 = vpop.f32.mrf.mxu3  ;;  %v541_v47 = vpop.f32.mrf.mxu1 }
  0xa0   : > { %v542_v60 = vadd.f32 %v541_v47, %v500_v44 }
  0xa2   : > { %v693_v48 = vpop.f32.mrf.mxu0 }
  0xa6   : > { %v589_v49 = vpop.f32.mrf.mxu2 }
  0xa7   : > { %v544_v50 = vpop.f32.mrf.mxu1  ;;  %v641_v51 = vpop.f32.mrf.mxu3  ;;  %v601_v62 = vadd.f32 %v589_v49, %v542_v60 }
  0xa8   : > { %v545_v3 = vadd.f32 %v544_v50, %v503_v43 }
  0xa9   : > { %v653_v0 = vadd.f32 %v641_v51, %v601_v62  ;;  %v927_v51 = vld [vmem:[%s1393_s12 + $0x10] sm:$0xff] }
  0xaa   : > { %v696_v52 = vpop.f32.mrf.mxu0 }
  0xab   : > { %v705_v5 = vadd.f32 %v693_v48, %v653_v0 }
  0xae   : > { %v592_v53 = vpop.f32.mrf.mxu2 }
  0xaf   : > { %v547_v54 = vpop.f32.mrf.mxu1  ;;  %v644_v55 = vpop.f32.mrf.mxu3  ;;  %v602_v6 = vadd.f32 %v592_v53, %v545_v3 }
  0xb0   : > { %v548_v13 = vadd.f32 %v547_v54, %v506_v45 }
  0xb1   : > { %v654_v9 = vadd.f32 %v644_v55, %v602_v6 }
  0xb2   : > { %v699_v56 = vpop.f32.mrf.mxu0 }
  0xb3   : > { %v706_v16 = vadd.f32 %v696_v52, %v654_v9 }
  0xb6   : > { %v595_v57 = vpop.f32.mrf.mxu2 }
  0xb7   : > { %v550_v58 = vpop.f32.mrf.mxu1  ;;  %v647_v59 = vpop.f32.mrf.mxu3  ;;  %v603_v17 = vadd.f32 %v595_v57, %v548_v13 }
  0xb8   : > { %v551_v29 = vadd.f32 %v550_v58, %v509_v46 }
  0xb9   : > { %v655_v24 = vadd.f32 %v647_v59, %v603_v17 }
  0xba   : > { %v702_v61 = vpop.f32.mrf.mxu0 }
  0xbb   : > { %v707_v32 = vadd.f32 %v699_v56, %v655_v24 }
  0xbe   : > { %v598_v63 = vpop.f32.mrf.mxu2 }
  0xbf   : > { %v650_v1 = vpop.f32.mrf.mxu3  ;;  %v745_v2 = vpop.f32.mrf.mxu1  ;;  %v604_v33 = vadd.f32 %v598_v63, %v551_v29  ;;  %v928_v63 = vld [vmem:[%s1393_s12 + $0x18] sm:$0xff] }
  0xc0   : > { %v757_v7 = vadd.f32 %v745_v2, %v705_v5 }
  0xc1   : > { %v656_v41 = vadd.f32 %v650_v1, %v604_v33 }
  0xc2   : > { %v901_v4 = vpop.f32.mrf.mxu0 }
  0xc3   : > { %v708_v48 = vadd.f32 %v702_v61, %v656_v41 }
  0xc6   : > { %v797_v8 = vpop.f32.mrf.mxu2 }
  0xc7   : > { %v809_v10 = vadd.f32 %v797_v8, %v757_v7  ;;  %v748_v11 = vpop.f32.mrf.mxu1  ;;  %v849_v12 = vpop.f32.mrf.mxu3 }
  0xc8   : > { %v758_v21 = vadd.f32 %v748_v11, %v706_v16 }
  0xc9   : > { %v861_v14 = vadd.f32 %v849_v12, %v809_v10 }
  0xca   : > { %v904_v20 = vpop.f32.mrf.mxu0 }
  0xcb   : > { %v913_v18 = vadd.f32 %v901_v4, %v861_v14 }
  0xcd   : > { %v921_v22 = vadd.f32 %v1196_v15, %v913_v18 }
  0xce   : > { %v800_v23 = vpop.f32.mrf.mxu2 }
  0xcf   : > { %v929_v25 = vadd.f32 %v925_v19, %v921_v22  ;;  %v810_v26 = vadd.f32 %v800_v23, %v758_v21  ;;  %v852_v27 = vpop.f32.mrf.mxu3  ;;  %v751_v28 = vpop.f32.mrf.mxu1 }
  0xd0   : > { %v759_v37 = vadd.f32 %v751_v28, %v707_v32 }
  0xd1   : > { %vm933_vm1 = vcmp.ge.f32.partialorder %v929_v25, 0.0  ;;  %v937_v30 = vmul.f32 0.1, %v929_v25  ;;  %v862_v31 = vadd.f32 %v852_v27, %v810_v26 }
  0xd2   : > { %v907_v40 = vpop.f32.mrf.mxu0 }
  0xd3   : > { %v941_v34 = vsel %vm933_vm1, %v929_v25, %v937_v30  ;;  %v914_v35 = vadd.f32 %v904_v20, %v862_v31 }
  0xd4   : > { %945 = vst.msk [vmem:[%s1402_s17] sm:$0xff] %vm448_vm0, %v941_v34 }
  0xd5   : > { %v922_v38 = vadd.f32 %v1196_v15, %v914_v35 }
  0xd6   : > { %v803_v39 = vpop.f32.mrf.mxu2 }
  0xd7   : > { %v930_v42 = vadd.f32 %v926_v36, %v922_v38  ;;  %v811_v43 = vadd.f32 %v803_v39, %v759_v37  ;;  %v855_v44 = vpop.f32.mrf.mxu3  ;;  %v754_v47 = vpop.f32.mrf.mxu1 }
  0xd8   : > { %v760_v52 = vadd.f32 %v754_v47, %v708_v48 }
  0xd9   : > { %vm934_vm2 = vcmp.ge.f32.partialorder %v930_v42, 0.0  ;;  %v938_v45 = vmul.f32 0.1, %v930_v42  ;;  %v863_v46 = vadd.f32 %v855_v44, %v811_v43 }
  0xda   : > { %v910_v58 = vpop.f32.mrf.mxu0 }
  0xdb   : > { %v942_v49 = vsel %vm934_vm2, %v930_v42, %v938_v45  ;;  %v915_v50 = vadd.f32 %v907_v40, %v863_v46 }
  0xdc   : > { %946 = vst.msk [vmem:[%s1402_s17 + $0x8] sm:$0xff] %vm448_vm0, %v942_v49 }
  0xdd   : > { %v923_v53 = vadd.f32 %v1196_v15, %v915_v50 }
  0xde   : > { %v806_v54 = vpop.f32.mrf.mxu2 }
  0xdf   : > { %v931_v55 = vadd.f32 %v927_v51, %v923_v53  ;;  %v812_v56 = vadd.f32 %v806_v54, %v760_v52  ;;  %v858_v57 = vpop.f32.mrf.mxu3 }
  0xe1   : > { %vm935_vm3 = vcmp.ge.f32.partialorder %v931_v55, 0.0  ;;  %v939_v59 = vmul.f32 0.1, %v931_v55  ;;  %v864_v60 = vadd.f32 %v858_v57, %v812_v56 }
  0xe3   : > { %v943_v62 = vsel %vm935_vm3, %v931_v55, %v939_v59  ;;  %v916_v61 = vadd.f32 %v910_v58, %v864_v60 }
  0xe4   : > { %947 = vst.msk [vmem:[%s1402_s17 + $0x10] sm:$0xff] %vm448_vm0, %v943_v62 }
  0xe5   : > { %v924_v0 = vadd.f32 %v1196_v15, %v916_v61 }
  0xe7   : > { %v932_v1 = vadd.f32 %v928_v63, %v924_v0 }
  0xe9   : > { %vm936_vm4 = vcmp.ge.f32.partialorder %v932_v1, 0.0  ;;  %v940_v2 = vmul.f32 0.1, %v932_v1 }
  0xeb   : > { %v944_v3 = vsel %vm936_vm4, %v932_v1, %v940_v2 }
  0xec   : > { %948 = vst.msk [vmem:[%s1402_s17 + $0x18] sm:$0xff] %vm448_vm0, %v944_v3 }
  0xed PF: > { %s16_s23 = sadd.s32 1, %s1219_s23   ;;  %s1431_s21 = smov %s1215_s22 }
  0xee   : > { %p13_p5 = scmp.ge.s32.totalorder %s16_s23, 4   ;;  %s1432_s22 = smov %s1434_s24 }
  0xf0   :  { %15 = sbr.rel (!%p13_p5) target bundleno = 2 (0x2), region = 91 }

// kernel: mv_res_encoder_forward.14
= control target key start
LH: loop header
LB: loop body
LE: loop exit
PB: predicated region body
PF: predicated region fallthrough
CT: control target
= control target key end

     0   :  { %s1160_s18 = smov 0   ;;  %s1162_s19 = smov 0   ;;  %s1318_s0 = inlined_call_operand.vmem [shape: f32[2,48,16], index: 0, kind: input, shape index: {}, may-alias: {0,1,2}]   ;;  %s1319_s1 = inlined_call_operand.vmem [shape: f32[2,48,16], index: 1, kind: input, shape index: {}, may-alias: {0,1,2}]   ;;  %s1320_s2 = inlined_call_operand.vmem [shape: f32[2,48,16], index: 2, kind: input, shape index: {}, may-alias: {0,1,2}]   ;;  %s1321_s3 = inlined_call_operand.vmem [shape: f32[9,16,16], index: 3, kind: input, shape index: {}]   ;;  %s1322_s4 = inlined_call_operand.vmem [shape: f32[1,16], index: 4, kind: input, shape index: {}]   ;;  %s1323_s5 = inlined_call_operand.vmem [shape: f32[2,32,16], index: 5, kind: output, shape index: {}]  }
   0x1   :  { %s1164_s20 = smov 0  }
   0x2 LB: > { %s27_s21 = sadd.s32 1, %s1123_s19  ;;  %p1005_p0 = scmp.ge.s32.totalorder %s1127_s20, 1  ;;  %s1127_s20 = sphi %s1164_s20, %s15_s20   ;;  %s1123_s19 = sphi %s1162_s19, %s1325_s19   ;;  %s1119_s18 = sphi %s1160_s18, %s1324_s18  }
   0x3   : > { %p29_p1 = scmp.ge.s32.totalorder %s27_s21, 2  ;;  %p266_p2 = scmp.lt.s32.totalorder %s1127_s20, 3 }
   0x5   : > { %s1327_s21 = smov (%p29_p1, %s27_s21), 0  ;;  %p267_p3 = pnand %p1005_p0, %p266_p2 }
   0x6   : > { %p332_p4 = scmp.lt.s32.totalorder (!%p267_p3), %s1119_s18, 1 }
   0x7   : > { %270 = sbr.rel (%p267_p3) target bundleno = 235 (0xeb), region = 40 }
   0xc   : > { %v1012_v0 = vld [vmem:[%s1321_s3 + $0x18] sm:$0xff]  ;;  %v1011_v1 = vld [vmem:[%s1321_s3 + $0x10] sm:$0xff]  ;;  %v1022_v2 = vld [vmem:[%s1321_s3 + $0x28] sm:$0xff]  ;;  %s1329_s18 = smov (!%p332_p4, %s1119_s18), 1  ;;  %vm385_vm0 = vcmask 130048   ;;  %v1129_v35 = vmov 0.0  }
   0xd   : > { %1070 = vmatpush.msra.mxu1 %v1012_v0  ;;  %1071 = vmatpush.msra.mxu2 %v1012_v0  ;;  %v1028_v3 = vld [vmem:[%s1321_s3 + $0x38] sm:$0xff]  ;;  %v400_v4 = vld [vmem:[%s1321_s3 + $0x8] sm:$0xff]  ;;  %v1021_v5 = vld [vmem:[%s1321_s3 + $0x20] sm:$0xff]  ;;  %s1199_s9 = smul.u32 48, %s1329_s18  ;;  %394 = vst.msk [vmem:[#allocation2 + $0x30] sm:$0xff] %vm385_vm0, %v1129_v35  ;;  %s1069_s30 = sshll.u32 %s1329_s18, 5 }
   0xe   : > { %1072 = vmatpush.msra.mxu3 %v1012_v0  ;;  %434 = vmatpush.msra.mxu0 %v1012_v0  ;;  %v1027_v6 = vld [vmem:[%s1321_s3 + $0x30] sm:$0xff]  ;;  %v399_v7 = vld [vmem:[%s1321_s3] sm:$0xff]  ;;  %v1034_v8 = vld [vmem:[%s1321_s3 + $0x48] sm:$0xff]  ;;  %s1299_s8 = scalar_lea.vmem %s1323_s5, %s1069_s30 }
   0xf   : > { %1073 = vmatpush.msra.mxu1 %v1011_v1  ;;  %1074 = vmatpush.msra.mxu2 %v1011_v1  ;;  %s339_s22 = scalar_lea.vmem %s1318_s0, %s1199_s9  ;;  %s1066_s23 = sadd.s32 32, %s1199_s9  ;;  %v1033_v9 = vld [vmem:[%s1321_s3 + $0x40] sm:$0xff]  ;;  %v1040_v15 = vld [vmem:[%s1321_s3 + $0x58] sm:$0xff]  ;;  %v1046_v17 = vld [vmem:[%s1321_s3 + $0x68] sm:$0xff] }
  0x10   : > { %1075 = vmatpush.msra.mxu3 %v1011_v1  ;;  %435 = vmatpush.msra.mxu0 %v1011_v1  ;;  %v382_v10 = vld [vmem:[%s339_s22 + $0x8] sm:$0xff]  ;;  %v383_v11 = vld [vmem:[%s339_s22 + $0x10] sm:$0xff]  ;;  %v384_v12 = vld [vmem:[%s339_s22 + $0x18] sm:$0xff]  ;;  %s354_s28 = scalar_lea.vmem %s1319_s1, %s1066_s23  ;;  %s1068_s29 = sadd.s32 40, %s1199_s9 }
  0x11   : > { %523 = vmatpush.msrb.mxu2 %v1022_v2  ;;  %475 = vmatpush.msrb.mxu1 %v400_v4  ;;  %387 = vst.msk [vmem:[#allocation2 + $0x8] sm:$0xff] %vm385_vm0, %v382_v10  ;;  %v390_v13 = vld [vmem:[%s354_s28] sm:$0xff]  ;;  %v1052_v19 = vld [vmem:[%s1321_s3 + $0x78] sm:$0xff]  ;;  %s367_s9 = scalar_lea.vmem %s1320_s2, %s1068_s29  ;;  %v1058_v21 = vld [vmem:[%s1321_s3 + $0x88] sm:$0xff] }
  0x12   : > { %575 = vmatpush.msrb.mxu3 %v1028_v3  ;;  %627 = vmatpush.msrb.mxu0 %v1034_v8  ;;  %388 = vst.msk [vmem:[#allocation2 + $0x10] sm:$0xff] %vm385_vm0, %v383_v11  ;;  %v381_v14 = vld [vmem:[%s339_s22] sm:$0xff]  ;;  %v1051_v24 = vld [vmem:[%s1321_s3 + $0x70] sm:$0xff] }
  0x13   : > { %524 = vmatpush.msrb.mxu2 %v1021_v5  ;;  %476 = vmatpush.msrb.mxu1 %v399_v7  ;;  %389 = vst.msk [vmem:[#allocation2 + $0x18] sm:$0xff] %vm385_vm0, %v384_v12  ;;  %v1045_v22 = vld [vmem:[%s1321_s3 + $0x60] sm:$0xff]  ;;  %v1039_v25 = vld [vmem:[%s1321_s3 + $0x50] sm:$0xff] }
  0x14   : > { %576 = vmatpush.msrb.mxu3 %v1027_v6  ;;  %628 = vmatpush.msrb.mxu0 %v1033_v9  ;;  %391 = vst.msk [vmem:[#allocation2 + $0x20] sm:$0xff] %vm385_vm0, %v390_v13  ;;  %v1057_v26 = vld [vmem:[%s1321_s3 + $0x80] sm:$0xff] }
  0x15   : > { %386 = vst.msk [vmem:[#allocation2] sm:$0xff] %vm385_vm0, %v381_v14  ;;  %v392_v27 = vld [vmem:[%s367_s9] sm:$0xff] }
  0x16   : > { %393 = vst.msk [vmem:[#allocation2 + $0x28] sm:$0xff] %vm385_vm0, %v392_v27 }
  0x18   : > { %v542_v30 = vld [vmem:[#allocation2 + $0x8] sm:$0xff] }
  0x19   : > { %v402_v16 = vld [vmem:[#allocation2 + $0x9] sm:$0xff] }
  0x1a   : > { %1014 = vmatmul.msk.f32.vlgmr.msra.gmra.mxu1 %vm385_vm0, %v402_v16  ;;  %v403_v18 = vld [vmem:[#allocation2 + $0x11] sm:$0xff] }
  0x1b   : > { %1015 = vmatmul.msk.f32.vlgmr.msra.gmra.mxu2 %vm385_vm0, %v403_v18  ;;  %v404_v20 = vld [vmem:[#allocation2 + $0x19] sm:$0xff]  ;;  %679 = vmatpush.msra.mxu1 %v1040_v15  ;;  %v491_v31 = vld [vmem:[#allocation2 + $0xa] sm:$0xff] }
  0x1c   : > { %1016 = vmatmul.msk.f32.vlgmr.msra.gmra.mxu3 %vm385_vm0, %v404_v20  ;;  %731 = vmatpush.msra.mxu2 %v1046_v17  ;;  %v401_v23 = vld [vmem:[#allocation2 + $0x1] sm:$0xff]  ;;  %v543_v32 = vld [vmem:[#allocation2 + $0x10] sm:$0xff]  ;;  %v544_v34 = vld [vmem:[#allocation2 + $0x18] sm:$0xff] }
  0x1d   : > { %1013 = vmatmul.msk.f32.vlgmr.msra.gmra.mxu0 %vm385_vm0, %v401_v23  ;;  %783 = vmatpush.msra.mxu3 %v1052_v19  ;;  %v395_v28 = vld [vmem:[#allocation2] sm:$0xff]  ;;  %v492_v33 = vld [vmem:[#allocation2 + $0x12] sm:$0xff]  ;;  %v701_v40 = vld [vmem:[#allocation2 + $0x28] sm:$0xff] }
  0x1e   : > { %835 = vmatpush.msra.mxu0 %v1058_v21  ;;  %732 = vmatpush.msra.mxu2 %v1045_v22  ;;  %v490_v29 = vld [vmem:[#allocation2 + $0x2] sm:$0xff]  ;;  %v493_v36 = vld [vmem:[#allocation2 + $0x1a] sm:$0xff]  ;;  %v805_v42 = vld [vmem:[#allocation2 + $0x2a] sm:$0xff] }
  0x1f   : > { %784 = vmatpush.msra.mxu3 %v1051_v24  ;;  %680 = vmatpush.msra.mxu1 %v1039_v25  ;;  %v545_v37 = vld [vmem:[#allocation2 + $0x20] sm:$0xff]  ;;  %v753_v41 = vld [vmem:[#allocation2 + $0x29] sm:$0xff] }
  0x20   : > { %836 = vmatpush.msra.mxu0 %v1057_v26  ;;  %v597_v38 = vld [vmem:[#allocation2 + $0x21] sm:$0xff]  ;;  %v1104_v15 = vld [vmem:[%s1322_s4] ss:$0 sm:$0xff] }
  0x21   : > { %v649_v39 = vld [vmem:[#allocation2 + $0x22] sm:$0xff] }
  0x22   : > { %1017 = vmatmul.msk.f32.vlgmr.msrb.gmra.mxu1 %vm385_vm0, %v395_v28 }
  0x23   : > { %1023 = vmatmul.msk.f32.vlgmr.msrb.gmra.mxu2 %vm385_vm0, %v490_v29 }
  0x24   : > { %1029 = vmatmul.msk.f32.vlgmr.msrb.gmra.mxu3 %vm385_vm0, %v542_v30 }
  0x25   : > { %1035 = vmatmul.msk.f32.vlgmr.msrb.gmra.mxu0 %vm385_vm0, %v402_v16 }
  0x2a   : > { %1018 = vmatmul.msk.f32.gmra.mxu1 %vm385_vm0, %v542_v30 }
  0x2b   : > { %1024 = vmatmul.msk.f32.gmra.mxu2 %vm385_vm0, %v491_v31 }
  0x2c   : > { %1030 = vmatmul.msk.f32.gmra.mxu3 %vm385_vm0, %v543_v32 }
  0x2d   : > { %1036 = vmatmul.msk.f32.gmra.mxu0 %vm385_vm0, %v403_v18 }
  0x32   : > { %1019 = vmatmul.msk.f32.gmra.mxu1 %vm385_vm0, %v543_v32 }
  0x33   : > { %1025 = vmatmul.msk.f32.gmra.mxu2 %vm385_vm0, %v492_v33 }
  0x34   : > { %1031 = vmatmul.msk.f32.gmra.mxu3 %vm385_vm0, %v544_v34 }
  0x35   : > { %1037 = vmatmul.msk.f32.gmra.mxu0 %vm385_vm0, %v404_v20 }
  0x3a   : > { %1020 = vmatmul.msk.f32.gmra.mxu1 %vm385_vm0, %v544_v34 }
  0x3b   : > { %1026 = vmatmul.msk.f32.gmra.mxu2 %vm385_vm0, %v493_v36 }
  0x3c   : > { %1032 = vmatmul.msk.f32.gmra.mxu3 %vm385_vm0, %v545_v37 }
  0x3d   : > { %1038 = vmatmul.msk.f32.gmra.mxu0 %vm385_vm0, %v597_v38 }
  0x42   : > { %1041 = vmatmul.msk.f32.vlgmr.msra.gmra.mxu1 %vm385_vm0, %v491_v31 }
  0x43   : > { %1047 = vmatmul.msk.f32.vlgmr.msra.gmra.mxu2 %vm385_vm0, %v543_v32 }
  0x44   : > { %1053 = vmatmul.msk.f32.vlgmr.msra.gmra.mxu3 %vm385_vm0, %v403_v18 }
  0x45   : > { %1059 = vmatmul.msk.f32.vlgmr.msra.gmra.mxu0 %vm385_vm0, %v492_v33 }
  0x4a   : > { %1042 = vmatmul.msk.f32.gmra.mxu1 %vm385_vm0, %v492_v33 }
  0x4b   : > { %1048 = vmatmul.msk.f32.gmra.mxu2 %vm385_vm0, %v544_v34 }
  0x4c   : > { %1054 = vmatmul.msk.f32.gmra.mxu3 %vm385_vm0, %v404_v20 }
  0x4d   : > { %1060 = vmatmul.msk.f32.gmra.mxu0 %vm385_vm0, %v493_v36 }
  0x52   : > { %1043 = vmatmul.msk.f32.gmra.mxu1 %vm385_vm0, %v493_v36 }
  0x53   : > { %1049 = vmatmul.msk.f32.gmra.mxu2 %vm385_vm0, %v545_v37 }
  0x54   : > { %1055 = vmatmul.msk.f32.gmra.mxu3 %vm385_vm0, %v597_v38 }
  0x55   : > { %1061 = vmatmul.msk.f32.gmra.mxu0 %vm385_vm0, %v649_v39 }
  0x5a   : > { %1044 = vmatmul.msk.f32.gmra.mxu1 %vm385_vm0, %v649_v39 }
  0x5b   : > { %1050 = vmatmul.msk.f32.gmra.mxu2 %vm385_vm0, %v701_v40 }
  0x5c   : > { %1056 = vmatmul.msk.f32.gmra.mxu3 %vm385_vm0, %v753_v41 }
  0x5d   : > { %1062 = vmatmul.msk.f32.gmra.mxu0 %vm385_vm0, %v805_v42 }
  0x97   : > { %v440_v43 = vpop.f32.mrf.mxu1 }
  0x9a   : > { %v437_v44 = vpop.f32.mrf.mxu0 }
  0x9e   : > { %v443_v45 = vpop.f32.mrf.mxu2 }
  0x9f   : > { %v446_v46 = vpop.f32.mrf.mxu3  ;;  %v478_v47 = vpop.f32.mrf.mxu1 }
  0xa0   : > { %v479_v60 = vadd.f32 %v478_v47, %v437_v44 }
  0xa2   : > { %v630_v48 = vpop.f32.mrf.mxu0 }
  0xa6   : > { %v526_v49 = vpop.f32.mrf.mxu2 }
  0xa7   : > { %v481_v50 = vpop.f32.mrf.mxu1  ;;  %v578_v51 = vpop.f32.mrf.mxu3  ;;  %v538_v62 = vadd.f32 %v526_v49, %v479_v60 }
  0xa8   : > { %v482_v3 = vadd.f32 %v481_v50, %v440_v43 }
  0xa9   : > { %v590_v0 = vadd.f32 %v578_v51, %v538_v62 }
  0xaa   : > { %v633_v52 = vpop.f32.mrf.mxu0 }
  0xab   : > { %v642_v5 = vadd.f32 %v630_v48, %v590_v0 }
  0xae   : > { %v529_v53 = vpop.f32.mrf.mxu2 }
  0xaf   : > { %v484_v54 = vpop.f32.mrf.mxu1  ;;  %v581_v55 = vpop.f32.mrf.mxu3  ;;  %v539_v6 = vadd.f32 %v529_v53, %v482_v3 }
  0xb0   : > { %v485_v13 = vadd.f32 %v484_v54, %v443_v45 }
  0xb1   : > { %v591_v9 = vadd.f32 %v581_v55, %v539_v6 }
  0xb2   : > { %v636_v56 = vpop.f32.mrf.mxu0 }
  0xb3   : > { %v643_v16 = vadd.f32 %v633_v52, %v591_v9 }
  0xb6   : > { %v532_v57 = vpop.f32.mrf.mxu2 }
  0xb7   : > { %v487_v58 = vpop.f32.mrf.mxu1  ;;  %v584_v59 = vpop.f32.mrf.mxu3  ;;  %v540_v17 = vadd.f32 %v532_v57, %v485_v13 }
  0xb8   : > { %v488_v28 = vadd.f32 %v487_v58, %v446_v46 }
  0xb9   : > { %v592_v23 = vadd.f32 %v584_v59, %v540_v17 }
  0xba   : > { %v639_v61 = vpop.f32.mrf.mxu0 }
  0xbb   : > { %v644_v31 = vadd.f32 %v636_v56, %v592_v23 }
  0xbe   : > { %v535_v63 = vpop.f32.mrf.mxu2 }
  0xbf   : > { %v587_v1 = vpop.f32.mrf.mxu3  ;;  %v682_v2 = vpop.f32.mrf.mxu1  ;;  %v541_v32 = vadd.f32 %v535_v63, %v488_v28 }
  0xc0   : > { %v694_v7 = vadd.f32 %v682_v2, %v642_v5 }
  0xc1   : > { %v593_v38 = vadd.f32 %v587_v1, %v541_v32 }
  0xc2   : > { %v838_v4 = vpop.f32.mrf.mxu0 }
  0xc3   : > { %v645_v45 = vadd.f32 %v639_v61, %v593_v38 }
  0xc6   : > { %v734_v8 = vpop.f32.mrf.mxu2 }
  0xc7   : > { %v746_v10 = vadd.f32 %v734_v8, %v694_v7  ;;  %v685_v11 = vpop.f32.mrf.mxu1  ;;  %v786_v12 = vpop.f32.mrf.mxu3 }
  0xc8   : > { %v695_v20 = vadd.f32 %v685_v11, %v643_v16 }
  0xc9   : > { %v798_v14 = vadd.f32 %v786_v12, %v746_v10 }
  0xca   : > { %v841_v19 = vpop.f32.mrf.mxu0 }
  0xcb   : > { %v850_v18 = vadd.f32 %v838_v4, %v798_v14 }
  0xcd   : > { %v858_v21 = vadd.f32 %v1104_v15, %v850_v18 }
  0xce   : > { %v737_v22 = vpop.f32.mrf.mxu2 }
  0xcf   : > { %vm862_vm1 = vcmp.ge.f32.partialorder %v858_v21, 0.0  ;;  %v866_v24 = vmul.f32 0.01, %v858_v21  ;;  %v747_v25 = vadd.f32 %v737_v22, %v695_v20  ;;  %v789_v26 = vpop.f32.mrf.mxu3  ;;  %v688_v27 = vpop.f32.mrf.mxu1 }
  0xd0   : > { %v696_v34 = vadd.f32 %v688_v27, %v644_v31 }
  0xd1   : > { %v870_v29 = vsel %vm862_vm1, %v858_v21, %v866_v24  ;;  %v799_v30 = vadd.f32 %v789_v26, %v747_v25 }
  0xd2   : > { %874 = vst.msk [vmem:[%s1299_s8] sm:$0xff] %vm385_vm0, %v870_v29  ;;  %v844_v37 = vpop.f32.mrf.mxu0 }
  0xd3   : > { %v851_v33 = vadd.f32 %v841_v19, %v799_v30 }
  0xd5   : > { %v859_v35 = vadd.f32 %v1104_v15, %v851_v33 }
  0xd6   : > { %v740_v36 = vpop.f32.mrf.mxu2 }
  0xd7   : > { %vm863_vm2 = vcmp.ge.f32.partialorder %v859_v35, 0.0  ;;  %v867_v39 = vmul.f32 0.01, %v859_v35  ;;  %v748_v40 = vadd.f32 %v740_v36, %v696_v34  ;;  %v792_v41 = vpop.f32.mrf.mxu3  ;;  %v691_v44 = vpop.f32.mrf.mxu1 }
  0xd8   : > { %v697_v47 = vadd.f32 %v691_v44, %v645_v45 }
  0xd9   : > { %v871_v42 = vsel %vm863_vm2, %v859_v35, %v867_v39  ;;  %v800_v43 = vadd.f32 %v792_v41, %v748_v40 }
  0xda   : > { %875 = vst.msk [vmem:[%s1299_s8 + $0x8] sm:$0xff] %vm385_vm0, %v871_v42  ;;  %v847_v53 = vpop.f32.mrf.mxu0 }
  0xdb   : > { %v852_v46 = vadd.f32 %v844_v37, %v800_v43 }
  0xdd   : > { %v860_v48 = vadd.f32 %v1104_v15, %v852_v46 }
  0xde   : > { %v743_v49 = vpop.f32.mrf.mxu2 }
  0xdf   : > { %vm864_vm3 = vcmp.ge.f32.partialorder %v860_v48, 0.0  ;;  %v868_v50 = vmul.f32 0.01, %v860_v48  ;;  %v749_v51 = vadd.f32 %v743_v49, %v697_v47  ;;  %v795_v52 = vpop.f32.mrf.mxu3 }
  0xe1   : > { %v872_v54 = vsel %vm864_vm3, %v860_v48, %v868_v50  ;;  %v801_v55 = vadd.f32 %v795_v52, %v749_v51 }
  0xe2   : > { %876 = vst.msk [vmem:[%s1299_s8 + $0x10] sm:$0xff] %vm385_vm0, %v872_v54 }
  0xe3   : > { %v853_v56 = vadd.f32 %v847_v53, %v801_v55 }
  0xe5   : > { %v861_v57 = vadd.f32 %v1104_v15, %v853_v56 }
  0xe7   : > { %vm865_vm4 = vcmp.ge.f32.partialorder %v861_v57, 0.0  ;;  %v869_v58 = vmul.f32 0.01, %v861_v57 }
  0xe9   : > { %v873_v59 = vsel %vm865_vm4, %v861_v57, %v869_v58 }
  0xea   : > { %877 = vst.msk [vmem:[%s1299_s8 + $0x18] sm:$0xff] %vm385_vm0, %v873_v59 }
  0xeb PF: > { %s15_s20 = sadd.s32 1, %s1127_s20   ;;  %s1324_s18 = smov %s1123_s19 }
  0xec   : > { %p12_p5 = scmp.ge.s32.totalorder %s15_s20, 4   ;;  %s1325_s19 = smov %s1327_s21 }
  0xee   :  { %14 = sbr.rel (!%p12_p5) target bundleno = 2 (0x2), region = 84 }

// kernel: mv_res_encoder_forward.16
= control target key start
LH: loop header
LB: loop body
LE: loop exit
PB: predicated region body
PF: predicated region fallthrough
CT: control target
= control target key end

     0   :  { %s844_s21 = smov 0   ;;  %s846_s22 = smov 0   ;;  %s1009_s0 = inlined_call_operand.vmem [shape: f32[2,24,64], index: 0, kind: input, shape index: {}, may-alias: {0,1}]   ;;  %s1010_s1 = inlined_call_operand.vmem [shape: f32[2,24,64], index: 1, kind: input, shape index: {}, may-alias: {0,1}]   ;;  %s1011_s2 = inlined_call_operand.vmem [shape: f32[4,64,16], index: 2, kind: input, shape index: {}]   ;;  %s1012_s3 = inlined_call_operand.vmem [shape: f32[1,16], index: 3, kind: input, shape index: {}]   ;;  %s1013_s4 = inlined_call_operand.vmem [shape: f32[16,16], index: 4, kind: input, shape index: {}]   ;;  %s1014_s5 = inlined_call_operand.vmem [shape: f32[1,16], index: 5, kind: input, shape index: {}]   ;;  %s1015_s6 = inlined_call_operand.vmem [shape: f32[2,16,16], index: 6, kind: output, shape index: {}]  }
   0x1   :  { %s848_s23 = smov 0  }
   0x2 LB: > { %s28_s24 = sadd.s32 1, %s802_s22  ;;  %p704_p0 = scmp.ge.s32.totalorder %s806_s23, 1  ;;  %s806_s23 = sphi %s848_s23, %s16_s23   ;;  %s802_s22 = sphi %s846_s22, %s1017_s22   ;;  %s798_s21 = sphi %s844_s21, %s1016_s21  }
   0x3   : > { %p30_p1 = scmp.ge.s32.totalorder %s28_s24, 2  ;;  %p264_p2 = scmp.lt.s32.totalorder %s806_s23, 3 }
   0x5   : > { %s1019_s24 = smov (%p30_p1, %s28_s24), 0  ;;  %p265_p3 = pnand %p704_p0, %p264_p2 }
   0x6   : > { %p321_p4 = scmp.lt.s32.totalorder (!%p265_p3), %s798_s21, 1 }
   0x7   : > { %268 = sbr.rel (%p265_p3) target bundleno = 326 (0x146), region = 44 }
   0xc   : > { %v728_v0 = vld [vmem:[%s1011_s2 + $0xb8] sm:$0xff]  ;;  %v727_v1 = vld [vmem:[%s1011_s2 + $0xb0] sm:$0xff]  ;;  %vm358_vm0 = vcmask 523264   ;;  %v726_v5 = vld [vmem:[%s1011_s2 + $0xa8] sm:$0xff]  ;;  %v808_v6 = vmov 0.0   ;;  %s1021_s21 = smov (!%p321_p4, %s798_s21), 1 }
   0xd   : > { %v738_v2 = vld [vmem:[%s1011_s2 + $0xf8] sm:$0xff]  ;;  %468 = vmatpush.msra.mxu2 %v728_v0  ;;  %363 = vst.msk [vmem:[#allocation2 + $0x18] sm:$0xff] %vm358_vm0, %v808_v6  ;;  %v737_v7 = vld [vmem:[%s1011_s2 + $0xf0] sm:$0xff]  ;;  %v736_v10 = vld [vmem:[%s1011_s2 + $0xe8] sm:$0xff]  ;;  %s750_s9 = smul.u32 24, %s1021_s21  ;;  %vm541_vm1 = vcmask 130048  }
   0xe   : > { %510 = vmatpush.msra.mxu3 %v738_v2  ;;  %v716_v3 = vld [vmem:[%s1011_s2 + $0x78] sm:$0xff]  ;;  %v715_v8 = vld [vmem:[%s1011_s2 + $0x70] sm:$0xff]  ;;  %v714_v11 = vld [vmem:[%s1011_s2 + $0x68] sm:$0xff]  ;;  %s747_s26 = sshll.u32 %s1021_s21, 4 }
   0xf   : > { %v373_v4 = vld [vmem:[%s1011_s2 + $0x38] sm:$0xff]  ;;  %399 = vmatpush.msra.mxu0 %v716_v3  ;;  %v372_v9 = vld [vmem:[%s1011_s2 + $0x30] sm:$0xff]  ;;  %469 = vmatpush.msra.mxu2 %v727_v1  ;;  %v725_v12 = vld [vmem:[%s1011_s2 + $0xa0] sm:$0xff]  ;;  %s328_s20 = scalar_lea.vmem %s1009_s0, %s750_s9  ;;  %s746_s25 = sadd.s32 16, %s750_s9 }
  0x10   : > { %428 = vmatpush.msra.mxu1 %v373_v4  ;;  %511 = vmatpush.msra.mxu3 %v737_v7  ;;  %v371_v13 = vld [vmem:[%s1011_s2 + $0x28] sm:$0xff]  ;;  %v735_v14 = vld [vmem:[%s1011_s2 + $0xe0] sm:$0xff]  ;;  %v724_v17 = vld [vmem:[%s1011_s2 + $0x98] sm:$0xff]  ;;  %s343_s8 = scalar_lea.vmem %s1010_s1, %s746_s25  ;;  %s354_s29 = scalar_lea.vmem %s1015_s6, %s747_s26 }
  0x11   : > { %400 = vmatpush.msra.mxu0 %v715_v8  ;;  %470 = vmatpush.msra.mxu2 %v726_v5  ;;  %v713_v15 = vld [vmem:[%s1011_s2 + $0x60] sm:$0xff]  ;;  %v734_v18 = vld [vmem:[%s1011_s2 + $0xd8] sm:$0xff]  ;;  %v723_v21 = vld [vmem:[%s1011_s2 + $0x90] sm:$0xff] }
  0x12   : > { %429 = vmatpush.msra.mxu1 %v372_v9  ;;  %512 = vmatpush.msra.mxu3 %v736_v10  ;;  %v370_v16 = vld [vmem:[%s1011_s2 + $0x20] sm:$0xff]  ;;  %v712_v19 = vld [vmem:[%s1011_s2 + $0x58] sm:$0xff]  ;;  %v722_v22 = vld [vmem:[%s1011_s2 + $0x88] sm:$0xff] }
  0x13   : > { %401 = vmatpush.msra.mxu0 %v714_v11  ;;  %471 = vmatpush.msra.mxu2 %v725_v12  ;;  %v369_v20 = vld [vmem:[%s1011_s2 + $0x18] sm:$0xff]  ;;  %v733_v23 = vld [vmem:[%s1011_s2 + $0xd0] sm:$0xff]  ;;  %v357_v26 = vld [vmem:[%s328_s20 + $0x8] sm:$0xff] }
  0x14   : > { %430 = vmatpush.msra.mxu1 %v371_v13  ;;  %513 = vmatpush.msra.mxu3 %v735_v14  ;;  %v711_v24 = vld [vmem:[%s1011_s2 + $0x50] sm:$0xff]  ;;  %v732_v27 = vld [vmem:[%s1011_s2 + $0xc8] sm:$0xff]  ;;  %360 = vst.msk [vmem:[#allocation2 + $0x8] sm:$0xff] %vm358_vm0, %v357_v26  ;;  %v361_v29 = vld [vmem:[%s343_s8] sm:$0xff] }
  0x15   : > { %402 = vmatpush.msra.mxu0 %v713_v15  ;;  %472 = vmatpush.msra.mxu2 %v724_v17  ;;  %v368_v25 = vld [vmem:[%s1011_s2 + $0x10] sm:$0xff]  ;;  %v710_v28 = vld [vmem:[%s1011_s2 + $0x48] sm:$0xff]  ;;  %362 = vst.msk [vmem:[#allocation2 + $0x10] sm:$0xff] %vm358_vm0, %v361_v29  ;;  %v356_v31 = vld [vmem:[%s328_s20] sm:$0xff] }
  0x16   : > { %431 = vmatpush.msra.mxu1 %v370_v16  ;;  %514 = vmatpush.msra.mxu3 %v734_v18  ;;  %v367_v30 = vld [vmem:[%s1011_s2 + $0x8] sm:$0xff]  ;;  %v721_v32 = vld [vmem:[%s1011_s2 + $0x80] sm:$0xff]  ;;  %359 = vst.msk [vmem:[#allocation2] sm:$0xff] %vm358_vm0, %v356_v31 }
  0x17   : > { %403 = vmatpush.msra.mxu0 %v712_v19  ;;  %473 = vmatpush.msra.mxu2 %v723_v21  ;;  %v731_v33 = vld [vmem:[%s1011_s2 + $0xc0] sm:$0xff]  ;;  %v536_v42 = vld [vmem:[%s1013_s4 + $0x8] sm:$0xff] }
  0x18   : > { %432 = vmatpush.msra.mxu1 %v369_v20  ;;  %515 = vmatpush.msra.mxu3 %v733_v23  ;;  %v709_v34 = vld [vmem:[%s1011_s2 + $0x40] sm:$0xff] }
  0x19   : > { %404 = vmatpush.msra.mxu0 %v711_v24  ;;  %474 = vmatpush.msra.mxu2 %v722_v22  ;;  %v366_v35 = vld [vmem:[%s1011_s2] sm:$0xff] }
  0x1a   : > { %433 = vmatpush.msra.mxu1 %v368_v25  ;;  %516 = vmatpush.msra.mxu3 %v732_v27  ;;  %v535_v43 = vld [vmem:[%s1013_s4] sm:$0xff] }
  0x1b   : > { %405 = vmatpush.msra.mxu0 %v710_v28  ;;  %475 = vmatpush.msra.mxu2 %v721_v32  ;;  %v443_v36 = vld [vmem:[#allocation2 + $0x8] sm:$0xff]  ;;  %v778_v50 = vld [vmem:[%s1012_s3] ss:$0 sm:$0xff] }
  0x1c   : > { %434 = vmatpush.msra.mxu1 %v367_v30  ;;  %517 = vmatpush.msra.mxu3 %v731_v33  ;;  %v485_v37 = vld [vmem:[#allocation2 + $0x9] sm:$0xff]  ;;  %v486_v41 = vld [vmem:[#allocation2 + $0x11] sm:$0xff]  ;;  %v779_v63 = vld [vmem:[%s1014_s5] ss:$0 sm:$0xff] }
  0x1d   : > { %406 = vmatpush.msra.mxu0 %v709_v34  ;;  %729 = vmatmul.msk.f32.vlgmr.msra.gmra.mxu2 %vm358_vm0, %v443_v36  ;;  %v374_v38 = vld [vmem:[#allocation2 + $0x1] sm:$0xff]  ;;  %v444_v40 = vld [vmem:[#allocation2 + $0x10] sm:$0xff] }
  0x1e   : > { %435 = vmatpush.msra.mxu1 %v366_v35  ;;  %739 = vmatmul.msk.f32.vlgmr.msra.gmra.mxu3 %vm358_vm0, %v485_v37  ;;  %v364_v39 = vld [vmem:[#allocation2] sm:$0xff] }
  0x1f   : > { %717 = vmatmul.msk.f32.vlgmr.msra.gmra.mxu0 %vm358_vm0, %v374_v38  ;;  %719 = vmatmul.msk.f32.vlgmr.msra.gmra.mxu1 %vm358_vm0, %v364_v39 }
  0x20   : > { %562 = vmatpush.msrb.mxu0 %v536_v42  ;;  %748 = vmatpush.msrb.mxu1 %v536_v42 }
  0x22   : > { %563 = vmatpush.msrb.mxu0 %v535_v43  ;;  %749 = vmatpush.msrb.mxu1 %v535_v43 }
  0x25   : > { %730 = vmatmul.msk.f32.gmra.mxu2 %vm358_vm0, %v444_v40 }
  0x26   : > { %740 = vmatmul.msk.f32.gmra.mxu3 %vm358_vm0, %v486_v41 }
  0x27   : > { %718 = vmatmul.msk.f32.gmra.mxu0 %vm358_vm0, %v485_v37  ;;  %720 = vmatmul.msk.f32.gmra.mxu1 %vm358_vm0, %v443_v36 }
  0x9c   : > { %v408_v44 = vpop.f32.mrf.mxu0  ;;  %v437_v45 = vpop.f32.mrf.mxu1 }
  0x9d   : > { %v438_v46 = vadd.f32 %v437_v45, %v408_v44 }
  0xa0   : > { %v477_v47 = vpop.f32.mrf.mxu2 }
  0xa1   : > { %v483_v48 = vadd.f32 %v477_v47, %v438_v46  ;;  %v519_v49 = vpop.f32.mrf.mxu3 }
  0xa3   : > { %v525_v51 = vadd.f32 %v519_v49, %v483_v48 }
  0xa4   : > { %v411_v52 = vpop.f32.mrf.mxu0  ;;  %v440_v53 = vpop.f32.mrf.mxu1 }
  0xa5   : > { %v531_v54 = vadd.f32 %v778_v50, %v525_v51  ;;  %v441_v55 = vadd.f32 %v440_v53, %v411_v52 }
  0xa7   : > { %v533_v56 = vmul.f32 %v531_v54, %v531_v54 }
  0xa8   : > { %v480_v57 = vpop.f32.mrf.mxu2 }
  0xa9   : > { %v484_v58 = vadd.f32 %v480_v57, %v441_v55  ;;  %741 = vmatmul.msk.f32.vlgmr.msrb.gmra.mxu0 %vm541_vm1, %v533_v56  ;;  %v522_v59 = vpop.f32.mrf.mxu3 }
  0xab   : > { %v526_v60 = vadd.f32 %v522_v59, %v484_v58 }
  0xad   : > { %v532_v61 = vadd.f32 %v778_v50, %v526_v60 }
  0xaf   : > { %v534_v62 = vmul.f32 %v532_v61, %v532_v61 }
  0xb1   : > { %742 = vmatmul.msk.f32.vlgmr.msrb.gmra.mxu1 %vm541_vm1, %v534_v62 }
 0x126   : > { %v565_v0 = vpop.f32.mrf.mxu0 }
 0x127   : > { %v566_v1 = vadd.f32 %v779_v63, %v565_v0 }
 0x129   : > { %780 = vrsqrt.f32 %v566_v1  ;;  %vm577_vm3 = vweird.f32 %v566_v1 }
 0x12e   : > { %v568_v2 = vpop.f32.mrf.mxu1 }
 0x12f   : > { %v781_v3 = vpop.eup %780  ;;  %v569_v4 = vadd.f32 %v779_v63, %v568_v2 }
 0x130   : > { %v572_v5 = vmul.f32 %v781_v3, %v566_v1  ;;  %vm578_vm2 = vweird.f32 %v781_v3 }
 0x131   : > { %782 = vrsqrt.f32 %v569_v4  ;;  %vm579_vm4 = vmor %vm577_vm3, %vm578_vm2  ;;  %vm587_vm6 = vweird.f32 %v569_v4 }
 0x132   : > { %v573_v6 = vmul.f32 %v781_v3, %v572_v5 }
 0x134   : > { %v574_v7 = vmul.f32 0.5, %v573_v6 }
 0x136   : > { %v575_v8 = vsub.f32 1.5, %v574_v7 }
 0x137   : > { %v783_v9 = vpop.eup %782 }
 0x138   : > { %v576_v10 = vmul.f32 %v781_v3, %v575_v8  ;;  %v582_v11 = vmul.f32 %v783_v9, %v569_v4  ;;  %vm588_vm5 = vweird.f32 %v783_v9 }
 0x139   : > { %vm589_vm7 = vmor %vm587_vm6, %vm588_vm5 }
 0x13a   : > { %v580_v12 = vsel %vm579_vm4, %v781_v3, %v576_v10  ;;  %v583_v13 = vmul.f32 %v783_v9, %v582_v11 }
 0x13b   : > { %v591_v14 = vmul.f32 %v580_v12, %v531_v54 }
 0x13c   : > { %v584_v15 = vmul.f32 0.5, %v583_v13 }
 0x13d   : > { %593 = vst.msk [vmem:[%s354_s29] sm:$0xff] %vm541_vm1, %v591_v14 }
 0x13e   : > { %v585_v16 = vsub.f32 1.5, %v584_v15 }
 0x140   : > { %v586_v17 = vmul.f32 %v783_v9, %v585_v16 }
 0x142   : > { %v590_v18 = vsel %vm589_vm7, %v783_v9, %v586_v17 }
 0x143   : > { %v592_v19 = vmul.f32 %v590_v18, %v532_v61 }
 0x145   : > { %594 = vst.msk [vmem:[%s354_s29 + $0x8] sm:$0xff] %vm541_vm1, %v592_v19 }
 0x146 PF: > { %s16_s23 = sadd.s32 1, %s806_s23   ;;  %s1016_s21 = smov %s802_s22 }
 0x147   : > { %p13_p5 = scmp.ge.s32.totalorder %s16_s23, 4   ;;  %s1017_s22 = smov %s1019_s24 }
 0x149   :  { %15 = sbr.rel (!%p13_p5) target bundleno = 2 (0x2), region = 80 }

// kernel: mv_res_encoder_forward.18
= control target key start
LH: loop header
LB: loop body
LE: loop exit
PB: predicated region body
PF: predicated region fallthrough
CT: control target
= control target key end

     0   :  { %s1060_s21 = smov 0   ;;  %s1062_s22 = smov 0   ;;  %s1188_s0 = inlined_call_operand.vmem [shape: f32[2,32,16], index: 0, kind: input, shape index: {}, may-alias: {0,1,2}]   ;;  %s1189_s1 = inlined_call_operand.vmem [shape: f32[2,32,16], index: 1, kind: input, shape index: {}, may-alias: {0,1,2}]   ;;  %s1190_s2 = inlined_call_operand.vmem [shape: f32[2,32,16], index: 2, kind: input, shape index: {}, may-alias: {0,1,2}]   ;;  %s1191_s3 = inlined_call_operand.vmem [shape: f32[9,16,16], index: 3, kind: input, shape index: {}]   ;;  %s1192_s4 = inlined_call_operand.vmem [shape: f32[1,16], index: 4, kind: input, shape index: {}]   ;;  %s1193_s5 = inlined_call_operand.vmem [shape: f32[2,16,16], index: 5, kind: input, shape index: {}]   ;;  %s1194_s6 = inlined_call_operand.vmem [shape: f32[2,16,16], index: 6, kind: output, shape index: {}]  }
   0x1   :  { %s1064_s23 = smov 0  }
   0x2 LB: > { %s28_s24 = sadd.s32 1, %s1018_s22  ;;  %p916_p0 = scmp.ge.s32.totalorder %s1022_s23, 1  ;;  %s1022_s23 = sphi %s1064_s23, %s16_s23   ;;  %s1018_s22 = sphi %s1062_s22, %s1196_s22   ;;  %s1014_s21 = sphi %s1060_s21, %s1195_s21  }
   0x3   : > { %p30_p1 = scmp.ge.s32.totalorder %s28_s24, 2  ;;  %p300_p2 = scmp.lt.s32.totalorder %s1022_s23, 3 }
   0x5   : > { %s1198_s24 = smov (%p30_p1, %s28_s24), 0  ;;  %p301_p3 = pnand %p916_p0, %p300_p2 }
   0x6   : > { %p369_p4 = scmp.lt.s32.totalorder (!%p301_p3), %s1014_s21, 1 }
   0x7   : > { %304 = sbr.rel (%p301_p3) target bundleno = 201 (0xc9), region = 44 }
   0xc   : > { %v928_v0 = vld [vmem:[%s1191_s3 + $0x18] sm:$0xff]  ;;  %v927_v1 = vld [vmem:[%s1191_s3 + $0x10] sm:$0xff]  ;;  %v437_v2 = vld [vmem:[%s1191_s3 + $0x8] sm:$0xff]  ;;  %s1200_s21 = smov (!%p369_p4, %s1014_s21), 1  ;;  %vm426_vm0 = vcmask 130048   ;;  %v1024_v16 = vmov 0.0  }
   0xd   : > { %972 = vmatpush.msra.mxu1 %v928_v0  ;;  %v934_v3 = vld [vmem:[%s1191_s3 + $0x28] sm:$0xff]  ;;  %463 = vmatpush.msra.mxu0 %v928_v0  ;;  %v933_v4 = vld [vmem:[%s1191_s3 + $0x20] sm:$0xff]  ;;  %v938_v5 = vld [vmem:[%s1191_s3 + $0x38] sm:$0xff]  ;;  %s963_s25 = sshll.u32 %s1200_s21, 5  ;;  %433 = vst.msk [vmem:[#allocation2 + $0x20] sm:$0xff] %vm426_vm0, %v1024_v16 }
   0xe   : > { %526 = vmatpush.msra.mxu2 %v934_v3  ;;  %562 = vmatpush.msra.mxu3 %v938_v5  ;;  %v950_v6 = vld [vmem:[%s1191_s3 + $0x68] sm:$0xff]  ;;  %v937_v7 = vld [vmem:[%s1191_s3 + $0x30] sm:$0xff]  ;;  %v436_v8 = vld [vmem:[%s1191_s3] sm:$0xff]  ;;  %s376_s8 = scalar_lea.vmem %s1188_s0, %s963_s25  ;;  %s965_s9 = sadd.s32 16, %s963_s25 }
   0xf   : > { %973 = vmatpush.msra.mxu1 %v927_v1  ;;  %464 = vmatpush.msra.mxu0 %v927_v1  ;;  %v942_v9 = vld [vmem:[%s1191_s3 + $0x48] sm:$0xff]  ;;  %v954_v10 = vld [vmem:[%s1191_s3 + $0x78] sm:$0xff]  ;;  %v949_v11 = vld [vmem:[%s1191_s3 + $0x60] sm:$0xff]  ;;  %s387_s16 = scalar_lea.vmem %s1189_s1, %s965_s9  ;;  %s967_s17 = sadd.s32 24, %s963_s25 }
  0x10   : > { %527 = vmatpush.msra.mxu2 %v933_v4  ;;  %563 = vmatpush.msra.mxu3 %v937_v7  ;;  %v941_v12 = vld [vmem:[%s1191_s3 + $0x40] sm:$0xff]  ;;  %v953_v13 = vld [vmem:[%s1191_s3 + $0x70] sm:$0xff]  ;;  %v425_v14 = vld [vmem:[%s376_s8 + $0x8] sm:$0xff]  ;;  %s400_s20 = scalar_lea.vmem %s1190_s2, %s967_s17  ;;  %s968_s9 = sshll.u32 %s1200_s21, 4 }
  0x11   : > { %492 = vmatpush.msrb.mxu1 %v437_v2  ;;  %v424_v15 = vld [vmem:[%s376_s8] sm:$0xff]  ;;  %598 = vmatpush.msrb.mxu0 %v942_v9  ;;  %428 = vst.msk [vmem:[#allocation2 + $0x8] sm:$0xff] %vm426_vm0, %v425_v14  ;;  %v946_v21 = vld [vmem:[%s1191_s3 + $0x58] sm:$0xff]  ;;  %v958_v22 = vld [vmem:[%s1191_s3 + $0x88] sm:$0xff]  ;;  %s412_s12 = scalar_lea.vmem %s1193_s5, %s968_s9 }
  0x12   : > { %670 = vmatpush.msrb.mxu2 %v950_v6  ;;  %v429_v17 = vld [vmem:[%s387_s16] sm:$0xff]  ;;  %706 = vmatpush.msrb.mxu3 %v954_v10  ;;  %427 = vst.msk [vmem:[#allocation2] sm:$0xff] %vm426_vm0, %v424_v15  ;;  %v945_v25 = vld [vmem:[%s1191_s3 + $0x50] sm:$0xff]  ;;  %s422_s16 = scalar_lea.vmem %s1194_s6, %s968_s9 }
  0x13   : > { %493 = vmatpush.msrb.mxu1 %v436_v8  ;;  %430 = vst.msk [vmem:[#allocation2 + $0x10] sm:$0xff] %vm426_vm0, %v429_v17  ;;  %599 = vmatpush.msrb.mxu0 %v941_v12  ;;  %v431_v18 = vld [vmem:[%s400_s20] sm:$0xff] }
  0x14   : > { %671 = vmatpush.msrb.mxu2 %v949_v11  ;;  %707 = vmatpush.msrb.mxu3 %v953_v13  ;;  %432 = vst.msk [vmem:[#allocation2 + $0x18] sm:$0xff] %vm426_vm0, %v431_v18  ;;  %v957_v26 = vld [vmem:[%s1191_s3 + $0x80] sm:$0xff]  ;;  %v760_v11 = vld [vmem:[%s412_s12 + $0x8] sm:$0xff] }
  0x15   : > { %v999_v59 = vld [vmem:[%s1192_s4] ss:$0 sm:$0xff] }
  0x16   : > { %v759_v62 = vld [vmem:[%s412_s12] sm:$0xff] }
  0x18   : > { %v537_v19 = vld [vmem:[#allocation2 + $0x8] sm:$0xff] }
  0x19   : > { %939 = vmatmul.msk.f32.vlgmr.msra.gmra.mxu3 %vm426_vm0, %v537_v19  ;;  %v501_v23 = vld [vmem:[#allocation2 + $0x2] sm:$0xff] }
  0x1a   : > { %v439_v20 = vld [vmem:[#allocation2 + $0x9] sm:$0xff]  ;;  %v438_v24 = vld [vmem:[#allocation2 + $0x1] sm:$0xff]  ;;  %935 = vmatmul.msk.f32.vlgmr.msra.gmra.mxu2 %vm426_vm0, %v501_v23 }
  0x1b   : > { %930 = vmatmul.msk.f32.vlgmr.msra.gmra.mxu1 %vm426_vm0, %v439_v20  ;;  %929 = vmatmul.msk.f32.vlgmr.msra.gmra.mxu0 %vm426_vm0, %v438_v24  ;;  %v538_v27 = vld [vmem:[#allocation2 + $0x10] sm:$0xff]  ;;  %v434_v28 = vld [vmem:[#allocation2] sm:$0xff]  ;;  %v646_v32 = vld [vmem:[#allocation2 + $0x18] sm:$0xff] }
  0x1c   : > { %634 = vmatpush.msra.mxu1 %v946_v21  ;;  %742 = vmatpush.msra.mxu0 %v958_v22  ;;  %v502_v29 = vld [vmem:[#allocation2 + $0xa] sm:$0xff]  ;;  %v682_v31 = vld [vmem:[#allocation2 + $0x19] sm:$0xff] }
  0x1d   : > { %v574_v30 = vld [vmem:[#allocation2 + $0x11] sm:$0xff]  ;;  %v718_v34 = vld [vmem:[#allocation2 + $0x1a] sm:$0xff] }
  0x1e   : > { %635 = vmatpush.msra.mxu1 %v945_v25  ;;  %743 = vmatpush.msra.mxu0 %v957_v26  ;;  %v717_v33 = vld [vmem:[#allocation2 + $0x12] sm:$0xff] }
  0x21   : > { %940 = vmatmul.msk.f32.gmra.mxu3 %vm426_vm0, %v538_v27 }
  0x22   : > { %936 = vmatmul.msk.f32.gmra.mxu2 %vm426_vm0, %v502_v29 }
  0x23   : > { %931 = vmatmul.msk.f32.vlgmr.msrb.gmra.mxu1 %vm426_vm0, %v434_v28  ;;  %943 = vmatmul.msk.f32.vlgmr.msrb.gmra.mxu0 %vm426_vm0, %v439_v20 }
  0x29   : > { %955 = vmatmul.msk.f32.vlgmr.msrb.gmra.mxu3 %vm426_vm0, %v574_v30 }
  0x2a   : > { %951 = vmatmul.msk.f32.vlgmr.msrb.gmra.mxu2 %vm426_vm0, %v538_v27 }
  0x2b   : > { %932 = vmatmul.msk.f32.gmra.mxu1 %vm426_vm0, %v537_v19  ;;  %944 = vmatmul.msk.f32.gmra.mxu0 %vm426_vm0, %v574_v30 }
  0x31   : > { %956 = vmatmul.msk.f32.gmra.mxu3 %vm426_vm0, %v682_v31 }
  0x32   : > { %952 = vmatmul.msk.f32.gmra.mxu2 %vm426_vm0, %v646_v32 }
  0x33   : > { %947 = vmatmul.msk.f32.vlgmr.msra.gmra.mxu1 %vm426_vm0, %v502_v29  ;;  %959 = vmatmul.msk.f32.vlgmr.msra.gmra.mxu0 %vm426_vm0, %v717_v33 }
  0x3b   : > { %948 = vmatmul.msk.f32.gmra.mxu1 %vm426_vm0, %v717_v33  ;;  %960 = vmatmul.msk.f32.gmra.mxu0 %vm426_vm0, %v718_v34 }
  0x98   : > { %v469_v35 = vpop.f32.mrf.mxu1  ;;  %v466_v36 = vpop.f32.mrf.mxu0 }
  0x9c   : > { %v565_v37 = vpop.f32.mrf.mxu3 }
  0x9d   : > { %v529_v38 = vpop.f32.mrf.mxu2 }
  0xa0   : > { %v495_v39 = vpop.f32.mrf.mxu1  ;;  %v601_v40 = vpop.f32.mrf.mxu0 }
  0xa1   : > { %v496_v41 = vadd.f32 %v495_v39, %v466_v36 }
  0xa3   : > { %v535_v43 = vadd.f32 %v529_v38, %v496_v41 }
  0xa4   : > { %v568_v42 = vpop.f32.mrf.mxu3 }
  0xa5   : > { %v532_v44 = vpop.f32.mrf.mxu2  ;;  %v571_v47 = vadd.f32 %v565_v37, %v535_v43 }
  0xa7   : > { %v607_v49 = vadd.f32 %v601_v40, %v571_v47 }
  0xa8   : > { %v498_v45 = vpop.f32.mrf.mxu1  ;;  %v604_v46 = vpop.f32.mrf.mxu0 }
  0xa9   : > { %v499_v48 = vadd.f32 %v498_v45, %v469_v35 }
  0xab   : > { %v536_v50 = vadd.f32 %v532_v44, %v499_v48 }
  0xac   : > { %v709_v53 = vpop.f32.mrf.mxu3 }
  0xad   : > { %v673_v51 = vpop.f32.mrf.mxu2  ;;  %v572_v56 = vadd.f32 %v568_v42, %v536_v50 }
  0xaf   : > { %v608_v60 = vadd.f32 %v604_v46, %v572_v56 }
  0xb0   : > { %v637_v52 = vpop.f32.mrf.mxu1  ;;  %v745_v55 = vpop.f32.mrf.mxu0 }
  0xb1   : > { %v643_v54 = vadd.f32 %v637_v52, %v607_v49 }
  0xb3   : > { %v679_v57 = vadd.f32 %v673_v51, %v643_v54 }
  0xb4   : > { %v712_v3 = vpop.f32.mrf.mxu3 }
  0xb5   : > { %v715_v58 = vadd.f32 %v709_v53, %v679_v57  ;;  %v676_v0 = vpop.f32.mrf.mxu2 }
  0xb7   : > { %v751_v61 = vadd.f32 %v745_v55, %v715_v58 }
  0xb8   : > { %v640_v63 = vpop.f32.mrf.mxu1  ;;  %v748_v6 = vpop.f32.mrf.mxu0 }
  0xb9   : > { %v757_v1 = vadd.f32 %v999_v59, %v751_v61  ;;  %v644_v2 = vadd.f32 %v640_v63, %v608_v60 }
  0xbb   : > { %v761_v4 = vadd.f32 %v759_v62, %v757_v1  ;;  %v680_v5 = vadd.f32 %v676_v0, %v644_v2 }
  0xbd   : > { %vm763_vm1 = vcmp.ge.f32.partialorder %v761_v4, 0.0  ;;  %v765_v7 = vmul.f32 0.1, %v761_v4  ;;  %v716_v8 = vadd.f32 %v712_v3, %v680_v5 }
  0xbf   : > { %v767_v9 = vsel %vm763_vm1, %v761_v4, %v765_v7  ;;  %v752_v10 = vadd.f32 %v748_v6, %v716_v8 }
  0xc0   : > { %769 = vst.msk [vmem:[%s422_s16] sm:$0xff] %vm426_vm0, %v767_v9 }
  0xc1   : > { %v758_v12 = vadd.f32 %v999_v59, %v752_v10 }
  0xc3   : > { %v762_v13 = vadd.f32 %v760_v11, %v758_v12 }
  0xc5   : > { %vm764_vm2 = vcmp.ge.f32.partialorder %v762_v13, 0.0  ;;  %v766_v14 = vmul.f32 0.1, %v762_v13 }
  0xc7   : > { %v768_v15 = vsel %vm764_vm2, %v762_v13, %v766_v14 }
  0xc8   : > { %770 = vst.msk [vmem:[%s422_s16 + $0x8] sm:$0xff] %vm426_vm0, %v768_v15 }
  0xc9 PF: > { %s16_s23 = sadd.s32 1, %s1022_s23   ;;  %s1195_s21 = smov %s1018_s22 }
  0xca   : > { %p13_p5 = scmp.ge.s32.totalorder %s16_s23, 4   ;;  %s1196_s22 = smov %s1198_s24 }
  0xcc   :  { %15 = sbr.rel (!%p13_p5) target bundleno = 2 (0x2), region = 91 }

// kernel: mv_res_encoder_forward.17
= control target key start
LH: loop header
LB: loop body
LE: loop exit
PB: predicated region body
PF: predicated region fallthrough
CT: control target
= control target key end

     0   :  { %s967_s18 = smov 0   ;;  %s969_s19 = smov 0   ;;  %s1092_s0 = inlined_call_operand.vmem [shape: f32[2,32,16], index: 0, kind: input, shape index: {}, may-alias: {0,1,2}]   ;;  %s1093_s1 = inlined_call_operand.vmem [shape: f32[2,32,16], index: 1, kind: input, shape index: {}, may-alias: {0,1,2}]   ;;  %s1094_s2 = inlined_call_operand.vmem [shape: f32[2,32,16], index: 2, kind: input, shape index: {}, may-alias: {0,1,2}]   ;;  %s1095_s3 = inlined_call_operand.vmem [shape: f32[9,16,16], index: 3, kind: input, shape index: {}]   ;;  %s1096_s4 = inlined_call_operand.vmem [shape: f32[1,16], index: 4, kind: input, shape index: {}]   ;;  %s1097_s5 = inlined_call_operand.vmem [shape: f32[2,16,16], index: 5, kind: output, shape index: {}]  }
   0x1   :  { %s971_s20 = smov 0  }
   0x2 LB: > { %s27_s21 = sadd.s32 1, %s930_s19  ;;  %p831_p0 = scmp.ge.s32.totalorder %s934_s20, 1  ;;  %s934_s20 = sphi %s971_s20, %s15_s20   ;;  %s930_s19 = sphi %s969_s19, %s1099_s19   ;;  %s926_s18 = sphi %s967_s18, %s1098_s18  }
   0x3   : > { %p29_p1 = scmp.ge.s32.totalorder %s27_s21, 2  ;;  %p258_p2 = scmp.lt.s32.totalorder %s934_s20, 3 }
   0x5   : > { %s1101_s21 = smov (%p29_p1, %s27_s21), 0  ;;  %p259_p3 = pnand %p831_p0, %p258_p2 }
   0x6   : > { %p316_p4 = scmp.lt.s32.totalorder (!%p259_p3), %s926_s18, 1 }
   0x7   : > { %262 = sbr.rel (%p259_p3) target bundleno = 199 (0xc7), region = 40 }
   0xc   : > { %v841_v0 = vld [vmem:[%s1095_s3 + $0x18] sm:$0xff]  ;;  %v840_v1 = vld [vmem:[%s1095_s3 + $0x10] sm:$0xff]  ;;  %v374_v2 = vld [vmem:[%s1095_s3 + $0x8] sm:$0xff]  ;;  %s1103_s18 = smov (!%p316_p4, %s926_s18), 1  ;;  %vm363_vm0 = vcmask 130048   ;;  %v936_v16 = vmov 0.0  }
   0xd   : > { %884 = vmatpush.msra.mxu1 %v841_v0  ;;  %v847_v3 = vld [vmem:[%s1095_s3 + $0x28] sm:$0xff]  ;;  %400 = vmatpush.msra.mxu0 %v841_v0  ;;  %v846_v4 = vld [vmem:[%s1095_s3 + $0x20] sm:$0xff]  ;;  %v851_v5 = vld [vmem:[%s1095_s3 + $0x38] sm:$0xff]  ;;  %s876_s17 = sshll.u32 %s1103_s18, 5  ;;  %370 = vst.msk [vmem:[#allocation2 + $0x20] sm:$0xff] %vm363_vm0, %v936_v16  ;;  %s881_s30 = sshll.u32 %s1103_s18, 4 }
   0xe   : > { %463 = vmatpush.msra.mxu2 %v847_v3  ;;  %499 = vmatpush.msra.mxu3 %v851_v5  ;;  %v863_v6 = vld [vmem:[%s1095_s3 + $0x68] sm:$0xff]  ;;  %v850_v7 = vld [vmem:[%s1095_s3 + $0x30] sm:$0xff]  ;;  %v373_v8 = vld [vmem:[%s1095_s3] sm:$0xff]  ;;  %s323_s28 = scalar_lea.vmem %s1092_s0, %s876_s17  ;;  %s878_s29 = sadd.s32 16, %s876_s17 }
   0xf   : > { %885 = vmatpush.msra.mxu1 %v840_v1  ;;  %401 = vmatpush.msra.mxu0 %v840_v1  ;;  %v855_v9 = vld [vmem:[%s1095_s3 + $0x48] sm:$0xff]  ;;  %v867_v10 = vld [vmem:[%s1095_s3 + $0x78] sm:$0xff]  ;;  %v862_v11 = vld [vmem:[%s1095_s3 + $0x60] sm:$0xff]  ;;  %s334_s11 = scalar_lea.vmem %s1093_s1, %s878_s29  ;;  %s880_s12 = sadd.s32 24, %s876_s17 }
  0x10   : > { %464 = vmatpush.msra.mxu2 %v846_v4  ;;  %500 = vmatpush.msra.mxu3 %v850_v7  ;;  %v854_v12 = vld [vmem:[%s1095_s3 + $0x40] sm:$0xff]  ;;  %v866_v13 = vld [vmem:[%s1095_s3 + $0x70] sm:$0xff]  ;;  %v362_v14 = vld [vmem:[%s323_s28 + $0x8] sm:$0xff]  ;;  %s347_s15 = scalar_lea.vmem %s1094_s2, %s880_s12  ;;  %s359_s8 = scalar_lea.vmem %s1097_s5, %s881_s30 }
  0x11   : > { %429 = vmatpush.msrb.mxu1 %v374_v2  ;;  %v361_v15 = vld [vmem:[%s323_s28] sm:$0xff]  ;;  %535 = vmatpush.msrb.mxu0 %v855_v9  ;;  %365 = vst.msk [vmem:[#allocation2 + $0x8] sm:$0xff] %vm363_vm0, %v362_v14  ;;  %v859_v21 = vld [vmem:[%s1095_s3 + $0x58] sm:$0xff]  ;;  %v871_v22 = vld [vmem:[%s1095_s3 + $0x88] sm:$0xff] }
  0x12   : > { %607 = vmatpush.msrb.mxu2 %v863_v6  ;;  %v366_v17 = vld [vmem:[%s334_s11] sm:$0xff]  ;;  %643 = vmatpush.msrb.mxu3 %v867_v10  ;;  %364 = vst.msk [vmem:[#allocation2] sm:$0xff] %vm363_vm0, %v361_v15  ;;  %v858_v25 = vld [vmem:[%s1095_s3 + $0x50] sm:$0xff] }
  0x13   : > { %430 = vmatpush.msrb.mxu1 %v373_v8  ;;  %367 = vst.msk [vmem:[#allocation2 + $0x10] sm:$0xff] %vm363_vm0, %v366_v17  ;;  %536 = vmatpush.msrb.mxu0 %v854_v12  ;;  %v368_v18 = vld [vmem:[%s347_s15] sm:$0xff] }
  0x14   : > { %608 = vmatpush.msrb.mxu2 %v862_v11  ;;  %644 = vmatpush.msrb.mxu3 %v866_v13  ;;  %369 = vst.msk [vmem:[#allocation2 + $0x18] sm:$0xff] %vm363_vm0, %v368_v18  ;;  %v870_v26 = vld [vmem:[%s1095_s3 + $0x80] sm:$0xff] }
  0x15   : > { %v911_v59 = vld [vmem:[%s1096_s4] ss:$0 sm:$0xff] }
  0x18   : > { %v474_v19 = vld [vmem:[#allocation2 + $0x8] sm:$0xff] }
  0x19   : > { %852 = vmatmul.msk.f32.vlgmr.msra.gmra.mxu3 %vm363_vm0, %v474_v19  ;;  %v438_v23 = vld [vmem:[#allocation2 + $0x2] sm:$0xff] }
  0x1a   : > { %v376_v20 = vld [vmem:[#allocation2 + $0x9] sm:$0xff]  ;;  %v375_v24 = vld [vmem:[#allocation2 + $0x1] sm:$0xff]  ;;  %848 = vmatmul.msk.f32.vlgmr.msra.gmra.mxu2 %vm363_vm0, %v438_v23 }
  0x1b   : > { %843 = vmatmul.msk.f32.vlgmr.msra.gmra.mxu1 %vm363_vm0, %v376_v20  ;;  %842 = vmatmul.msk.f32.vlgmr.msra.gmra.mxu0 %vm363_vm0, %v375_v24  ;;  %v475_v27 = vld [vmem:[#allocation2 + $0x10] sm:$0xff]  ;;  %v371_v28 = vld [vmem:[#allocation2] sm:$0xff]  ;;  %v583_v32 = vld [vmem:[#allocation2 + $0x18] sm:$0xff] }
  0x1c   : > { %571 = vmatpush.msra.mxu1 %v859_v21  ;;  %679 = vmatpush.msra.mxu0 %v871_v22  ;;  %v439_v29 = vld [vmem:[#allocation2 + $0xa] sm:$0xff]  ;;  %v619_v31 = vld [vmem:[#allocation2 + $0x19] sm:$0xff] }
  0x1d   : > { %v511_v30 = vld [vmem:[#allocation2 + $0x11] sm:$0xff]  ;;  %v655_v34 = vld [vmem:[#allocation2 + $0x1a] sm:$0xff] }
  0x1e   : > { %572 = vmatpush.msra.mxu1 %v858_v25  ;;  %680 = vmatpush.msra.mxu0 %v870_v26  ;;  %v654_v33 = vld [vmem:[#allocation2 + $0x12] sm:$0xff] }
  0x21   : > { %853 = vmatmul.msk.f32.gmra.mxu3 %vm363_vm0, %v475_v27 }
  0x22   : > { %849 = vmatmul.msk.f32.gmra.mxu2 %vm363_vm0, %v439_v29 }
  0x23   : > { %844 = vmatmul.msk.f32.vlgmr.msrb.gmra.mxu1 %vm363_vm0, %v371_v28  ;;  %856 = vmatmul.msk.f32.vlgmr.msrb.gmra.mxu0 %vm363_vm0, %v376_v20 }
  0x29   : > { %868 = vmatmul.msk.f32.vlgmr.msrb.gmra.mxu3 %vm363_vm0, %v511_v30 }
  0x2a   : > { %864 = vmatmul.msk.f32.vlgmr.msrb.gmra.mxu2 %vm363_vm0, %v475_v27 }
  0x2b   : > { %845 = vmatmul.msk.f32.gmra.mxu1 %vm363_vm0, %v474_v19  ;;  %857 = vmatmul.msk.f32.gmra.mxu0 %vm363_vm0, %v511_v30 }
  0x31   : > { %869 = vmatmul.msk.f32.gmra.mxu3 %vm363_vm0, %v619_v31 }
  0x32   : > { %865 = vmatmul.msk.f32.gmra.mxu2 %vm363_vm0, %v583_v32 }
  0x33   : > { %860 = vmatmul.msk.f32.vlgmr.msra.gmra.mxu1 %vm363_vm0, %v439_v29  ;;  %872 = vmatmul.msk.f32.vlgmr.msra.gmra.mxu0 %vm363_vm0, %v654_v33 }
  0x3b   : > { %861 = vmatmul.msk.f32.gmra.mxu1 %vm363_vm0, %v654_v33  ;;  %873 = vmatmul.msk.f32.gmra.mxu0 %vm363_vm0, %v655_v34 }
  0x98   : > { %v406_v35 = vpop.f32.mrf.mxu1  ;;  %v403_v36 = vpop.f32.mrf.mxu0 }
  0x9c   : > { %v502_v37 = vpop.f32.mrf.mxu3 }
  0x9d   : > { %v466_v38 = vpop.f32.mrf.mxu2 }
  0xa0   : > { %v432_v39 = vpop.f32.mrf.mxu1  ;;  %v538_v40 = vpop.f32.mrf.mxu0 }
  0xa1   : > { %v433_v41 = vadd.f32 %v432_v39, %v403_v36 }
  0xa3   : > { %v472_v43 = vadd.f32 %v466_v38, %v433_v41 }
  0xa4   : > { %v505_v42 = vpop.f32.mrf.mxu3 }
  0xa5   : > { %v469_v44 = vpop.f32.mrf.mxu2  ;;  %v508_v47 = vadd.f32 %v502_v37, %v472_v43 }
  0xa7   : > { %v544_v49 = vadd.f32 %v538_v40, %v508_v47 }
  0xa8   : > { %v435_v45 = vpop.f32.mrf.mxu1  ;;  %v541_v46 = vpop.f32.mrf.mxu0 }
  0xa9   : > { %v436_v48 = vadd.f32 %v435_v45, %v406_v35 }
  0xab   : > { %v473_v50 = vadd.f32 %v469_v44, %v436_v48 }
  0xac   : > { %v646_v53 = vpop.f32.mrf.mxu3 }
  0xad   : > { %v610_v51 = vpop.f32.mrf.mxu2  ;;  %v509_v56 = vadd.f32 %v505_v42, %v473_v50 }
  0xaf   : > { %v545_v60 = vadd.f32 %v541_v46, %v509_v56 }
  0xb0   : > { %v574_v52 = vpop.f32.mrf.mxu1  ;;  %v682_v55 = vpop.f32.mrf.mxu0 }
  0xb1   : > { %v580_v54 = vadd.f32 %v574_v52, %v544_v49 }
  0xb3   : > { %v616_v57 = vadd.f32 %v610_v51, %v580_v54 }
  0xb4   : > { %v649_v2 = vpop.f32.mrf.mxu3 }
  0xb5   : > { %v652_v58 = vadd.f32 %v646_v53, %v616_v57  ;;  %v613_v63 = vpop.f32.mrf.mxu2 }
  0xb7   : > { %v688_v61 = vadd.f32 %v682_v55, %v652_v58 }
  0xb8   : > { %v577_v62 = vpop.f32.mrf.mxu1  ;;  %v685_v5 = vpop.f32.mrf.mxu0 }
  0xb9   : > { %v694_v0 = vadd.f32 %v911_v59, %v688_v61  ;;  %v581_v1 = vadd.f32 %v577_v62, %v545_v60 }
  0xbb   : > { %vm696_vm1 = vcmp.ge.f32.partialorder %v694_v0, 0.0  ;;  %v698_v3 = vmul.f32 0.01, %v694_v0  ;;  %v617_v4 = vadd.f32 %v613_v63, %v581_v1 }
  0xbd   : > { %v700_v6 = vsel %vm696_vm1, %v694_v0, %v698_v3  ;;  %v653_v7 = vadd.f32 %v649_v2, %v617_v4 }
  0xbe   : > { %702 = vst.msk [vmem:[%s359_s8] sm:$0xff] %vm363_vm0, %v700_v6 }
  0xbf   : > { %v689_v8 = vadd.f32 %v685_v5, %v653_v7 }
  0xc1   : > { %v695_v9 = vadd.f32 %v911_v59, %v689_v8 }
  0xc3   : > { %vm697_vm2 = vcmp.ge.f32.partialorder %v695_v9, 0.0  ;;  %v699_v10 = vmul.f32 0.01, %v695_v9 }
  0xc5   : > { %v701_v11 = vsel %vm697_vm2, %v695_v9, %v699_v10 }
  0xc6   : > { %703 = vst.msk [vmem:[%s359_s8 + $0x8] sm:$0xff] %vm363_vm0, %v701_v11 }
  0xc7 PF: > { %s15_s20 = sadd.s32 1, %s934_s20   ;;  %s1098_s18 = smov %s930_s19 }
  0xc8   : > { %p12_p5 = scmp.ge.s32.totalorder %s15_s20, 4   ;;  %s1099_s19 = smov %s1101_s21 }
  0xca   :  { %14 = sbr.rel (!%p12_p5) target bundleno = 2 (0x2), region = 84 }

// kernel: mv_res_encoder_forward.19
= control target key start
LH: loop header
LB: loop body
LE: loop exit
PB: predicated region body
PF: predicated region fallthrough
CT: control target
= control target key end

     0   :  { %s626_s15 = smov 0   ;;  %s628_s16 = smov 0   ;;  %s773_s0 = inlined_call_operand.vmem [shape: f32[2,16,64], index: 0, kind: input, shape index: {}, may-alias: {0,1}]   ;;  %s774_s1 = inlined_call_operand.vmem [shape: f32[2,16,64], index: 1, kind: input, shape index: {}, may-alias: {0,1}]   ;;  %s775_s2 = inlined_call_operand.vmem [shape: f32[4,64,16], index: 2, kind: input, shape index: {}]   ;;  %s776_s3 = inlined_call_operand.vmem [shape: f32[1,16], index: 3, kind: input, shape index: {}]   ;;  %s777_s4 = inlined_call_operand.vmem [shape: f32[2,8,16], index: 4, kind: output, shape index: {}]  }
   0x1   :  { %s630_s17 = smov 0  }
   0x2 LB: > { %s26_s18 = sadd.s32 1, %s594_s16  ;;  %p510_p0 = scmp.ge.s32.totalorder %s598_s17, 1  ;;  %s598_s17 = sphi %s630_s17, %s14_s17   ;;  %s594_s16 = sphi %s628_s16, %s779_s16   ;;  %s590_s15 = sphi %s626_s15, %s778_s15  }
   0x3   : > { %p28_p1 = scmp.ge.s32.totalorder %s26_s18, 2  ;;  %p200_p2 = scmp.lt.s32.totalorder %s598_s17, 3 }
   0x5   : > { %s781_s18 = smov (%p28_p1, %s26_s18), 0  ;;  %p201_p3 = pnand %p510_p0, %p200_p2 }
   0x6   : > { %p240_p4 = scmp.lt.s32.totalorder (!%p201_p3), %s590_s15, 1 }
   0x7   : > { %204 = sbr.rel (%p201_p3) target bundleno = 168 (0xa8), region = 36 }
   0xc   : > { %v533_v0 = vld [vmem:[%s775_s2 + $0xb8] sm:$0xff]  ;;  %v532_v1 = vld [vmem:[%s775_s2 + $0xb0] sm:$0xff]  ;;  %vm266_vm0 = vcmask 523264   ;;  %v531_v5 = vld [vmem:[%s775_s2 + $0xa8] sm:$0xff]  ;;  %v600_v6 = vmov 0.0   ;;  %s783_s15 = smov (!%p240_p4, %s590_s15), 1 }
   0xd   : > { %v542_v2 = vld [vmem:[%s775_s2 + $0xf8] sm:$0xff]  ;;  %357 = vmatpush.msra.mxu2 %v533_v0  ;;  %270 = vst.msk [vmem:[#allocation2 + $0x10] sm:$0xff] %vm266_vm0, %v600_v6  ;;  %v541_v7 = vld [vmem:[%s775_s2 + $0xf0] sm:$0xff]  ;;  %v540_v10 = vld [vmem:[%s775_s2 + $0xe8] sm:$0xff]  ;;  %s546_s25 = sshll.u32 %s783_s15, 4  ;;  %vm409_vm1 = vcmask 130048  }
   0xe   : > { %391 = vmatpush.msra.mxu3 %v542_v2  ;;  %v523_v3 = vld [vmem:[%s775_s2 + $0x78] sm:$0xff]  ;;  %v522_v8 = vld [vmem:[%s775_s2 + $0x70] sm:$0xff]  ;;  %v521_v11 = vld [vmem:[%s775_s2 + $0x68] sm:$0xff]  ;;  %s548_s30 = sadd.s32 8, %s546_s25  ;;  %s247_s11 = scalar_lea.vmem %s773_s0, %s546_s25 }
   0xf   : > { %v279_v4 = vld [vmem:[%s775_s2 + $0x38] sm:$0xff]  ;;  %301 = vmatpush.msra.mxu0 %v523_v3  ;;  %v278_v9 = vld [vmem:[%s775_s2 + $0x30] sm:$0xff]  ;;  %358 = vmatpush.msra.mxu2 %v532_v1  ;;  %v530_v12 = vld [vmem:[%s775_s2 + $0xa0] sm:$0xff]  ;;  %s256_s14 = scalar_lea.vmem %s774_s1, %s548_s30  ;;  %s515_s25 = sshll.u32 %s783_s15, 3 }
  0x10   : > { %324 = vmatpush.msra.mxu1 %v279_v4  ;;  %392 = vmatpush.msra.mxu3 %v541_v7  ;;  %v277_v13 = vld [vmem:[%s775_s2 + $0x28] sm:$0xff]  ;;  %v539_v14 = vld [vmem:[%s775_s2 + $0xe0] sm:$0xff]  ;;  %v529_v17 = vld [vmem:[%s775_s2 + $0x98] sm:$0xff]  ;;  %s264_s30 = scalar_lea.vmem %s777_s4, %s515_s25 }
  0x11   : > { %302 = vmatpush.msra.mxu0 %v522_v8  ;;  %359 = vmatpush.msra.mxu2 %v531_v5  ;;  %v520_v15 = vld [vmem:[%s775_s2 + $0x60] sm:$0xff]  ;;  %v538_v18 = vld [vmem:[%s775_s2 + $0xd8] sm:$0xff]  ;;  %v528_v21 = vld [vmem:[%s775_s2 + $0x90] sm:$0xff] }
  0x12   : > { %325 = vmatpush.msra.mxu1 %v278_v9  ;;  %393 = vmatpush.msra.mxu3 %v540_v10  ;;  %v276_v16 = vld [vmem:[%s775_s2 + $0x20] sm:$0xff]  ;;  %v519_v19 = vld [vmem:[%s775_s2 + $0x58] sm:$0xff]  ;;  %v537_v22 = vld [vmem:[%s775_s2 + $0xd0] sm:$0xff] }
  0x13   : > { %303 = vmatpush.msra.mxu0 %v521_v11  ;;  %360 = vmatpush.msra.mxu2 %v530_v12  ;;  %v275_v20 = vld [vmem:[%s775_s2 + $0x18] sm:$0xff]  ;;  %v518_v23 = vld [vmem:[%s775_s2 + $0x50] sm:$0xff]  ;;  %v265_v25 = vld [vmem:[%s247_s11] sm:$0xff] }
  0x14   : > { %326 = vmatpush.msra.mxu1 %v277_v13  ;;  %394 = vmatpush.msra.mxu3 %v539_v14  ;;  %v274_v24 = vld [vmem:[%s775_s2 + $0x10] sm:$0xff]  ;;  %v268_v26 = vld [vmem:[%s256_s14] sm:$0xff]  ;;  %v527_v27 = vld [vmem:[%s775_s2 + $0x88] sm:$0xff]  ;;  %267 = vst.msk [vmem:[#allocation2] sm:$0xff] %vm266_vm0, %v265_v25 }
  0x15   : > { %304 = vmatpush.msra.mxu0 %v520_v15  ;;  %361 = vmatpush.msra.mxu2 %v529_v17  ;;  %v536_v28 = vld [vmem:[%s775_s2 + $0xc8] sm:$0xff]  ;;  %269 = vst.msk [vmem:[#allocation2 + $0x8] sm:$0xff] %vm266_vm0, %v268_v26  ;;  %v526_v31 = vld [vmem:[%s775_s2 + $0x80] sm:$0xff] }
  0x16   : > { %327 = vmatpush.msra.mxu1 %v276_v16  ;;  %395 = vmatpush.msra.mxu3 %v538_v18  ;;  %v517_v29 = vld [vmem:[%s775_s2 + $0x48] sm:$0xff]  ;;  %v535_v32 = vld [vmem:[%s775_s2 + $0xc0] sm:$0xff] }
  0x17   : > { %305 = vmatpush.msra.mxu0 %v519_v19  ;;  %362 = vmatpush.msra.mxu2 %v528_v21  ;;  %v273_v30 = vld [vmem:[%s775_s2 + $0x8] sm:$0xff]  ;;  %v516_v33 = vld [vmem:[%s775_s2 + $0x40] sm:$0xff] }
  0x18   : > { %328 = vmatpush.msra.mxu1 %v275_v20  ;;  %396 = vmatpush.msra.mxu3 %v537_v22  ;;  %v272_v34 = vld [vmem:[%s775_s2] sm:$0xff] }
  0x19   : > { %306 = vmatpush.msra.mxu0 %v518_v23  ;;  %363 = vmatpush.msra.mxu2 %v527_v27  ;;  %v575_v45 = vld [vmem:[%s776_s3] ss:$0 sm:$0xff] }
  0x1a   : > { %329 = vmatpush.msra.mxu1 %v274_v24  ;;  %397 = vmatpush.msra.mxu3 %v536_v28 }
  0x1b   : > { %307 = vmatpush.msra.mxu0 %v517_v29  ;;  %364 = vmatpush.msra.mxu2 %v526_v31  ;;  %v271_v35 = vld [vmem:[#allocation2] sm:$0xff] }
  0x1c   : > { %330 = vmatpush.msra.mxu1 %v273_v30  ;;  %398 = vmatpush.msra.mxu3 %v535_v32  ;;  %v336_v36 = vld [vmem:[#allocation2 + $0x8] sm:$0xff] }
  0x1d   : > { %308 = vmatpush.msra.mxu0 %v516_v33  ;;  %v370_v37 = vld [vmem:[#allocation2 + $0x9] sm:$0xff]  ;;  %v280_v38 = vld [vmem:[#allocation2 + $0x1] sm:$0xff]  ;;  %534 = vmatmul.msk.f32.vlgmr.msra.gmra.mxu2 %vm266_vm0, %v336_v36 }
  0x1e   : > { %331 = vmatpush.msra.mxu1 %v272_v34  ;;  %543 = vmatmul.msk.f32.vlgmr.msra.gmra.mxu3 %vm266_vm0, %v370_v37 }
  0x1f   : > { %525 = vmatmul.msk.f32.vlgmr.msra.gmra.mxu1 %vm266_vm0, %v271_v35  ;;  %524 = vmatmul.msk.f32.vlgmr.msra.gmra.mxu0 %vm266_vm0, %v280_v38 }
  0x9c   : > { %v333_v39 = vpop.f32.mrf.mxu1  ;;  %v310_v40 = vpop.f32.mrf.mxu0 }
  0x9d   : > { %v334_v41 = vadd.f32 %v333_v39, %v310_v40 }
  0xa0   : > { %v366_v42 = vpop.f32.mrf.mxu2 }
  0xa1   : > { %v400_v43 = vpop.f32.mrf.mxu3  ;;  %v369_v44 = vadd.f32 %v366_v42, %v334_v41 }
  0xa3   : > { %v403_v46 = vadd.f32 %v400_v43, %v369_v44 }
  0xa5   : > { %v408_v47 = vadd.f32 %v575_v45, %v403_v46 }
  0xa7   : > { %410 = vst.msk [vmem:[%s264_s30] sm:$0xff] %vm409_vm1, %v408_v47 }
  0xa8 PF: > { %s14_s17 = sadd.s32 1, %s598_s17   ;;  %s778_s15 = smov %s594_s16 }
  0xa9   : > { %p11_p5 = scmp.ge.s32.totalorder %s14_s17, 4   ;;  %s779_s16 = smov %s781_s18 }
  0xab   :  { %13 = sbr.rel (!%p11_p5) target bundleno = 2 (0x2), region = 72 }

</bundles_post_ra>
